<compile_context>
chip_gen: v5e
topology: v5e:2x2
jax: 0.10.0
libtpu: 0.0.40
codegen_flags: <defaults>
</compile_context>

<pallas_src>
import functools

import jax
import jax.numpy as jnp
from jax import random
from jax.experimental import pallas as pl
from jax.experimental.pallas import tpu as pltpu


ACT_DTYPE = jnp.bfloat16   # activation / weight storage dtype (MXU-native)
_TM = 512                  # row tile for matmul / elementwise kernels


# ------------------------------------------------------------------ utilities
def _row_tiling(m):
    """Row tile satisfying the (8,128) rule with NO padding copies."""
    if m > _TM and m % 8 == 0:
        return _TM, pl.cdiv(m, _TM)
    return m, 1           # full-dim block: divisibility rule is waived


# ------------------------------------------------------------ Pallas kernels
def _conv_kernel(x_ref, w_ref, b_ref, o_ref, *, relu):
    # o = act(x @ w + b)   (BN scale pre-folded into w, epilogue in f32)
    acc = jnp.dot(x_ref[...], w_ref[...], preferred_element_type=jnp.float32)
    acc = acc + b_ref[...]
    if relu:
        acc = jnp.maximum(acc, 0.0)
    o_ref[...] = acc.astype(o_ref.dtype)


def _conv_res_kernel(x_ref, w_ref, b_ref, r_ref, o_ref, *, relu):
    # o = act(x @ w + b + residual)  -- residual add fused into the matmul
    acc = jnp.dot(x_ref[...], w_ref[...], preferred_element_type=jnp.float32)
    acc = acc + b_ref[...] + r_ref[...].astype(jnp.float32)
    if relu:
        acc = jnp.maximum(acc, 0.0)
    o_ref[...] = acc.astype(o_ref.dtype)


def _add_kernel(a_ref, b_ref, o_ref, *, relu):
    r = a_ref[...].astype(jnp.float32) + b_ref[...].astype(jnp.float32)
    if relu:
        r = jnp.maximum(r, 0.0)
    o_ref[...] = r.astype(o_ref.dtype)


def _matmul_bias(x2d, w2d, bias2d, relu, residual2d=None):
    """(M,K)@(K,N) + bias (+ residual), optional ReLU.  No pad / no slice."""
    m, k = x2d.shape
    _, n = w2d.shape
    tm, gm = _row_tiling(m)
    in_specs = [
        pl.BlockSpec((tm, k), lambda i: (i, 0)),     # activations (M-tiled)
        pl.BlockSpec((k, n), lambda i: (0, 0)),      # folded weights (full)
        pl.BlockSpec((1, n), lambda i: (0, 0)),      # bias (f32)
    ]
    args = [x2d, w2d, bias2d]
    if residual2d is not None:
        in_specs.append(pl.BlockSpec((tm, n), lambda i: (i, 0)))
        args.append(residual2d)
        kernel = functools.partial(_conv_res_kernel, relu=relu)
    else:
        kernel = functools.partial(_conv_kernel, relu=relu)
    return pl.pallas_call(
        kernel,
        out_shape=jax.ShapeDtypeStruct((m, n), ACT_DTYPE),
        grid=(gm,),
        in_specs=in_specs,
        out_specs=pl.BlockSpec((tm, n), lambda i: (i, 0)),
        compiler_params=pltpu.CompilerParams(
            dimension_semantics=("parallel",)),
    )(*args)


def add_nhwc(a, b, relu=False):
    """Elementwise a+b (optional ReLU) without padding copies."""
    shape = a.shape
    c = shape[-1]
    a2 = a.reshape(-1, c)
    b2 = b.reshape(-1, c)
    m = a2.shape[0]
    tm, gm = _row_tiling(m)
    out = pl.pallas_call(
        functools.partial(_add_kernel, relu=relu),
        out_shape=jax.ShapeDtypeStruct((m, c), ACT_DTYPE),
        grid=(gm,),
        in_specs=[pl.BlockSpec((tm, c), lambda i: (i, 0)),
                  pl.BlockSpec((tm, c), lambda i: (i, 0))],
        out_specs=pl.BlockSpec((tm, c), lambda i: (i, 0)),
        compiler_params=pltpu.CompilerParams(
            dimension_semantics=("parallel",)),
    )(a2, b2)
    return out.reshape(shape)


# ------------------------------------------------------------------ conv glue
def conv_apply(x, unit, stride, pad, relu=False, residual=None):
    """x: NHWC bf16.  unit: pre-folded conv(+BN) params.  Returns NHWC bf16."""
    n, h, w, cin = x.shape
    k = unit['k']
    cout = unit['cout']
    ho = (h + 2 * pad - k) // stride + 1
    wo = (w + 2 * pad - k) // stride + 1
    if k == 1 and stride == 1 and pad == 0:
        patches = x.reshape(n * h * w, cin)            # zero-copy reshape
    else:
        xp = jnp.pad(x, ((0, 0), (pad, pad), (pad, pad), (0, 0))) if pad else x
        cols = []
        for di in range(k):
            for dj in range(k):
                cols.append(xp[:, di:di + stride * ho:stride,
                               dj:dj + stride * wo:stride, :])
        patches = jnp.concatenate(cols, axis=-1).reshape(n * ho * wo, k * k * cin)
    res2d = None
    if residual is not None:
        res2d = residual.reshape(n * ho * wo, cout)
    out = _matmul_bias(patches, unit['w2d'], unit['b'], relu, res2d)
    return out.reshape(n, ho, wo, cout)


def upsample_nearest(x, factor):
    x = jnp.repeat(x, factor, axis=1)
    x = jnp.repeat(x, factor, axis=2)
    return x


# --------------------------------------------------------------- param setup
class KeyGen:
    def __init__(self, key):
        self.key = key

    def __call__(self):
        self.key, sub = random.split(self.key)
        return sub


def make_conv_unit(kg, cin, cout, k, bn=True, bias=False, std=0.05, eps=1e-5):
    """Conv (+ folded eval-mode BN) with weights pre-transposed to (K, Cout)."""
    w = std * random.normal(kg(), (cout, cin, k, k), jnp.float32)
    w2d = jnp.transpose(w, (2, 3, 1, 0)).reshape(k * k * cin, cout)
    if bn:
        gamma = 1.0 + 0.1 * random.normal(kg(), (cout,), jnp.float32)
        beta = 0.1 * random.normal(kg(), (cout,), jnp.float32)
        mean = 0.1 * random.normal(kg(), (cout,), jnp.float32)
        var = 0.9 + 0.2 * jax.nn.sigmoid(random.normal(kg(), (cout,), jnp.float32))
        scale = gamma / jnp.sqrt(var + eps)
        w2d = w2d * scale[None, :]          # fold BN scale into the weights
        b = beta - mean * scale
    elif bias:
        b = 0.05 * random.normal(kg(), (cout,), jnp.float32)
    else:
        b = jnp.zeros((cout,), jnp.float32)
    return {'w2d': w2d.astype(ACT_DTYPE),
            'b': b.reshape(1, cout).astype(jnp.float32),
            'k': k, 'cout': cout}


def make_bottleneck(kg, inplanes, planes, stride=1, downsample=False):
    exp = 4
    p = {'conv1': make_conv_unit(kg, inplanes, planes, 1),
         'conv2': make_conv_unit(kg, planes, planes, 3),
         'conv3': make_conv_unit(kg, planes, planes * exp, 1),
         'stride': stride}
    if downsample:
        p['ds'] = make_conv_unit(kg, inplanes, planes * exp, 1)
    return p


def apply_bottleneck(x, p):
    out = conv_apply(x, p['conv1'], 1, 0, relu=True)
    out = conv_apply(out, p['conv2'], p['stride'], 1, relu=True)
    if 'ds' in p:
        residual = conv_apply(x, p['ds'], p['stride'], 0, relu=False)
    else:
        residual = x
    # residual add + final ReLU fused into conv3's epilogue
    return conv_apply(out, p['conv3'], 1, 0, relu=True, residual=residual)


def make_basic(kg, inplanes, planes, stride=1, downsample=False):
    p = {'conv1': make_conv_unit(kg, inplanes, planes, 3),
         'conv2': make_conv_unit(kg, planes, planes, 3),
         'stride': stride}
    if downsample:
        p['ds'] = make_conv_unit(kg, inplanes, planes, 1)
    return p


def apply_basic(x, p):
    out = conv_apply(x, p['conv1'], p['stride'], 1, relu=True)
    if 'ds' in p:
        residual = conv_apply(x, p['ds'], p['stride'], 0, relu=False)
    else:
        residual = x
    # residual add + final ReLU fused into conv2's epilogue
    return conv_apply(out, p['conv2'], 1, 1, relu=True, residual=residual)


def make_ppm(kg, num_branches, num_blocks, num_inchannels, num_channels,
             multi_scale_output):
    # BASIC block, expansion = 1
    branches = []
    for i in range(num_branches):
        blocks = []
        ds = num_inchannels[i] != num_channels[i]
        blocks.append(make_basic(kg, num_inchannels[i], num_channels[i], 1, ds))
        num_inchannels[i] = num_channels[i]
        for _ in range(1, num_blocks[i]):
            blocks.append(make_basic(kg, num_inchannels[i], num_channels[i]))
        branches.append(blocks)
    fuse = []
    n_out = num_branches if multi_scale_output else 1
    for i in range(n_out):
        row = []
        for j in range(num_branches):
            if j > i:
                row.append({'type': 'up',
                            'conv': make_conv_unit(kg, num_inchannels[j],
                                                   num_inchannels[i], 1),
                            'factor': 2 ** (j - i)})
            elif j == i:
                row.append(None)
            else:
                seq = []
                for kk in range(i - j):
                    last = kk == i - j - 1
                    cout = num_inchannels[i] if last else num_inchannels[j]
                    seq.append({'conv': make_conv_unit(kg, num_inchannels[j], cout, 3),
                                'relu': not last})
                row.append({'type': 'down', 'seq': seq})
        fuse.append(row)
    return {'branches': branches, 'fuse': fuse, 'num_branches': num_branches}


def apply_down(x, f, residual=None, relu_out=False):
    y = x
    n = len(f['seq'])
    for idx, s in enumerate(f['seq']):
        last = idx == n - 1
        y = conv_apply(y, s['conv'], 2, 1,
                       relu=(s['relu'] or (last and relu_out)),
                       residual=residual if last else None)
    return y


def apply_ppm(xs, p):
    """Mutates xs in place (matches PyTorch list mutation semantics)."""
    nb = p['num_branches']
    for i in range(nb):
        for blk in p['branches'][i]:
            xs[i] = apply_basic(xs[i], blk)
    if nb == 1:
        return [xs[0]]
    x_fuse = []
    for i in range(len(p['fuse'])):
        row = p['fuse'][i]
        others, downs = [], []
        for j in range(nb):
            f = row[j]
            if f is None:
                others.append(xs[j])
            elif f['type'] == 'up':
                y = conv_apply(xs[j], f['conv'], 1, 0, relu=False)
                others.append(upsample_nearest(y, f['factor']))
            else:
                downs.append((f, xs[j]))
        if downs:
            acc = others[0]
            for t in others[1:]:
                acc = add_nhwc(acc, t, relu=False)
            for f, xj in downs[:-1]:
                acc = add_nhwc(acc, apply_down(xj, f), relu=False)
            f, xj = downs[-1]
            # partial sum + final ReLU fused into the strided conv's epilogue
            y = apply_down(xj, f, residual=acc, relu_out=True)
        else:
            y = others[0]
            for idx, t in enumerate(others[1:]):
                y = add_nhwc(y, t, relu=(idx == len(others) - 2))
        x_fuse.append(y)
    return x_fuse


def make_model_params(key, cfg):
    kg = KeyGen(key)
    p = {'cfg': cfg}
    # stem
    p['conv1'] = make_conv_unit(kg, 3, 64, 3)
    p['conv2'] = make_conv_unit(kg, 64, 64, 3)
    # layer1: 4 Bottlenecks (64 -> 256)
    layer1 = [make_bottleneck(kg, 64, 64, 1, downsample=True)]
    for _ in range(3):
        layer1.append(make_bottleneck(kg, 256, 64, 1, downsample=False))
    p['layer1'] = layer1

    num_channels = cfg['NUM_CHANNELS']
    num_inchannels = [c * 1 for c in num_channels]  # BASIC expansion = 1
    nb = cfg['NUM_BRANCHES']
    pre = [256]
    input_layer = []
    for i in range(nb):
        if i < len(pre):
            if num_inchannels[i] != pre[i]:
                input_layer.append({'type': 'conv',
                                    'conv': make_conv_unit(kg, pre[i],
                                                           num_inchannels[i], 3)})
            else:
                input_layer.append(None)
        else:
            seq = []
            for j in range(i + 1 - len(pre)):
                cin = pre[-1]
                cout = num_inchannels[i] if j == i - len(pre) else cin
                seq.append({'conv': make_conv_unit(kg, cin, cout, 3)})
            input_layer.append({'type': 'down', 'seq': seq})
    p['input_layer'] = input_layer

    num_modules = cfg['NUM_MODULES']
    heatmap_ch = cfg['NUM_JOINTS']
    final_k = cfg['FINAL_CONV_KERNEL']
    ppnet, fc, hm, fc_, hm_ = [], [], [], [], []
    for i in range(num_modules):
        mso = not (i == num_modules - 1)
        ppnet.append(make_ppm(kg, nb, cfg['NUM_BLOCKS'], num_inchannels,
                              num_channels, mso))
        ch = num_inchannels[0]
        fc.append(make_conv_unit(kg, ch, ch, 1))
        hm.append({'c1': make_conv_unit(kg, ch, 32, 3),
                   'c2': make_conv_unit(kg, 32, 32, 3),
                   'c3': make_conv_unit(kg, 32, heatmap_ch, final_k,
                                        bn=False, bias=True),
                   'final_k': final_k})
        if i < num_modules - 1:
            fc_.append(make_conv_unit(kg, ch, ch, 1, bn=False, bias=True))
            hm_.append(make_conv_unit(kg, heatmap_ch, ch, 1, bn=False, bias=True))
    p['ppnet'], p['fc'], p['heatmap'], p['fc_'], p['heatmap_'] = ppnet, fc, hm, fc_, hm_
    return p


# -------------------------------------------------------------------- forward
def forward(params, x_nchw):
    cfg = params['cfg']
    x = jnp.transpose(x_nchw, (0, 2, 3, 1)).astype(ACT_DTYPE)   # NCHW -> NHWC
    x = conv_apply(x, params['conv1'], 2, 1, relu=True)
    x = conv_apply(x, params['conv2'], 2, 1, relu=True)
    for blk in params['layer1']:
        x = apply_bottleneck(x, blk)

    x_list = []
    for i in range(cfg['NUM_BRANCHES']):
        tl = params['input_layer'][i]
        if tl is None:
            x_list.append(x)
        elif tl['type'] == 'conv':
            x_list.append(conv_apply(x, tl['conv'], 1, 1, relu=True))
        else:
            y = x
            for s in tl['seq']:
                y = conv_apply(y, s['conv'], 2, 1, relu=True)
            x_list.append(y)

    outs = []
    num_modules = cfg['NUM_MODULES']
    for i in range(num_modules):
        y_list = apply_ppm(x_list, params['ppnet'][i])   # mutates x_list
        fc = conv_apply(y_list[0], params['fc'][i], 1, 0, relu=True)
        hm = params['heatmap'][i]
        h = conv_apply(fc, hm['c1'], 1, 1, relu=True)
        h = conv_apply(h, hm['c2'], 1, 1, relu=True)
        pad = 1 if hm['final_k'] == 3 else 0
        heatmap = conv_apply(h, hm['c3'], 1, pad, relu=False)
        outs.append(jnp.transpose(heatmap, (0, 3, 1, 2)).astype(jnp.float32))
        if i < num_modules - 1:
            # x_list[0] + fc_(fc) + heatmap_(heatmap), fused into two conv calls
            fc_b = conv_apply(fc, params['fc_'][i], 1, 0, residual=x_list[0])
            x_list[0] = conv_apply(heatmap, params['heatmap_'][i], 1, 0,
                                   residual=fc_b)
            for j in range(1, len(x_list)):
                x_list[j] = add_nhwc(x_list[j], y_list[j], relu=False)
    return outs


# ------------------------------------------------------------------------ cfg
CFG = {
    'NUM_BRANCHES': 2,
    'NUM_BLOCKS': [1, 1],
    'NUM_CHANNELS': [32, 64],
    'NUM_MODULES': 2,
    'NUM_JOINTS': 4,
    'FINAL_CONV_KERNEL': 1,
    'BLOCK': 'BASIC',
    'FUSE_METHOD': 'SUM',
}


if __name__ == "__main__":
    key = random.PRNGKey(0)
    pkey, xkey = random.split(key)
    params = make_model_params(pkey, CFG)
    x = random.normal(xkey, (2, 3, 32, 32), jnp.float32)   # NCHW like PyTorch

    fwd = jax.jit(lambda xin: forward(params, xin))
    outs = fwd(x)
    outs = jax.block_until_ready(outs)
    assert len(outs) == CFG['NUM_MODULES']
    for o in outs:
        assert o.shape == (2, CFG['NUM_JOINTS'], 8, 8), o.shape
        assert bool(jnp.isfinite(o).all())
    print("KERNEL_OK")
</pallas_src>

<mosaic_0001>
module attributes {stable_mosaic.version = 11 : i64} {
  func.func @_conv_kernel(%arg0: i32, %arg1: memref<512x27xbf16, #tpu.memory_space<vmem>>, %arg2: memref<27x64xbf16, #tpu.memory_space<vmem>>, %arg3: memref<1x64xf32, #tpu.memory_space<vmem>>, %arg4: memref<512x64xbf16, #tpu.memory_space<vmem>>) attributes {dimension_semantics = [#tpu.dimension_semantics<parallel>], iteration_bounds = array<i64: 1>, scalar_prefetch = 0 : i64, scratch_operands = 0 : i64, tpu.core_type = #tpu.core_type<tc>, window_params = [{transform_indices = @transform_0, window_bounds = array<i64: 512, 27>}, {pipeline_mode = #tpu.pipeline_mode<synchronous>, transform_indices = @transform_1, window_bounds = array<i64: 27, 64>}, {pipeline_mode = #tpu.pipeline_mode<synchronous>, transform_indices = @transform_2, window_bounds = array<i64: 1, 64>}, {transform_indices = @transform_3, window_bounds = array<i64: 512, 64>}]} {
    %c0 = arith.constant 0 : index
    %c0_0 = arith.constant 0 : index
    %0 = vector.load %arg1[%c0, %c0_0] : memref<512x27xbf16, #tpu.memory_space<vmem>>, vector<512x27xbf16>
    %c0_1 = arith.constant 0 : index
    %c0_2 = arith.constant 0 : index
    %1 = vector.load %arg2[%c0_1, %c0_2] : memref<27x64xbf16, #tpu.memory_space<vmem>>, vector<27x64xbf16>
    %cst = arith.constant dense<0.000000e+00> : vector<512x64xf32>
    %2 = tpu.matmul %0, %1, %cst {dimension_numbers = #tpu.dot_dimension_numbers<[1], [0], [0], [1], [0, 0, 1, 1], [], []>} : vector<512x27xbf16>, vector<27x64xbf16>, vector<512x64xf32> -> vector<512x64xf32>
    %c0_3 = arith.constant 0 : index
    %c0_4 = arith.constant 0 : index
    %3 = vector.load %arg3[%c0_3, %c0_4] : memref<1x64xf32, #tpu.memory_space<vmem>>, vector<1x64xf32>
    %4 = vector.broadcast %3 : vector<1x64xf32> to vector<512x64xf32>
    %5 = arith.addf %2, %4 : vector<512x64xf32>
    %cst_5 = arith.constant 0.000000e+00 : f32
    %6 = vector.broadcast %cst_5 : f32 to vector<512x64xf32>
    %7 = arith.maximumf %5, %6 : vector<512x64xf32>
    %8 = arith.truncf %7 : vector<512x64xf32> to vector<512x64xbf16>
    %c0_6 = arith.constant 0 : index
    %c0_7 = arith.constant 0 : index
    %9 = vector.load %arg4[%c0_6, %c0_7] : memref<512x64xbf16, #tpu.memory_space<vmem>>, vector<512x64xbf16>
    tpu.vector_store %arg4[%c0_6, %c0_7], %8 {strides = array<i32>} : memref<512x64xbf16, #tpu.memory_space<vmem>>, vector<512x64xbf16>,
    return
  }
  func.func @transform_0(%arg0: i32) -> (i32, i32) {
    %c0_i32 = arith.constant 0 : i32
    %c0_i32_0 = arith.constant 0 : i32
    return %arg0, %c0_i32 : i32, i32
  }
  func.func @transform_1(%arg0: i32) -> (i32, i32) {
    %c0_i32 = arith.constant 0 : i32
    %c0_i32_0 = arith.constant 0 : i32
    %c0_i32_1 = arith.constant 0 : i32
    return %c0_i32, %c0_i32_0 : i32, i32
  }
  func.func @transform_2(%arg0: i32) -> (i32, i32) {
    %c0_i32 = arith.constant 0 : i32
    %c0_i32_0 = arith.constant 0 : i32
    %c0_i32_1 = arith.constant 0 : i32
    return %c0_i32, %c0_i32_0 : i32, i32
  }
  func.func @transform_3(%arg0: i32) -> (i32, i32) {
    %c0_i32 = arith.constant 0 : i32
    %c0_i32_0 = arith.constant 0 : i32
    return %arg0, %c0_i32 : i32, i32
  }
}

module attributes {stable_mosaic.version = 11 : i64} {
  func.func @_conv_kernel(%arg0: i32, %arg1: memref<128x576xbf16, #tpu.memory_space<vmem>>, %arg2: memref<576x64xbf16, #tpu.memory_space<vmem>>, %arg3: memref<1x64xf32, #tpu.memory_space<vmem>>, %arg4: memref<128x64xbf16, #tpu.memory_space<vmem>>) attributes {dimension_semantics = [#tpu.dimension_semantics<parallel>], iteration_bounds = array<i64: 1>, scalar_prefetch = 0 : i64, scratch_operands = 0 : i64, tpu.core_type = #tpu.core_type<tc>, window_params = [{transform_indices = @transform_0, window_bounds = array<i64: 128, 576>}, {pipeline_mode = #tpu.pipeline_mode<synchronous>, transform_indices = @transform_1, window_bounds = array<i64: 576, 64>}, {pipeline_mode = #tpu.pipeline_mode<synchronous>, transform_indices = @transform_2, window_bounds = array<i64: 1, 64>}, {transform_indices = @transform_3, window_bounds = array<i64: 128, 64>}]} {
    %c0 = arith.constant 0 : index
    %c0_0 = arith.constant 0 : index
    %0 = vector.load %arg1[%c0, %c0_0] : memref<128x576xbf16, #tpu.memory_space<vmem>>, vector<128x576xbf16>
    %c0_1 = arith.constant 0 : index
    %c0_2 = arith.constant 0 : index
    %1 = vector.load %arg2[%c0_1, %c0_2] : memref<576x64xbf16, #tpu.memory_space<vmem>>, vector<576x64xbf16>
    %cst = arith.constant dense<0.000000e+00> : vector<128x64xf32>
    %2 = tpu.matmul %0, %1, %cst {dimension_numbers = #tpu.dot_dimension_numbers<[1], [0], [0], [1], [0, 0, 1, 1], [], []>} : vector<128x576xbf16>, vector<576x64xbf16>, vector<128x64xf32> -> vector<128x64xf32>
    %c0_3 = arith.constant 0 : index
    %c0_4 = arith.constant 0 : index
    %3 = vector.load %arg3[%c0_3, %c0_4] : memref<1x64xf32, #tpu.memory_space<vmem>>, vector<1x64xf32>
    %4 = vector.broadcast %3 : vector<1x64xf32> to vector<128x64xf32>
    %5 = arith.addf %2, %4 : vector<128x64xf32>
    %cst_5 = arith.constant 0.000000e+00 : f32
    %6 = vector.broadcast %cst_5 : f32 to vector<128x64xf32>
    %7 = arith.maximumf %5, %6 : vector<128x64xf32>
    %8 = arith.truncf %7 : vector<128x64xf32> to vector<128x64xbf16>
    %c0_6 = arith.constant 0 : index
    %c0_7 = arith.constant 0 : index
    %9 = vector.load %arg4[%c0_6, %c0_7] : memref<128x64xbf16, #tpu.memory_space<vmem>>, vector<128x64xbf16>
    tpu.vector_store %arg4[%c0_6, %c0_7], %8 {strides = array<i32>} : memref<128x64xbf16, #tpu.memory_space<vmem>>, vector<128x64xbf16>,
    return
  }
  func.func @transform_0(%arg0: i32) -> (i32, i32) {
    %c0_i32 = arith.constant 0 : i32
    %c0_i32_0 = arith.constant 0 : i32
    return %arg0, %c0_i32 : i32, i32
  }
  func.func @transform_1(%arg0: i32) -> (i32, i32) {
    %c0_i32 = arith.constant 0 : i32
    %c0_i32_0 = arith.constant 0 : i32
    %c0_i32_1 = arith.constant 0 : i32
    return %c0_i32, %c0_i32_0 : i32, i32
  }
  func.func @transform_2(%arg0: i32) -> (i32, i32) {
    %c0_i32 = arith.constant 0 : i32
    %c0_i32_0 = arith.constant 0 : i32
    %c0_i32_1 = arith.constant 0 : i32
    return %c0_i32, %c0_i32_0 : i32, i32
  }
  func.func @transform_3(%arg0: i32) -> (i32, i32) {
    %c0_i32 = arith.constant 0 : i32
    %c0_i32_0 = arith.constant 0 : i32
    return %arg0, %c0_i32 : i32, i32
  }
}

module attributes {stable_mosaic.version = 11 : i64} {
  func.func @_conv_kernel(%arg0: i32, %arg1: memref<128x64xbf16, #tpu.memory_space<vmem>>, %arg2: memref<64x64xbf16, #tpu.memory_space<vmem>>, %arg3: memref<1x64xf32, #tpu.memory_space<vmem>>, %arg4: memref<128x64xbf16, #tpu.memory_space<vmem>>) attributes {dimension_semantics = [#tpu.dimension_semantics<parallel>], iteration_bounds = array<i64: 1>, scalar_prefetch = 0 : i64, scratch_operands = 0 : i64, tpu.core_type = #tpu.core_type<tc>, window_params = [{transform_indices = @transform_0, window_bounds = array<i64: 128, 64>}, {pipeline_mode = #tpu.pipeline_mode<synchronous>, transform_indices = @transform_1, window_bounds = array<i64: 64, 64>}, {pipeline_mode = #tpu.pipeline_mode<synchronous>, transform_indices = @transform_2, window_bounds = array<i64: 1, 64>}, {transform_indices = @transform_3, window_bounds = array<i64: 128, 64>}]} {
    %c0 = arith.constant 0 : index
    %c0_0 = arith.constant 0 : index
    %0 = vector.load %arg1[%c0, %c0_0] : memref<128x64xbf16, #tpu.memory_space<vmem>>, vector<128x64xbf16>
    %c0_1 = arith.constant 0 : index
    %c0_2 = arith.constant 0 : index
    %1 = vector.load %arg2[%c0_1, %c0_2] : memref<64x64xbf16, #tpu.memory_space<vmem>>, vector<64x64xbf16>
    %cst = arith.constant dense<0.000000e+00> : vector<128x64xf32>
    %2 = tpu.matmul %0, %1, %cst {dimension_numbers = #tpu.dot_dimension_numbers<[1], [0], [0], [1], [0, 0, 1, 1], [], []>} : vector<128x64xbf16>, vector<64x64xbf16>, vector<128x64xf32> -> vector<128x64xf32>
    %c0_3 = arith.constant 0 : index
    %c0_4 = arith.constant 0 : index
    %3 = vector.load %arg3[%c0_3, %c0_4] : memref<1x64xf32, #tpu.memory_space<vmem>>, vector<1x64xf32>
    %4 = vector.broadcast %3 : vector<1x64xf32> to vector<128x64xf32>
    %5 = arith.addf %2, %4 : vector<128x64xf32>
    %cst_5 = arith.constant 0.000000e+00 : f32
    %6 = vector.broadcast %cst_5 : f32 to vector<128x64xf32>
    %7 = arith.maximumf %5, %6 : vector<128x64xf32>
    %8 = arith.truncf %7 : vector<128x64xf32> to vector<128x64xbf16>
    %c0_6 = arith.constant 0 : index
    %c0_7 = arith.constant 0 : index
    %9 = vector.load %arg4[%c0_6, %c0_7] : memref<128x64xbf16, #tpu.memory_space<vmem>>, vector<128x64xbf16>
    tpu.vector_store %arg4[%c0_6, %c0_7], %8 {strides = array<i32>} : memref<128x64xbf16, #tpu.memory_space<vmem>>, vector<128x64xbf16>,
    return
  }
  func.func @transform_0(%arg0: i32) -> (i32, i32) {
    %c0_i32 = arith.constant 0 : i32
    %c0_i32_0 = arith.constant 0 : i32
    return %arg0, %c0_i32 : i32, i32
  }
  func.func @transform_1(%arg0: i32) -> (i32, i32) {
    %c0_i32 = arith.constant 0 : i32
    %c0_i32_0 = arith.constant 0 : i32
    %c0_i32_1 = arith.constant 0 : i32
    return %c0_i32, %c0_i32_0 : i32, i32
  }
  func.func @transform_2(%arg0: i32) -> (i32, i32) {
    %c0_i32 = arith.constant 0 : i32
    %c0_i32_0 = arith.constant 0 : i32
    %c0_i32_1 = arith.constant 0 : i32
    return %c0_i32, %c0_i32_0 : i32, i32
  }
  func.func @transform_3(%arg0: i32) -> (i32, i32) {
    %c0_i32 = arith.constant 0 : i32
    %c0_i32_0 = arith.constant 0 : i32
    return %arg0, %c0_i32 : i32, i32
  }
}

module attributes {stable_mosaic.version = 11 : i64} {
  func.func @_conv_kernel(%arg0: i32, %arg1: memref<128x64xbf16, #tpu.memory_space<vmem>>, %arg2: memref<64x256xbf16, #tpu.memory_space<vmem>>, %arg3: memref<1x256xf32, #tpu.memory_space<vmem>>, %arg4: memref<128x256xbf16, #tpu.memory_space<vmem>>) attributes {dimension_semantics = [#tpu.dimension_semantics<parallel>], iteration_bounds = array<i64: 1>, scalar_prefetch = 0 : i64, scratch_operands = 0 : i64, tpu.core_type = #tpu.core_type<tc>, window_params = [{transform_indices = @transform_0, window_bounds = array<i64: 128, 64>}, {pipeline_mode = #tpu.pipeline_mode<synchronous>, transform_indices = @transform_1, window_bounds = array<i64: 64, 256>}, {pipeline_mode = #tpu.pipeline_mode<synchronous>, transform_indices = @transform_2, window_bounds = array<i64: 1, 256>}, {transform_indices = @transform_3, window_bounds = array<i64: 128, 256>}]} {
    %c0 = arith.constant 0 : index
    %c0_0 = arith.constant 0 : index
    %0 = vector.load %arg1[%c0, %c0_0] : memref<128x64xbf16, #tpu.memory_space<vmem>>, vector<128x64xbf16>
    %c0_1 = arith.constant 0 : index
    %c0_2 = arith.constant 0 : index
    %1 = vector.load %arg2[%c0_1, %c0_2] : memref<64x256xbf16, #tpu.memory_space<vmem>>, vector<64x256xbf16>
    %cst = arith.constant dense<0.000000e+00> : vector<128x256xf32>
    %2 = tpu.matmul %0, %1, %cst {dimension_numbers = #tpu.dot_dimension_numbers<[1], [0], [0], [1], [0, 0, 1, 1], [], []>} : vector<128x64xbf16>, vector<64x256xbf16>, vector<128x256xf32> -> vector<128x256xf32>
    %c0_3 = arith.constant 0 : index
    %c0_4 = arith.constant 0 : index
    %3 = vector.load %arg3[%c0_3, %c0_4] : memref<1x256xf32, #tpu.memory_space<vmem>>, vector<1x256xf32>
    %4 = vector.broadcast %3 : vector<1x256xf32> to vector<128x256xf32>
    %5 = arith.addf %2, %4 : vector<128x256xf32>
    %6 = arith.truncf %5 : vector<128x256xf32> to vector<128x256xbf16>
    %c0_5 = arith.constant 0 : index
    %c0_6 = arith.constant 0 : index
    %7 = vector.load %arg4[%c0_5, %c0_6] : memref<128x256xbf16, #tpu.memory_space<vmem>>, vector<128x256xbf16>
    tpu.vector_store %arg4[%c0_5, %c0_6], %6 {strides = array<i32>} : memref<128x256xbf16, #tpu.memory_space<vmem>>, vector<128x256xbf16>,
    return
  }
  func.func @transform_0(%arg0: i32) -> (i32, i32) {
    %c0_i32 = arith.constant 0 : i32
    %c0_i32_0 = arith.constant 0 : i32
    return %arg0, %c0_i32 : i32, i32
  }
  func.func @transform_1(%arg0: i32) -> (i32, i32) {
    %c0_i32 = arith.constant 0 : i32
    %c0_i32_0 = arith.constant 0 : i32
    %c0_i32_1 = arith.constant 0 : i32
    return %c0_i32, %c0_i32_0 : i32, i32
  }
  func.func @transform_2(%arg0: i32) -> (i32, i32) {
    %c0_i32 = arith.constant 0 : i32
    %c0_i32_0 = arith.constant 0 : i32
    %c0_i32_1 = arith.constant 0 : i32
    return %c0_i32, %c0_i32_0 : i32, i32
  }
  func.func @transform_3(%arg0: i32) -> (i32, i32) {
    %c0_i32 = arith.constant 0 : i32
    %c0_i32_0 = arith.constant 0 : i32
    return %arg0, %c0_i32 : i32, i32
  }
}

module attributes {stable_mosaic.version = 11 : i64} {
  func.func @_conv_res_kernel(%arg0: i32, %arg1: memref<128x64xbf16, #tpu.memory_space<vmem>>, %arg2: memref<64x256xbf16, #tpu.memory_space<vmem>>, %arg3: memref<1x256xf32, #tpu.memory_space<vmem>>, %arg4: memref<128x256xbf16, #tpu.memory_space<vmem>>, %arg5: memref<128x256xbf16, #tpu.memory_space<vmem>>) attributes {dimension_semantics = [#tpu.dimension_semantics<parallel>], iteration_bounds = array<i64: 1>, scalar_prefetch = 0 : i64, scratch_operands = 0 : i64, tpu.core_type = #tpu.core_type<tc>, window_params = [{transform_indices = @transform_0, window_bounds = array<i64: 128, 64>}, {pipeline_mode = #tpu.pipeline_mode<synchronous>, transform_indices = @transform_1, window_bounds = array<i64: 64, 256>}, {pipeline_mode = #tpu.pipeline_mode<synchronous>, transform_indices = @transform_2, window_bounds = array<i64: 1, 256>}, {transform_indices = @transform_3, window_bounds = array<i64: 128, 256>}, {transform_indices = @transform_4, window_bounds = array<i64: 128, 256>}]} {
    %c0 = arith.constant 0 : index
    %c0_0 = arith.constant 0 : index
    %0 = vector.load %arg1[%c0, %c0_0] : memref<128x64xbf16, #tpu.memory_space<vmem>>, vector<128x64xbf16>
    %c0_1 = arith.constant 0 : index
    %c0_2 = arith.constant 0 : index
    %1 = vector.load %arg2[%c0_1, %c0_2] : memref<64x256xbf16, #tpu.memory_space<vmem>>, vector<64x256xbf16>
    %cst = arith.constant dense<0.000000e+00> : vector<128x256xf32>
    %2 = tpu.matmul %0, %1, %cst {dimension_numbers = #tpu.dot_dimension_numbers<[1], [0], [0], [1], [0, 0, 1, 1], [], []>} : vector<128x64xbf16>, vector<64x256xbf16>, vector<128x256xf32> -> vector<128x256xf32>
    %c0_3 = arith.constant 0 : index
    %c0_4 = arith.constant 0 : index
    %3 = vector.load %arg3[%c0_3, %c0_4] : memref<1x256xf32, #tpu.memory_space<vmem>>, vector<1x256xf32>
    %4 = vector.broadcast %3 : vector<1x256xf32> to vector<128x256xf32>
    %5 = arith.addf %2, %4 : vector<128x256xf32>
    %c0_5 = arith.constant 0 : index
    %c0_6 = arith.constant 0 : index
    %6 = vector.load %arg4[%c0_5, %c0_6] : memref<128x256xbf16, #tpu.memory_space<vmem>>, vector<128x256xbf16>
    %7 = arith.extf %6 : vector<128x256xbf16> to vector<128x256xf32>
    %8 = arith.addf %5, %7 : vector<128x256xf32>
    %cst_7 = arith.constant 0.000000e+00 : f32
    %9 = vector.broadcast %cst_7 : f32 to vector<128x256xf32>
    %10 = arith.maximumf %8, %9 : vector<128x256xf32>
    %11 = arith.truncf %10 : vector<128x256xf32> to vector<128x256xbf16>
    %c0_8 = arith.constant 0 : index
    %c0_9 = arith.constant 0 : index
    %12 = vector.load %arg5[%c0_8, %c0_9] : memref<128x256xbf16, #tpu.memory_space<vmem>>, vector<128x256xbf16>
    tpu.vector_store %arg5[%c0_8, %c0_9], %11 {strides = array<i32>} : memref<128x256xbf16, #tpu.memory_space<vmem>>, vector<128x256xbf16>,
    return
  }
  func.func @transform_0(%arg0: i32) -> (i32, i32) {
    %c0_i32 = arith.constant 0 : i32
    %c0_i32_0 = arith.constant 0 : i32
    return %arg0, %c0_i32 : i32, i32
  }
  func.func @transform_1(%arg0: i32) -> (i32, i32) {
    %c0_i32 = arith.constant 0 : i32
    %c0_i32_0 = arith.constant 0 : i32
    %c0_i32_1 = arith.constant 0 : i32
    return %c0_i32, %c0_i32_0 : i32, i32
  }
  func.func @transform_2(%arg0: i32) -> (i32, i32) {
    %c0_i32 = arith.constant 0 : i32
    %c0_i32_0 = arith.constant 0 : i32
    %c0_i32_1 = arith.constant 0 : i32
    return %c0_i32, %c0_i32_0 : i32, i32
  }
  func.func @transform_3(%arg0: i32) -> (i32, i32) {
    %c0_i32 = arith.constant 0 : i32
    %c0_i32_0 = arith.constant 0 : i32
    return %arg0, %c0_i32 : i32, i32
  }
  func.func @transform_4(%arg0: i32) -> (i32, i32) {
    %c0_i32 = arith.constant 0 : i32
    %c0_i32_0 = arith.constant 0 : i32
    return %arg0, %c0_i32 : i32, i32
  }
}

module attributes {stable_mosaic.version = 11 : i64} {
  func.func @_conv_kernel(%arg0: i32, %arg1: memref<128x256xbf16, #tpu.memory_space<vmem>>, %arg2: memref<256x64xbf16, #tpu.memory_space<vmem>>, %arg3: memref<1x64xf32, #tpu.memory_space<vmem>>, %arg4: memref<128x64xbf16, #tpu.memory_space<vmem>>) attributes {dimension_semantics = [#tpu.dimension_semantics<parallel>], iteration_bounds = array<i64: 1>, scalar_prefetch = 0 : i64, scratch_operands = 0 : i64, tpu.core_type = #tpu.core_type<tc>, window_params = [{transform_indices = @transform_0, window_bounds = array<i64: 128, 256>}, {pipeline_mode = #tpu.pipeline_mode<synchronous>, transform_indices = @transform_1, window_bounds = array<i64: 256, 64>}, {pipeline_mode = #tpu.pipeline_mode<synchronous>, transform_indices = @transform_2, window_bounds = array<i64: 1, 64>}, {transform_indices = @transform_3, window_bounds = array<i64: 128, 64>}]} {
    %c0 = arith.constant 0 : index
    %c0_0 = arith.constant 0 : index
    %0 = vector.load %arg1[%c0, %c0_0] : memref<128x256xbf16, #tpu.memory_space<vmem>>, vector<128x256xbf16>
    %c0_1 = arith.constant 0 : index
    %c0_2 = arith.constant 0 : index
    %1 = vector.load %arg2[%c0_1, %c0_2] : memref<256x64xbf16, #tpu.memory_space<vmem>>, vector<256x64xbf16>
    %cst = arith.constant dense<0.000000e+00> : vector<128x64xf32>
    %2 = tpu.matmul %0, %1, %cst {dimension_numbers = #tpu.dot_dimension_numbers<[1], [0], [0], [1], [0, 0, 1, 1], [], []>} : vector<128x256xbf16>, vector<256x64xbf16>, vector<128x64xf32> -> vector<128x64xf32>
    %c0_3 = arith.constant 0 : index
    %c0_4 = arith.constant 0 : index
    %3 = vector.load %arg3[%c0_3, %c0_4] : memref<1x64xf32, #tpu.memory_space<vmem>>, vector<1x64xf32>
    %4 = vector.broadcast %3 : vector<1x64xf32> to vector<128x64xf32>
    %5 = arith.addf %2, %4 : vector<128x64xf32>
    %cst_5 = arith.constant 0.000000e+00 : f32
    %6 = vector.broadcast %cst_5 : f32 to vector<128x64xf32>
    %7 = arith.maximumf %5, %6 : vector<128x64xf32>
    %8 = arith.truncf %7 : vector<128x64xf32> to vector<128x64xbf16>
    %c0_6 = arith.constant 0 : index
    %c0_7 = arith.constant 0 : index
    %9 = vector.load %arg4[%c0_6, %c0_7] : memref<128x64xbf16, #tpu.memory_space<vmem>>, vector<128x64xbf16>
    tpu.vector_store %arg4[%c0_6, %c0_7], %8 {strides = array<i32>} : memref<128x64xbf16, #tpu.memory_space<vmem>>, vector<128x64xbf16>,
    return
  }
  func.func @transform_0(%arg0: i32) -> (i32, i32) {
    %c0_i32 = arith.constant 0 : i32
    %c0_i32_0 = arith.constant 0 : i32
    return %arg0, %c0_i32 : i32, i32
  }
  func.func @transform_1(%arg0: i32) -> (i32, i32) {
    %c0_i32 = arith.constant 0 : i32
    %c0_i32_0 = arith.constant 0 : i32
    %c0_i32_1 = arith.constant 0 : i32
    return %c0_i32, %c0_i32_0 : i32, i32
  }
  func.func @transform_2(%arg0: i32) -> (i32, i32) {
    %c0_i32 = arith.constant 0 : i32
    %c0_i32_0 = arith.constant 0 : i32
    %c0_i32_1 = arith.constant 0 : i32
    return %c0_i32, %c0_i32_0 : i32, i32
  }
  func.func @transform_3(%arg0: i32) -> (i32, i32) {
    %c0_i32 = arith.constant 0 : i32
    %c0_i32_0 = arith.constant 0 : i32
    return %arg0, %c0_i32 : i32, i32
  }
}

module attributes {stable_mosaic.version = 11 : i64} {
  func.func @_conv_kernel(%arg0: i32, %arg1: memref<128x2304xbf16, #tpu.memory_space<vmem>>, %arg2: memref<2304x32xbf16, #tpu.memory_space<vmem>>, %arg3: memref<1x32xf32, #tpu.memory_space<vmem>>, %arg4: memref<128x32xbf16, #tpu.memory_space<vmem>>) attributes {dimension_semantics = [#tpu.dimension_semantics<parallel>], iteration_bounds = array<i64: 1>, scalar_prefetch = 0 : i64, scratch_operands = 0 : i64, tpu.core_type = #tpu.core_type<tc>, window_params = [{transform_indices = @transform_0, window_bounds = array<i64: 128, 2304>}, {pipeline_mode = #tpu.pipeline_mode<synchronous>, transform_indices = @transform_1, window_bounds = array<i64: 2304, 32>}, {pipeline_mode = #tpu.pipeline_mode<synchronous>, transform_indices = @transform_2, window_bounds = array<i64: 1, 32>}, {transform_indices = @transform_3, window_bounds = array<i64: 128, 32>}]} {
    %c0 = arith.constant 0 : index
    %c0_0 = arith.constant 0 : index
    %0 = vector.load %arg1[%c0, %c0_0] : memref<128x2304xbf16, #tpu.memory_space<vmem>>, vector<128x2304xbf16>
    %c0_1 = arith.constant 0 : index
    %c0_2 = arith.constant 0 : index
    %1 = vector.load %arg2[%c0_1, %c0_2] : memref<2304x32xbf16, #tpu.memory_space<vmem>>, vector<2304x32xbf16>
    %cst = arith.constant dense<0.000000e+00> : vector<128x32xf32>
    %2 = tpu.matmul %0, %1, %cst {dimension_numbers = #tpu.dot_dimension_numbers<[1], [0], [0], [1], [0, 0, 1, 1], [], []>} : vector<128x2304xbf16>, vector<2304x32xbf16>, vector<128x32xf32> -> vector<128x32xf32>
    %c0_3 = arith.constant 0 : index
    %c0_4 = arith.constant 0 : index
    %3 = vector.load %arg3[%c0_3, %c0_4] : memref<1x32xf32, #tpu.memory_space<vmem>>, vector<1x32xf32>
    %4 = vector.broadcast %3 : vector<1x32xf32> to vector<128x32xf32>
    %5 = arith.addf %2, %4 : vector<128x32xf32>
    %cst_5 = arith.constant 0.000000e+00 : f32
    %6 = vector.broadcast %cst_5 : f32 to vector<128x32xf32>
    %7 = arith.maximumf %5, %6 : vector<128x32xf32>
    %8 = arith.truncf %7 : vector<128x32xf32> to vector<128x32xbf16>
    %c0_6 = arith.constant 0 : index
    %c0_7 = arith.constant 0 : index
    %9 = vector.load %arg4[%c0_6, %c0_7] : memref<128x32xbf16, #tpu.memory_space<vmem>>, vector<128x32xbf16>
    tpu.vector_store %arg4[%c0_6, %c0_7], %8 {strides = array<i32>} : memref<128x32xbf16, #tpu.memory_space<vmem>>, vector<128x32xbf16>,
    return
  }
  func.func @transform_0(%arg0: i32) -> (i32, i32) {
    %c0_i32 = arith.constant 0 : i32
    %c0_i32_0 = arith.constant 0 : i32
    return %arg0, %c0_i32 : i32, i32
  }
  func.func @transform_1(%arg0: i32) -> (i32, i32) {
    %c0_i32 = arith.constant 0 : i32
    %c0_i32_0 = arith.constant 0 : i32
    %c0_i32_1 = arith.constant 0 : i32
    return %c0_i32, %c0_i32_0 : i32, i32
  }
  func.func @transform_2(%arg0: i32) -> (i32, i32) {
    %c0_i32 = arith.constant 0 : i32
    %c0_i32_0 = arith.constant 0 : i32
    %c0_i32_1 = arith.constant 0 : i32
    return %c0_i32, %c0_i32_0 : i32, i32
  }
  func.func @transform_3(%arg0: i32) -> (i32, i32) {
    %c0_i32 = arith.constant 0 : i32
    %c0_i32_0 = arith.constant 0 : i32
    return %arg0, %c0_i32 : i32, i32
  }
}

module attributes {stable_mosaic.version = 11 : i64} {
  func.func @_conv_kernel(%arg0: i32, %arg1: memref<128x288xbf16, #tpu.memory_space<vmem>>, %arg2: memref<288x32xbf16, #tpu.memory_space<vmem>>, %arg3: memref<1x32xf32, #tpu.memory_space<vmem>>, %arg4: memref<128x32xbf16, #tpu.memory_space<vmem>>) attributes {dimension_semantics = [#tpu.dimension_semantics<parallel>], iteration_bounds = array<i64: 1>, scalar_prefetch = 0 : i64, scratch_operands = 0 : i64, tpu.core_type = #tpu.core_type<tc>, window_params = [{transform_indices = @transform_0, window_bounds = array<i64: 128, 288>}, {pipeline_mode = #tpu.pipeline_mode<synchronous>, transform_indices = @transform_1, window_bounds = array<i64: 288, 32>}, {pipeline_mode = #tpu.pipeline_mode<synchronous>, transform_indices = @transform_2, window_bounds = array<i64: 1, 32>}, {transform_indices = @transform_3, window_bounds = array<i64: 128, 32>}]} {
    %c0 = arith.constant 0 : index
    %c0_0 = arith.constant 0 : index
    %0 = vector.load %arg1[%c0, %c0_0] : memref<128x288xbf16, #tpu.memory_space<vmem>>, vector<128x288xbf16>
    %c0_1 = arith.constant 0 : index
    %c0_2 = arith.constant 0 : index
    %1 = vector.load %arg2[%c0_1, %c0_2] : memref<288x32xbf16, #tpu.memory_space<vmem>>, vector<288x32xbf16>
    %cst = arith.constant dense<0.000000e+00> : vector<128x32xf32>
    %2 = tpu.matmul %0, %1, %cst {dimension_numbers = #tpu.dot_dimension_numbers<[1], [0], [0], [1], [0, 0, 1, 1], [], []>} : vector<128x288xbf16>, vector<288x32xbf16>, vector<128x32xf32> -> vector<128x32xf32>
    %c0_3 = arith.constant 0 : index
    %c0_4 = arith.constant 0 : index
    %3 = vector.load %arg3[%c0_3, %c0_4] : memref<1x32xf32, #tpu.memory_space<vmem>>, vector<1x32xf32>
    %4 = vector.broadcast %3 : vector<1x32xf32> to vector<128x32xf32>
    %5 = arith.addf %2, %4 : vector<128x32xf32>
    %cst_5 = arith.constant 0.000000e+00 : f32
    %6 = vector.broadcast %cst_5 : f32 to vector<128x32xf32>
    %7 = arith.maximumf %5, %6 : vector<128x32xf32>
    %8 = arith.truncf %7 : vector<128x32xf32> to vector<128x32xbf16>
    %c0_6 = arith.constant 0 : index
    %c0_7 = arith.constant 0 : index
    %9 = vector.load %arg4[%c0_6, %c0_7] : memref<128x32xbf16, #tpu.memory_space<vmem>>, vector<128x32xbf16>
    tpu.vector_store %arg4[%c0_6, %c0_7], %8 {strides = array<i32>} : memref<128x32xbf16, #tpu.memory_space<vmem>>, vector<128x32xbf16>,
    return
  }
  func.func @transform_0(%arg0: i32) -> (i32, i32) {
    %c0_i32 = arith.constant 0 : i32
    %c0_i32_0 = arith.constant 0 : i32
    return %arg0, %c0_i32 : i32, i32
  }
  func.func @transform_1(%arg0: i32) -> (i32, i32) {
    %c0_i32 = arith.constant 0 : i32
    %c0_i32_0 = arith.constant 0 : i32
    %c0_i32_1 = arith.constant 0 : i32
    return %c0_i32, %c0_i32_0 : i32, i32
  }
  func.func @transform_2(%arg0: i32) -> (i32, i32) {
    %c0_i32 = arith.constant 0 : i32
    %c0_i32_0 = arith.constant 0 : i32
    %c0_i32_1 = arith.constant 0 : i32
    return %c0_i32, %c0_i32_0 : i32, i32
  }
  func.func @transform_3(%arg0: i32) -> (i32, i32) {
    %c0_i32 = arith.constant 0 : i32
    %c0_i32_0 = arith.constant 0 : i32
    return %arg0, %c0_i32 : i32, i32
  }
}

module attributes {stable_mosaic.version = 11 : i64} {
  func.func @_conv_res_kernel(%arg0: i32, %arg1: memref<128x288xbf16, #tpu.memory_space<vmem>>, %arg2: memref<288x32xbf16, #tpu.memory_space<vmem>>, %arg3: memref<1x32xf32, #tpu.memory_space<vmem>>, %arg4: memref<128x32xbf16, #tpu.memory_space<vmem>>, %arg5: memref<128x32xbf16, #tpu.memory_space<vmem>>) attributes {dimension_semantics = [#tpu.dimension_semantics<parallel>], iteration_bounds = array<i64: 1>, scalar_prefetch = 0 : i64, scratch_operands = 0 : i64, tpu.core_type = #tpu.core_type<tc>, window_params = [{transform_indices = @transform_0, window_bounds = array<i64: 128, 288>}, {pipeline_mode = #tpu.pipeline_mode<synchronous>, transform_indices = @transform_1, window_bounds = array<i64: 288, 32>}, {pipeline_mode = #tpu.pipeline_mode<synchronous>, transform_indices = @transform_2, window_bounds = array<i64: 1, 32>}, {transform_indices = @transform_3, window_bounds = array<i64: 128, 32>}, {transform_indices = @transform_4, window_bounds = array<i64: 128, 32>}]} {
    %c0 = arith.constant 0 : index
    %c0_0 = arith.constant 0 : index
    %0 = vector.load %arg1[%c0, %c0_0] : memref<128x288xbf16, #tpu.memory_space<vmem>>, vector<128x288xbf16>
    %c0_1 = arith.constant 0 : index
    %c0_2 = arith.constant 0 : index
    %1 = vector.load %arg2[%c0_1, %c0_2] : memref<288x32xbf16, #tpu.memory_space<vmem>>, vector<288x32xbf16>
    %cst = arith.constant dense<0.000000e+00> : vector<128x32xf32>
    %2 = tpu.matmul %0, %1, %cst {dimension_numbers = #tpu.dot_dimension_numbers<[1], [0], [0], [1], [0, 0, 1, 1], [], []>} : vector<128x288xbf16>, vector<288x32xbf16>, vector<128x32xf32> -> vector<128x32xf32>
    %c0_3 = arith.constant 0 : index
    %c0_4 = arith.constant 0 : index
    %3 = vector.load %arg3[%c0_3, %c0_4] : memref<1x32xf32, #tpu.memory_space<vmem>>, vector<1x32xf32>
    %4 = vector.broadcast %3 : vector<1x32xf32> to vector<128x32xf32>
    %5 = arith.addf %2, %4 : vector<128x32xf32>
    %c0_5 = arith.constant 0 : index
    %c0_6 = arith.constant 0 : index
    %6 = vector.load %arg4[%c0_5, %c0_6] : memref<128x32xbf16, #tpu.memory_space<vmem>>, vector<128x32xbf16>
    %7 = arith.extf %6 : vector<128x32xbf16> to vector<128x32xf32>
    %8 = arith.addf %5, %7 : vector<128x32xf32>
    %cst_7 = arith.constant 0.000000e+00 : f32
    %9 = vector.broadcast %cst_7 : f32 to vector<128x32xf32>
    %10 = arith.maximumf %8, %9 : vector<128x32xf32>
    %11 = arith.truncf %10 : vector<128x32xf32> to vector<128x32xbf16>
    %c0_8 = arith.constant 0 : index
    %c0_9 = arith.constant 0 : index
    %12 = vector.load %arg5[%c0_8, %c0_9] : memref<128x32xbf16, #tpu.memory_space<vmem>>, vector<128x32xbf16>
    tpu.vector_store %arg5[%c0_8, %c0_9], %11 {strides = array<i32>} : memref<128x32xbf16, #tpu.memory_space<vmem>>, vector<128x32xbf16>,
    return
  }
  func.func @transform_0(%arg0: i32) -> (i32, i32) {
    %c0_i32 = arith.constant 0 : i32
    %c0_i32_0 = arith.constant 0 : i32
    return %arg0, %c0_i32 : i32, i32
  }
  func.func @transform_1(%arg0: i32) -> (i32, i32) {
    %c0_i32 = arith.constant 0 : i32
    %c0_i32_0 = arith.constant 0 : i32
    %c0_i32_1 = arith.constant 0 : i32
    return %c0_i32, %c0_i32_0 : i32, i32
  }
  func.func @transform_2(%arg0: i32) -> (i32, i32) {
    %c0_i32 = arith.constant 0 : i32
    %c0_i32_0 = arith.constant 0 : i32
    %c0_i32_1 = arith.constant 0 : i32
    return %c0_i32, %c0_i32_0 : i32, i32
  }
  func.func @transform_3(%arg0: i32) -> (i32, i32) {
    %c0_i32 = arith.constant 0 : i32
    %c0_i32_0 = arith.constant 0 : i32
    return %arg0, %c0_i32 : i32, i32
  }
  func.func @transform_4(%arg0: i32) -> (i32, i32) {
    %c0_i32 = arith.constant 0 : i32
    %c0_i32_0 = arith.constant 0 : i32
    return %arg0, %c0_i32 : i32, i32
  }
}

module attributes {stable_mosaic.version = 11 : i64} {
  func.func @_conv_kernel(%arg0: i32, %arg1: memref<32x2304xbf16, #tpu.memory_space<vmem>>, %arg2: memref<2304x64xbf16, #tpu.memory_space<vmem>>, %arg3: memref<1x64xf32, #tpu.memory_space<vmem>>, %arg4: memref<32x64xbf16, #tpu.memory_space<vmem>>) attributes {dimension_semantics = [#tpu.dimension_semantics<parallel>], iteration_bounds = array<i64: 1>, scalar_prefetch = 0 : i64, scratch_operands = 0 : i64, tpu.core_type = #tpu.core_type<tc>, window_params = [{transform_indices = @transform_0, window_bounds = array<i64: 32, 2304>}, {pipeline_mode = #tpu.pipeline_mode<synchronous>, transform_indices = @transform_1, window_bounds = array<i64: 2304, 64>}, {pipeline_mode = #tpu.pipeline_mode<synchronous>, transform_indices = @transform_2, window_bounds = array<i64: 1, 64>}, {transform_indices = @transform_3, window_bounds = array<i64: 32, 64>}]} {
    %c0 = arith.constant 0 : index
    %c0_0 = arith.constant 0 : index
    %0 = vector.load %arg1[%c0, %c0_0] : memref<32x2304xbf16, #tpu.memory_space<vmem>>, vector<32x2304xbf16>
    %c0_1 = arith.constant 0 : index
    %c0_2 = arith.constant 0 : index
    %1 = vector.load %arg2[%c0_1, %c0_2] : memref<2304x64xbf16, #tpu.memory_space<vmem>>, vector<2304x64xbf16>
    %cst = arith.constant dense<0.000000e+00> : vector<32x64xf32>
    %2 = tpu.matmul %0, %1, %cst {dimension_numbers = #tpu.dot_dimension_numbers<[1], [0], [0], [1], [0, 0, 1, 1], [], []>} : vector<32x2304xbf16>, vector<2304x64xbf16>, vector<32x64xf32> -> vector<32x64xf32>
    %c0_3 = arith.constant 0 : index
    %c0_4 = arith.constant 0 : index
    %3 = vector.load %arg3[%c0_3, %c0_4] : memref<1x64xf32, #tpu.memory_space<vmem>>, vector<1x64xf32>
    %4 = vector.broadcast %3 : vector<1x64xf32> to vector<32x64xf32>
    %5 = arith.addf %2, %4 : vector<32x64xf32>
    %cst_5 = arith.constant 0.000000e+00 : f32
    %6 = vector.broadcast %cst_5 : f32 to vector<32x64xf32>
    %7 = arith.maximumf %5, %6 : vector<32x64xf32>
    %8 = arith.truncf %7 : vector<32x64xf32> to vector<32x64xbf16>
    %c0_6 = arith.constant 0 : index
    %c0_7 = arith.constant 0 : index
    %9 = vector.load %arg4[%c0_6, %c0_7] : memref<32x64xbf16, #tpu.memory_space<vmem>>, vector<32x64xbf16>
    tpu.vector_store %arg4[%c0_6, %c0_7], %8 {strides = array<i32>} : memref<32x64xbf16, #tpu.memory_space<vmem>>, vector<32x64xbf16>,
    return
  }
  func.func @transform_0(%arg0: i32) -> (i32, i32) {
    %c0_i32 = arith.constant 0 : i32
    %c0_i32_0 = arith.constant 0 : i32
    return %arg0, %c0_i32 : i32, i32
  }
  func.func @transform_1(%arg0: i32) -> (i32, i32) {
    %c0_i32 = arith.constant 0 : i32
    %c0_i32_0 = arith.constant 0 : i32
    %c0_i32_1 = arith.constant 0 : i32
    return %c0_i32, %c0_i32_0 : i32, i32
  }
  func.func @transform_2(%arg0: i32) -> (i32, i32) {
    %c0_i32 = arith.constant 0 : i32
    %c0_i32_0 = arith.constant 0 : i32
    %c0_i32_1 = arith.constant 0 : i32
    return %c0_i32, %c0_i32_0 : i32, i32
  }
  func.func @transform_3(%arg0: i32) -> (i32, i32) {
    %c0_i32 = arith.constant 0 : i32
    %c0_i32_0 = arith.constant 0 : i32
    return %arg0, %c0_i32 : i32, i32
  }
}

module attributes {stable_mosaic.version = 11 : i64} {
  func.func @_conv_res_kernel(%arg0: i32, %arg1: memref<32x288xbf16, #tpu.memory_space<vmem>>, %arg2: memref<288x64xbf16, #tpu.memory_space<vmem>>, %arg3: memref<1x64xf32, #tpu.memory_space<vmem>>, %arg4: memref<32x64xbf16, #tpu.memory_space<vmem>>, %arg5: memref<32x64xbf16, #tpu.memory_space<vmem>>) attributes {dimension_semantics = [#tpu.dimension_semantics<parallel>], iteration_bounds = array<i64: 1>, scalar_prefetch = 0 : i64, scratch_operands = 0 : i64, tpu.core_type = #tpu.core_type<tc>, window_params = [{transform_indices = @transform_0, window_bounds = array<i64: 32, 288>}, {pipeline_mode = #tpu.pipeline_mode<synchronous>, transform_indices = @transform_1, window_bounds = array<i64: 288, 64>}, {pipeline_mode = #tpu.pipeline_mode<synchronous>, transform_indices = @transform_2, window_bounds = array<i64: 1, 64>}, {transform_indices = @transform_3, window_bounds = array<i64: 32, 64>}, {transform_indices = @transform_4, window_bounds = array<i64: 32, 64>}]} {
    %c0 = arith.constant 0 : index
    %c0_0 = arith.constant 0 : index
    %0 = vector.load %arg1[%c0, %c0_0] : memref<32x288xbf16, #tpu.memory_space<vmem>>, vector<32x288xbf16>
    %c0_1 = arith.constant 0 : index
    %c0_2 = arith.constant 0 : index
    %1 = vector.load %arg2[%c0_1, %c0_2] : memref<288x64xbf16, #tpu.memory_space<vmem>>, vector<288x64xbf16>
    %cst = arith.constant dense<0.000000e+00> : vector<32x64xf32>
    %2 = tpu.matmul %0, %1, %cst {dimension_numbers = #tpu.dot_dimension_numbers<[1], [0], [0], [1], [0, 0, 1, 1], [], []>} : vector<32x288xbf16>, vector<288x64xbf16>, vector<32x64xf32> -> vector<32x64xf32>
    %c0_3 = arith.constant 0 : index
    %c0_4 = arith.constant 0 : index
    %3 = vector.load %arg3[%c0_3, %c0_4] : memref<1x64xf32, #tpu.memory_space<vmem>>, vector<1x64xf32>
    %4 = vector.broadcast %3 : vector<1x64xf32> to vector<32x64xf32>
    %5 = arith.addf %2, %4 : vector<32x64xf32>
    %c0_5 = arith.constant 0 : index
    %c0_6 = arith.constant 0 : index
    %6 = vector.load %arg4[%c0_5, %c0_6] : memref<32x64xbf16, #tpu.memory_space<vmem>>, vector<32x64xbf16>
    %7 = arith.extf %6 : vector<32x64xbf16> to vector<32x64xf32>
    %8 = arith.addf %5, %7 : vector<32x64xf32>
    %cst_7 = arith.constant 0.000000e+00 : f32
    %9 = vector.broadcast %cst_7 : f32 to vector<32x64xf32>
    %10 = arith.maximumf %8, %9 : vector<32x64xf32>
    %11 = arith.truncf %10 : vector<32x64xf32> to vector<32x64xbf16>
    %c0_8 = arith.constant 0 : index
    %c0_9 = arith.constant 0 : index
    %12 = vector.load %arg5[%c0_8, %c0_9] : memref<32x64xbf16, #tpu.memory_space<vmem>>, vector<32x64xbf16>
    tpu.vector_store %arg5[%c0_8, %c0_9], %11 {strides = array<i32>} : memref<32x64xbf16, #tpu.memory_space<vmem>>, vector<32x64xbf16>,
    return
  }
  func.func @transform_0(%arg0: i32) -> (i32, i32) {
    %c0_i32 = arith.constant 0 : i32
    %c0_i32_0 = arith.constant 0 : i32
    return %arg0, %c0_i32 : i32, i32
  }
  func.func @transform_1(%arg0: i32) -> (i32, i32) {
    %c0_i32 = arith.constant 0 : i32
    %c0_i32_0 = arith.constant 0 : i32
    %c0_i32_1 = arith.constant 0 : i32
    return %c0_i32, %c0_i32_0 : i32, i32
  }
  func.func @transform_2(%arg0: i32) -> (i32, i32) {
    %c0_i32 = arith.constant 0 : i32
    %c0_i32_0 = arith.constant 0 : i32
    %c0_i32_1 = arith.constant 0 : i32
    return %c0_i32, %c0_i32_0 : i32, i32
  }
  func.func @transform_3(%arg0: i32) -> (i32, i32) {
    %c0_i32 = arith.constant 0 : i32
    %c0_i32_0 = arith.constant 0 : i32
    return %arg0, %c0_i32 : i32, i32
  }
  func.func @transform_4(%arg0: i32) -> (i32, i32) {
    %c0_i32 = arith.constant 0 : i32
    %c0_i32_0 = arith.constant 0 : i32
    return %arg0, %c0_i32 : i32, i32
  }
}

module attributes {stable_mosaic.version = 11 : i64} {
  func.func @_conv_res_kernel(%arg0: i32, %arg1: memref<32x576xbf16, #tpu.memory_space<vmem>>, %arg2: memref<576x64xbf16, #tpu.memory_space<vmem>>, %arg3: memref<1x64xf32, #tpu.memory_space<vmem>>, %arg4: memref<32x64xbf16, #tpu.memory_space<vmem>>, %arg5: memref<32x64xbf16, #tpu.memory_space<vmem>>) attributes {dimension_semantics = [#tpu.dimension_semantics<parallel>], iteration_bounds = array<i64: 1>, scalar_prefetch = 0 : i64, scratch_operands = 0 : i64, tpu.core_type = #tpu.core_type<tc>, window_params = [{transform_indices = @transform_0, window_bounds = array<i64: 32, 576>}, {pipeline_mode = #tpu.pipeline_mode<synchronous>, transform_indices = @transform_1, window_bounds = array<i64: 576, 64>}, {pipeline_mode = #tpu.pipeline_mode<synchronous>, transform_indices = @transform_2, window_bounds = array<i64: 1, 64>}, {transform_indices = @transform_3, window_bounds = array<i64: 32, 64>}, {transform_indices = @transform_4, window_bounds = array<i64: 32, 64>}]} {
    %c0 = arith.constant 0 : index
    %c0_0 = arith.constant 0 : index
    %0 = vector.load %arg1[%c0, %c0_0] : memref<32x576xbf16, #tpu.memory_space<vmem>>, vector<32x576xbf16>
    %c0_1 = arith.constant 0 : index
    %c0_2 = arith.constant 0 : index
    %1 = vector.load %arg2[%c0_1, %c0_2] : memref<576x64xbf16, #tpu.memory_space<vmem>>, vector<576x64xbf16>
    %cst = arith.constant dense<0.000000e+00> : vector<32x64xf32>
    %2 = tpu.matmul %0, %1, %cst {dimension_numbers = #tpu.dot_dimension_numbers<[1], [0], [0], [1], [0, 0, 1, 1], [], []>} : vector<32x576xbf16>, vector<576x64xbf16>, vector<32x64xf32> -> vector<32x64xf32>
    %c0_3 = arith.constant 0 : index
    %c0_4 = arith.constant 0 : index
    %3 = vector.load %arg3[%c0_3, %c0_4] : memref<1x64xf32, #tpu.memory_space<vmem>>, vector<1x64xf32>
    %4 = vector.broadcast %3 : vector<1x64xf32> to vector<32x64xf32>
    %5 = arith.addf %2, %4 : vector<32x64xf32>
    %c0_5 = arith.constant 0 : index
    %c0_6 = arith.constant 0 : index
    %6 = vector.load %arg4[%c0_5, %c0_6] : memref<32x64xbf16, #tpu.memory_space<vmem>>, vector<32x64xbf16>
    %7 = arith.extf %6 : vector<32x64xbf16> to vector<32x64xf32>
    %8 = arith.addf %5, %7 : vector<32x64xf32>
    %cst_7 = arith.constant 0.000000e+00 : f32
    %9 = vector.broadcast %cst_7 : f32 to vector<32x64xf32>
    %10 = arith.maximumf %8, %9 : vector<32x64xf32>
    %11 = arith.truncf %10 : vector<32x64xf32> to vector<32x64xbf16>
    %c0_8 = arith.constant 0 : index
    %c0_9 = arith.constant 0 : index
    %12 = vector.load %arg5[%c0_8, %c0_9] : memref<32x64xbf16, #tpu.memory_space<vmem>>, vector<32x64xbf16>
    tpu.vector_store %arg5[%c0_8, %c0_9], %11 {strides = array<i32>} : memref<32x64xbf16, #tpu.memory_space<vmem>>, vector<32x64xbf16>,
    return
  }
  func.func @transform_0(%arg0: i32) -> (i32, i32) {
    %c0_i32 = arith.constant 0 : i32
    %c0_i32_0 = arith.constant 0 : i32
    return %arg0, %c0_i32 : i32, i32
  }
  func.func @transform_1(%arg0: i32) -> (i32, i32) {
    %c0_i32 = arith.constant 0 : i32
    %c0_i32_0 = arith.constant 0 : i32
    %c0_i32_1 = arith.constant 0 : i32
    return %c0_i32, %c0_i32_0 : i32, i32
  }
  func.func @transform_2(%arg0: i32) -> (i32, i32) {
    %c0_i32 = arith.constant 0 : i32
    %c0_i32_0 = arith.constant 0 : i32
    %c0_i32_1 = arith.constant 0 : i32
    return %c0_i32, %c0_i32_0 : i32, i32
  }
  func.func @transform_3(%arg0: i32) -> (i32, i32) {
    %c0_i32 = arith.constant 0 : i32
    %c0_i32_0 = arith.constant 0 : i32
    return %arg0, %c0_i32 : i32, i32
  }
  func.func @transform_4(%arg0: i32) -> (i32, i32) {
    %c0_i32 = arith.constant 0 : i32
    %c0_i32_0 = arith.constant 0 : i32
    return %arg0, %c0_i32 : i32, i32
  }
}

module attributes {stable_mosaic.version = 11 : i64} {
  func.func @_conv_kernel(%arg0: i32, %arg1: memref<32x576xbf16, #tpu.memory_space<vmem>>, %arg2: memref<576x64xbf16, #tpu.memory_space<vmem>>, %arg3: memref<1x64xf32, #tpu.memory_space<vmem>>, %arg4: memref<32x64xbf16, #tpu.memory_space<vmem>>) attributes {dimension_semantics = [#tpu.dimension_semantics<parallel>], iteration_bounds = array<i64: 1>, scalar_prefetch = 0 : i64, scratch_operands = 0 : i64, tpu.core_type = #tpu.core_type<tc>, window_params = [{transform_indices = @transform_0, window_bounds = array<i64: 32, 576>}, {pipeline_mode = #tpu.pipeline_mode<synchronous>, transform_indices = @transform_1, window_bounds = array<i64: 576, 64>}, {pipeline_mode = #tpu.pipeline_mode<synchronous>, transform_indices = @transform_2, window_bounds = array<i64: 1, 64>}, {transform_indices = @transform_3, window_bounds = array<i64: 32, 64>}]} {
    %c0 = arith.constant 0 : index
    %c0_0 = arith.constant 0 : index
    %0 = vector.load %arg1[%c0, %c0_0] : memref<32x576xbf16, #tpu.memory_space<vmem>>, vector<32x576xbf16>
    %c0_1 = arith.constant 0 : index
    %c0_2 = arith.constant 0 : index
    %1 = vector.load %arg2[%c0_1, %c0_2] : memref<576x64xbf16, #tpu.memory_space<vmem>>, vector<576x64xbf16>
    %cst = arith.constant dense<0.000000e+00> : vector<32x64xf32>
    %2 = tpu.matmul %0, %1, %cst {dimension_numbers = #tpu.dot_dimension_numbers<[1], [0], [0], [1], [0, 0, 1, 1], [], []>} : vector<32x576xbf16>, vector<576x64xbf16>, vector<32x64xf32> -> vector<32x64xf32>
    %c0_3 = arith.constant 0 : index
    %c0_4 = arith.constant 0 : index
    %3 = vector.load %arg3[%c0_3, %c0_4] : memref<1x64xf32, #tpu.memory_space<vmem>>, vector<1x64xf32>
    %4 = vector.broadcast %3 : vector<1x64xf32> to vector<32x64xf32>
    %5 = arith.addf %2, %4 : vector<32x64xf32>
    %cst_5 = arith.constant 0.000000e+00 : f32
    %6 = vector.broadcast %cst_5 : f32 to vector<32x64xf32>
    %7 = arith.maximumf %5, %6 : vector<32x64xf32>
    %8 = arith.truncf %7 : vector<32x64xf32> to vector<32x64xbf16>
    %c0_6 = arith.constant 0 : index
    %c0_7 = arith.constant 0 : index
    %9 = vector.load %arg4[%c0_6, %c0_7] : memref<32x64xbf16, #tpu.memory_space<vmem>>, vector<32x64xbf16>
    tpu.vector_store %arg4[%c0_6, %c0_7], %8 {strides = array<i32>} : memref<32x64xbf16, #tpu.memory_space<vmem>>, vector<32x64xbf16>,
    return
  }
  func.func @transform_0(%arg0: i32) -> (i32, i32) {
    %c0_i32 = arith.constant 0 : i32
    %c0_i32_0 = arith.constant 0 : i32
    return %arg0, %c0_i32 : i32, i32
  }
  func.func @transform_1(%arg0: i32) -> (i32, i32) {
    %c0_i32 = arith.constant 0 : i32
    %c0_i32_0 = arith.constant 0 : i32
    %c0_i32_1 = arith.constant 0 : i32
    return %c0_i32, %c0_i32_0 : i32, i32
  }
  func.func @transform_2(%arg0: i32) -> (i32, i32) {
    %c0_i32 = arith.constant 0 : i32
    %c0_i32_0 = arith.constant 0 : i32
    %c0_i32_1 = arith.constant 0 : i32
    return %c0_i32, %c0_i32_0 : i32, i32
  }
  func.func @transform_3(%arg0: i32) -> (i32, i32) {
    %c0_i32 = arith.constant 0 : i32
    %c0_i32_0 = arith.constant 0 : i32
    return %arg0, %c0_i32 : i32, i32
  }
}

module attributes {stable_mosaic.version = 11 : i64} {
  func.func @_add_kernel(%arg0: i32, %arg1: memref<32x64xbf16, #tpu.memory_space<vmem>>, %arg2: memref<32x64xbf16, #tpu.memory_space<vmem>>, %arg3: memref<32x64xbf16, #tpu.memory_space<vmem>>) attributes {dimension_semantics = [#tpu.dimension_semantics<parallel>], iteration_bounds = array<i64: 1>, scalar_prefetch = 0 : i64, scratch_operands = 0 : i64, tpu.core_type = #tpu.core_type<tc>, window_params = [{transform_indices = @transform_0, window_bounds = array<i64: 32, 64>}, {transform_indices = @transform_1, window_bounds = array<i64: 32, 64>}, {transform_indices = @transform_2, window_bounds = array<i64: 32, 64>}]} {
    %c0 = arith.constant 0 : index
    %c0_0 = arith.constant 0 : index
    %0 = vector.load %arg1[%c0, %c0_0] : memref<32x64xbf16, #tpu.memory_space<vmem>>, vector<32x64xbf16>
    %1 = arith.extf %0 : vector<32x64xbf16> to vector<32x64xf32>
    %c0_1 = arith.constant 0 : index
    %c0_2 = arith.constant 0 : index
    %2 = vector.load %arg2[%c0_1, %c0_2] : memref<32x64xbf16, #tpu.memory_space<vmem>>, vector<32x64xbf16>
    %3 = arith.extf %2 : vector<32x64xbf16> to vector<32x64xf32>
    %4 = arith.addf %1, %3 : vector<32x64xf32>
    %5 = arith.truncf %4 : vector<32x64xf32> to vector<32x64xbf16>
    %c0_3 = arith.constant 0 : index
    %c0_4 = arith.constant 0 : index
    %6 = vector.load %arg3[%c0_3, %c0_4] : memref<32x64xbf16, #tpu.memory_space<vmem>>, vector<32x64xbf16>
    tpu.vector_store %arg3[%c0_3, %c0_4], %5 {strides = array<i32>} : memref<32x64xbf16, #tpu.memory_space<vmem>>, vector<32x64xbf16>,
    return
  }
  func.func @transform_0(%arg0: i32) -> (i32, i32) {
    %c0_i32 = arith.constant 0 : i32
    %c0_i32_0 = arith.constant 0 : i32
    return %arg0, %c0_i32 : i32, i32
  }
  func.func @transform_1(%arg0: i32) -> (i32, i32) {
    %c0_i32 = arith.constant 0 : i32
    %c0_i32_0 = arith.constant 0 : i32
    return %arg0, %c0_i32 : i32, i32
  }
  func.func @transform_2(%arg0: i32) -> (i32, i32) {
    %c0_i32 = arith.constant 0 : i32
    %c0_i32_0 = arith.constant 0 : i32
    return %arg0, %c0_i32 : i32, i32
  }
}

module attributes {stable_mosaic.version = 11 : i64} {
  func.func @_conv_kernel(%arg0: i32, %arg1: memref<32x64xbf16, #tpu.memory_space<vmem>>, %arg2: memref<64x32xbf16, #tpu.memory_space<vmem>>, %arg3: memref<1x32xf32, #tpu.memory_space<vmem>>, %arg4: memref<32x32xbf16, #tpu.memory_space<vmem>>) attributes {dimension_semantics = [#tpu.dimension_semantics<parallel>], iteration_bounds = array<i64: 1>, scalar_prefetch = 0 : i64, scratch_operands = 0 : i64, tpu.core_type = #tpu.core_type<tc>, window_params = [{transform_indices = @transform_0, window_bounds = array<i64: 32, 64>}, {pipeline_mode = #tpu.pipeline_mode<synchronous>, transform_indices = @transform_1, window_bounds = array<i64: 64, 32>}, {pipeline_mode = #tpu.pipeline_mode<synchronous>, transform_indices = @transform_2, window_bounds = array<i64: 1, 32>}, {transform_indices = @transform_3, window_bounds = array<i64: 32, 32>}]} {
    %c0 = arith.constant 0 : index
    %c0_0 = arith.constant 0 : index
    %0 = vector.load %arg1[%c0, %c0_0] : memref<32x64xbf16, #tpu.memory_space<vmem>>, vector<32x64xbf16>
    %c0_1 = arith.constant 0 : index
    %c0_2 = arith.constant 0 : index
    %1 = vector.load %arg2[%c0_1, %c0_2] : memref<64x32xbf16, #tpu.memory_space<vmem>>, vector<64x32xbf16>
    %cst = arith.constant dense<0.000000e+00> : vector<32x32xf32>
    %2 = tpu.matmul %0, %1, %cst {dimension_numbers = #tpu.dot_dimension_numbers<[1], [0], [0], [1], [0, 0, 1, 1], [], []>} : vector<32x64xbf16>, vector<64x32xbf16>, vector<32x32xf32> -> vector<32x32xf32>
    %c0_3 = arith.constant 0 : index
    %c0_4 = arith.constant 0 : index
    %3 = vector.load %arg3[%c0_3, %c0_4] : memref<1x32xf32, #tpu.memory_space<vmem>>, vector<1x32xf32>
    %4 = vector.broadcast %3 : vector<1x32xf32> to vector<32x32xf32>
    %5 = arith.addf %2, %4 : vector<32x32xf32>
    %6 = arith.truncf %5 : vector<32x32xf32> to vector<32x32xbf16>
    %c0_5 = arith.constant 0 : index
    %c0_6 = arith.constant 0 : index
    %7 = vector.load %arg4[%c0_5, %c0_6] : memref<32x32xbf16, #tpu.memory_space<vmem>>, vector<32x32xbf16>
    tpu.vector_store %arg4[%c0_5, %c0_6], %6 {strides = array<i32>} : memref<32x32xbf16, #tpu.memory_space<vmem>>, vector<32x32xbf16>,
    return
  }
  func.func @transform_0(%arg0: i32) -> (i32, i32) {
    %c0_i32 = arith.constant 0 : i32
    %c0_i32_0 = arith.constant 0 : i32
    return %arg0, %c0_i32 : i32, i32
  }
  func.func @transform_1(%arg0: i32) -> (i32, i32) {
    %c0_i32 = arith.constant 0 : i32
    %c0_i32_0 = arith.constant 0 : i32
    %c0_i32_1 = arith.constant 0 : i32
    return %c0_i32, %c0_i32_0 : i32, i32
  }
  func.func @transform_2(%arg0: i32) -> (i32, i32) {
    %c0_i32 = arith.constant 0 : i32
    %c0_i32_0 = arith.constant 0 : i32
    %c0_i32_1 = arith.constant 0 : i32
    return %c0_i32, %c0_i32_0 : i32, i32
  }
  func.func @transform_3(%arg0: i32) -> (i32, i32) {
    %c0_i32 = arith.constant 0 : i32
    %c0_i32_0 = arith.constant 0 : i32
    return %arg0, %c0_i32 : i32, i32
  }
}

module attributes {stable_mosaic.version = 11 : i64} {
  func.func @_add_kernel(%arg0: i32, %arg1: memref<128x32xbf16, #tpu.memory_space<vmem>>, %arg2: memref<128x32xbf16, #tpu.memory_space<vmem>>, %arg3: memref<128x32xbf16, #tpu.memory_space<vmem>>) attributes {dimension_semantics = [#tpu.dimension_semantics<parallel>], iteration_bounds = array<i64: 1>, scalar_prefetch = 0 : i64, scratch_operands = 0 : i64, tpu.core_type = #tpu.core_type<tc>, window_params = [{transform_indices = @transform_0, window_bounds = array<i64: 128, 32>}, {transform_indices = @transform_1, window_bounds = array<i64: 128, 32>}, {transform_indices = @transform_2, window_bounds = array<i64: 128, 32>}]} {
    %c0 = arith.constant 0 : index
    %c0_0 = arith.constant 0 : index
    %0 = vector.load %arg1[%c0, %c0_0] : memref<128x32xbf16, #tpu.memory_space<vmem>>, vector<128x32xbf16>
    %1 = arith.extf %0 : vector<128x32xbf16> to vector<128x32xf32>
    %c0_1 = arith.constant 0 : index
    %c0_2 = arith.constant 0 : index
    %2 = vector.load %arg2[%c0_1, %c0_2] : memref<128x32xbf16, #tpu.memory_space<vmem>>, vector<128x32xbf16>
    %3 = arith.extf %2 : vector<128x32xbf16> to vector<128x32xf32>
    %4 = arith.addf %1, %3 : vector<128x32xf32>
    %cst = arith.constant 0.000000e+00 : f32
    %5 = vector.broadcast %cst : f32 to vector<128x32xf32>
    %6 = arith.maximumf %4, %5 : vector<128x32xf32>
    %7 = arith.truncf %6 : vector<128x32xf32> to vector<128x32xbf16>
    %c0_3 = arith.constant 0 : index
    %c0_4 = arith.constant 0 : index
    %8 = vector.load %arg3[%c0_3, %c0_4] : memref<128x32xbf16, #tpu.memory_space<vmem>>, vector<128x32xbf16>
    tpu.vector_store %arg3[%c0_3, %c0_4], %7 {strides = array<i32>} : memref<128x32xbf16, #tpu.memory_space<vmem>>, vector<128x32xbf16>,
    return
  }
  func.func @transform_0(%arg0: i32) -> (i32, i32) {
    %c0_i32 = arith.constant 0 : i32
    %c0_i32_0 = arith.constant 0 : i32
    return %arg0, %c0_i32 : i32, i32
  }
  func.func @transform_1(%arg0: i32) -> (i32, i32) {
    %c0_i32 = arith.constant 0 : i32
    %c0_i32_0 = arith.constant 0 : i32
    return %arg0, %c0_i32 : i32, i32
  }
  func.func @transform_2(%arg0: i32) -> (i32, i32) {
    %c0_i32 = arith.constant 0 : i32
    %c0_i32_0 = arith.constant 0 : i32
    return %arg0, %c0_i32 : i32, i32
  }
}

module attributes {stable_mosaic.version = 11 : i64} {
  func.func @_conv_kernel(%arg0: i32, %arg1: memref<128x32xbf16, #tpu.memory_space<vmem>>, %arg2: memref<32x32xbf16, #tpu.memory_space<vmem>>, %arg3: memref<1x32xf32, #tpu.memory_space<vmem>>, %arg4: memref<128x32xbf16, #tpu.memory_space<vmem>>) attributes {dimension_semantics = [#tpu.dimension_semantics<parallel>], iteration_bounds = array<i64: 1>, scalar_prefetch = 0 : i64, scratch_operands = 0 : i64, tpu.core_type = #tpu.core_type<tc>, window_params = [{transform_indices = @transform_0, window_bounds = array<i64: 128, 32>}, {pipeline_mode = #tpu.pipeline_mode<synchronous>, transform_indices = @transform_1, window_bounds = array<i64: 32, 32>}, {pipeline_mode = #tpu.pipeline_mode<synchronous>, transform_indices = @transform_2, window_bounds = array<i64: 1, 32>}, {transform_indices = @transform_3, window_bounds = array<i64: 128, 32>}]} {
    %c0 = arith.constant 0 : index
    %c0_0 = arith.constant 0 : index
    %0 = vector.load %arg1[%c0, %c0_0] : memref<128x32xbf16, #tpu.memory_space<vmem>>, vector<128x32xbf16>
    %c0_1 = arith.constant 0 : index
    %c0_2 = arith.constant 0 : index
    %1 = vector.load %arg2[%c0_1, %c0_2] : memref<32x32xbf16, #tpu.memory_space<vmem>>, vector<32x32xbf16>
    %cst = arith.constant dense<0.000000e+00> : vector<128x32xf32>
    %2 = tpu.matmul %0, %1, %cst {dimension_numbers = #tpu.dot_dimension_numbers<[1], [0], [0], [1], [0, 0, 1, 1], [], []>} : vector<128x32xbf16>, vector<32x32xbf16>, vector<128x32xf32> -> vector<128x32xf32>
    %c0_3 = arith.constant 0 : index
    %c0_4 = arith.constant 0 : index
    %3 = vector.load %arg3[%c0_3, %c0_4] : memref<1x32xf32, #tpu.memory_space<vmem>>, vector<1x32xf32>
    %4 = vector.broadcast %3 : vector<1x32xf32> to vector<128x32xf32>
    %5 = arith.addf %2, %4 : vector<128x32xf32>
    %cst_5 = arith.constant 0.000000e+00 : f32
    %6 = vector.broadcast %cst_5 : f32 to vector<128x32xf32>
    %7 = arith.maximumf %5, %6 : vector<128x32xf32>
    %8 = arith.truncf %7 : vector<128x32xf32> to vector<128x32xbf16>
    %c0_6 = arith.constant 0 : index
    %c0_7 = arith.constant 0 : index
    %9 = vector.load %arg4[%c0_6, %c0_7] : memref<128x32xbf16, #tpu.memory_space<vmem>>, vector<128x32xbf16>
    tpu.vector_store %arg4[%c0_6, %c0_7], %8 {strides = array<i32>} : memref<128x32xbf16, #tpu.memory_space<vmem>>, vector<128x32xbf16>,
    return
  }
  func.func @transform_0(%arg0: i32) -> (i32, i32) {
    %c0_i32 = arith.constant 0 : i32
    %c0_i32_0 = arith.constant 0 : i32
    return %arg0, %c0_i32 : i32, i32
  }
  func.func @transform_1(%arg0: i32) -> (i32, i32) {
    %c0_i32 = arith.constant 0 : i32
    %c0_i32_0 = arith.constant 0 : i32
    %c0_i32_1 = arith.constant 0 : i32
    return %c0_i32, %c0_i32_0 : i32, i32
  }
  func.func @transform_2(%arg0: i32) -> (i32, i32) {
    %c0_i32 = arith.constant 0 : i32
    %c0_i32_0 = arith.constant 0 : i32
    %c0_i32_1 = arith.constant 0 : i32
    return %c0_i32, %c0_i32_0 : i32, i32
  }
  func.func @transform_3(%arg0: i32) -> (i32, i32) {
    %c0_i32 = arith.constant 0 : i32
    %c0_i32_0 = arith.constant 0 : i32
    return %arg0, %c0_i32 : i32, i32
  }
}

module attributes {stable_mosaic.version = 11 : i64} {
  func.func @_conv_res_kernel(%arg0: i32, %arg1: memref<128x32xbf16, #tpu.memory_space<vmem>>, %arg2: memref<32x32xbf16, #tpu.memory_space<vmem>>, %arg3: memref<1x32xf32, #tpu.memory_space<vmem>>, %arg4: memref<128x32xbf16, #tpu.memory_space<vmem>>, %arg5: memref<128x32xbf16, #tpu.memory_space<vmem>>) attributes {dimension_semantics = [#tpu.dimension_semantics<parallel>], iteration_bounds = array<i64: 1>, scalar_prefetch = 0 : i64, scratch_operands = 0 : i64, tpu.core_type = #tpu.core_type<tc>, window_params = [{transform_indices = @transform_0, window_bounds = array<i64: 128, 32>}, {pipeline_mode = #tpu.pipeline_mode<synchronous>, transform_indices = @transform_1, window_bounds = array<i64: 32, 32>}, {pipeline_mode = #tpu.pipeline_mode<synchronous>, transform_indices = @transform_2, window_bounds = array<i64: 1, 32>}, {transform_indices = @transform_3, window_bounds = array<i64: 128, 32>}, {transform_indices = @transform_4, window_bounds = array<i64: 128, 32>}]} {
    %c0 = arith.constant 0 : index
    %c0_0 = arith.constant 0 : index
    %0 = vector.load %arg1[%c0, %c0_0] : memref<128x32xbf16, #tpu.memory_space<vmem>>, vector<128x32xbf16>
    %c0_1 = arith.constant 0 : index
    %c0_2 = arith.constant 0 : index
    %1 = vector.load %arg2[%c0_1, %c0_2] : memref<32x32xbf16, #tpu.memory_space<vmem>>, vector<32x32xbf16>
    %cst = arith.constant dense<0.000000e+00> : vector<128x32xf32>
    %2 = tpu.matmul %0, %1, %cst {dimension_numbers = #tpu.dot_dimension_numbers<[1], [0], [0], [1], [0, 0, 1, 1], [], []>} : vector<128x32xbf16>, vector<32x32xbf16>, vector<128x32xf32> -> vector<128x32xf32>
    %c0_3 = arith.constant 0 : index
    %c0_4 = arith.constant 0 : index
    %3 = vector.load %arg3[%c0_3, %c0_4] : memref<1x32xf32, #tpu.memory_space<vmem>>, vector<1x32xf32>
    %4 = vector.broadcast %3 : vector<1x32xf32> to vector<128x32xf32>
    %5 = arith.addf %2, %4 : vector<128x32xf32>
    %c0_5 = arith.constant 0 : index
    %c0_6 = arith.constant 0 : index
    %6 = vector.load %arg4[%c0_5, %c0_6] : memref<128x32xbf16, #tpu.memory_space<vmem>>, vector<128x32xbf16>
    %7 = arith.extf %6 : vector<128x32xbf16> to vector<128x32xf32>
    %8 = arith.addf %5, %7 : vector<128x32xf32>
    %9 = arith.truncf %8 : vector<128x32xf32> to vector<128x32xbf16>
    %c0_7 = arith.constant 0 : index
    %c0_8 = arith.constant 0 : index
    %10 = vector.load %arg5[%c0_7, %c0_8] : memref<128x32xbf16, #tpu.memory_space<vmem>>, vector<128x32xbf16>
    tpu.vector_store %arg5[%c0_7, %c0_8], %9 {strides = array<i32>} : memref<128x32xbf16, #tpu.memory_space<vmem>>, vector<128x32xbf16>,
    return
  }
  func.func @transform_0(%arg0: i32) -> (i32, i32) {
    %c0_i32 = arith.constant 0 : i32
    %c0_i32_0 = arith.constant 0 : i32
    return %arg0, %c0_i32 : i32, i32
  }
  func.func @transform_1(%arg0: i32) -> (i32, i32) {
    %c0_i32 = arith.constant 0 : i32
    %c0_i32_0 = arith.constant 0 : i32
    %c0_i32_1 = arith.constant 0 : i32
    return %c0_i32, %c0_i32_0 : i32, i32
  }
  func.func @transform_2(%arg0: i32) -> (i32, i32) {
    %c0_i32 = arith.constant 0 : i32
    %c0_i32_0 = arith.constant 0 : i32
    %c0_i32_1 = arith.constant 0 : i32
    return %c0_i32, %c0_i32_0 : i32, i32
  }
  func.func @transform_3(%arg0: i32) -> (i32, i32) {
    %c0_i32 = arith.constant 0 : i32
    %c0_i32_0 = arith.constant 0 : i32
    return %arg0, %c0_i32 : i32, i32
  }
  func.func @transform_4(%arg0: i32) -> (i32, i32) {
    %c0_i32 = arith.constant 0 : i32
    %c0_i32_0 = arith.constant 0 : i32
    return %arg0, %c0_i32 : i32, i32
  }
}

module attributes {stable_mosaic.version = 11 : i64} {
  func.func @_conv_kernel(%arg0: i32, %arg1: memref<128x32xbf16, #tpu.memory_space<vmem>>, %arg2: memref<32x4xbf16, #tpu.memory_space<vmem>>, %arg3: memref<1x4xf32, #tpu.memory_space<vmem>>, %arg4: memref<128x4xbf16, #tpu.memory_space<vmem>>) attributes {dimension_semantics = [#tpu.dimension_semantics<parallel>], iteration_bounds = array<i64: 1>, scalar_prefetch = 0 : i64, scratch_operands = 0 : i64, tpu.core_type = #tpu.core_type<tc>, window_params = [{transform_indices = @transform_0, window_bounds = array<i64: 128, 32>}, {pipeline_mode = #tpu.pipeline_mode<synchronous>, transform_indices = @transform_1, window_bounds = array<i64: 32, 4>}, {pipeline_mode = #tpu.pipeline_mode<synchronous>, transform_indices = @transform_2, window_bounds = array<i64: 1, 4>}, {transform_indices = @transform_3, window_bounds = array<i64: 128, 4>}]} {
    %c0 = arith.constant 0 : index
    %c0_0 = arith.constant 0 : index
    %0 = vector.load %arg1[%c0, %c0_0] : memref<128x32xbf16, #tpu.memory_space<vmem>>, vector<128x32xbf16>
    %c0_1 = arith.constant 0 : index
    %c0_2 = arith.constant 0 : index
    %1 = vector.load %arg2[%c0_1, %c0_2] : memref<32x4xbf16, #tpu.memory_space<vmem>>, vector<32x4xbf16>
    %cst = arith.constant dense<0.000000e+00> : vector<128x4xf32>
    %2 = tpu.matmul %0, %1, %cst {dimension_numbers = #tpu.dot_dimension_numbers<[1], [0], [0], [1], [0, 0, 1, 1], [], []>} : vector<128x32xbf16>, vector<32x4xbf16>, vector<128x4xf32> -> vector<128x4xf32>
    %c0_3 = arith.constant 0 : index
    %c0_4 = arith.constant 0 : index
    %3 = vector.load %arg3[%c0_3, %c0_4] : memref<1x4xf32, #tpu.memory_space<vmem>>, vector<1x4xf32>
    %4 = vector.broadcast %3 : vector<1x4xf32> to vector<128x4xf32>
    %5 = arith.addf %2, %4 : vector<128x4xf32>
    %6 = arith.truncf %5 : vector<128x4xf32> to vector<128x4xbf16>
    %c0_5 = arith.constant 0 : index
    %c0_6 = arith.constant 0 : index
    %7 = vector.load %arg4[%c0_5, %c0_6] : memref<128x4xbf16, #tpu.memory_space<vmem>>, vector<128x4xbf16>
    tpu.vector_store %arg4[%c0_5, %c0_6], %6 {strides = array<i32>} : memref<128x4xbf16, #tpu.memory_space<vmem>>, vector<128x4xbf16>,
    return
  }
  func.func @transform_0(%arg0: i32) -> (i32, i32) {
    %c0_i32 = arith.constant 0 : i32
    %c0_i32_0 = arith.constant 0 : i32
    return %arg0, %c0_i32 : i32, i32
  }
  func.func @transform_1(%arg0: i32) -> (i32, i32) {
    %c0_i32 = arith.constant 0 : i32
    %c0_i32_0 = arith.constant 0 : i32
    %c0_i32_1 = arith.constant 0 : i32
    return %c0_i32, %c0_i32_0 : i32, i32
  }
  func.func @transform_2(%arg0: i32) -> (i32, i32) {
    %c0_i32 = arith.constant 0 : i32
    %c0_i32_0 = arith.constant 0 : i32
    %c0_i32_1 = arith.constant 0 : i32
    return %c0_i32, %c0_i32_0 : i32, i32
  }
  func.func @transform_3(%arg0: i32) -> (i32, i32) {
    %c0_i32 = arith.constant 0 : i32
    %c0_i32_0 = arith.constant 0 : i32
    return %arg0, %c0_i32 : i32, i32
  }
}

module attributes {stable_mosaic.version = 11 : i64} {
  func.func @_conv_res_kernel(%arg0: i32, %arg1: memref<128x4xbf16, #tpu.memory_space<vmem>>, %arg2: memref<4x32xbf16, #tpu.memory_space<vmem>>, %arg3: memref<1x32xf32, #tpu.memory_space<vmem>>, %arg4: memref<128x32xbf16, #tpu.memory_space<vmem>>, %arg5: memref<128x32xbf16, #tpu.memory_space<vmem>>) attributes {dimension_semantics = [#tpu.dimension_semantics<parallel>], iteration_bounds = array<i64: 1>, scalar_prefetch = 0 : i64, scratch_operands = 0 : i64, tpu.core_type = #tpu.core_type<tc>, window_params = [{transform_indices = @transform_0, window_bounds = array<i64: 128, 4>}, {pipeline_mode = #tpu.pipeline_mode<synchronous>, transform_indices = @transform_1, window_bounds = array<i64: 4, 32>}, {pipeline_mode = #tpu.pipeline_mode<synchronous>, transform_indices = @transform_2, window_bounds = array<i64: 1, 32>}, {transform_indices = @transform_3, window_bounds = array<i64: 128, 32>}, {transform_indices = @transform_4, window_bounds = array<i64: 128, 32>}]} {
    %c0 = arith.constant 0 : index
    %c0_0 = arith.constant 0 : index
    %0 = vector.load %arg1[%c0, %c0_0] : memref<128x4xbf16, #tpu.memory_space<vmem>>, vector<128x4xbf16>
    %c0_1 = arith.constant 0 : index
    %c0_2 = arith.constant 0 : index
    %1 = vector.load %arg2[%c0_1, %c0_2] : memref<4x32xbf16, #tpu.memory_space<vmem>>, vector<4x32xbf16>
    %cst = arith.constant dense<0.000000e+00> : vector<128x32xf32>
    %2 = tpu.matmul %0, %1, %cst {dimension_numbers = #tpu.dot_dimension_numbers<[1], [0], [0], [1], [0, 0, 1, 1], [], []>} : vector<128x4xbf16>, vector<4x32xbf16>, vector<128x32xf32> -> vector<128x32xf32>
    %c0_3 = arith.constant 0 : index
    %c0_4 = arith.constant 0 : index
    %3 = vector.load %arg3[%c0_3, %c0_4] : memref<1x32xf32, #tpu.memory_space<vmem>>, vector<1x32xf32>
    %4 = vector.broadcast %3 : vector<1x32xf32> to vector<128x32xf32>
    %5 = arith.addf %2, %4 : vector<128x32xf32>
    %c0_5 = arith.constant 0 : index
    %c0_6 = arith.constant 0 : index
    %6 = vector.load %arg4[%c0_5, %c0_6] : memref<128x32xbf16, #tpu.memory_space<vmem>>, vector<128x32xbf16>
    %7 = arith.extf %6 : vector<128x32xbf16> to vector<128x32xf32>
    %8 = arith.addf %5, %7 : vector<128x32xf32>
    %9 = arith.truncf %8 : vector<128x32xf32> to vector<128x32xbf16>
    %c0_7 = arith.constant 0 : index
    %c0_8 = arith.constant 0 : index
    %10 = vector.load %arg5[%c0_7, %c0_8] : memref<128x32xbf16, #tpu.memory_space<vmem>>, vector<128x32xbf16>
    tpu.vector_store %arg5[%c0_7, %c0_8], %9 {strides = array<i32>} : memref<128x32xbf16, #tpu.memory_space<vmem>>, vector<128x32xbf16>,
    return
  }
  func.func @transform_0(%arg0: i32) -> (i32, i32) {
    %c0_i32 = arith.constant 0 : i32
    %c0_i32_0 = arith.constant 0 : i32
    return %arg0, %c0_i32 : i32, i32
  }
  func.func @transform_1(%arg0: i32) -> (i32, i32) {
    %c0_i32 = arith.constant 0 : i32
    %c0_i32_0 = arith.constant 0 : i32
    %c0_i32_1 = arith.constant 0 : i32
    return %c0_i32, %c0_i32_0 : i32, i32
  }
  func.func @transform_2(%arg0: i32) -> (i32, i32) {
    %c0_i32 = arith.constant 0 : i32
    %c0_i32_0 = arith.constant 0 : i32
    %c0_i32_1 = arith.constant 0 : i32
    return %c0_i32, %c0_i32_0 : i32, i32
  }
  func.func @transform_3(%arg0: i32) -> (i32, i32) {
    %c0_i32 = arith.constant 0 : i32
    %c0_i32_0 = arith.constant 0 : i32
    return %arg0, %c0_i32 : i32, i32
  }
  func.func @transform_4(%arg0: i32) -> (i32, i32) {
    %c0_i32 = arith.constant 0 : i32
    %c0_i32_0 = arith.constant 0 : i32
    return %arg0, %c0_i32 : i32, i32
  }
}

</mosaic_0001>

<bundles_post_ra>
// kernel: _lambda_.41
= control target key start
LH: loop header
LB: loop body
LE: loop exit
PB: predicated region body
PF: predicated region fallthrough
CT: control target
= control target key end

     0   :  { %vm355_vm0 = vcmask 1044480   ;;  %vm356_vm1 = vcmask 1045504   ;;  %v938_v2 = vmov 65535   ;;  %vm258_vm2 = vcmask 220160   ;;  %s1421_s1 = inlined_call_operand.vmem [shape: bf16[27,64], index: 1, kind: input, shape index: {}]   ;;  %s1422_s2 = inlined_call_operand.vmem [shape: f32[1,64], index: 2, kind: input, shape index: {}]   ;;  %s1423_s0 = inlined_call_operand.vmem [shape: bf16[512,27], index: 0, kind: input, shape index: {}]   ;;  %s1424_s3 = inlined_call_operand.vmem [shape: bf16[512,64], index: 3, kind: output, shape index: {}]  }
   0x1   :  { %v862_v0 = vld [vmem:[%s1421_s1 + $0x8] sm:$0xf]  ;;  %v929_v1 = vld [vmem:[%s1421_s1 + $0x8] sm:$0x30]  ;;  %v357_v3 = vsel %vm355_vm0, 4294967295, %v938_v2  ;;  %v928_v7 = vld [vmem:[%s1421_s1] sm:$0xff] }
   0x2   :  { %v863_v4 = vor.u32 %v929_v1, %v862_v0  ;;  %v358_v5 = vsel %vm356_vm1, %v357_v3, 0  ;;  %v896_v8 = vld [vmem:[%s1423_s0] sm:$0xff]  ;;  %v897_v12 = vld [vmem:[%s1423_s0 + $0x8] sm:$0xff]  ;;  %v898_v16 = vld [vmem:[%s1423_s0 + $0x10] sm:$0xff]  ;;  %vm659_vm3 = vcmask 519168  }
   0x3   :  { %v904_v9 = vld [vmem:[%s1423_s0 + $0x40] sm:$0xff]  ;;  %v905_v13 = vld [vmem:[%s1423_s0 + $0x48] sm:$0xff]  ;;  %v906_v17 = vld [vmem:[%s1423_s0 + $0x50] sm:$0xff] }
   0x4   :  { %v360_v6 = vand.u32 %v863_v4, %v358_v5  ;;  %v912_v10 = vld [vmem:[%s1423_s0 + $0x80] sm:$0xff]  ;;  %v913_v14 = vld [vmem:[%s1423_s0 + $0x88] sm:$0xff]  ;;  %v914_v18 = vld [vmem:[%s1423_s0 + $0x90] sm:$0xff] }
   0x5   :  { %v920_v11 = vld [vmem:[%s1423_s0 + $0xc0] sm:$0xff]  ;;  %v921_v15 = vld [vmem:[%s1423_s0 + $0xc8] sm:$0xff]  ;;  %v922_v19 = vld [vmem:[%s1423_s0 + $0xd0] sm:$0xff] }
   0x6   :  { %368 = vmatpush.bf16.msra.mxu0 %v360_v6  ;;  %930 = vmatpush.bf16.msra.mxu1 %v360_v6  ;;  %v899_v20 = vld [vmem:[%s1423_s0 + $0x18] sm:$0xff]  ;;  %v900_v24 = vld [vmem:[%s1423_s0 + $0x20] sm:$0xff]  ;;  %v901_v28 = vld [vmem:[%s1423_s0 + $0x28] sm:$0xff] }
   0x7   :  { %931 = vmatpush.bf16.msra.mxu2 %v360_v6  ;;  %932 = vmatpush.bf16.msra.mxu3 %v360_v6  ;;  %v907_v21 = vld [vmem:[%s1423_s0 + $0x58] sm:$0xff]  ;;  %v908_v25 = vld [vmem:[%s1423_s0 + $0x60] sm:$0xff]  ;;  %v909_v29 = vld [vmem:[%s1423_s0 + $0x68] sm:$0xff] }
   0x8   :  { %v915_v22 = vld [vmem:[%s1423_s0 + $0x98] sm:$0xff]  ;;  %v916_v26 = vld [vmem:[%s1423_s0 + $0xa0] sm:$0xff]  ;;  %v917_v30 = vld [vmem:[%s1423_s0 + $0xa8] sm:$0xff] }
   0x9   :  { %v923_v23 = vld [vmem:[%s1423_s0 + $0xd8] sm:$0xff]  ;;  %v924_v27 = vld [vmem:[%s1423_s0 + $0xe0] sm:$0xff]  ;;  %v925_v31 = vld [vmem:[%s1423_s0 + $0xe8] sm:$0xff] }
   0xa   :  { %369 = vmatpush.bf16.msra.mxu0 %v928_v7  ;;  %933 = vmatpush.bf16.msra.mxu1 %v928_v7  ;;  %v902_v32 = vld [vmem:[%s1423_s0 + $0x30] sm:$0xff]  ;;  %v903_v36 = vld [vmem:[%s1423_s0 + $0x38] sm:$0xff]  ;;  %v1099_v40 = vld [vmem:[%s1422_s2] ss:$0 sm:$0xff] }
   0xb   :  { %934 = vmatpush.bf16.msra.mxu2 %v928_v7  ;;  %935 = vmatpush.bf16.msra.mxu3 %v928_v7  ;;  %v910_v33 = vld [vmem:[%s1423_s0 + $0x70] sm:$0xff]  ;;  %v911_v37 = vld [vmem:[%s1423_s0 + $0x78] sm:$0xff] }
   0xc   :  { %v918_v34 = vld [vmem:[%s1423_s0 + $0xb0] sm:$0xff]  ;;  %v919_v38 = vld [vmem:[%s1423_s0 + $0xb8] sm:$0xff] }
   0xd   :  { %864 = vmatmul.msk.bf16.vlgmr.msra.gmra.mxu0 %vm258_vm2, %v896_v8  ;;  %872 = vmatmul.msk.bf16.vlgmr.msra.gmra.mxu1 %vm258_vm2, %v904_v9  ;;  %v926_v35 = vld [vmem:[%s1423_s0 + $0xf0] sm:$0xff]  ;;  %v927_v39 = vld [vmem:[%s1423_s0 + $0xf8] sm:$0xff] }
   0xe   :  { %880 = vmatmul.msk.bf16.vlgmr.msra.gmra.mxu2 %vm258_vm2, %v912_v10  ;;  %888 = vmatmul.msk.bf16.vlgmr.msra.gmra.mxu3 %vm258_vm2, %v920_v11 }
  0x1d   :  { %865 = vmatmul.msk.bf16.gmra.mxu0 %vm258_vm2, %v897_v12  ;;  %873 = vmatmul.msk.bf16.gmra.mxu1 %vm258_vm2, %v905_v13 }
  0x1e   :  { %881 = vmatmul.msk.bf16.gmra.mxu2 %vm258_vm2, %v913_v14  ;;  %889 = vmatmul.msk.bf16.gmra.mxu3 %vm258_vm2, %v921_v15 }
  0x2d   :  { %866 = vmatmul.msk.bf16.gmra.mxu0 %vm258_vm2, %v898_v16  ;;  %874 = vmatmul.msk.bf16.gmra.mxu1 %vm258_vm2, %v906_v17 }
  0x2e   :  { %882 = vmatmul.msk.bf16.gmra.mxu2 %vm258_vm2, %v914_v18  ;;  %890 = vmatmul.msk.bf16.gmra.mxu3 %vm258_vm2, %v922_v19 }
  0x3d   :  { %867 = vmatmul.msk.bf16.gmra.mxu0 %vm258_vm2, %v899_v20  ;;  %875 = vmatmul.msk.bf16.gmra.mxu1 %vm258_vm2, %v907_v21 }
  0x3e   :  { %883 = vmatmul.msk.bf16.gmra.mxu2 %vm258_vm2, %v915_v22  ;;  %891 = vmatmul.msk.bf16.gmra.mxu3 %vm258_vm2, %v923_v23 }
  0x4d   :  { %868 = vmatmul.msk.bf16.gmra.mxu0 %vm258_vm2, %v900_v24  ;;  %876 = vmatmul.msk.bf16.gmra.mxu1 %vm258_vm2, %v908_v25 }
  0x4e   :  { %884 = vmatmul.msk.bf16.gmra.mxu2 %vm258_vm2, %v916_v26  ;;  %892 = vmatmul.msk.bf16.gmra.mxu3 %vm258_vm2, %v924_v27 }
  0x5d   :  { %869 = vmatmul.msk.bf16.gmra.mxu0 %vm258_vm2, %v901_v28  ;;  %877 = vmatmul.msk.bf16.gmra.mxu1 %vm258_vm2, %v909_v29 }
  0x5e   :  { %885 = vmatmul.msk.bf16.gmra.mxu2 %vm258_vm2, %v917_v30  ;;  %893 = vmatmul.msk.bf16.gmra.mxu3 %vm258_vm2, %v925_v31 }
  0x6d   :  { %870 = vmatmul.msk.bf16.gmra.mxu0 %vm258_vm2, %v902_v32  ;;  %878 = vmatmul.msk.bf16.gmra.mxu1 %vm258_vm2, %v910_v33 }
  0x6e   :  { %886 = vmatmul.msk.bf16.gmra.mxu2 %vm258_vm2, %v918_v34  ;;  %894 = vmatmul.msk.bf16.gmra.mxu3 %vm258_vm2, %v926_v35 }
  0x7d   :  { %871 = vmatmul.msk.bf16.gmra.mxu0 %vm258_vm2, %v903_v36  ;;  %879 = vmatmul.msk.bf16.gmra.mxu1 %vm258_vm2, %v911_v37 }
  0x7e   :  { %887 = vmatmul.msk.bf16.gmra.mxu2 %vm258_vm2, %v919_v38  ;;  %895 = vmatmul.msk.bf16.gmra.mxu3 %vm258_vm2, %v927_v39 }
  0x8a   :  { %v371_v41 = vpop.f32.mrf.mxu0  ;;  %v411_v42 = vpop.f32.mrf.mxu1 }
  0x8b   :  { %v372_v43 = vadd.f32 %v1099_v40, %v371_v41  ;;  %v412_v44 = vadd.f32 %v1099_v40, %v411_v42 }
  0x8d   :  { %v531_v45 = vmax.f32 %v372_v43, 0.0  ;;  %v547_v46 = vmax.f32 %v412_v44, 0.0 }
  0x8f   :  { %v595_v47 = vpack.c.bf16 %v531_v45, %v531_v45  ;;  %v611_v48 = vpack.c.bf16 %v547_v46, %v547_v46 }
  0x91   :  { %660 = vst.msk [vmem:[%s1424_s3] sm:$0xf] %vm659_vm3, %v595_v47  ;;  %v451_v49 = vpop.f32.mrf.mxu2  ;;  %v491_v50 = vpop.f32.mrf.mxu3 }
  0x92   :  { %676 = vst.msk [vmem:[%s1424_s3 + $0x40] sm:$0xf] %vm659_vm3, %v611_v48  ;;  %v452_v51 = vadd.f32 %v1099_v40, %v451_v49  ;;  %v492_v52 = vadd.f32 %v1099_v40, %v491_v50  ;;  %v373_v53 = vpop.f32.mrf.mxu0  ;;  %v413_v54 = vpop.f32.mrf.mxu1 }
  0x93   :  { %v374_v55 = vadd.f32 %v1099_v40, %v373_v53  ;;  %v414_v56 = vadd.f32 %v1099_v40, %v413_v54 }
  0x94   :  { %v563_v57 = vmax.f32 %v452_v51, 0.0  ;;  %v579_v58 = vmax.f32 %v492_v52, 0.0 }
  0x95   :  { %v532_v59 = vmax.f32 %v374_v55, 0.0  ;;  %v548_v60 = vmax.f32 %v414_v56, 0.0 }
  0x96   :  { %v627_v61 = vpack.c.bf16 %v563_v57, %v563_v57  ;;  %v643_v62 = vpack.c.bf16 %v579_v58, %v579_v58 }
  0x97   :  { %v596_v63 = vpack.c.bf16 %v532_v59, %v532_v59  ;;  %v612_v0 = vpack.c.bf16 %v548_v60, %v548_v60 }
  0x98   :  { %692 = vst.msk [vmem:[%s1424_s3 + $0x80] sm:$0xf] %vm659_vm3, %v627_v61 }
  0x99   :  { %708 = vst.msk [vmem:[%s1424_s3 + $0xc0] sm:$0xf] %vm659_vm3, %v643_v62  ;;  %v453_v1 = vpop.f32.mrf.mxu2  ;;  %v493_v2 = vpop.f32.mrf.mxu3 }
  0x9a   :  { %661 = vst.msk [vmem:[%s1424_s3 + $0x4] sm:$0xf] %vm659_vm3, %v596_v63  ;;  %v454_v3 = vadd.f32 %v1099_v40, %v453_v1  ;;  %v494_v4 = vadd.f32 %v1099_v40, %v493_v2  ;;  %v376_v5 = vpop.f32.mrf.mxu0  ;;  %v416_v6 = vpop.f32.mrf.mxu1 }
  0x9b   :  { %677 = vst.msk [vmem:[%s1424_s3 + $0x44] sm:$0xf] %vm659_vm3, %v612_v0  ;;  %v377_v7 = vadd.f32 %v1099_v40, %v376_v5  ;;  %v417_v8 = vadd.f32 %v1099_v40, %v416_v6 }
  0x9c   :  { %v564_v9 = vmax.f32 %v454_v3, 0.0  ;;  %v580_v10 = vmax.f32 %v494_v4, 0.0 }
  0x9d   :  { %v533_v11 = vmax.f32 %v377_v7, 0.0  ;;  %v549_v12 = vmax.f32 %v417_v8, 0.0 }
  0x9e   :  { %v628_v13 = vpack.c.bf16 %v564_v9, %v564_v9  ;;  %v644_v14 = vpack.c.bf16 %v580_v10, %v580_v10 }
  0x9f   :  { %v597_v15 = vpack.c.bf16 %v533_v11, %v533_v11  ;;  %v613_v16 = vpack.c.bf16 %v549_v12, %v549_v12 }
  0xa0   :  { %693 = vst.msk [vmem:[%s1424_s3 + $0x84] sm:$0xf] %vm659_vm3, %v628_v13 }
  0xa1   :  { %709 = vst.msk [vmem:[%s1424_s3 + $0xc4] sm:$0xf] %vm659_vm3, %v644_v14  ;;  %v456_v17 = vpop.f32.mrf.mxu2  ;;  %v496_v18 = vpop.f32.mrf.mxu3 }
  0xa2   :  { %662 = vst.msk [vmem:[%s1424_s3 + $0x8] sm:$0xf] %vm659_vm3, %v597_v15  ;;  %v457_v19 = vadd.f32 %v1099_v40, %v456_v17  ;;  %v497_v20 = vadd.f32 %v1099_v40, %v496_v18  ;;  %v378_v21 = vpop.f32.mrf.mxu0  ;;  %v418_v22 = vpop.f32.mrf.mxu1 }
  0xa3   :  { %678 = vst.msk [vmem:[%s1424_s3 + $0x48] sm:$0xf] %vm659_vm3, %v613_v16  ;;  %v379_v23 = vadd.f32 %v1099_v40, %v378_v21  ;;  %v419_v24 = vadd.f32 %v1099_v40, %v418_v22 }
  0xa4   :  { %v565_v25 = vmax.f32 %v457_v19, 0.0  ;;  %v581_v26 = vmax.f32 %v497_v20, 0.0 }
  0xa5   :  { %v534_v27 = vmax.f32 %v379_v23, 0.0  ;;  %v550_v28 = vmax.f32 %v419_v24, 0.0 }
  0xa6   :  { %v629_v29 = vpack.c.bf16 %v565_v25, %v565_v25  ;;  %v645_v30 = vpack.c.bf16 %v581_v26, %v581_v26 }
  0xa7   :  { %v598_v31 = vpack.c.bf16 %v534_v27, %v534_v27  ;;  %v614_v32 = vpack.c.bf16 %v550_v28, %v550_v28 }
  0xa8   :  { %694 = vst.msk [vmem:[%s1424_s3 + $0x88] sm:$0xf] %vm659_vm3, %v629_v29 }
  0xa9   :  { %710 = vst.msk [vmem:[%s1424_s3 + $0xc8] sm:$0xf] %vm659_vm3, %v645_v30  ;;  %v458_v33 = vpop.f32.mrf.mxu2  ;;  %v498_v34 = vpop.f32.mrf.mxu3 }
  0xaa   :  { %663 = vst.msk [vmem:[%s1424_s3 + $0xc] sm:$0xf] %vm659_vm3, %v598_v31  ;;  %v459_v35 = vadd.f32 %v1099_v40, %v458_v33  ;;  %v499_v36 = vadd.f32 %v1099_v40, %v498_v34  ;;  %v381_v37 = vpop.f32.mrf.mxu0  ;;  %v421_v38 = vpop.f32.mrf.mxu1 }
  0xab   :  { %679 = vst.msk [vmem:[%s1424_s3 + $0x4c] sm:$0xf] %vm659_vm3, %v614_v32  ;;  %v382_v39 = vadd.f32 %v1099_v40, %v381_v37  ;;  %v422_v41 = vadd.f32 %v1099_v40, %v421_v38 }
  0xac   :  { %v566_v42 = vmax.f32 %v459_v35, 0.0  ;;  %v582_v43 = vmax.f32 %v499_v36, 0.0 }
  0xad   :  { %v535_v44 = vmax.f32 %v382_v39, 0.0  ;;  %v551_v45 = vmax.f32 %v422_v41, 0.0 }
  0xae   :  { %v630_v46 = vpack.c.bf16 %v566_v42, %v566_v42  ;;  %v646_v47 = vpack.c.bf16 %v582_v43, %v582_v43 }
  0xaf   :  { %v599_v48 = vpack.c.bf16 %v535_v44, %v535_v44  ;;  %v615_v49 = vpack.c.bf16 %v551_v45, %v551_v45 }
  0xb0   :  { %695 = vst.msk [vmem:[%s1424_s3 + $0x8c] sm:$0xf] %vm659_vm3, %v630_v46 }
  0xb1   :  { %711 = vst.msk [vmem:[%s1424_s3 + $0xcc] sm:$0xf] %vm659_vm3, %v646_v47  ;;  %v461_v50 = vpop.f32.mrf.mxu2  ;;  %v501_v51 = vpop.f32.mrf.mxu3 }
  0xb2   :  { %664 = vst.msk [vmem:[%s1424_s3 + $0x10] sm:$0xf] %vm659_vm3, %v599_v48  ;;  %v462_v52 = vadd.f32 %v1099_v40, %v461_v50  ;;  %v502_v53 = vadd.f32 %v1099_v40, %v501_v51  ;;  %v383_v54 = vpop.f32.mrf.mxu0  ;;  %v423_v55 = vpop.f32.mrf.mxu1 }
  0xb3   :  { %680 = vst.msk [vmem:[%s1424_s3 + $0x50] sm:$0xf] %vm659_vm3, %v615_v49  ;;  %v384_v56 = vadd.f32 %v1099_v40, %v383_v54  ;;  %v424_v57 = vadd.f32 %v1099_v40, %v423_v55 }
  0xb4   :  { %v567_v58 = vmax.f32 %v462_v52, 0.0  ;;  %v583_v59 = vmax.f32 %v502_v53, 0.0 }
  0xb5   :  { %v536_v60 = vmax.f32 %v384_v56, 0.0  ;;  %v552_v61 = vmax.f32 %v424_v57, 0.0 }
  0xb6   :  { %v631_v62 = vpack.c.bf16 %v567_v58, %v567_v58  ;;  %v647_v63 = vpack.c.bf16 %v583_v59, %v583_v59 }
  0xb7   :  { %v600_v0 = vpack.c.bf16 %v536_v60, %v536_v60  ;;  %v616_v1 = vpack.c.bf16 %v552_v61, %v552_v61 }
  0xb8   :  { %696 = vst.msk [vmem:[%s1424_s3 + $0x90] sm:$0xf] %vm659_vm3, %v631_v62 }
  0xb9   :  { %712 = vst.msk [vmem:[%s1424_s3 + $0xd0] sm:$0xf] %vm659_vm3, %v647_v63  ;;  %v463_v2 = vpop.f32.mrf.mxu2  ;;  %v503_v3 = vpop.f32.mrf.mxu3 }
  0xba   :  { %665 = vst.msk [vmem:[%s1424_s3 + $0x14] sm:$0xf] %vm659_vm3, %v600_v0  ;;  %v464_v4 = vadd.f32 %v1099_v40, %v463_v2  ;;  %v504_v5 = vadd.f32 %v1099_v40, %v503_v3  ;;  %v386_v6 = vpop.f32.mrf.mxu0  ;;  %v426_v7 = vpop.f32.mrf.mxu1 }
  0xbb   :  { %681 = vst.msk [vmem:[%s1424_s3 + $0x54] sm:$0xf] %vm659_vm3, %v616_v1  ;;  %v387_v8 = vadd.f32 %v1099_v40, %v386_v6  ;;  %v427_v9 = vadd.f32 %v1099_v40, %v426_v7 }
  0xbc   :  { %v568_v10 = vmax.f32 %v464_v4, 0.0  ;;  %v584_v11 = vmax.f32 %v504_v5, 0.0 }
  0xbd   :  { %v537_v12 = vmax.f32 %v387_v8, 0.0  ;;  %v553_v13 = vmax.f32 %v427_v9, 0.0 }
  0xbe   :  { %v632_v14 = vpack.c.bf16 %v568_v10, %v568_v10  ;;  %v648_v15 = vpack.c.bf16 %v584_v11, %v584_v11 }
  0xbf   :  { %v601_v16 = vpack.c.bf16 %v537_v12, %v537_v12  ;;  %v617_v17 = vpack.c.bf16 %v553_v13, %v553_v13 }
  0xc0   :  { %697 = vst.msk [vmem:[%s1424_s3 + $0x94] sm:$0xf] %vm659_vm3, %v632_v14 }
  0xc1   :  { %713 = vst.msk [vmem:[%s1424_s3 + $0xd4] sm:$0xf] %vm659_vm3, %v648_v15  ;;  %v466_v18 = vpop.f32.mrf.mxu2  ;;  %v506_v19 = vpop.f32.mrf.mxu3 }
  0xc2   :  { %666 = vst.msk [vmem:[%s1424_s3 + $0x18] sm:$0xf] %vm659_vm3, %v601_v16  ;;  %v467_v20 = vadd.f32 %v1099_v40, %v466_v18  ;;  %v507_v21 = vadd.f32 %v1099_v40, %v506_v19  ;;  %v388_v22 = vpop.f32.mrf.mxu0  ;;  %v428_v23 = vpop.f32.mrf.mxu1 }
  0xc3   :  { %682 = vst.msk [vmem:[%s1424_s3 + $0x58] sm:$0xf] %vm659_vm3, %v617_v17  ;;  %v389_v24 = vadd.f32 %v1099_v40, %v388_v22  ;;  %v429_v25 = vadd.f32 %v1099_v40, %v428_v23 }
  0xc4   :  { %v569_v26 = vmax.f32 %v467_v20, 0.0  ;;  %v585_v27 = vmax.f32 %v507_v21, 0.0 }
  0xc5   :  { %v538_v28 = vmax.f32 %v389_v24, 0.0  ;;  %v554_v29 = vmax.f32 %v429_v25, 0.0 }
  0xc6   :  { %v633_v30 = vpack.c.bf16 %v569_v26, %v569_v26  ;;  %v649_v31 = vpack.c.bf16 %v585_v27, %v585_v27 }
  0xc7   :  { %v602_v32 = vpack.c.bf16 %v538_v28, %v538_v28  ;;  %v618_v33 = vpack.c.bf16 %v554_v29, %v554_v29 }
  0xc8   :  { %698 = vst.msk [vmem:[%s1424_s3 + $0x98] sm:$0xf] %vm659_vm3, %v633_v30 }
  0xc9   :  { %714 = vst.msk [vmem:[%s1424_s3 + $0xd8] sm:$0xf] %vm659_vm3, %v649_v31  ;;  %v468_v34 = vpop.f32.mrf.mxu2  ;;  %v508_v35 = vpop.f32.mrf.mxu3 }
  0xca   :  { %667 = vst.msk [vmem:[%s1424_s3 + $0x1c] sm:$0xf] %vm659_vm3, %v602_v32  ;;  %v469_v36 = vadd.f32 %v1099_v40, %v468_v34  ;;  %v509_v37 = vadd.f32 %v1099_v40, %v508_v35  ;;  %v391_v38 = vpop.f32.mrf.mxu0  ;;  %v431_v39 = vpop.f32.mrf.mxu1 }
  0xcb   :  { %683 = vst.msk [vmem:[%s1424_s3 + $0x5c] sm:$0xf] %vm659_vm3, %v618_v33  ;;  %v392_v41 = vadd.f32 %v1099_v40, %v391_v38  ;;  %v432_v42 = vadd.f32 %v1099_v40, %v431_v39 }
  0xcc   :  { %v570_v43 = vmax.f32 %v469_v36, 0.0  ;;  %v586_v44 = vmax.f32 %v509_v37, 0.0 }
  0xcd   :  { %v539_v45 = vmax.f32 %v392_v41, 0.0  ;;  %v555_v46 = vmax.f32 %v432_v42, 0.0 }
  0xce   :  { %v634_v47 = vpack.c.bf16 %v570_v43, %v570_v43  ;;  %v650_v48 = vpack.c.bf16 %v586_v44, %v586_v44 }
  0xcf   :  { %v603_v49 = vpack.c.bf16 %v539_v45, %v539_v45  ;;  %v619_v50 = vpack.c.bf16 %v555_v46, %v555_v46 }
  0xd0   :  { %699 = vst.msk [vmem:[%s1424_s3 + $0x9c] sm:$0xf] %vm659_vm3, %v634_v47 }
  0xd1   :  { %715 = vst.msk [vmem:[%s1424_s3 + $0xdc] sm:$0xf] %vm659_vm3, %v650_v48  ;;  %v471_v51 = vpop.f32.mrf.mxu2  ;;  %v511_v52 = vpop.f32.mrf.mxu3 }
  0xd2   :  { %668 = vst.msk [vmem:[%s1424_s3 + $0x20] sm:$0xf] %vm659_vm3, %v603_v49  ;;  %v472_v53 = vadd.f32 %v1099_v40, %v471_v51  ;;  %v512_v54 = vadd.f32 %v1099_v40, %v511_v52  ;;  %v393_v55 = vpop.f32.mrf.mxu0  ;;  %v433_v56 = vpop.f32.mrf.mxu1 }
  0xd3   :  { %684 = vst.msk [vmem:[%s1424_s3 + $0x60] sm:$0xf] %vm659_vm3, %v619_v50  ;;  %v394_v57 = vadd.f32 %v1099_v40, %v393_v55  ;;  %v434_v58 = vadd.f32 %v1099_v40, %v433_v56 }
  0xd4   :  { %v571_v59 = vmax.f32 %v472_v53, 0.0  ;;  %v587_v60 = vmax.f32 %v512_v54, 0.0 }
  0xd5   :  { %v540_v61 = vmax.f32 %v394_v57, 0.0  ;;  %v556_v62 = vmax.f32 %v434_v58, 0.0 }
  0xd6   :  { %v635_v63 = vpack.c.bf16 %v571_v59, %v571_v59  ;;  %v651_v0 = vpack.c.bf16 %v587_v60, %v587_v60 }
  0xd7   :  { %v604_v1 = vpack.c.bf16 %v540_v61, %v540_v61  ;;  %v620_v2 = vpack.c.bf16 %v556_v62, %v556_v62 }
  0xd8   :  { %700 = vst.msk [vmem:[%s1424_s3 + $0xa0] sm:$0xf] %vm659_vm3, %v635_v63 }
  0xd9   :  { %716 = vst.msk [vmem:[%s1424_s3 + $0xe0] sm:$0xf] %vm659_vm3, %v651_v0  ;;  %v473_v3 = vpop.f32.mrf.mxu2  ;;  %v513_v4 = vpop.f32.mrf.mxu3 }
  0xda   :  { %669 = vst.msk [vmem:[%s1424_s3 + $0x24] sm:$0xf] %vm659_vm3, %v604_v1  ;;  %v474_v5 = vadd.f32 %v1099_v40, %v473_v3  ;;  %v514_v6 = vadd.f32 %v1099_v40, %v513_v4  ;;  %v396_v7 = vpop.f32.mrf.mxu0  ;;  %v436_v8 = vpop.f32.mrf.mxu1 }
  0xdb   :  { %685 = vst.msk [vmem:[%s1424_s3 + $0x64] sm:$0xf] %vm659_vm3, %v620_v2  ;;  %v397_v9 = vadd.f32 %v1099_v40, %v396_v7  ;;  %v437_v10 = vadd.f32 %v1099_v40, %v436_v8 }
  0xdc   :  { %v572_v11 = vmax.f32 %v474_v5, 0.0  ;;  %v588_v12 = vmax.f32 %v514_v6, 0.0 }
  0xdd   :  { %v541_v13 = vmax.f32 %v397_v9, 0.0  ;;  %v557_v14 = vmax.f32 %v437_v10, 0.0 }
  0xde   :  { %v636_v15 = vpack.c.bf16 %v572_v11, %v572_v11  ;;  %v652_v16 = vpack.c.bf16 %v588_v12, %v588_v12 }
  0xdf   :  { %v605_v17 = vpack.c.bf16 %v541_v13, %v541_v13  ;;  %v621_v18 = vpack.c.bf16 %v557_v14, %v557_v14 }
  0xe0   :  { %701 = vst.msk [vmem:[%s1424_s3 + $0xa4] sm:$0xf] %vm659_vm3, %v636_v15 }
  0xe1   :  { %717 = vst.msk [vmem:[%s1424_s3 + $0xe4] sm:$0xf] %vm659_vm3, %v652_v16  ;;  %v476_v19 = vpop.f32.mrf.mxu2  ;;  %v516_v20 = vpop.f32.mrf.mxu3 }
  0xe2   :  { %670 = vst.msk [vmem:[%s1424_s3 + $0x28] sm:$0xf] %vm659_vm3, %v605_v17  ;;  %v477_v21 = vadd.f32 %v1099_v40, %v476_v19  ;;  %v517_v22 = vadd.f32 %v1099_v40, %v516_v20  ;;  %v398_v23 = vpop.f32.mrf.mxu0  ;;  %v438_v24 = vpop.f32.mrf.mxu1 }
  0xe3   :  { %686 = vst.msk [vmem:[%s1424_s3 + $0x68] sm:$0xf] %vm659_vm3, %v621_v18  ;;  %v399_v25 = vadd.f32 %v1099_v40, %v398_v23  ;;  %v439_v26 = vadd.f32 %v1099_v40, %v438_v24 }
  0xe4   :  { %v573_v27 = vmax.f32 %v477_v21, 0.0  ;;  %v589_v28 = vmax.f32 %v517_v22, 0.0 }
  0xe5   :  { %v542_v29 = vmax.f32 %v399_v25, 0.0  ;;  %v558_v30 = vmax.f32 %v439_v26, 0.0 }
  0xe6   :  { %v637_v31 = vpack.c.bf16 %v573_v27, %v573_v27  ;;  %v653_v32 = vpack.c.bf16 %v589_v28, %v589_v28 }
  0xe7   :  { %v606_v33 = vpack.c.bf16 %v542_v29, %v542_v29  ;;  %v622_v34 = vpack.c.bf16 %v558_v30, %v558_v30 }
  0xe8   :  { %702 = vst.msk [vmem:[%s1424_s3 + $0xa8] sm:$0xf] %vm659_vm3, %v637_v31 }
  0xe9   :  { %718 = vst.msk [vmem:[%s1424_s3 + $0xe8] sm:$0xf] %vm659_vm3, %v653_v32  ;;  %v478_v35 = vpop.f32.mrf.mxu2  ;;  %v518_v36 = vpop.f32.mrf.mxu3 }
  0xea   :  { %671 = vst.msk [vmem:[%s1424_s3 + $0x2c] sm:$0xf] %vm659_vm3, %v606_v33  ;;  %v479_v37 = vadd.f32 %v1099_v40, %v478_v35  ;;  %v519_v38 = vadd.f32 %v1099_v40, %v518_v36  ;;  %v401_v39 = vpop.f32.mrf.mxu0  ;;  %v441_v41 = vpop.f32.mrf.mxu1 }
  0xeb   :  { %687 = vst.msk [vmem:[%s1424_s3 + $0x6c] sm:$0xf] %vm659_vm3, %v622_v34  ;;  %v402_v42 = vadd.f32 %v1099_v40, %v401_v39  ;;  %v442_v43 = vadd.f32 %v1099_v40, %v441_v41 }
  0xec   :  { %v574_v44 = vmax.f32 %v479_v37, 0.0  ;;  %v590_v45 = vmax.f32 %v519_v38, 0.0 }
  0xed   :  { %v543_v46 = vmax.f32 %v402_v42, 0.0  ;;  %v559_v47 = vmax.f32 %v442_v43, 0.0 }
  0xee   :  { %v638_v48 = vpack.c.bf16 %v574_v44, %v574_v44  ;;  %v654_v49 = vpack.c.bf16 %v590_v45, %v590_v45 }
  0xef   :  { %v607_v50 = vpack.c.bf16 %v543_v46, %v543_v46  ;;  %v623_v51 = vpack.c.bf16 %v559_v47, %v559_v47 }
  0xf0   :  { %703 = vst.msk [vmem:[%s1424_s3 + $0xac] sm:$0xf] %vm659_vm3, %v638_v48 }
  0xf1   :  { %719 = vst.msk [vmem:[%s1424_s3 + $0xec] sm:$0xf] %vm659_vm3, %v654_v49  ;;  %v481_v52 = vpop.f32.mrf.mxu2  ;;  %v521_v53 = vpop.f32.mrf.mxu3 }
  0xf2   :  { %672 = vst.msk [vmem:[%s1424_s3 + $0x30] sm:$0xf] %vm659_vm3, %v607_v50  ;;  %v482_v54 = vadd.f32 %v1099_v40, %v481_v52  ;;  %v522_v55 = vadd.f32 %v1099_v40, %v521_v53  ;;  %v403_v56 = vpop.f32.mrf.mxu0  ;;  %v443_v57 = vpop.f32.mrf.mxu1 }
  0xf3   :  { %688 = vst.msk [vmem:[%s1424_s3 + $0x70] sm:$0xf] %vm659_vm3, %v623_v51  ;;  %v404_v58 = vadd.f32 %v1099_v40, %v403_v56  ;;  %v444_v59 = vadd.f32 %v1099_v40, %v443_v57 }
  0xf4   :  { %v575_v60 = vmax.f32 %v482_v54, 0.0  ;;  %v591_v61 = vmax.f32 %v522_v55, 0.0 }
  0xf5   :  { %v544_v62 = vmax.f32 %v404_v58, 0.0  ;;  %v560_v63 = vmax.f32 %v444_v59, 0.0 }
  0xf6   :  { %v639_v0 = vpack.c.bf16 %v575_v60, %v575_v60  ;;  %v655_v1 = vpack.c.bf16 %v591_v61, %v591_v61 }
  0xf7   :  { %v608_v2 = vpack.c.bf16 %v544_v62, %v544_v62  ;;  %v624_v3 = vpack.c.bf16 %v560_v63, %v560_v63 }
  0xf8   :  { %704 = vst.msk [vmem:[%s1424_s3 + $0xb0] sm:$0xf] %vm659_vm3, %v639_v0 }
  0xf9   :  { %720 = vst.msk [vmem:[%s1424_s3 + $0xf0] sm:$0xf] %vm659_vm3, %v655_v1  ;;  %v483_v4 = vpop.f32.mrf.mxu2  ;;  %v523_v5 = vpop.f32.mrf.mxu3 }
  0xfa   :  { %673 = vst.msk [vmem:[%s1424_s3 + $0x34] sm:$0xf] %vm659_vm3, %v608_v2  ;;  %v484_v6 = vadd.f32 %v1099_v40, %v483_v4  ;;  %v524_v7 = vadd.f32 %v1099_v40, %v523_v5  ;;  %v406_v8 = vpop.f32.mrf.mxu0  ;;  %v446_v9 = vpop.f32.mrf.mxu1 }
  0xfb   :  { %689 = vst.msk [vmem:[%s1424_s3 + $0x74] sm:$0xf] %vm659_vm3, %v624_v3  ;;  %v407_v10 = vadd.f32 %v1099_v40, %v406_v8  ;;  %v447_v11 = vadd.f32 %v1099_v40, %v446_v9 }
  0xfc   :  { %v576_v12 = vmax.f32 %v484_v6, 0.0  ;;  %v592_v13 = vmax.f32 %v524_v7, 0.0 }
  0xfd   :  { %v545_v14 = vmax.f32 %v407_v10, 0.0  ;;  %v561_v15 = vmax.f32 %v447_v11, 0.0 }
  0xfe   :  { %v640_v16 = vpack.c.bf16 %v576_v12, %v576_v12  ;;  %v656_v17 = vpack.c.bf16 %v592_v13, %v592_v13 }
  0xff   :  { %v609_v18 = vpack.c.bf16 %v545_v14, %v545_v14  ;;  %v625_v19 = vpack.c.bf16 %v561_v15, %v561_v15 }
 0x100   :  { %705 = vst.msk [vmem:[%s1424_s3 + $0xb4] sm:$0xf] %vm659_vm3, %v640_v16 }
 0x101   :  { %721 = vst.msk [vmem:[%s1424_s3 + $0xf4] sm:$0xf] %vm659_vm3, %v656_v17  ;;  %v486_v20 = vpop.f32.mrf.mxu2  ;;  %v526_v21 = vpop.f32.mrf.mxu3 }
 0x102   :  { %674 = vst.msk [vmem:[%s1424_s3 + $0x38] sm:$0xf] %vm659_vm3, %v609_v18  ;;  %v487_v22 = vadd.f32 %v1099_v40, %v486_v20  ;;  %v527_v23 = vadd.f32 %v1099_v40, %v526_v21  ;;  %v408_v24 = vpop.f32.mrf.mxu0  ;;  %v448_v25 = vpop.f32.mrf.mxu1 }
 0x103   :  { %690 = vst.msk [vmem:[%s1424_s3 + $0x78] sm:$0xf] %vm659_vm3, %v625_v19  ;;  %v409_v26 = vadd.f32 %v1099_v40, %v408_v24  ;;  %v449_v27 = vadd.f32 %v1099_v40, %v448_v25 }
 0x104   :  { %v577_v28 = vmax.f32 %v487_v22, 0.0  ;;  %v593_v29 = vmax.f32 %v527_v23, 0.0 }
 0x105   :  { %v546_v30 = vmax.f32 %v409_v26, 0.0  ;;  %v562_v31 = vmax.f32 %v449_v27, 0.0 }
 0x106   :  { %v641_v32 = vpack.c.bf16 %v577_v28, %v577_v28  ;;  %v657_v33 = vpack.c.bf16 %v593_v29, %v593_v29 }
 0x107   :  { %v610_v34 = vpack.c.bf16 %v546_v30, %v546_v30  ;;  %v626_v35 = vpack.c.bf16 %v562_v31, %v562_v31 }
 0x108   :  { %706 = vst.msk [vmem:[%s1424_s3 + $0xb8] sm:$0xf] %vm659_vm3, %v641_v32 }
 0x109   :  { %722 = vst.msk [vmem:[%s1424_s3 + $0xf8] sm:$0xf] %vm659_vm3, %v657_v33  ;;  %v488_v36 = vpop.f32.mrf.mxu2  ;;  %v528_v37 = vpop.f32.mrf.mxu3 }
 0x10a   :  { %675 = vst.msk [vmem:[%s1424_s3 + $0x3c] sm:$0xf] %vm659_vm3, %v610_v34  ;;  %v489_v38 = vadd.f32 %v1099_v40, %v488_v36  ;;  %v529_v39 = vadd.f32 %v1099_v40, %v528_v37 }
 0x10b   :  { %691 = vst.msk [vmem:[%s1424_s3 + $0x7c] sm:$0xf] %vm659_vm3, %v626_v35 }
 0x10c   :  { %v578_v41 = vmax.f32 %v489_v38, 0.0  ;;  %v594_v42 = vmax.f32 %v529_v39, 0.0 }
 0x10e   :  { %v642_v43 = vpack.c.bf16 %v578_v41, %v578_v41  ;;  %v658_v44 = vpack.c.bf16 %v594_v42, %v594_v42 }
 0x110   :  { %707 = vst.msk [vmem:[%s1424_s3 + $0xbc] sm:$0xf] %vm659_vm3, %v642_v43 }
 0x111   :  { %723 = vst.msk [vmem:[%s1424_s3 + $0xfc] sm:$0xf] %vm659_vm3, %v658_v44 }

// kernel: _lambda_.42
= control target key start
LH: loop header
LB: loop body
LE: loop exit
PB: predicated region body
PF: predicated region fallthrough
CT: control target
= control target key end

     0   :  { %vm555_vm0 = vcmask 523264   ;;  %vm857_vm1 = vcmask 519168   ;;  %s1788_s1 = inlined_call_operand.vmem [shape: bf16[576,64], index: 1, kind: input, shape index: {}]   ;;  %s1789_s2 = inlined_call_operand.vmem [shape: f32[1,64], index: 2, kind: input, shape index: {}]   ;;  %s1790_s0 = inlined_call_operand.vmem [shape: bf16[128,576], index: 0, kind: input, shape index: {}]   ;;  %s1791_s3 = inlined_call_operand.vmem [shape: bf16[128,64], index: 3, kind: output, shape index: {}]  }
   0x1   :  { %v1237_v0 = vld [vmem:[%s1788_s1 + $0x38] sm:$0xff]  ;;  %v1236_v1 = vld [vmem:[%s1788_s1 + $0x30] sm:$0xff]  ;;  %v1235_v2 = vld [vmem:[%s1788_s1 + $0x28] sm:$0xff] }
   0x2   :  { %1266 = vmatpush.bf16.msra.mxu1 %v1237_v0  ;;  %1267 = vmatpush.bf16.msra.mxu2 %v1237_v0  ;;  %v1234_v3 = vld [vmem:[%s1788_s1 + $0x20] sm:$0xff]  ;;  %v1233_v4 = vld [vmem:[%s1788_s1 + $0x18] sm:$0xff]  ;;  %v1232_v5 = vld [vmem:[%s1788_s1 + $0x10] sm:$0xff] }
   0x3   :  { %1268 = vmatpush.bf16.msra.mxu3 %v1237_v0  ;;  %580 = vmatpush.bf16.msra.mxu0 %v1237_v0  ;;  %v1231_v6 = vld [vmem:[%s1788_s1 + $0x8] sm:$0xff]  ;;  %v1230_v7 = vld [vmem:[%s1788_s1] sm:$0xff]  ;;  %v920_v8 = vld [vmem:[%s1790_s0 + $0x50] sm:$0xf] }
   0x4   :  { %v1202_v9 = vld [vmem:[%s1790_s0 + $0x60] sm:$0xf0]  ;;  %v960_v10 = vld [vmem:[%s1790_s0 + $0xa0] sm:$0xf]  ;;  %v1212_v11 = vld [vmem:[%s1790_s0 + $0xb0] sm:$0xf0] }
   0x5   :  { %v1000_v12 = vld [vmem:[%s1790_s0 + $0xf0] sm:$0xf]  ;;  %v1222_v13 = vld [vmem:[%s1790_s0 + $0x100] sm:$0xf0]  ;;  %v880_v14 = vld [vmem:[%s1790_s0] sm:$0xf]  ;;  %v921_v18 = vor.u32 %v1202_v9, %v920_v8  ;;  %v961_v19 = vor.u32 %v1212_v11, %v960_v10 }
   0x6   :  { %1269 = vmatpush.bf16.msra.mxu1 %v1236_v1  ;;  %1270 = vmatpush.bf16.msra.mxu2 %v1236_v1  ;;  %v1192_v15 = vld [vmem:[%s1790_s0 + $0x10] sm:$0xf0]  ;;  %v1253_v16 = vld [vmem:[%s1788_s1 + $0xb8] sm:$0xff]  ;;  %v1001_v20 = vor.u32 %v1222_v13, %v1000_v12  ;;  %v1251_v28 = vld [vmem:[%s1788_s1 + $0xa8] sm:$0xff] }
   0x7   :  { %1271 = vmatpush.bf16.msra.mxu3 %v1236_v1  ;;  %581 = vmatpush.bf16.msra.mxu0 %v1236_v1  ;;  %v1245_v17 = vld [vmem:[%s1788_s1 + $0x78] sm:$0xff]  ;;  %v881_v21 = vor.u32 %v1192_v15, %v880_v14  ;;  %v1252_v24 = vld [vmem:[%s1788_s1 + $0xb0] sm:$0xff]  ;;  %v1243_v29 = vld [vmem:[%s1788_s1 + $0x68] sm:$0xff] }
   0x8   :  { %v1261_v22 = vld [vmem:[%s1788_s1 + $0xf8] sm:$0xff]  ;;  %v1244_v25 = vld [vmem:[%s1788_s1 + $0x70] sm:$0xff]  ;;  %v1259_v30 = vld [vmem:[%s1788_s1 + $0xe8] sm:$0xff] }
   0x9   :  { %v1265_v23 = vld [vmem:[%s1788_s1 + $0x118] sm:$0xff]  ;;  %v1260_v26 = vld [vmem:[%s1788_s1 + $0xf0] sm:$0xff]  ;;  %v1263_v31 = vld [vmem:[%s1788_s1 + $0x108] sm:$0xff] }
   0xa   :  { %1272 = vmatpush.bf16.msra.mxu1 %v1235_v2  ;;  %1273 = vmatpush.bf16.msra.mxu2 %v1235_v2  ;;  %v1264_v27 = vld [vmem:[%s1788_s1 + $0x110] sm:$0xff]  ;;  %v1250_v32 = vld [vmem:[%s1788_s1 + $0xa0] sm:$0xff]  ;;  %v940_v35 = vld [vmem:[%s1790_s0 + $0x78] sm:$0xf] }
   0xb   :  { %1274 = vmatpush.bf16.msra.mxu3 %v1235_v2  ;;  %582 = vmatpush.bf16.msra.mxu0 %v1235_v2  ;;  %v1242_v33 = vld [vmem:[%s1788_s1 + $0x60] sm:$0xff]  ;;  %v1207_v36 = vld [vmem:[%s1790_s0 + $0x88] sm:$0xf0]  ;;  %v980_v37 = vld [vmem:[%s1790_s0 + $0xc8] sm:$0xf] }
   0xc   :  { %v1258_v34 = vld [vmem:[%s1788_s1 + $0xe0] sm:$0xff]  ;;  %v1217_v38 = vld [vmem:[%s1790_s0 + $0xd8] sm:$0xf0]  ;;  %v1020_v39 = vld [vmem:[%s1790_s0 + $0x118] sm:$0xf]  ;;  %v941_v46 = vor.u32 %v1207_v36, %v940_v35 }
   0xd   :  { %v1227_v40 = vld [vmem:[%s1790_s0 + $0x128] sm:$0xf0]  ;;  %v900_v41 = vld [vmem:[%s1790_s0 + $0x28] sm:$0xf]  ;;  %v1197_v42 = vld [vmem:[%s1790_s0 + $0x38] sm:$0xf0]  ;;  %v981_v47 = vor.u32 %v1217_v38, %v980_v37 }
   0xe   :  { %1275 = vmatpush.bf16.msra.mxu1 %v1234_v3  ;;  %1276 = vmatpush.bf16.msra.mxu2 %v1234_v3  ;;  %v1262_v43 = vld [vmem:[%s1788_s1 + $0x100] sm:$0xff]  ;;  %v1249_v44 = vld [vmem:[%s1788_s1 + $0x98] sm:$0xff]  ;;  %v1021_v48 = vor.u32 %v1227_v40, %v1020_v39  ;;  %v901_v49 = vor.u32 %v1197_v42, %v900_v41  ;;  %v1248_v51 = vld [vmem:[%s1788_s1 + $0x90] sm:$0xff] }
   0xf   :  { %1277 = vmatpush.bf16.msra.mxu3 %v1234_v3  ;;  %583 = vmatpush.bf16.msra.mxu0 %v1234_v3  ;;  %v1241_v45 = vld [vmem:[%s1788_s1 + $0x58] sm:$0xff]  ;;  %v1240_v52 = vld [vmem:[%s1788_s1 + $0x50] sm:$0xff]  ;;  %v1247_v54 = vld [vmem:[%s1788_s1 + $0x88] sm:$0xff] }
  0x10   :  { %v1257_v50 = vld [vmem:[%s1788_s1 + $0xd8] sm:$0xff]  ;;  %v1256_v53 = vld [vmem:[%s1788_s1 + $0xd0] sm:$0xff]  ;;  %v1239_v55 = vld [vmem:[%s1788_s1 + $0x48] sm:$0xff] }
  0x11   :  { %v1255_v56 = vld [vmem:[%s1788_s1 + $0xc8] sm:$0xff]  ;;  %v1246_v57 = vld [vmem:[%s1788_s1 + $0x80] sm:$0xff]  ;;  %v882_v61 = vld [vmem:[%s1790_s0 + $0x14] sm:$0xf0] }
  0x12   :  { %1278 = vmatpush.bf16.msra.mxu1 %v1233_v4  ;;  %1279 = vmatpush.bf16.msra.mxu2 %v1233_v4  ;;  %v1238_v58 = vld [vmem:[%s1788_s1 + $0x40] sm:$0xff]  ;;  %v888_v62 = vld [vmem:[%s1790_s0 + $0x8] sm:$0xf]  ;;  %v1193_v63 = vld [vmem:[%s1790_s0 + $0x18] sm:$0xf0] }
  0x13   :  { %1280 = vmatpush.bf16.msra.mxu3 %v1233_v4  ;;  %584 = vmatpush.bf16.msra.mxu0 %v1233_v4  ;;  %v1254_v59 = vld [vmem:[%s1788_s1 + $0xc0] sm:$0xff]  ;;  %v1191_v0 = vld [vmem:[%s1790_s0 + $0xc] sm:$0xf]  ;;  %v896_v2 = vld [vmem:[%s1790_s0 + $0x10] sm:$0xf] }
  0x14   :  { %v1190_v60 = vld [vmem:[%s1790_s0 + $0x4] sm:$0xf]  ;;  %v890_v1 = vld [vmem:[%s1790_s0 + $0x1c] sm:$0xf0]  ;;  %v1195_v8 = vld [vmem:[%s1790_s0 + $0x2c] sm:$0xf] }
  0x15   :  { %v1194_v3 = vld [vmem:[%s1790_s0 + $0x20] sm:$0xf0]  ;;  %v885_v4 = vor.u32 %v1190_v60, %v882_v61  ;;  %v902_v9 = vld [vmem:[%s1790_s0 + $0x3c] sm:$0xf0]  ;;  %v908_v10 = vld [vmem:[%s1790_s0 + $0x30] sm:$0xf] }
  0x16   :  { %1281 = vmatpush.bf16.msra.mxu1 %v1232_v5  ;;  %1282 = vmatpush.bf16.msra.mxu2 %v1232_v5  ;;  %v1198_v11 = vld [vmem:[%s1790_s0 + $0x40] sm:$0xf0]  ;;  %v1196_v12 = vld [vmem:[%s1790_s0 + $0x34] sm:$0xf]  ;;  %v910_v13 = vld [vmem:[%s1790_s0 + $0x44] sm:$0xf0] }
  0x17   :  { %1283 = vmatpush.bf16.msra.mxu3 %v1232_v5  ;;  %585 = vmatpush.bf16.msra.mxu0 %v1232_v5  ;;  %v889_v5 = vor.u32 %v1193_v63, %v888_v62  ;;  %v916_v14 = vld [vmem:[%s1790_s0 + $0x38] sm:$0xf]  ;;  %v1199_v15 = vld [vmem:[%s1790_s0 + $0x48] sm:$0xf0]  ;;  %v1208_v35 = vld [vmem:[%s1790_s0 + $0x90] sm:$0xf0] }
  0x18   :  { %v1206_v36 = vld [vmem:[%s1790_s0 + $0x84] sm:$0xf]  ;;  %v950_v37 = vld [vmem:[%s1790_s0 + $0x94] sm:$0xf0]  ;;  %v956_v38 = vld [vmem:[%s1790_s0 + $0x88] sm:$0xf] }
  0x19   :  { %v1209_v39 = vld [vmem:[%s1790_s0 + $0x98] sm:$0xf0]  ;;  %v953_v42 = vor.u32 %v1206_v36, %v950_v37  ;;  %v1216_v60 = vld [vmem:[%s1790_s0 + $0xd4] sm:$0xf]  ;;  %v990_v61 = vld [vmem:[%s1790_s0 + $0xe4] sm:$0xf0] }
  0x1a   :  { %1284 = vmatpush.bf16.msra.mxu1 %v1231_v6  ;;  %1285 = vmatpush.bf16.msra.mxu2 %v1231_v6  ;;  %v996_v62 = vld [vmem:[%s1790_s0 + $0xd8] sm:$0xf]  ;;  %v1219_v63 = vld [vmem:[%s1790_s0 + $0xe8] sm:$0xf0] }
  0x1b   :  { %1286 = vmatpush.bf16.msra.mxu3 %v1231_v6  ;;  %586 = vmatpush.bf16.msra.mxu0 %v1231_v6  ;;  %v893_v6 = vor.u32 %v1191_v0, %v890_v1 }
  0x1e   :  { %1287 = vmatpush.bf16.msra.mxu1 %v1230_v7  ;;  %1288 = vmatpush.bf16.msra.mxu2 %v1230_v7 }
  0x1f   :  { %1289 = vmatpush.bf16.msra.mxu3 %v1230_v7  ;;  %587 = vmatpush.bf16.msra.mxu0 %v1230_v7  ;;  %v897_v7 = vor.u32 %v1194_v3, %v896_v2  ;;  %v993_v2 = vor.u32 %v1216_v60, %v990_v61  ;;  %v997_v3 = vor.u32 %v1219_v63, %v996_v62 }
  0x21   :  { %598 = vmatmul.bf16.vlgmr.msra.gmra.mxu1 %v921_v18  ;;  %608 = vmatmul.bf16.vlgmr.msra.gmra.mxu2 %v961_v19  ;;  %v913_v18 = vor.u32 %v1196_v12, %v910_v13  ;;  %v917_v19 = vor.u32 %v1199_v15, %v916_v14 }
  0x22   :  { %678 = vmatpush.bf16.msrb.mxu2 %v1253_v16  ;;  %629 = vmatpush.bf16.msrb.mxu1 %v1245_v17  ;;  %v905_v16 = vor.u32 %v1195_v8, %v902_v9  ;;  %v909_v17 = vor.u32 %v1198_v11, %v908_v10  ;;  %v1221_v8 = vld [vmem:[%s1790_s0 + $0xfc] sm:$0xf]  ;;  %v1010_v9 = vld [vmem:[%s1790_s0 + $0x10c] sm:$0xf0]  ;;  %v1016_v10 = vld [vmem:[%s1790_s0 + $0x100] sm:$0xf] }
  0x23   :  { %618 = vmatmul.bf16.vlgmr.msra.gmra.mxu3 %v1001_v20  ;;  %588 = vmatmul.bf16.vlgmr.msra.gmra.mxu0 %v881_v21  ;;  %v1200_v20 = vld [vmem:[%s1790_s0 + $0x54] sm:$0xf]  ;;  %v922_v21 = vld [vmem:[%s1790_s0 + $0x64] sm:$0xf0]  ;;  %v1013_v15 = vor.u32 %v1221_v8, %v1010_v9 }
  0x24   :  { %727 = vmatpush.bf16.msrb.mxu3 %v1261_v22  ;;  %780 = vmatpush.bf16.msrb.mxu0 %v1265_v23  ;;  %v928_v22 = vld [vmem:[%s1790_s0 + $0x58] sm:$0xf]  ;;  %v1203_v23 = vld [vmem:[%s1790_s0 + $0x68] sm:$0xf0]  ;;  %v1224_v11 = vld [vmem:[%s1790_s0 + $0x110] sm:$0xf0] }
  0x26   :  { %679 = vmatpush.bf16.msrb.mxu2 %v1252_v24  ;;  %630 = vmatpush.bf16.msrb.mxu1 %v1244_v25  ;;  %v1201_v24 = vld [vmem:[%s1790_s0 + $0x5c] sm:$0xf]  ;;  %v930_v25 = vld [vmem:[%s1790_s0 + $0x6c] sm:$0xf0] }
  0x28   :  { %728 = vmatpush.bf16.msrb.mxu3 %v1260_v26  ;;  %781 = vmatpush.bf16.msrb.mxu0 %v1264_v27  ;;  %v936_v26 = vld [vmem:[%s1790_s0 + $0x60] sm:$0xf]  ;;  %v1204_v27 = vld [vmem:[%s1790_s0 + $0x70] sm:$0xf0] }
  0x2a   :  { %680 = vmatpush.bf16.msrb.mxu2 %v1251_v28  ;;  %631 = vmatpush.bf16.msrb.mxu1 %v1243_v29  ;;  %v925_v28 = vor.u32 %v1200_v20, %v922_v21  ;;  %v929_v29 = vor.u32 %v1203_v23, %v928_v22 }
  0x2c   :  { %729 = vmatpush.bf16.msrb.mxu3 %v1259_v30  ;;  %782 = vmatpush.bf16.msrb.mxu0 %v1263_v31  ;;  %v933_v30 = vor.u32 %v1201_v24, %v930_v25  ;;  %v937_v31 = vor.u32 %v1204_v27, %v936_v26  ;;  %v1225_v25 = vld [vmem:[%s1790_s0 + $0x11c] sm:$0xf]  ;;  %v1022_v26 = vld [vmem:[%s1790_s0 + $0x12c] sm:$0xf0]  ;;  %v1028_v27 = vld [vmem:[%s1790_s0 + $0x120] sm:$0xf] }
  0x2d   :  { %v1025_v36 = vor.u32 %v1225_v25, %v1022_v26 }
  0x2e   :  { %681 = vmatpush.bf16.msrb.mxu2 %v1250_v32  ;;  %632 = vmatpush.bf16.msrb.mxu1 %v1242_v33  ;;  %v1205_v32 = vld [vmem:[%s1790_s0 + $0x7c] sm:$0xf]  ;;  %v942_v33 = vld [vmem:[%s1790_s0 + $0x8c] sm:$0xf0] }
  0x2f   :  { %v945_v40 = vor.u32 %v1205_v32, %v942_v33  ;;  %v1229_v32 = vld [vmem:[%s1790_s0 + $0x138] sm:$0xf0] }
  0x30   :  { %730 = vmatpush.bf16.msrb.mxu3 %v1258_v34  ;;  %783 = vmatpush.bf16.msrb.mxu0 %v1262_v43  ;;  %v948_v34 = vld [vmem:[%s1790_s0 + $0x80] sm:$0xf]  ;;  %v957_v43 = vor.u32 %v1209_v39, %v956_v38 }
  0x31   :  { %603 = vmatmul.bf16.gmra.mxu1 %v941_v46  ;;  %613 = vmatmul.bf16.gmra.mxu2 %v981_v47  ;;  %v949_v41 = vor.u32 %v1208_v35, %v948_v34  ;;  %v968_v46 = vld [vmem:[%s1790_s0 + $0xa8] sm:$0xf]  ;;  %v1213_v47 = vld [vmem:[%s1790_s0 + $0xb8] sm:$0xf0] }
  0x32   :  { %682 = vmatpush.bf16.msrb.mxu2 %v1249_v44  ;;  %633 = vmatpush.bf16.msrb.mxu1 %v1241_v45  ;;  %v1210_v44 = vld [vmem:[%s1790_s0 + $0xa4] sm:$0xf]  ;;  %v962_v45 = vld [vmem:[%s1790_s0 + $0xb4] sm:$0xf0] }
  0x33   :  { %623 = vmatmul.bf16.gmra.mxu3 %v1021_v48  ;;  %593 = vmatmul.bf16.gmra.mxu0 %v901_v49  ;;  %v1211_v48 = vld [vmem:[%s1790_s0 + $0xac] sm:$0xf]  ;;  %v970_v49 = vld [vmem:[%s1790_s0 + $0xbc] sm:$0xf0] }
  0x34   :  { %731 = vmatpush.bf16.msrb.mxu3 %v1257_v50  ;;  %v976_v50 = vld [vmem:[%s1790_s0 + $0xb0] sm:$0xf] }
  0x36   :  { %683 = vmatpush.bf16.msrb.mxu2 %v1248_v51  ;;  %634 = vmatpush.bf16.msrb.mxu1 %v1240_v52  ;;  %v1214_v51 = vld [vmem:[%s1790_s0 + $0xc0] sm:$0xf0]  ;;  %v965_v52 = vor.u32 %v1210_v44, %v962_v45 }
  0x38   :  { %732 = vmatpush.bf16.msrb.mxu3 %v1256_v53  ;;  %v969_v53 = vor.u32 %v1213_v47, %v968_v46 }
  0x3a   :  { %684 = vmatpush.bf16.msrb.mxu2 %v1247_v54  ;;  %635 = vmatpush.bf16.msrb.mxu1 %v1239_v55  ;;  %v973_v54 = vor.u32 %v1211_v48, %v970_v49  ;;  %v977_v55 = vor.u32 %v1214_v51, %v976_v50 }
  0x3c   :  { %733 = vmatpush.bf16.msrb.mxu3 %v1255_v56  ;;  %v1215_v56 = vld [vmem:[%s1790_s0 + $0xcc] sm:$0xf] }
  0x3e   :  { %685 = vmatpush.bf16.msrb.mxu2 %v1246_v57  ;;  %636 = vmatpush.bf16.msrb.mxu1 %v1238_v58  ;;  %v982_v57 = vld [vmem:[%s1790_s0 + $0xdc] sm:$0xf0]  ;;  %v988_v58 = vld [vmem:[%s1790_s0 + $0xd0] sm:$0xf] }
  0x3f   :  { %v985_v0 = vor.u32 %v1215_v56, %v982_v57 }
  0x40   :  { %734 = vmatpush.bf16.msrb.mxu3 %v1254_v59  ;;  %v1218_v59 = vld [vmem:[%s1790_s0 + $0xe0] sm:$0xf0] }
  0x41   :  { %637 = vmatmul.bf16.vlgmr.msrb.gmra.mxu1 %v885_v4  ;;  %686 = vmatmul.bf16.vlgmr.msrb.gmra.mxu2 %v889_v5  ;;  %v989_v1 = vor.u32 %v1218_v59, %v988_v58  ;;  %v1220_v4 = vld [vmem:[%s1790_s0 + $0xf4] sm:$0xf]  ;;  %v1002_v5 = vld [vmem:[%s1790_s0 + $0x104] sm:$0xf0] }
  0x42   :  { %v1005_v12 = vor.u32 %v1220_v4, %v1002_v5 }
  0x43   :  { %735 = vmatmul.bf16.vlgmr.msrb.gmra.mxu3 %v893_v6  ;;  %1182 = vmatmul.msk.bf16.vlgmr.msrb.gmra.mxu0 %vm555_vm0, %v897_v7  ;;  %v1008_v6 = vld [vmem:[%s1790_s0 + $0xf8] sm:$0xf]  ;;  %v1223_v7 = vld [vmem:[%s1790_s0 + $0x108] sm:$0xf0] }
  0x44   :  { %v1009_v13 = vor.u32 %v1223_v7, %v1008_v6 }
  0x51   :  { %642 = vmatmul.bf16.gmra.mxu1 %v905_v16  ;;  %691 = vmatmul.bf16.gmra.mxu2 %v909_v17  ;;  %v1017_v16 = vor.u32 %v1224_v11, %v1016_v10 }
  0x53   :  { %740 = vmatmul.bf16.gmra.mxu3 %v913_v18  ;;  %1183 = vmatmul.msk.bf16.gmra.mxu0 %vm555_vm0, %v917_v19  ;;  %v1647_v18 = vld [vmem:[%s1789_s2] ss:$0 sm:$0xff] }
  0x61   :  { %647 = vmatmul.bf16.gmra.mxu1 %v925_v28  ;;  %696 = vmatmul.bf16.gmra.mxu2 %v929_v29  ;;  %v1228_v28 = vld [vmem:[%s1790_s0 + $0x130] sm:$0xf0]  ;;  %v1226_v29 = vld [vmem:[%s1790_s0 + $0x124] sm:$0xf] }
  0x62   :  { %v1029_v37 = vor.u32 %v1228_v28, %v1028_v27 }
  0x63   :  { %745 = vmatmul.bf16.gmra.mxu3 %v933_v30  ;;  %1184 = vmatmul.msk.bf16.gmra.mxu0 %vm555_vm0, %v937_v31  ;;  %v1030_v30 = vld [vmem:[%s1790_s0 + $0x134] sm:$0xf0]  ;;  %v1036_v31 = vld [vmem:[%s1790_s0 + $0x128] sm:$0xf] }
  0x71   :  { %652 = vmatmul.bf16.gmra.mxu1 %v945_v40  ;;  %701 = vmatmul.bf16.gmra.mxu2 %v949_v41  ;;  %v1033_v40 = vor.u32 %v1226_v29, %v1030_v30  ;;  %v1037_v41 = vor.u32 %v1229_v32, %v1036_v31 }
  0x73   :  { %750 = vmatmul.bf16.gmra.mxu3 %v953_v42  ;;  %1185 = vmatmul.msk.bf16.gmra.mxu0 %vm555_vm0, %v957_v43 }
  0x81   :  { %657 = vmatmul.bf16.gmra.mxu1 %v965_v52  ;;  %706 = vmatmul.bf16.gmra.mxu2 %v969_v53 }
  0x83   :  { %755 = vmatmul.bf16.gmra.mxu3 %v973_v54  ;;  %1186 = vmatmul.msk.bf16.gmra.mxu0 %vm555_vm0, %v977_v55 }
  0x91   :  { %662 = vmatmul.bf16.gmra.mxu1 %v985_v0  ;;  %711 = vmatmul.bf16.gmra.mxu2 %v989_v1 }
  0x93   :  { %760 = vmatmul.bf16.gmra.mxu3 %v993_v2  ;;  %1187 = vmatmul.msk.bf16.gmra.mxu0 %vm555_vm0, %v997_v3 }
  0x9e   :  { %v1641_v14 = vpop.f32.mrf.mxu1 }
  0xa0   :  { %v589_v17 = vpop.f32.mrf.mxu0 }
  0xa1   :  { %667 = vmatmul.bf16.gmra.mxu1 %v1005_v12  ;;  %716 = vmatmul.bf16.gmra.mxu2 %v1009_v13  ;;  %v590_v55 = vadd.f32 %v1647_v18, %v589_v17 }
  0xa3   :  { %765 = vmatmul.bf16.gmra.mxu3 %v1013_v15  ;;  %1188 = vmatmul.msk.bf16.gmra.mxu0 %vm555_vm0, %v1017_v16 }
  0xa4   :  { %v609_v19 = vpop.f32.mrf.mxu2 }
  0xa5   :  { %v1650_v20 = vadd.f32 %v1647_v18, %v609_v19 }
  0xa6   :  { %v619_v21 = vpop.f32.mrf.mxu3  ;;  %v1655_v23 = vpop.f32.mrf.mxu1 }
  0xa7   :  { %v1653_v22 = vadd.f32 %v1647_v18, %v619_v21 }
  0xa8   :  { %v591_v24 = vpop.f32.mrf.mxu0 }
  0xa9   :  { %v592_v63 = vadd.f32 %v1647_v18, %v591_v24 }
  0xac   :  { %v611_v33 = vpop.f32.mrf.mxu2 }
  0xad   :  { %v1682_v34 = vadd.f32 %v1647_v18, %v611_v33 }
  0xae   :  { %v621_v35 = vpop.f32.mrf.mxu3  ;;  %v1687_v39 = vpop.f32.mrf.mxu1 }
  0xaf   :  { %v1685_v38 = vadd.f32 %v1647_v18, %v621_v35 }
  0xb0   :  { %v594_v42 = vpop.f32.mrf.mxu0 }
  0xb1   :  { %672 = vmatmul.bf16.gmra.mxu1 %v1025_v36  ;;  %721 = vmatmul.bf16.gmra.mxu2 %v1029_v37  ;;  %v595_v10 = vadd.f32 %v1647_v18, %v594_v42 }
  0xb3   :  { %770 = vmatmul.bf16.gmra.mxu3 %v1033_v40  ;;  %1189 = vmatmul.msk.bf16.gmra.mxu0 %vm555_vm0, %v1037_v41  ;;  %v600_v40 = vadd.f32 %v1647_v18, %v1641_v14 }
  0xb4   :  { %v614_v43 = vpop.f32.mrf.mxu2 }
  0xb5   :  { %v1691_v44 = vadd.f32 %v1647_v18, %v614_v43 }
  0xb6   :  { %v624_v45 = vpop.f32.mrf.mxu3  ;;  %v1696_v47 = vpop.f32.mrf.mxu1 }
  0xb7   :  { %v1694_v46 = vadd.f32 %v1647_v18, %v624_v45 }
  0xb8   :  { %v596_v48 = vpop.f32.mrf.mxu0 }
  0xb9   :  { %v597_v26 = vadd.f32 %v1647_v18, %v596_v48 }
  0xbc   :  { %v616_v49 = vpop.f32.mrf.mxu2 }
  0xbd   :  { %v1699_v50 = vadd.f32 %v1647_v18, %v616_v49 }
  0xbe   :  { %v626_v51 = vpop.f32.mrf.mxu3  ;;  %v638_v53 = vpop.f32.mrf.mxu1 }
  0xbf   :  { %v1702_v52 = vadd.f32 %v1647_v18, %v626_v51  ;;  %v639_v56 = vadd.f32 %v638_v53, %v590_v55 }
  0xc0   :  { %v785_v54 = vpop.f32.mrf.mxu0 }
  0xc4   :  { %v687_v57 = vpop.f32.mrf.mxu2 }
  0xc5   :  { %v688_v58 = vadd.f32 %v687_v57, %v639_v56  ;;  %v602_v56 = vadd.f32 %v1647_v18, %v1655_v23 }
  0xc6   :  { %v736_v59 = vpop.f32.mrf.mxu3  ;;  %v640_v60 = vpop.f32.mrf.mxu1 }
  0xc7   :  { %v737_v61 = vadd.f32 %v736_v59, %v688_v58  ;;  %v641_v2 = vadd.f32 %v640_v60, %v592_v63 }
  0xc8   :  { %v787_v62 = vpop.f32.mrf.mxu0 }
  0xc9   :  { %v786_v0 = vadd.f32 %v785_v54, %v737_v61 }
  0xcb   :  { %v825_v1 = vmax.f32 %v786_v0, 0.0 }
  0xcc   :  { %v689_v3 = vpop.f32.mrf.mxu2 }
  0xcd   :  { %v841_v4 = vpack.c.bf16 %v825_v1, %v825_v1  ;;  %v690_v5 = vadd.f32 %v689_v3, %v641_v2  ;;  %v605_v2 = vadd.f32 %v1647_v18, %v1687_v39 }
  0xce   :  { %v738_v6 = vpop.f32.mrf.mxu3  ;;  %v643_v7 = vpop.f32.mrf.mxu1 }
  0xcf   :  { %858 = vst.msk [vmem:[%s1791_s3] sm:$0xf] %vm857_vm1, %v841_v4  ;;  %v739_v8 = vadd.f32 %v738_v6, %v690_v5  ;;  %v644_v13 = vadd.f32 %v643_v7, %v595_v10 }
  0xd0   :  { %v790_v9 = vpop.f32.mrf.mxu0 }
  0xd1   :  { %v788_v11 = vadd.f32 %v787_v62, %v739_v8 }
  0xd3   :  { %v826_v12 = vmax.f32 %v788_v11, 0.0 }
  0xd4   :  { %v692_v15 = vpop.f32.mrf.mxu2 }
  0xd5   :  { %v842_v16 = vpack.c.bf16 %v826_v12, %v826_v12  ;;  %v693_v17 = vadd.f32 %v692_v15, %v644_v13  ;;  %v607_v12 = vadd.f32 %v1647_v18, %v1696_v47 }
  0xd6   :  { %v741_v19 = vpop.f32.mrf.mxu3  ;;  %v645_v21 = vpop.f32.mrf.mxu1 }
  0xd7   :  { %859 = vst.msk [vmem:[%s1791_s3 + $0x4] sm:$0xf] %vm857_vm1, %v842_v16  ;;  %v742_v24 = vadd.f32 %v741_v19, %v693_v17  ;;  %v646_v29 = vadd.f32 %v645_v21, %v597_v26 }
  0xd8   :  { %v792_v25 = vpop.f32.mrf.mxu0 }
  0xd9   :  { %v791_v27 = vadd.f32 %v790_v9, %v742_v24 }
  0xdb   :  { %v827_v28 = vmax.f32 %v791_v27, 0.0 }
  0xdc   :  { %v694_v30 = vpop.f32.mrf.mxu2 }
  0xdd   :  { %v843_v31 = vpack.c.bf16 %v827_v28, %v827_v28  ;;  %v695_v32 = vadd.f32 %v694_v30, %v646_v29 }
  0xde   :  { %v743_v33 = vpop.f32.mrf.mxu3  ;;  %v648_v35 = vpop.f32.mrf.mxu1 }
  0xdf   :  { %860 = vst.msk [vmem:[%s1791_s3 + $0x8] sm:$0xf] %vm857_vm1, %v843_v31  ;;  %v744_v36 = vadd.f32 %v743_v33, %v695_v32  ;;  %v649_v43 = vadd.f32 %v648_v35, %v600_v40 }
  0xe0   :  { %v795_v37 = vpop.f32.mrf.mxu0 }
  0xe1   :  { %v793_v41 = vadd.f32 %v792_v25, %v744_v36 }
  0xe3   :  { %v828_v42 = vmax.f32 %v793_v41, 0.0 }
  0xe4   :  { %v697_v45 = vpop.f32.mrf.mxu2 }
  0xe5   :  { %v844_v48 = vpack.c.bf16 %v828_v42, %v828_v42  ;;  %v698_v49 = vadd.f32 %v697_v45, %v649_v43 }
  0xe6   :  { %v746_v51 = vpop.f32.mrf.mxu3  ;;  %v650_v53 = vpop.f32.mrf.mxu1 }
  0xe7   :  { %861 = vst.msk [vmem:[%s1791_s3 + $0xc] sm:$0xf] %vm857_vm1, %v844_v48  ;;  %v747_v54 = vadd.f32 %v746_v51, %v698_v49  ;;  %v651_v58 = vadd.f32 %v650_v53, %v602_v56 }
  0xe8   :  { %v797_v55 = vpop.f32.mrf.mxu0 }
  0xe9   :  { %v796_v57 = vadd.f32 %v795_v37, %v747_v54 }
  0xeb   :  { %v829_v14 = vmax.f32 %v796_v57, 0.0 }
  0xec   :  { %v699_v59 = vpop.f32.mrf.mxu2 }
  0xed   :  { %v845_v60 = vpack.c.bf16 %v829_v14, %v829_v14  ;;  %v700_v61 = vadd.f32 %v699_v59, %v651_v58 }
  0xee   :  { %v748_v62 = vpop.f32.mrf.mxu3  ;;  %v653_v63 = vpop.f32.mrf.mxu1 }
  0xef   :  { %862 = vst.msk [vmem:[%s1791_s3 + $0x10] sm:$0xf] %vm857_vm1, %v845_v60  ;;  %v749_v0 = vadd.f32 %v748_v62, %v700_v61  ;;  %v654_v4 = vadd.f32 %v653_v63, %v605_v2 }
  0xf0   :  { %v800_v1 = vpop.f32.mrf.mxu0 }
  0xf1   :  { %v798_v3 = vadd.f32 %v797_v55, %v749_v0 }
  0xf3   :  { %v830_v23 = vmax.f32 %v798_v3, 0.0 }
  0xf4   :  { %v702_v5 = vpop.f32.mrf.mxu2 }
  0xf5   :  { %v846_v6 = vpack.c.bf16 %v830_v23, %v830_v23  ;;  %v703_v7 = vadd.f32 %v702_v5, %v654_v4 }
  0xf6   :  { %v751_v8 = vpop.f32.mrf.mxu3  ;;  %v655_v9 = vpop.f32.mrf.mxu1 }
  0xf7   :  { %863 = vst.msk [vmem:[%s1791_s3 + $0x14] sm:$0xf] %vm857_vm1, %v846_v6  ;;  %v752_v10 = vadd.f32 %v751_v8, %v703_v7  ;;  %v656_v15 = vadd.f32 %v655_v9, %v607_v12 }
  0xf8   :  { %v802_v11 = vpop.f32.mrf.mxu0 }
  0xf9   :  { %v801_v13 = vadd.f32 %v800_v1, %v752_v10 }
  0xfb   :  { %v831_v39 = vmax.f32 %v801_v13, 0.0 }
  0xfc   :  { %v704_v16 = vpop.f32.mrf.mxu2 }
  0xfd   :  { %v847_v17 = vpack.c.bf16 %v831_v39, %v831_v39  ;;  %v705_v19 = vadd.f32 %v704_v16, %v656_v15 }
  0xfe   :  { %v753_v21 = vpop.f32.mrf.mxu3  ;;  %v658_v24 = vpop.f32.mrf.mxu1 }
  0xff   :  { %864 = vst.msk [vmem:[%s1791_s3 + $0x18] sm:$0xf] %vm857_vm1, %v847_v17  ;;  %v754_v25 = vadd.f32 %v753_v21, %v705_v19  ;;  %v659_v29 = vadd.f32 %v658_v24, %v1650_v20 }
 0x100   :  { %v805_v26 = vpop.f32.mrf.mxu0 }
 0x101   :  { %v803_v27 = vadd.f32 %v802_v11, %v754_v25 }
 0x103   :  { %v832_v28 = vmax.f32 %v803_v27, 0.0 }
 0x104   :  { %v707_v18 = vpop.f32.mrf.mxu2 }
 0x105   :  { %v848_v47 = vpack.c.bf16 %v832_v28, %v832_v28  ;;  %v708_v30 = vadd.f32 %v707_v18, %v659_v29 }
 0x106   :  { %v756_v31 = vpop.f32.mrf.mxu3  ;;  %v660_v32 = vpop.f32.mrf.mxu1 }
 0x107   :  { %865 = vst.msk [vmem:[%s1791_s3 + $0x1c] sm:$0xf] %vm857_vm1, %v848_v47  ;;  %v757_v33 = vadd.f32 %v756_v31, %v708_v30  ;;  %v661_v40 = vadd.f32 %v660_v32, %v1682_v34 }
 0x108   :  { %v807_v35 = vpop.f32.mrf.mxu0 }
 0x109   :  { %v806_v36 = vadd.f32 %v805_v26, %v757_v33 }
 0x10b   :  { %v833_v37 = vmax.f32 %v806_v36, 0.0 }
 0x10c   :  { %v709_v41 = vpop.f32.mrf.mxu2 }
 0x10d   :  { %v849_v42 = vpack.c.bf16 %v833_v37, %v833_v37  ;;  %v710_v43 = vadd.f32 %v709_v41, %v661_v40 }
 0x10e   :  { %v758_v20 = vpop.f32.mrf.mxu3  ;;  %v663_v45 = vpop.f32.mrf.mxu1 }
 0x10f   :  { %866 = vst.msk [vmem:[%s1791_s3 + $0x20] sm:$0xf] %vm857_vm1, %v849_v42  ;;  %v759_v48 = vadd.f32 %v758_v20, %v710_v43  ;;  %v664_v54 = vadd.f32 %v663_v45, %v1691_v44 }
 0x110   :  { %v810_v49 = vpop.f32.mrf.mxu0 }
 0x111   :  { %v808_v51 = vadd.f32 %v807_v35, %v759_v48 }
 0x113   :  { %v834_v53 = vmax.f32 %v808_v51, 0.0 }
 0x114   :  { %v712_v55 = vpop.f32.mrf.mxu2 }
 0x115   :  { %v850_v56 = vpack.c.bf16 %v834_v53, %v834_v53  ;;  %v713_v57 = vadd.f32 %v712_v55, %v664_v54 }
 0x116   :  { %v761_v34 = vpop.f32.mrf.mxu3  ;;  %v665_v14 = vpop.f32.mrf.mxu1 }
 0x117   :  { %867 = vst.msk [vmem:[%s1791_s3 + $0x24] sm:$0xf] %vm857_vm1, %v850_v56  ;;  %v762_v58 = vadd.f32 %v761_v34, %v713_v57  ;;  %v666_v62 = vadd.f32 %v665_v14, %v1699_v50 }
 0x118   :  { %v812_v59 = vpop.f32.mrf.mxu0 }
 0x119   :  { %v811_v60 = vadd.f32 %v810_v49, %v762_v58 }
 0x11b   :  { %v835_v61 = vmax.f32 %v811_v60, 0.0 }
 0x11c   :  { %v714_v63 = vpop.f32.mrf.mxu2 }
 0x11d   :  { %v851_v0 = vpack.c.bf16 %v835_v61, %v835_v61  ;;  %v715_v1 = vadd.f32 %v714_v63, %v666_v62 }
 0x11e   :  { %v763_v44 = vpop.f32.mrf.mxu3  ;;  %v668_v2 = vpop.f32.mrf.mxu1 }
 0x11f   :  { %868 = vst.msk [vmem:[%s1791_s3 + $0x28] sm:$0xf] %vm857_vm1, %v851_v0  ;;  %v764_v3 = vadd.f32 %v763_v44, %v715_v1  ;;  %v669_v6 = vadd.f32 %v668_v2, %v1653_v22 }
 0x120   :  { %v815_v4 = vpop.f32.mrf.mxu0 }
 0x121   :  { %v813_v23 = vadd.f32 %v812_v59, %v764_v3 }
 0x123   :  { %v836_v5 = vmax.f32 %v813_v23, 0.0 }
 0x124   :  { %v717_v7 = vpop.f32.mrf.mxu2 }
 0x125   :  { %v852_v8 = vpack.c.bf16 %v836_v5, %v836_v5  ;;  %v718_v9 = vadd.f32 %v717_v7, %v669_v6 }
 0x126   :  { %v766_v50 = vpop.f32.mrf.mxu3  ;;  %v670_v10 = vpop.f32.mrf.mxu1 }
 0x127   :  { %869 = vst.msk [vmem:[%s1791_s3 + $0x2c] sm:$0xf] %vm857_vm1, %v852_v8  ;;  %v767_v11 = vadd.f32 %v766_v50, %v718_v9  ;;  %v671_v39 = vadd.f32 %v670_v10, %v1685_v38 }
 0x128   :  { %v817_v15 = vpop.f32.mrf.mxu0 }
 0x129   :  { %v816_v12 = vadd.f32 %v815_v4, %v767_v11 }
 0x12b   :  { %v837_v13 = vmax.f32 %v816_v12, 0.0 }
 0x12c   :  { %v719_v16 = vpop.f32.mrf.mxu2 }
 0x12d   :  { %v853_v17 = vpack.c.bf16 %v837_v13, %v837_v13  ;;  %v720_v19 = vadd.f32 %v719_v16, %v671_v39 }
 0x12e   :  { %v768_v22 = vpop.f32.mrf.mxu3  ;;  %v673_v21 = vpop.f32.mrf.mxu1 }
 0x12f   :  { %870 = vst.msk [vmem:[%s1791_s3 + $0x30] sm:$0xf] %vm857_vm1, %v853_v17  ;;  %v769_v24 = vadd.f32 %v768_v22, %v720_v19  ;;  %v674_v27 = vadd.f32 %v673_v21, %v1694_v46 }
 0x130   :  { %v820_v47 = vpop.f32.mrf.mxu0 }
 0x131   :  { %v818_v25 = vadd.f32 %v817_v15, %v769_v24 }
 0x133   :  { %v838_v26 = vmax.f32 %v818_v25, 0.0 }
 0x134   :  { %v722_v28 = vpop.f32.mrf.mxu2 }
 0x135   :  { %v854_v29 = vpack.c.bf16 %v838_v26, %v838_v26  ;;  %v723_v18 = vadd.f32 %v722_v28, %v674_v27 }
 0x136   :  { %v771_v38 = vpop.f32.mrf.mxu3  ;;  %v675_v31 = vpop.f32.mrf.mxu1 }
 0x137   :  { %871 = vst.msk [vmem:[%s1791_s3 + $0x34] sm:$0xf] %vm857_vm1, %v854_v29  ;;  %v772_v30 = vadd.f32 %v771_v38, %v723_v18  ;;  %v676_v35 = vadd.f32 %v675_v31, %v1702_v52 }
 0x138   :  { %v822_v42 = vpop.f32.mrf.mxu0 }
 0x139   :  { %v821_v32 = vadd.f32 %v820_v47, %v772_v30 }
 0x13b   :  { %v839_v33 = vmax.f32 %v821_v32, 0.0 }
 0x13c   :  { %v724_v36 = vpop.f32.mrf.mxu2 }
 0x13d   :  { %v855_v37 = vpack.c.bf16 %v839_v33, %v839_v33  ;;  %v725_v40 = vadd.f32 %v724_v36, %v676_v35 }
 0x13e   :  { %v773_v46 = vpop.f32.mrf.mxu3 }
 0x13f   :  { %872 = vst.msk [vmem:[%s1791_s3 + $0x38] sm:$0xf] %vm857_vm1, %v855_v37  ;;  %v774_v41 = vadd.f32 %v773_v46, %v725_v40 }
 0x141   :  { %v823_v43 = vadd.f32 %v822_v42, %v774_v41 }
 0x143   :  { %v840_v20 = vmax.f32 %v823_v43, 0.0 }
 0x145   :  { %v856_v45 = vpack.c.bf16 %v840_v20, %v840_v20 }
 0x147   :  { %873 = vst.msk [vmem:[%s1791_s3 + $0x3c] sm:$0xf] %vm857_vm1, %v856_v45 }

// kernel: _lambda_.43
= control target key start
LH: loop header
LB: loop body
LE: loop exit
PB: predicated region body
PF: predicated region fallthrough
CT: control target
= control target key end

     0   :  { %vm107_vm0 = vcmask 523264   ;;  %vm213_vm1 = vcmask 519168   ;;  %s464_s1 = inlined_call_operand.vmem [shape: bf16[64,64], index: 1, kind: input, shape index: {}]   ;;  %s465_s2 = inlined_call_operand.vmem [shape: f32[1,64], index: 2, kind: input, shape index: {}]   ;;  %s466_s0 = inlined_call_operand.vmem [shape: bf16[128,64], index: 0, kind: input, shape index: {}]   ;;  %s467_s3 = inlined_call_operand.vmem [shape: bf16[128,64], index: 3, kind: output, shape index: {}]  }
   0x1   :  { %v301_v0 = vld [vmem:[%s464_s1 + $0x18] sm:$0xff]  ;;  %v300_v1 = vld [vmem:[%s464_s1 + $0x10] sm:$0xff]  ;;  %v299_v2 = vld [vmem:[%s464_s1 + $0x8] sm:$0xff] }
   0x2   :  { %136 = vmatpush.bf16.msra.mxu0 %v301_v0  ;;  %302 = vmatpush.bf16.msra.mxu1 %v301_v0  ;;  %v298_v3 = vld [vmem:[%s464_s1] sm:$0xff]  ;;  %v292_v5 = vld [vmem:[%s466_s0 + $0x10] sm:$0xff]  ;;  %v291_v8 = vld [vmem:[%s466_s0 + $0x8] sm:$0xff] }
   0x3   :  { %303 = vmatpush.bf16.msra.mxu2 %v301_v0  ;;  %304 = vmatpush.bf16.msra.mxu3 %v301_v0  ;;  %v290_v4 = vld [vmem:[%s466_s0] sm:$0xff]  ;;  %v296_v7 = vld [vmem:[%s466_s0 + $0x30] sm:$0xff]  ;;  %v293_v9 = vld [vmem:[%s466_s0 + $0x18] sm:$0xff] }
   0x4   :  { %v294_v6 = vld [vmem:[%s466_s0 + $0x20] sm:$0xff]  ;;  %v295_v10 = vld [vmem:[%s466_s0 + $0x28] sm:$0xff]  ;;  %v297_v11 = vld [vmem:[%s466_s0 + $0x38] sm:$0xff] }
   0x5   :  { %v382_v12 = vld [vmem:[%s465_s2] ss:$0 sm:$0xff] }
   0x6   :  { %137 = vmatpush.bf16.msra.mxu0 %v300_v1  ;;  %305 = vmatpush.bf16.msra.mxu1 %v300_v1 }
   0x7   :  { %306 = vmatpush.bf16.msra.mxu2 %v300_v1  ;;  %307 = vmatpush.bf16.msra.mxu3 %v300_v1 }
   0xa   :  { %138 = vmatpush.bf16.msra.mxu0 %v299_v2  ;;  %308 = vmatpush.bf16.msra.mxu1 %v299_v2 }
   0xb   :  { %309 = vmatpush.bf16.msra.mxu2 %v299_v2  ;;  %310 = vmatpush.bf16.msra.mxu3 %v299_v2 }
   0xe   :  { %139 = vmatpush.bf16.msra.mxu0 %v298_v3  ;;  %311 = vmatpush.bf16.msra.mxu1 %v298_v3 }
   0xf   :  { %312 = vmatpush.bf16.msra.mxu2 %v298_v3  ;;  %313 = vmatpush.bf16.msra.mxu3 %v298_v3 }
  0x11   :  { %282 = vmatmul.msk.bf16.vlgmr.msra.gmra.mxu0 %vm107_vm0, %v290_v4  ;;  %284 = vmatmul.msk.bf16.vlgmr.msra.gmra.mxu1 %vm107_vm0, %v292_v5 }
  0x12   :  { %286 = vmatmul.msk.bf16.vlgmr.msra.gmra.mxu2 %vm107_vm0, %v294_v6  ;;  %288 = vmatmul.msk.bf16.vlgmr.msra.gmra.mxu3 %vm107_vm0, %v296_v7 }
  0x21   :  { %283 = vmatmul.msk.bf16.gmra.mxu0 %vm107_vm0, %v291_v8  ;;  %285 = vmatmul.msk.bf16.gmra.mxu1 %vm107_vm0, %v293_v9 }
  0x22   :  { %287 = vmatmul.msk.bf16.gmra.mxu2 %vm107_vm0, %v295_v10  ;;  %289 = vmatmul.msk.bf16.gmra.mxu3 %vm107_vm0, %v297_v11 }
  0x8e   :  { %v141_v13 = vpop.f32.mrf.mxu0  ;;  %v151_v14 = vpop.f32.mrf.mxu1 }
  0x8f   :  { %v142_v15 = vadd.f32 %v382_v12, %v141_v13  ;;  %v152_v16 = vadd.f32 %v382_v12, %v151_v14 }
  0x91   :  { %v181_v17 = vmax.f32 %v142_v15, 0.0  ;;  %v185_v18 = vmax.f32 %v152_v16, 0.0 }
  0x93   :  { %v197_v19 = vpack.c.bf16 %v181_v17, %v181_v17  ;;  %v201_v20 = vpack.c.bf16 %v185_v18, %v185_v18 }
  0x95   :  { %214 = vst.msk [vmem:[%s467_s3] sm:$0xf] %vm213_vm1, %v197_v19  ;;  %v161_v21 = vpop.f32.mrf.mxu2  ;;  %v171_v22 = vpop.f32.mrf.mxu3 }
  0x96   :  { %218 = vst.msk [vmem:[%s467_s3 + $0x10] sm:$0xf] %vm213_vm1, %v201_v20  ;;  %v162_v23 = vadd.f32 %v382_v12, %v161_v21  ;;  %v172_v24 = vadd.f32 %v382_v12, %v171_v22  ;;  %v143_v25 = vpop.f32.mrf.mxu0  ;;  %v153_v26 = vpop.f32.mrf.mxu1 }
  0x97   :  { %v144_v27 = vadd.f32 %v382_v12, %v143_v25  ;;  %v154_v28 = vadd.f32 %v382_v12, %v153_v26 }
  0x98   :  { %v189_v29 = vmax.f32 %v162_v23, 0.0  ;;  %v193_v30 = vmax.f32 %v172_v24, 0.0 }
  0x99   :  { %v182_v31 = vmax.f32 %v144_v27, 0.0  ;;  %v186_v32 = vmax.f32 %v154_v28, 0.0 }
  0x9a   :  { %v205_v33 = vpack.c.bf16 %v189_v29, %v189_v29  ;;  %v209_v34 = vpack.c.bf16 %v193_v30, %v193_v30 }
  0x9b   :  { %v198_v35 = vpack.c.bf16 %v182_v31, %v182_v31  ;;  %v202_v36 = vpack.c.bf16 %v186_v32, %v186_v32 }
  0x9c   :  { %222 = vst.msk [vmem:[%s467_s3 + $0x20] sm:$0xf] %vm213_vm1, %v205_v33 }
  0x9d   :  { %226 = vst.msk [vmem:[%s467_s3 + $0x30] sm:$0xf] %vm213_vm1, %v209_v34  ;;  %v163_v37 = vpop.f32.mrf.mxu2  ;;  %v173_v38 = vpop.f32.mrf.mxu3 }
  0x9e   :  { %215 = vst.msk [vmem:[%s467_s3 + $0x4] sm:$0xf] %vm213_vm1, %v198_v35  ;;  %v164_v39 = vadd.f32 %v382_v12, %v163_v37  ;;  %v174_v40 = vadd.f32 %v382_v12, %v173_v38  ;;  %v146_v41 = vpop.f32.mrf.mxu0  ;;  %v156_v42 = vpop.f32.mrf.mxu1 }
  0x9f   :  { %219 = vst.msk [vmem:[%s467_s3 + $0x14] sm:$0xf] %vm213_vm1, %v202_v36  ;;  %v147_v43 = vadd.f32 %v382_v12, %v146_v41  ;;  %v157_v44 = vadd.f32 %v382_v12, %v156_v42 }
  0xa0   :  { %v190_v45 = vmax.f32 %v164_v39, 0.0  ;;  %v194_v46 = vmax.f32 %v174_v40, 0.0 }
  0xa1   :  { %v183_v47 = vmax.f32 %v147_v43, 0.0  ;;  %v187_v48 = vmax.f32 %v157_v44, 0.0 }
  0xa2   :  { %v206_v49 = vpack.c.bf16 %v190_v45, %v190_v45  ;;  %v210_v50 = vpack.c.bf16 %v194_v46, %v194_v46 }
  0xa3   :  { %v199_v51 = vpack.c.bf16 %v183_v47, %v183_v47  ;;  %v203_v52 = vpack.c.bf16 %v187_v48, %v187_v48 }
  0xa4   :  { %223 = vst.msk [vmem:[%s467_s3 + $0x24] sm:$0xf] %vm213_vm1, %v206_v49 }
  0xa5   :  { %227 = vst.msk [vmem:[%s467_s3 + $0x34] sm:$0xf] %vm213_vm1, %v210_v50  ;;  %v166_v53 = vpop.f32.mrf.mxu2  ;;  %v176_v54 = vpop.f32.mrf.mxu3 }
  0xa6   :  { %216 = vst.msk [vmem:[%s467_s3 + $0x8] sm:$0xf] %vm213_vm1, %v199_v51  ;;  %v167_v55 = vadd.f32 %v382_v12, %v166_v53  ;;  %v177_v56 = vadd.f32 %v382_v12, %v176_v54  ;;  %v148_v57 = vpop.f32.mrf.mxu0  ;;  %v158_v58 = vpop.f32.mrf.mxu1 }
  0xa7   :  { %220 = vst.msk [vmem:[%s467_s3 + $0x18] sm:$0xf] %vm213_vm1, %v203_v52  ;;  %v149_v59 = vadd.f32 %v382_v12, %v148_v57  ;;  %v159_v60 = vadd.f32 %v382_v12, %v158_v58 }
  0xa8   :  { %v191_v61 = vmax.f32 %v167_v55, 0.0  ;;  %v195_v62 = vmax.f32 %v177_v56, 0.0 }
  0xa9   :  { %v184_v63 = vmax.f32 %v149_v59, 0.0  ;;  %v188_v0 = vmax.f32 %v159_v60, 0.0 }
  0xaa   :  { %v207_v1 = vpack.c.bf16 %v191_v61, %v191_v61  ;;  %v211_v2 = vpack.c.bf16 %v195_v62, %v195_v62 }
  0xab   :  { %v200_v3 = vpack.c.bf16 %v184_v63, %v184_v63  ;;  %v204_v4 = vpack.c.bf16 %v188_v0, %v188_v0 }
  0xac   :  { %224 = vst.msk [vmem:[%s467_s3 + $0x28] sm:$0xf] %vm213_vm1, %v207_v1 }
  0xad   :  { %228 = vst.msk [vmem:[%s467_s3 + $0x38] sm:$0xf] %vm213_vm1, %v211_v2  ;;  %v168_v5 = vpop.f32.mrf.mxu2  ;;  %v178_v6 = vpop.f32.mrf.mxu3 }
  0xae   :  { %217 = vst.msk [vmem:[%s467_s3 + $0xc] sm:$0xf] %vm213_vm1, %v200_v3  ;;  %v169_v7 = vadd.f32 %v382_v12, %v168_v5  ;;  %v179_v8 = vadd.f32 %v382_v12, %v178_v6 }
  0xaf   :  { %221 = vst.msk [vmem:[%s467_s3 + $0x1c] sm:$0xf] %vm213_vm1, %v204_v4 }
  0xb0   :  { %v192_v9 = vmax.f32 %v169_v7, 0.0  ;;  %v196_v10 = vmax.f32 %v179_v8, 0.0 }
  0xb2   :  { %v208_v11 = vpack.c.bf16 %v192_v9, %v192_v9  ;;  %v212_v13 = vpack.c.bf16 %v196_v10, %v196_v10 }
  0xb4   :  { %225 = vst.msk [vmem:[%s467_s3 + $0x2c] sm:$0xf] %vm213_vm1, %v208_v11 }
  0xb5   :  { %229 = vst.msk [vmem:[%s467_s3 + $0x3c] sm:$0xf] %vm213_vm1, %v212_v13 }

// kernel: _lambda_.45
= control target key start
LH: loop header
LB: loop body
LE: loop exit
PB: predicated region body
PF: predicated region fallthrough
CT: control target
= control target key end

     0   :  { %vm125_vm0 = vcmask 523264   ;;  %s583_s1 = inlined_call_operand.vmem [shape: bf16[64,256], index: 1, kind: input, shape index: {}]   ;;  %s584_s0 = inlined_call_operand.vmem [shape: bf16[128,64], index: 0, kind: input, shape index: {}]   ;;  %s585_s2 = inlined_call_operand.vmem [shape: f32[1,256], index: 2, kind: input, shape index: {}]   ;;  %s586_s3 = inlined_call_operand.vmem [shape: bf16[128,256], index: 3, kind: output, shape index: {}]  }
   0x1   :  { %v342_v0 = vld [vmem:[%s583_s1 + $0x30] sm:$0xf]  ;;  %v379_v1 = vld [vmem:[%s583_s1 + $0x34] sm:$0xf0]  ;;  %v378_v2 = vld [vmem:[%s583_s1 + $0x34] sm:$0xf] }
   0x2   :  { %v343_v3 = vor.u32 %v379_v1, %v342_v0  ;;  %v344_v4 = vld [vmem:[%s583_s1 + $0x38] sm:$0xf0]  ;;  %v334_v5 = vld [vmem:[%s583_s1 + $0x20] sm:$0xf]  ;;  %v377_v6 = vld [vmem:[%s583_s1 + $0x24] sm:$0xf0] }
   0x3   :  { %v347_v7 = vor.u32 %v378_v2, %v344_v4  ;;  %v376_v8 = vld [vmem:[%s583_s1 + $0x24] sm:$0xf]  ;;  %v336_v9 = vld [vmem:[%s583_s1 + $0x28] sm:$0xf0]  ;;  %v335_v10 = vor.u32 %v377_v6, %v334_v5  ;;  %v326_v12 = vld [vmem:[%s583_s1 + $0x10] sm:$0xf] }
   0x4   :  { %154 = vmatpush.bf16.msra.mxu0 %v343_v3  ;;  %380 = vmatpush.bf16.msra.mxu2 %v343_v3  ;;  %v339_v11 = vor.u32 %v376_v8, %v336_v9  ;;  %v375_v13 = vld [vmem:[%s583_s1 + $0x14] sm:$0xf0]  ;;  %v374_v14 = vld [vmem:[%s583_s1 + $0x14] sm:$0xf]  ;;  %v328_v15 = vld [vmem:[%s583_s1 + $0x18] sm:$0xf0] }
   0x5   :  { %203 = vmatpush.bf16.msra.mxu1 %v347_v7  ;;  %384 = vmatpush.bf16.msra.mxu3 %v347_v7  ;;  %v327_v16 = vor.u32 %v375_v13, %v326_v12  ;;  %v331_v17 = vor.u32 %v374_v14, %v328_v15  ;;  %v318_v18 = vld [vmem:[%s583_s1] sm:$0xf]  ;;  %v373_v19 = vld [vmem:[%s583_s1 + $0x4] sm:$0xf0]  ;;  %v372_v20 = vld [vmem:[%s583_s1 + $0x4] sm:$0xf] }
   0x6   :  { %v320_v21 = vld [vmem:[%s583_s1 + $0x8] sm:$0xf0]  ;;  %v319_v22 = vor.u32 %v373_v19, %v318_v18  ;;  %v364_v24 = vld [vmem:[%s584_s0] sm:$0xff]  ;;  %v366_v28 = vld [vmem:[%s584_s0 + $0x10] sm:$0xff] }
   0x7   :  { %v323_v23 = vor.u32 %v372_v20, %v320_v21  ;;  %v368_v25 = vld [vmem:[%s584_s0 + $0x20] sm:$0xff]  ;;  %v365_v26 = vld [vmem:[%s584_s0 + $0x8] sm:$0xff]  ;;  %v370_v29 = vld [vmem:[%s584_s0 + $0x30] sm:$0xff] }
   0x8   :  { %155 = vmatpush.bf16.msra.mxu0 %v335_v10  ;;  %381 = vmatpush.bf16.msra.mxu2 %v335_v10  ;;  %v369_v27 = vld [vmem:[%s584_s0 + $0x28] sm:$0xff]  ;;  %v367_v30 = vld [vmem:[%s584_s0 + $0x18] sm:$0xff]  ;;  %v39_v32 = vld [vmem:[%s585_s2] sm:$0x3] }
   0x9   :  { %204 = vmatpush.bf16.msra.mxu1 %v339_v11  ;;  %385 = vmatpush.bf16.msra.mxu3 %v339_v11  ;;  %v371_v31 = vld [vmem:[%s584_s0 + $0x38] sm:$0xff]  ;;  %v499_v33 = vperm.slane %v39_v32, 0  ;;  %v501_v34 = vperm.slane %v39_v32, 1 }
   0xc   :  { %156 = vmatpush.bf16.msra.mxu0 %v327_v16  ;;  %382 = vmatpush.bf16.msra.mxu2 %v327_v16 }
   0xd   :  { %205 = vmatpush.bf16.msra.mxu1 %v331_v17  ;;  %386 = vmatpush.bf16.msra.mxu3 %v331_v17 }
  0x10   :  { %157 = vmatpush.bf16.msra.mxu0 %v319_v22  ;;  %383 = vmatpush.bf16.msra.mxu2 %v319_v22 }
  0x11   :  { %206 = vmatpush.bf16.msra.mxu1 %v323_v23  ;;  %387 = vmatpush.bf16.msra.mxu3 %v323_v23 }
  0x13   :  { %348 = vmatmul.msk.bf16.vlgmr.msra.gmra.mxu0 %vm125_vm0, %v364_v24  ;;  %352 = vmatmul.msk.bf16.vlgmr.msra.gmra.mxu2 %vm125_vm0, %v368_v25 }
  0x14   :  { %356 = vmatmul.msk.bf16.vlgmr.msra.gmra.mxu1 %vm125_vm0, %v364_v24  ;;  %360 = vmatmul.msk.bf16.vlgmr.msra.gmra.mxu3 %vm125_vm0, %v368_v25 }
  0x23   :  { %349 = vmatmul.msk.bf16.gmra.mxu0 %vm125_vm0, %v365_v26  ;;  %353 = vmatmul.msk.bf16.gmra.mxu2 %vm125_vm0, %v369_v27 }
  0x24   :  { %357 = vmatmul.msk.bf16.gmra.mxu1 %vm125_vm0, %v365_v26  ;;  %361 = vmatmul.msk.bf16.gmra.mxu3 %vm125_vm0, %v369_v27 }
  0x33   :  { %350 = vmatmul.msk.bf16.gmra.mxu0 %vm125_vm0, %v366_v28  ;;  %354 = vmatmul.msk.bf16.gmra.mxu2 %vm125_vm0, %v370_v29 }
  0x34   :  { %358 = vmatmul.msk.bf16.gmra.mxu1 %vm125_vm0, %v366_v28  ;;  %362 = vmatmul.msk.bf16.gmra.mxu3 %vm125_vm0, %v370_v29 }
  0x43   :  { %351 = vmatmul.msk.bf16.gmra.mxu0 %vm125_vm0, %v367_v30  ;;  %355 = vmatmul.msk.bf16.gmra.mxu2 %vm125_vm0, %v371_v31 }
  0x44   :  { %359 = vmatmul.msk.bf16.gmra.mxu1 %vm125_vm0, %v367_v30  ;;  %363 = vmatmul.msk.bf16.gmra.mxu3 %vm125_vm0, %v371_v31 }
  0x90   :  { %v159_v35 = vpop.f32.mrf.mxu0 }
  0x91   :  { %v160_v36 = vadd.f32 %v159_v35, %v499_v33  ;;  %v208_v37 = vpop.f32.mrf.mxu1 }
  0x92   :  { %v209_v38 = vadd.f32 %v208_v37, %v501_v34 }
  0x94   :  { %v248_v39 = vpack.c.bf16 %v209_v38, %v160_v36 }
  0x96   :  { %264 = vst [vmem:[%s586_s3] sm:$0xff] %v248_v39  ;;  %v179_v40 = vpop.f32.mrf.mxu2 }
  0x97   :  { %v180_v41 = vadd.f32 %v179_v40, %v499_v33  ;;  %v228_v42 = vpop.f32.mrf.mxu3 }
  0x98   :  { %v229_v43 = vadd.f32 %v228_v42, %v501_v34  ;;  %v161_v44 = vpop.f32.mrf.mxu0 }
  0x99   :  { %v162_v45 = vadd.f32 %v161_v44, %v499_v33  ;;  %v210_v46 = vpop.f32.mrf.mxu1 }
  0x9a   :  { %v256_v47 = vpack.c.bf16 %v229_v43, %v180_v41  ;;  %v211_v48 = vadd.f32 %v210_v46, %v501_v34 }
  0x9c   :  { %272 = vst [vmem:[%s586_s3 + $0x40] sm:$0xff] %v256_v47  ;;  %v249_v49 = vpack.c.bf16 %v211_v48, %v162_v45 }
  0x9e   :  { %265 = vst [vmem:[%s586_s3 + $0x8] sm:$0xff] %v249_v49  ;;  %v181_v50 = vpop.f32.mrf.mxu2 }
  0x9f   :  { %v182_v51 = vadd.f32 %v181_v50, %v499_v33  ;;  %v230_v52 = vpop.f32.mrf.mxu3 }
  0xa0   :  { %v231_v53 = vadd.f32 %v230_v52, %v501_v34  ;;  %v164_v54 = vpop.f32.mrf.mxu0 }
  0xa1   :  { %v165_v55 = vadd.f32 %v164_v54, %v499_v33  ;;  %v213_v56 = vpop.f32.mrf.mxu1 }
  0xa2   :  { %v257_v57 = vpack.c.bf16 %v231_v53, %v182_v51  ;;  %v214_v58 = vadd.f32 %v213_v56, %v501_v34 }
  0xa4   :  { %273 = vst [vmem:[%s586_s3 + $0x48] sm:$0xff] %v257_v57  ;;  %v250_v59 = vpack.c.bf16 %v214_v58, %v165_v55 }
  0xa6   :  { %266 = vst [vmem:[%s586_s3 + $0x10] sm:$0xff] %v250_v59  ;;  %v184_v60 = vpop.f32.mrf.mxu2 }
  0xa7   :  { %v185_v61 = vadd.f32 %v184_v60, %v499_v33  ;;  %v233_v62 = vpop.f32.mrf.mxu3 }
  0xa8   :  { %v234_v63 = vadd.f32 %v233_v62, %v501_v34  ;;  %v166_v0 = vpop.f32.mrf.mxu0 }
  0xa9   :  { %v167_v1 = vadd.f32 %v166_v0, %v499_v33  ;;  %v215_v2 = vpop.f32.mrf.mxu1 }
  0xaa   :  { %v258_v3 = vpack.c.bf16 %v234_v63, %v185_v61  ;;  %v216_v4 = vadd.f32 %v215_v2, %v501_v34 }
  0xac   :  { %274 = vst [vmem:[%s586_s3 + $0x50] sm:$0xff] %v258_v3  ;;  %v251_v5 = vpack.c.bf16 %v216_v4, %v167_v1 }
  0xae   :  { %267 = vst [vmem:[%s586_s3 + $0x18] sm:$0xff] %v251_v5  ;;  %v186_v6 = vpop.f32.mrf.mxu2 }
  0xaf   :  { %v187_v7 = vadd.f32 %v186_v6, %v499_v33  ;;  %v235_v8 = vpop.f32.mrf.mxu3 }
  0xb0   :  { %v236_v9 = vadd.f32 %v235_v8, %v501_v34  ;;  %v169_v10 = vpop.f32.mrf.mxu0 }
  0xb1   :  { %v170_v11 = vadd.f32 %v169_v10, %v499_v33  ;;  %v218_v12 = vpop.f32.mrf.mxu1 }
  0xb2   :  { %v259_v13 = vpack.c.bf16 %v236_v9, %v187_v7  ;;  %v219_v14 = vadd.f32 %v218_v12, %v501_v34 }
  0xb4   :  { %275 = vst [vmem:[%s586_s3 + $0x58] sm:$0xff] %v259_v13  ;;  %v252_v15 = vpack.c.bf16 %v219_v14, %v170_v11 }
  0xb6   :  { %268 = vst [vmem:[%s586_s3 + $0x20] sm:$0xff] %v252_v15  ;;  %v189_v16 = vpop.f32.mrf.mxu2 }
  0xb7   :  { %v190_v17 = vadd.f32 %v189_v16, %v499_v33  ;;  %v238_v18 = vpop.f32.mrf.mxu3 }
  0xb8   :  { %v239_v19 = vadd.f32 %v238_v18, %v501_v34  ;;  %v171_v20 = vpop.f32.mrf.mxu0 }
  0xb9   :  { %v172_v21 = vadd.f32 %v171_v20, %v499_v33  ;;  %v220_v22 = vpop.f32.mrf.mxu1 }
  0xba   :  { %v260_v23 = vpack.c.bf16 %v239_v19, %v190_v17  ;;  %v221_v24 = vadd.f32 %v220_v22, %v501_v34 }
  0xbc   :  { %276 = vst [vmem:[%s586_s3 + $0x60] sm:$0xff] %v260_v23  ;;  %v253_v25 = vpack.c.bf16 %v221_v24, %v172_v21 }
  0xbe   :  { %269 = vst [vmem:[%s586_s3 + $0x28] sm:$0xff] %v253_v25  ;;  %v191_v26 = vpop.f32.mrf.mxu2 }
  0xbf   :  { %v192_v27 = vadd.f32 %v191_v26, %v499_v33  ;;  %v240_v28 = vpop.f32.mrf.mxu3 }
  0xc0   :  { %v241_v29 = vadd.f32 %v240_v28, %v501_v34  ;;  %v174_v30 = vpop.f32.mrf.mxu0 }
  0xc1   :  { %v175_v31 = vadd.f32 %v174_v30, %v499_v33  ;;  %v223_v32 = vpop.f32.mrf.mxu1 }
  0xc2   :  { %v261_v35 = vpack.c.bf16 %v241_v29, %v192_v27  ;;  %v224_v36 = vadd.f32 %v223_v32, %v501_v34 }
  0xc4   :  { %277 = vst [vmem:[%s586_s3 + $0x68] sm:$0xff] %v261_v35  ;;  %v254_v37 = vpack.c.bf16 %v224_v36, %v175_v31 }
  0xc6   :  { %270 = vst [vmem:[%s586_s3 + $0x30] sm:$0xff] %v254_v37  ;;  %v194_v38 = vpop.f32.mrf.mxu2 }
  0xc7   :  { %v195_v39 = vadd.f32 %v194_v38, %v499_v33  ;;  %v243_v40 = vpop.f32.mrf.mxu3 }
  0xc8   :  { %v244_v41 = vadd.f32 %v243_v40, %v501_v34  ;;  %v176_v42 = vpop.f32.mrf.mxu0 }
  0xc9   :  { %v177_v43 = vadd.f32 %v176_v42, %v499_v33  ;;  %v225_v44 = vpop.f32.mrf.mxu1 }
  0xca   :  { %v262_v45 = vpack.c.bf16 %v244_v41, %v195_v39  ;;  %v226_v46 = vadd.f32 %v225_v44, %v501_v34 }
  0xcc   :  { %278 = vst [vmem:[%s586_s3 + $0x70] sm:$0xff] %v262_v45  ;;  %v255_v47 = vpack.c.bf16 %v226_v46, %v177_v43 }
  0xce   :  { %271 = vst [vmem:[%s586_s3 + $0x38] sm:$0xff] %v255_v47  ;;  %v196_v48 = vpop.f32.mrf.mxu2 }
  0xcf   :  { %v197_v49 = vadd.f32 %v196_v48, %v499_v33  ;;  %v245_v50 = vpop.f32.mrf.mxu3 }
  0xd0   :  { %v246_v51 = vadd.f32 %v245_v50, %v501_v34 }
  0xd2   :  { %v263_v52 = vpack.c.bf16 %v246_v51, %v197_v49 }
  0xd4   :  { %279 = vst [vmem:[%s586_s3 + $0x78] sm:$0xff] %v263_v52 }

// kernel: _lambda_.46
= control target key start
LH: loop header
LB: loop body
LE: loop exit
PB: predicated region body
PF: predicated region fallthrough
CT: control target
= control target key end

     0   :  { %vm128_vm0 = vcmask 523264   ;;  %s751_s1 = inlined_call_operand.vmem [shape: bf16[64,256], index: 1, kind: input, shape index: {}]   ;;  %s752_s0 = inlined_call_operand.vmem [shape: bf16[128,64], index: 0, kind: input, shape index: {}]   ;;  %s753_s2 = inlined_call_operand.vmem [shape: f32[1,256], index: 2, kind: input, shape index: {}]   ;;  %s754_s3 = inlined_call_operand.vmem [shape: bf16[128,256], index: 3, kind: input, shape index: {}]   ;;  %s755_s4 = inlined_call_operand.vmem [shape: bf16[128,256], index: 4, kind: output, shape index: {}]  }
   0x1   :  { %v457_v0 = vld [vmem:[%s751_s1 + $0x30] sm:$0xf]  ;;  %v494_v1 = vld [vmem:[%s751_s1 + $0x34] sm:$0xf0]  ;;  %v493_v2 = vld [vmem:[%s751_s1 + $0x34] sm:$0xf] }
   0x2   :  { %v458_v3 = vor.u32 %v494_v1, %v457_v0  ;;  %v459_v4 = vld [vmem:[%s751_s1 + $0x38] sm:$0xf0]  ;;  %v449_v5 = vld [vmem:[%s751_s1 + $0x20] sm:$0xf]  ;;  %v492_v6 = vld [vmem:[%s751_s1 + $0x24] sm:$0xf0] }
   0x3   :  { %v462_v7 = vor.u32 %v493_v2, %v459_v4  ;;  %v491_v8 = vld [vmem:[%s751_s1 + $0x24] sm:$0xf]  ;;  %v451_v9 = vld [vmem:[%s751_s1 + $0x28] sm:$0xf0]  ;;  %v450_v10 = vor.u32 %v492_v6, %v449_v5  ;;  %v441_v12 = vld [vmem:[%s751_s1 + $0x10] sm:$0xf] }
   0x4   :  { %157 = vmatpush.bf16.msra.mxu0 %v458_v3  ;;  %495 = vmatpush.bf16.msra.mxu2 %v458_v3  ;;  %v454_v11 = vor.u32 %v491_v8, %v451_v9  ;;  %v490_v13 = vld [vmem:[%s751_s1 + $0x14] sm:$0xf0]  ;;  %v489_v14 = vld [vmem:[%s751_s1 + $0x14] sm:$0xf]  ;;  %v443_v15 = vld [vmem:[%s751_s1 + $0x18] sm:$0xf0] }
   0x5   :  { %206 = vmatpush.bf16.msra.mxu1 %v462_v7  ;;  %499 = vmatpush.bf16.msra.mxu3 %v462_v7  ;;  %v442_v16 = vor.u32 %v490_v13, %v441_v12  ;;  %v446_v17 = vor.u32 %v489_v14, %v443_v15  ;;  %v433_v18 = vld [vmem:[%s751_s1] sm:$0xf]  ;;  %v488_v19 = vld [vmem:[%s751_s1 + $0x4] sm:$0xf0]  ;;  %v487_v20 = vld [vmem:[%s751_s1 + $0x4] sm:$0xf] }
   0x6   :  { %v435_v21 = vld [vmem:[%s751_s1 + $0x8] sm:$0xf0]  ;;  %v434_v22 = vor.u32 %v488_v19, %v433_v18  ;;  %v479_v24 = vld [vmem:[%s752_s0] sm:$0xff]  ;;  %v481_v28 = vld [vmem:[%s752_s0 + $0x10] sm:$0xff] }
   0x7   :  { %v438_v23 = vor.u32 %v487_v20, %v435_v21  ;;  %v483_v25 = vld [vmem:[%s752_s0 + $0x20] sm:$0xff]  ;;  %v480_v26 = vld [vmem:[%s752_s0 + $0x8] sm:$0xff]  ;;  %v485_v29 = vld [vmem:[%s752_s0 + $0x30] sm:$0xff] }
   0x8   :  { %158 = vmatpush.bf16.msra.mxu0 %v450_v10  ;;  %496 = vmatpush.bf16.msra.mxu2 %v450_v10  ;;  %v484_v27 = vld [vmem:[%s752_s0 + $0x28] sm:$0xff]  ;;  %v482_v30 = vld [vmem:[%s752_s0 + $0x18] sm:$0xff]  ;;  %v42_v32 = vld [vmem:[%s753_s2] sm:$0x3] }
   0x9   :  { %207 = vmatpush.bf16.msra.mxu1 %v454_v11  ;;  %500 = vmatpush.bf16.msra.mxu3 %v454_v11  ;;  %v486_v31 = vld [vmem:[%s752_s0 + $0x38] sm:$0xff]  ;;  %v251_v33 = vld [vmem:[%s754_s3] sm:$0xff]  ;;  %v622_v34 = vperm.slane %v42_v32, 0  ;;  %v624_v35 = vperm.slane %v42_v32, 1  ;;  %v252_v45 = vld [vmem:[%s754_s3 + $0x8] sm:$0xff] }
   0xa   :  { %v267_v36 = vunpack.c.l.bf16 %v251_v33  ;;  %v268_v38 = vunpack.c.h.bf16 %v251_v33  ;;  %v259_v42 = vld [vmem:[%s754_s3 + $0x40] sm:$0xff]  ;;  %v269_v53 = vunpack.c.l.bf16 %v252_v45  ;;  %v270_v57 = vunpack.c.h.bf16 %v252_v45  ;;  %v260_v63 = vld [vmem:[%s754_s3 + $0x48] sm:$0xff]  ;;  %v253_v4 = vld [vmem:[%s754_s3 + $0x10] sm:$0xff] }
   0xb   :  { %v283_v47 = vunpack.c.l.bf16 %v259_v42  ;;  %v284_v50 = vunpack.c.h.bf16 %v259_v42  ;;  %v285_v6 = vunpack.c.l.bf16 %v260_v63  ;;  %v286_v10 = vunpack.c.h.bf16 %v260_v63 }
   0xc   :  { %159 = vmatpush.bf16.msra.mxu0 %v442_v16  ;;  %497 = vmatpush.bf16.msra.mxu2 %v442_v16  ;;  %v271_v13 = vunpack.c.l.bf16 %v253_v4 }
   0xd   :  { %208 = vmatpush.bf16.msra.mxu1 %v446_v17  ;;  %501 = vmatpush.bf16.msra.mxu3 %v446_v17  ;;  %v272_v17 = vunpack.c.h.bf16 %v253_v4 }
  0x10   :  { %160 = vmatpush.bf16.msra.mxu0 %v434_v22  ;;  %498 = vmatpush.bf16.msra.mxu2 %v434_v22 }
  0x11   :  { %209 = vmatpush.bf16.msra.mxu1 %v438_v23  ;;  %502 = vmatpush.bf16.msra.mxu3 %v438_v23  ;;  %v261_v23 = vld [vmem:[%s754_s3 + $0x50] sm:$0xff] }
  0x13   :  { %463 = vmatmul.msk.bf16.vlgmr.msra.gmra.mxu0 %vm128_vm0, %v479_v24  ;;  %467 = vmatmul.msk.bf16.vlgmr.msra.gmra.mxu2 %vm128_vm0, %v483_v25 }
  0x14   :  { %471 = vmatmul.msk.bf16.vlgmr.msra.gmra.mxu1 %vm128_vm0, %v479_v24  ;;  %475 = vmatmul.msk.bf16.vlgmr.msra.gmra.mxu3 %vm128_vm0, %v483_v25 }
  0x23   :  { %464 = vmatmul.msk.bf16.gmra.mxu0 %vm128_vm0, %v480_v26  ;;  %468 = vmatmul.msk.bf16.gmra.mxu2 %vm128_vm0, %v484_v27 }
  0x24   :  { %472 = vmatmul.msk.bf16.gmra.mxu1 %vm128_vm0, %v480_v26  ;;  %476 = vmatmul.msk.bf16.gmra.mxu3 %vm128_vm0, %v484_v27 }
  0x33   :  { %465 = vmatmul.msk.bf16.gmra.mxu0 %vm128_vm0, %v481_v28  ;;  %469 = vmatmul.msk.bf16.gmra.mxu2 %vm128_vm0, %v485_v29 }
  0x34   :  { %473 = vmatmul.msk.bf16.gmra.mxu1 %vm128_vm0, %v481_v28  ;;  %477 = vmatmul.msk.bf16.gmra.mxu3 %vm128_vm0, %v485_v29  ;;  %v254_v28 = vld [vmem:[%s754_s3 + $0x18] sm:$0xff] }
  0x43   :  { %466 = vmatmul.msk.bf16.gmra.mxu0 %vm128_vm0, %v482_v30  ;;  %470 = vmatmul.msk.bf16.gmra.mxu2 %vm128_vm0, %v486_v31 }
  0x44   :  { %474 = vmatmul.msk.bf16.gmra.mxu1 %vm128_vm0, %v482_v30  ;;  %478 = vmatmul.msk.bf16.gmra.mxu3 %vm128_vm0, %v486_v31  ;;  %v287_v30 = vunpack.c.l.bf16 %v261_v23 }
  0x90   :  { %v162_v37 = vpop.f32.mrf.mxu0 }
  0x91   :  { %v163_v39 = vadd.f32 %v162_v37, %v622_v34  ;;  %v211_v40 = vpop.f32.mrf.mxu1 }
  0x92   :  { %v212_v41 = vadd.f32 %v211_v40, %v624_v35 }
  0x93   :  { %v299_v43 = vadd.f32 %v267_v36, %v163_v39  ;;  %v288_v36 = vunpack.c.h.bf16 %v261_v23  ;;  %v273_v39 = vunpack.c.l.bf16 %v254_v28 }
  0x94   :  { %v300_v44 = vadd.f32 %v268_v38, %v212_v41 }
  0x95   :  { %v331_v46 = vmax.f32 %v299_v43, 0.0  ;;  %v274_v43 = vunpack.c.h.bf16 %v254_v28 }
  0x96   :  { %v332_v48 = vmax.f32 %v300_v44, 0.0  ;;  %v182_v49 = vpop.f32.mrf.mxu2 }
  0x97   :  { %v183_v51 = vadd.f32 %v182_v49, %v622_v34  ;;  %v231_v52 = vpop.f32.mrf.mxu3  ;;  %v262_v49 = vld [vmem:[%s754_s3 + $0x58] sm:$0xff] }
  0x98   :  { %v363_v54 = vpack.c.bf16 %v332_v48, %v331_v46  ;;  %v232_v55 = vadd.f32 %v231_v52, %v624_v35  ;;  %v164_v56 = vpop.f32.mrf.mxu0 }
  0x99   :  { %v315_v58 = vadd.f32 %v283_v47, %v183_v51  ;;  %v165_v59 = vadd.f32 %v164_v56, %v622_v34  ;;  %v213_v60 = vpop.f32.mrf.mxu1  ;;  %v289_v56 = vunpack.c.l.bf16 %v262_v49 }
  0x9a   :  { %379 = vst [vmem:[%s755_s4] sm:$0xff] %v363_v54  ;;  %v316_v61 = vadd.f32 %v284_v50, %v232_v55  ;;  %v214_v62 = vadd.f32 %v213_v60, %v624_v35  ;;  %v255_v54 = vld [vmem:[%s754_s3 + $0x20] sm:$0xff]  ;;  %v290_v60 = vunpack.c.h.bf16 %v262_v49 }
  0x9b   :  { %v347_v0 = vmax.f32 %v315_v58, 0.0  ;;  %v301_v1 = vadd.f32 %v269_v53, %v165_v59  ;;  %v275_v63 = vunpack.c.l.bf16 %v255_v54 }
  0x9c   :  { %v348_v2 = vmax.f32 %v316_v61, 0.0  ;;  %v302_v3 = vadd.f32 %v270_v57, %v214_v62 }
  0x9d   :  { %v333_v5 = vmax.f32 %v301_v1, 0.0 }
  0x9e   :  { %v371_v7 = vpack.c.bf16 %v348_v2, %v347_v0  ;;  %v334_v8 = vmax.f32 %v302_v3, 0.0  ;;  %v184_v9 = vpop.f32.mrf.mxu2  ;;  %v276_v3 = vunpack.c.h.bf16 %v255_v54 }
  0x9f   :  { %v185_v11 = vadd.f32 %v184_v9, %v622_v34  ;;  %v233_v12 = vpop.f32.mrf.mxu3  ;;  %v263_v9 = vld [vmem:[%s754_s3 + $0x60] sm:$0xff] }
  0xa0   :  { %387 = vst [vmem:[%s755_s4 + $0x40] sm:$0xff] %v371_v7  ;;  %v364_v14 = vpack.c.bf16 %v334_v8, %v333_v5  ;;  %v234_v15 = vadd.f32 %v233_v12, %v624_v35  ;;  %v167_v16 = vpop.f32.mrf.mxu0 }
  0xa1   :  { %v317_v18 = vadd.f32 %v285_v6, %v185_v11  ;;  %v168_v19 = vadd.f32 %v167_v16, %v622_v34  ;;  %v216_v20 = vpop.f32.mrf.mxu1  ;;  %v291_v16 = vunpack.c.l.bf16 %v263_v9 }
  0xa2   :  { %380 = vst [vmem:[%s755_s4 + $0x8] sm:$0xff] %v364_v14  ;;  %v318_v21 = vadd.f32 %v286_v10, %v234_v15  ;;  %v217_v22 = vadd.f32 %v216_v20, %v624_v35  ;;  %v256_v14 = vld [vmem:[%s754_s3 + $0x28] sm:$0xff]  ;;  %v292_v20 = vunpack.c.h.bf16 %v263_v9 }
  0xa3   :  { %v349_v24 = vmax.f32 %v317_v18, 0.0  ;;  %v303_v25 = vadd.f32 %v271_v13, %v168_v19  ;;  %v277_v23 = vunpack.c.l.bf16 %v256_v14 }
  0xa4   :  { %v350_v26 = vmax.f32 %v318_v21, 0.0  ;;  %v304_v27 = vadd.f32 %v272_v17, %v217_v22 }
  0xa5   :  { %v335_v29 = vmax.f32 %v303_v25, 0.0 }
  0xa6   :  { %v372_v31 = vpack.c.bf16 %v350_v26, %v349_v24  ;;  %v336_v32 = vmax.f32 %v304_v27, 0.0  ;;  %v187_v33 = vpop.f32.mrf.mxu2  ;;  %v278_v27 = vunpack.c.h.bf16 %v256_v14 }
  0xa7   :  { %v188_v37 = vadd.f32 %v187_v33, %v622_v34  ;;  %v236_v38 = vpop.f32.mrf.mxu3  ;;  %v264_v33 = vld [vmem:[%s754_s3 + $0x68] sm:$0xff] }
  0xa8   :  { %388 = vst [vmem:[%s755_s4 + $0x48] sm:$0xff] %v372_v31  ;;  %v365_v40 = vpack.c.bf16 %v336_v32, %v335_v29  ;;  %v237_v41 = vadd.f32 %v236_v38, %v624_v35  ;;  %v169_v42 = vpop.f32.mrf.mxu0 }
  0xa9   :  { %v319_v44 = vadd.f32 %v287_v30, %v188_v37  ;;  %v170_v45 = vadd.f32 %v169_v42, %v622_v34  ;;  %v218_v46 = vpop.f32.mrf.mxu1  ;;  %v293_v42 = vunpack.c.l.bf16 %v264_v33 }
  0xaa   :  { %381 = vst [vmem:[%s755_s4 + $0x10] sm:$0xff] %v365_v40  ;;  %v320_v47 = vadd.f32 %v288_v36, %v237_v41  ;;  %v219_v48 = vadd.f32 %v218_v46, %v624_v35  ;;  %v257_v40 = vld [vmem:[%s754_s3 + $0x30] sm:$0xff]  ;;  %v294_v46 = vunpack.c.h.bf16 %v264_v33 }
  0xab   :  { %v351_v50 = vmax.f32 %v319_v44, 0.0  ;;  %v305_v51 = vadd.f32 %v273_v39, %v170_v45  ;;  %v279_v49 = vunpack.c.l.bf16 %v257_v40 }
  0xac   :  { %v352_v52 = vmax.f32 %v320_v47, 0.0  ;;  %v306_v53 = vadd.f32 %v274_v43, %v219_v48 }
  0xad   :  { %v337_v55 = vmax.f32 %v305_v51, 0.0 }
  0xae   :  { %v373_v57 = vpack.c.bf16 %v352_v52, %v351_v50  ;;  %v338_v58 = vmax.f32 %v306_v53, 0.0  ;;  %v189_v59 = vpop.f32.mrf.mxu2  ;;  %v280_v53 = vunpack.c.h.bf16 %v257_v40 }
  0xaf   :  { %v190_v61 = vadd.f32 %v189_v59, %v622_v34  ;;  %v238_v62 = vpop.f32.mrf.mxu3  ;;  %v265_v59 = vld [vmem:[%s754_s3 + $0x70] sm:$0xff] }
  0xb0   :  { %389 = vst [vmem:[%s755_s4 + $0x50] sm:$0xff] %v373_v57  ;;  %v366_v0 = vpack.c.bf16 %v338_v58, %v337_v55  ;;  %v239_v1 = vadd.f32 %v238_v62, %v624_v35  ;;  %v172_v2 = vpop.f32.mrf.mxu0 }
  0xb1   :  { %v321_v4 = vadd.f32 %v289_v56, %v190_v61  ;;  %v173_v5 = vadd.f32 %v172_v2, %v622_v34  ;;  %v221_v6 = vpop.f32.mrf.mxu1  ;;  %v295_v2 = vunpack.c.l.bf16 %v265_v59 }
  0xb2   :  { %382 = vst [vmem:[%s755_s4 + $0x18] sm:$0xff] %v366_v0  ;;  %v322_v7 = vadd.f32 %v290_v60, %v239_v1  ;;  %v222_v8 = vadd.f32 %v221_v6, %v624_v35  ;;  %v258_v0 = vld [vmem:[%s754_s3 + $0x38] sm:$0xff]  ;;  %v296_v6 = vunpack.c.h.bf16 %v265_v59 }
  0xb3   :  { %v353_v10 = vmax.f32 %v321_v4, 0.0  ;;  %v307_v11 = vadd.f32 %v275_v63, %v173_v5  ;;  %v281_v9 = vunpack.c.l.bf16 %v258_v0 }
  0xb4   :  { %v354_v12 = vmax.f32 %v322_v7, 0.0  ;;  %v308_v13 = vadd.f32 %v276_v3, %v222_v8 }
  0xb5   :  { %v339_v15 = vmax.f32 %v307_v11, 0.0 }
  0xb6   :  { %v374_v17 = vpack.c.bf16 %v354_v12, %v353_v10  ;;  %v340_v18 = vmax.f32 %v308_v13, 0.0  ;;  %v192_v19 = vpop.f32.mrf.mxu2  ;;  %v282_v13 = vunpack.c.h.bf16 %v258_v0 }
  0xb7   :  { %v193_v21 = vadd.f32 %v192_v19, %v622_v34  ;;  %v241_v22 = vpop.f32.mrf.mxu3  ;;  %v266_v19 = vld [vmem:[%s754_s3 + $0x78] sm:$0xff] }
  0xb8   :  { %390 = vst [vmem:[%s755_s4 + $0x58] sm:$0xff] %v374_v17  ;;  %v367_v24 = vpack.c.bf16 %v340_v18, %v339_v15  ;;  %v242_v25 = vadd.f32 %v241_v22, %v624_v35  ;;  %v174_v26 = vpop.f32.mrf.mxu0 }
  0xb9   :  { %v323_v28 = vadd.f32 %v291_v16, %v193_v21  ;;  %v175_v29 = vadd.f32 %v174_v26, %v622_v34  ;;  %v223_v30 = vpop.f32.mrf.mxu1 }
  0xba   :  { %383 = vst [vmem:[%s755_s4 + $0x20] sm:$0xff] %v367_v24  ;;  %v324_v31 = vadd.f32 %v292_v20, %v242_v25  ;;  %v224_v32 = vadd.f32 %v223_v30, %v624_v35  ;;  %v297_v25 = vunpack.c.l.bf16 %v266_v19 }
  0xbb   :  { %v355_v36 = vmax.f32 %v323_v28, 0.0  ;;  %v309_v37 = vadd.f32 %v277_v23, %v175_v29  ;;  %v298_v29 = vunpack.c.h.bf16 %v266_v19 }
  0xbc   :  { %v356_v38 = vmax.f32 %v324_v31, 0.0  ;;  %v310_v39 = vadd.f32 %v278_v27, %v224_v32 }
  0xbd   :  { %v341_v41 = vmax.f32 %v309_v37, 0.0 }
  0xbe   :  { %v375_v43 = vpack.c.bf16 %v356_v38, %v355_v36  ;;  %v342_v44 = vmax.f32 %v310_v39, 0.0  ;;  %v194_v45 = vpop.f32.mrf.mxu2 }
  0xbf   :  { %v195_v47 = vadd.f32 %v194_v45, %v622_v34  ;;  %v243_v48 = vpop.f32.mrf.mxu3 }
  0xc0   :  { %391 = vst [vmem:[%s755_s4 + $0x60] sm:$0xff] %v375_v43  ;;  %v368_v50 = vpack.c.bf16 %v342_v44, %v341_v41  ;;  %v244_v51 = vadd.f32 %v243_v48, %v624_v35  ;;  %v177_v52 = vpop.f32.mrf.mxu0 }
  0xc1   :  { %v325_v54 = vadd.f32 %v293_v42, %v195_v47  ;;  %v178_v55 = vadd.f32 %v177_v52, %v622_v34  ;;  %v226_v56 = vpop.f32.mrf.mxu1 }
  0xc2   :  { %384 = vst [vmem:[%s755_s4 + $0x28] sm:$0xff] %v368_v50  ;;  %v326_v57 = vadd.f32 %v294_v46, %v244_v51  ;;  %v227_v58 = vadd.f32 %v226_v56, %v624_v35 }
  0xc3   :  { %v357_v60 = vmax.f32 %v325_v54, 0.0  ;;  %v311_v61 = vadd.f32 %v279_v49, %v178_v55 }
  0xc4   :  { %v358_v62 = vmax.f32 %v326_v57, 0.0  ;;  %v312_v63 = vadd.f32 %v280_v53, %v227_v58 }
  0xc5   :  { %v343_v1 = vmax.f32 %v311_v61, 0.0 }
  0xc6   :  { %v376_v3 = vpack.c.bf16 %v358_v62, %v357_v60  ;;  %v344_v4 = vmax.f32 %v312_v63, 0.0  ;;  %v197_v5 = vpop.f32.mrf.mxu2 }
  0xc7   :  { %v198_v7 = vadd.f32 %v197_v5, %v622_v34  ;;  %v246_v8 = vpop.f32.mrf.mxu3 }
  0xc8   :  { %392 = vst [vmem:[%s755_s4 + $0x68] sm:$0xff] %v376_v3  ;;  %v369_v10 = vpack.c.bf16 %v344_v4, %v343_v1  ;;  %v247_v11 = vadd.f32 %v246_v8, %v624_v35  ;;  %v179_v12 = vpop.f32.mrf.mxu0 }
  0xc9   :  { %v327_v14 = vadd.f32 %v295_v2, %v198_v7  ;;  %v180_v15 = vadd.f32 %v179_v12, %v622_v34  ;;  %v228_v16 = vpop.f32.mrf.mxu1 }
  0xca   :  { %385 = vst [vmem:[%s755_s4 + $0x30] sm:$0xff] %v369_v10  ;;  %v328_v17 = vadd.f32 %v296_v6, %v247_v11  ;;  %v229_v18 = vadd.f32 %v228_v16, %v624_v35 }
  0xcb   :  { %v359_v20 = vmax.f32 %v327_v14, 0.0  ;;  %v313_v21 = vadd.f32 %v281_v9, %v180_v15 }
  0xcc   :  { %v360_v22 = vmax.f32 %v328_v17, 0.0  ;;  %v314_v23 = vadd.f32 %v282_v13, %v229_v18 }
  0xcd   :  { %v345_v24 = vmax.f32 %v313_v21, 0.0 }
  0xce   :  { %v377_v26 = vpack.c.bf16 %v360_v22, %v359_v20  ;;  %v346_v27 = vmax.f32 %v314_v23, 0.0  ;;  %v199_v28 = vpop.f32.mrf.mxu2 }
  0xcf   :  { %v200_v30 = vadd.f32 %v199_v28, %v622_v34  ;;  %v248_v31 = vpop.f32.mrf.mxu3 }
  0xd0   :  { %393 = vst [vmem:[%s755_s4 + $0x70] sm:$0xff] %v377_v26  ;;  %v370_v32 = vpack.c.bf16 %v346_v27, %v345_v24  ;;  %v249_v33 = vadd.f32 %v248_v31, %v624_v35 }
  0xd1   :  { %v329_v36 = vadd.f32 %v297_v25, %v200_v30 }
  0xd2   :  { %386 = vst [vmem:[%s755_s4 + $0x38] sm:$0xff] %v370_v32  ;;  %v330_v37 = vadd.f32 %v298_v29, %v249_v33 }
  0xd3   :  { %v361_v38 = vmax.f32 %v329_v36, 0.0 }
  0xd4   :  { %v362_v39 = vmax.f32 %v330_v37, 0.0 }
  0xd6   :  { %v378_v40 = vpack.c.bf16 %v362_v39, %v361_v38 }
  0xd8   :  { %394 = vst [vmem:[%s755_s4 + $0x78] sm:$0xff] %v378_v40 }

// kernel: _lambda_.47
= control target key start
LH: loop header
LB: loop body
LE: loop exit
PB: predicated region body
PF: predicated region fallthrough
CT: control target
= control target key end

     0   :  { %vm372_vm0 = vcmask 519168   ;;  %s819_s1 = inlined_call_operand.vmem [shape: bf16[256,64], index: 1, kind: input, shape index: {}]   ;;  %s820_s2 = inlined_call_operand.vmem [shape: f32[1,64], index: 2, kind: input, shape index: {}]   ;;  %s821_s0 = inlined_call_operand.vmem [shape: bf16[128,256], index: 0, kind: input, shape index: {}]   ;;  %s822_s3 = inlined_call_operand.vmem [shape: bf16[128,64], index: 3, kind: output, shape index: {}]  }
   0x1   :  { %v544_v0 = vld [vmem:[%s819_s1 + $0x38] sm:$0xff]  ;;  %v543_v2 = vld [vmem:[%s819_s1 + $0x30] sm:$0xff]  ;;  %v542_v4 = vld [vmem:[%s819_s1 + $0x28] sm:$0xff] }
   0x2   :  { %v552_v1 = vld [vmem:[%s819_s1 + $0x78] sm:$0xff]  ;;  %242 = vmatpush.bf16.msra.mxu0 %v544_v0  ;;  %553 = vmatpush.bf16.msra.mxu2 %v544_v0  ;;  %v551_v3 = vld [vmem:[%s819_s1 + $0x70] sm:$0xff]  ;;  %v550_v5 = vld [vmem:[%s819_s1 + $0x68] sm:$0xff] }
   0x3   :  { %291 = vmatpush.bf16.msra.mxu1 %v552_v1  ;;  %561 = vmatpush.bf16.msra.mxu3 %v552_v1  ;;  %v541_v6 = vld [vmem:[%s819_s1 + $0x20] sm:$0xff]  ;;  %v540_v8 = vld [vmem:[%s819_s1 + $0x18] sm:$0xff]  ;;  %v539_v10 = vld [vmem:[%s819_s1 + $0x10] sm:$0xff] }
   0x4   :  { %v549_v7 = vld [vmem:[%s819_s1 + $0x60] sm:$0xff]  ;;  %v548_v9 = vld [vmem:[%s819_s1 + $0x58] sm:$0xff]  ;;  %v547_v11 = vld [vmem:[%s819_s1 + $0x50] sm:$0xff] }
   0x5   :  { %v538_v12 = vld [vmem:[%s819_s1 + $0x8] sm:$0xff]  ;;  %v537_v14 = vld [vmem:[%s819_s1] sm:$0xff]  ;;  %v403_v28 = vld [vmem:[%s821_s0 + $0x10] sm:$0xf] }
   0x6   :  { %243 = vmatpush.bf16.msra.mxu0 %v543_v2  ;;  %554 = vmatpush.bf16.msra.mxu2 %v543_v2  ;;  %v546_v13 = vld [vmem:[%s819_s1 + $0x48] sm:$0xff]  ;;  %v545_v15 = vld [vmem:[%s819_s1 + $0x40] sm:$0xff]  ;;  %v524_v29 = vld [vmem:[%s821_s0 + $0x14] sm:$0xf0] }
   0x7   :  { %292 = vmatpush.bf16.msra.mxu1 %v551_v3  ;;  %562 = vmatpush.bf16.msra.mxu3 %v551_v3  ;;  %v395_v16 = vld [vmem:[%s821_s0] sm:$0xf]  ;;  %v522_v17 = vld [vmem:[%s821_s0 + $0x4] sm:$0xf0]  ;;  %v521_v20 = vld [vmem:[%s821_s0 + $0x4] sm:$0xf]  ;;  %v404_v36 = vor.u32 %v524_v29, %v403_v28 }
   0x8   :  { %v427_v18 = vld [vmem:[%s821_s0 + $0x40] sm:$0xf]  ;;  %v530_v19 = vld [vmem:[%s821_s0 + $0x44] sm:$0xf0]  ;;  %v397_v21 = vld [vmem:[%s821_s0 + $0x8] sm:$0xf0]  ;;  %v396_v24 = vor.u32 %v522_v17, %v395_v16 }
   0x9   :  { %v529_v22 = vld [vmem:[%s821_s0 + $0x44] sm:$0xf]  ;;  %v429_v23 = vld [vmem:[%s821_s0 + $0x48] sm:$0xf0]  ;;  %v428_v25 = vor.u32 %v530_v19, %v427_v18  ;;  %v400_v26 = vor.u32 %v521_v20, %v397_v21  ;;  %v435_v30 = vld [vmem:[%s821_s0 + $0x50] sm:$0xf] }
   0xa   :  { %244 = vmatpush.bf16.msra.mxu0 %v542_v4  ;;  %555 = vmatpush.bf16.msra.mxu2 %v542_v4  ;;  %v432_v27 = vor.u32 %v529_v22, %v429_v23  ;;  %v532_v31 = vld [vmem:[%s821_s0 + $0x54] sm:$0xf0]  ;;  %v523_v32 = vld [vmem:[%s821_s0 + $0x14] sm:$0xf]  ;;  %v405_v33 = vld [vmem:[%s821_s0 + $0x18] sm:$0xf0] }
   0xb   :  { %293 = vmatpush.bf16.msra.mxu1 %v550_v5  ;;  %563 = vmatpush.bf16.msra.mxu3 %v550_v5  ;;  %v531_v34 = vld [vmem:[%s821_s0 + $0x54] sm:$0xf]  ;;  %v437_v35 = vld [vmem:[%s821_s0 + $0x58] sm:$0xf0]  ;;  %v436_v37 = vor.u32 %v532_v31, %v435_v30  ;;  %v408_v38 = vor.u32 %v523_v32, %v405_v33  ;;  %v411_v40 = vld [vmem:[%s821_s0 + $0x20] sm:$0xf] }
   0xc   :  { %v440_v39 = vor.u32 %v531_v34, %v437_v35  ;;  %v526_v41 = vld [vmem:[%s821_s0 + $0x24] sm:$0xf0]  ;;  %v443_v42 = vld [vmem:[%s821_s0 + $0x60] sm:$0xf]  ;;  %v525_v44 = vld [vmem:[%s821_s0 + $0x24] sm:$0xf] }
   0xd   :  { %v534_v43 = vld [vmem:[%s821_s0 + $0x64] sm:$0xf0]  ;;  %v413_v45 = vld [vmem:[%s821_s0 + $0x28] sm:$0xf0]  ;;  %v533_v46 = vld [vmem:[%s821_s0 + $0x64] sm:$0xf]  ;;  %v412_v48 = vor.u32 %v526_v41, %v411_v40 }
   0xe   :  { %245 = vmatpush.bf16.msra.mxu0 %v541_v6  ;;  %556 = vmatpush.bf16.msra.mxu2 %v541_v6  ;;  %v445_v47 = vld [vmem:[%s821_s0 + $0x68] sm:$0xf0]  ;;  %v444_v49 = vor.u32 %v534_v43, %v443_v42  ;;  %v416_v50 = vor.u32 %v525_v44, %v413_v45  ;;  %v419_v52 = vld [vmem:[%s821_s0 + $0x30] sm:$0xf]  ;;  %v528_v53 = vld [vmem:[%s821_s0 + $0x34] sm:$0xf0] }
   0xf   :  { %294 = vmatpush.bf16.msra.mxu1 %v549_v7  ;;  %564 = vmatpush.bf16.msra.mxu3 %v549_v7  ;;  %v448_v51 = vor.u32 %v533_v46, %v445_v47  ;;  %v451_v54 = vld [vmem:[%s821_s0 + $0x70] sm:$0xf]  ;;  %v536_v55 = vld [vmem:[%s821_s0 + $0x74] sm:$0xf0]  ;;  %v527_v56 = vld [vmem:[%s821_s0 + $0x34] sm:$0xf]  ;;  %v420_v60 = vor.u32 %v528_v53, %v419_v52 }
  0x10   :  { %v421_v57 = vld [vmem:[%s821_s0 + $0x38] sm:$0xf0]  ;;  %v535_v58 = vld [vmem:[%s821_s0 + $0x74] sm:$0xf]  ;;  %v452_v61 = vor.u32 %v536_v55, %v451_v54  ;;  %v737_v0 = vld [vmem:[%s820_s2] ss:$0 sm:$0xff] }
  0x11   :  { %v453_v59 = vld [vmem:[%s821_s0 + $0x78] sm:$0xf0]  ;;  %v424_v62 = vor.u32 %v527_v56, %v421_v57 }
  0x12   :  { %246 = vmatpush.bf16.msra.mxu0 %v540_v8  ;;  %557 = vmatpush.bf16.msra.mxu2 %v540_v8  ;;  %v456_v63 = vor.u32 %v535_v58, %v453_v59 }
  0x13   :  { %295 = vmatpush.bf16.msra.mxu1 %v548_v9  ;;  %565 = vmatpush.bf16.msra.mxu3 %v548_v9 }
  0x16   :  { %247 = vmatpush.bf16.msra.mxu0 %v539_v10  ;;  %558 = vmatpush.bf16.msra.mxu2 %v539_v10 }
  0x17   :  { %296 = vmatpush.bf16.msra.mxu1 %v547_v11  ;;  %566 = vmatpush.bf16.msra.mxu3 %v547_v11 }
  0x1a   :  { %248 = vmatpush.bf16.msra.mxu0 %v538_v12  ;;  %559 = vmatpush.bf16.msra.mxu2 %v538_v12 }
  0x1b   :  { %297 = vmatpush.bf16.msra.mxu1 %v546_v13  ;;  %567 = vmatpush.bf16.msra.mxu3 %v546_v13 }
  0x1e   :  { %249 = vmatpush.bf16.msra.mxu0 %v537_v14  ;;  %560 = vmatpush.bf16.msra.mxu2 %v537_v14 }
  0x1f   :  { %298 = vmatpush.bf16.msra.mxu1 %v545_v15  ;;  %568 = vmatpush.bf16.msra.mxu3 %v545_v15 }
  0x21   :  { %250 = vmatmul.bf16.vlgmr.msra.gmra.mxu0 %v396_v24  ;;  %270 = vmatmul.bf16.vlgmr.msra.gmra.mxu2 %v428_v25 }
  0x22   :  { %299 = vmatmul.bf16.vlgmr.msra.gmra.mxu1 %v400_v26  ;;  %319 = vmatmul.bf16.vlgmr.msra.gmra.mxu3 %v432_v27 }
  0x31   :  { %255 = vmatmul.bf16.gmra.mxu0 %v404_v36  ;;  %275 = vmatmul.bf16.gmra.mxu2 %v436_v37 }
  0x32   :  { %304 = vmatmul.bf16.gmra.mxu1 %v408_v38  ;;  %324 = vmatmul.bf16.gmra.mxu3 %v440_v39 }
  0x41   :  { %260 = vmatmul.bf16.gmra.mxu0 %v412_v48  ;;  %280 = vmatmul.bf16.gmra.mxu2 %v444_v49 }
  0x42   :  { %309 = vmatmul.bf16.gmra.mxu1 %v416_v50  ;;  %329 = vmatmul.bf16.gmra.mxu3 %v448_v51 }
  0x51   :  { %265 = vmatmul.bf16.gmra.mxu0 %v420_v60  ;;  %285 = vmatmul.bf16.gmra.mxu2 %v452_v61 }
  0x52   :  { %314 = vmatmul.bf16.gmra.mxu1 %v424_v62  ;;  %334 = vmatmul.bf16.gmra.mxu3 %v456_v63 }
  0x9e   :  { %v251_v1 = vpop.f32.mrf.mxu0 }
  0x9f   :  { %v252_v2 = vadd.f32 %v737_v0, %v251_v1  ;;  %v300_v3 = vpop.f32.mrf.mxu1 }
  0xa1   :  { %v301_v4 = vadd.f32 %v300_v3, %v252_v2 }
  0xa3   :  { %v340_v5 = vmax.f32 %v301_v4, 0.0 }
  0xa4   :  { %v271_v6 = vpop.f32.mrf.mxu2 }
  0xa5   :  { %v356_v7 = vpack.c.bf16 %v340_v5, %v340_v5  ;;  %v272_v8 = vadd.f32 %v737_v0, %v271_v6  ;;  %v320_v9 = vpop.f32.mrf.mxu3 }
  0xa6   :  { %v253_v10 = vpop.f32.mrf.mxu0 }
  0xa7   :  { %373 = vst.msk [vmem:[%s822_s3] sm:$0xf] %vm372_vm0, %v356_v7  ;;  %v321_v11 = vadd.f32 %v320_v9, %v272_v8  ;;  %v254_v12 = vadd.f32 %v737_v0, %v253_v10  ;;  %v302_v13 = vpop.f32.mrf.mxu1 }
  0xa9   :  { %v348_v14 = vmax.f32 %v321_v11, 0.0  ;;  %v303_v15 = vadd.f32 %v302_v13, %v254_v12 }
  0xab   :  { %v364_v16 = vpack.c.bf16 %v348_v14, %v348_v14  ;;  %v341_v17 = vmax.f32 %v303_v15, 0.0 }
  0xac   :  { %v273_v18 = vpop.f32.mrf.mxu2 }
  0xad   :  { %381 = vst.msk [vmem:[%s822_s3 + $0x20] sm:$0xf] %vm372_vm0, %v364_v16  ;;  %v357_v19 = vpack.c.bf16 %v341_v17, %v341_v17  ;;  %v274_v20 = vadd.f32 %v737_v0, %v273_v18  ;;  %v322_v21 = vpop.f32.mrf.mxu3 }
  0xae   :  { %v256_v22 = vpop.f32.mrf.mxu0 }
  0xaf   :  { %374 = vst.msk [vmem:[%s822_s3 + $0x4] sm:$0xf] %vm372_vm0, %v357_v19  ;;  %v323_v23 = vadd.f32 %v322_v21, %v274_v20  ;;  %v257_v24 = vadd.f32 %v737_v0, %v256_v22  ;;  %v305_v25 = vpop.f32.mrf.mxu1 }
  0xb1   :  { %v349_v26 = vmax.f32 %v323_v23, 0.0  ;;  %v306_v27 = vadd.f32 %v305_v25, %v257_v24 }
  0xb3   :  { %v365_v28 = vpack.c.bf16 %v349_v26, %v349_v26  ;;  %v342_v29 = vmax.f32 %v306_v27, 0.0 }
  0xb4   :  { %v276_v30 = vpop.f32.mrf.mxu2 }
  0xb5   :  { %382 = vst.msk [vmem:[%s822_s3 + $0x24] sm:$0xf] %vm372_vm0, %v365_v28  ;;  %v358_v31 = vpack.c.bf16 %v342_v29, %v342_v29  ;;  %v277_v32 = vadd.f32 %v737_v0, %v276_v30  ;;  %v325_v33 = vpop.f32.mrf.mxu3 }
  0xb6   :  { %v258_v34 = vpop.f32.mrf.mxu0 }
  0xb7   :  { %375 = vst.msk [vmem:[%s822_s3 + $0x8] sm:$0xf] %vm372_vm0, %v358_v31  ;;  %v326_v35 = vadd.f32 %v325_v33, %v277_v32  ;;  %v259_v36 = vadd.f32 %v737_v0, %v258_v34  ;;  %v307_v37 = vpop.f32.mrf.mxu1 }
  0xb9   :  { %v350_v38 = vmax.f32 %v326_v35, 0.0  ;;  %v308_v39 = vadd.f32 %v307_v37, %v259_v36 }
  0xbb   :  { %v366_v40 = vpack.c.bf16 %v350_v38, %v350_v38  ;;  %v343_v41 = vmax.f32 %v308_v39, 0.0 }
  0xbc   :  { %v278_v42 = vpop.f32.mrf.mxu2 }
  0xbd   :  { %383 = vst.msk [vmem:[%s822_s3 + $0x28] sm:$0xf] %vm372_vm0, %v366_v40  ;;  %v359_v43 = vpack.c.bf16 %v343_v41, %v343_v41  ;;  %v279_v44 = vadd.f32 %v737_v0, %v278_v42  ;;  %v327_v45 = vpop.f32.mrf.mxu3 }
  0xbe   :  { %v261_v46 = vpop.f32.mrf.mxu0 }
  0xbf   :  { %376 = vst.msk [vmem:[%s822_s3 + $0xc] sm:$0xf] %vm372_vm0, %v359_v43  ;;  %v328_v47 = vadd.f32 %v327_v45, %v279_v44  ;;  %v262_v48 = vadd.f32 %v737_v0, %v261_v46  ;;  %v310_v49 = vpop.f32.mrf.mxu1 }
  0xc1   :  { %v351_v50 = vmax.f32 %v328_v47, 0.0  ;;  %v311_v51 = vadd.f32 %v310_v49, %v262_v48 }
  0xc3   :  { %v367_v52 = vpack.c.bf16 %v351_v50, %v351_v50  ;;  %v344_v53 = vmax.f32 %v311_v51, 0.0 }
  0xc4   :  { %v281_v54 = vpop.f32.mrf.mxu2 }
  0xc5   :  { %384 = vst.msk [vmem:[%s822_s3 + $0x2c] sm:$0xf] %vm372_vm0, %v367_v52  ;;  %v360_v55 = vpack.c.bf16 %v344_v53, %v344_v53  ;;  %v282_v56 = vadd.f32 %v737_v0, %v281_v54  ;;  %v330_v57 = vpop.f32.mrf.mxu3 }
  0xc6   :  { %v263_v58 = vpop.f32.mrf.mxu0 }
  0xc7   :  { %377 = vst.msk [vmem:[%s822_s3 + $0x10] sm:$0xf] %vm372_vm0, %v360_v55  ;;  %v331_v59 = vadd.f32 %v330_v57, %v282_v56  ;;  %v264_v60 = vadd.f32 %v737_v0, %v263_v58  ;;  %v312_v61 = vpop.f32.mrf.mxu1 }
  0xc9   :  { %v352_v62 = vmax.f32 %v331_v59, 0.0  ;;  %v313_v63 = vadd.f32 %v312_v61, %v264_v60 }
  0xcb   :  { %v368_v1 = vpack.c.bf16 %v352_v62, %v352_v62  ;;  %v345_v2 = vmax.f32 %v313_v63, 0.0 }
  0xcc   :  { %v283_v3 = vpop.f32.mrf.mxu2 }
  0xcd   :  { %385 = vst.msk [vmem:[%s822_s3 + $0x30] sm:$0xf] %vm372_vm0, %v368_v1  ;;  %v361_v4 = vpack.c.bf16 %v345_v2, %v345_v2  ;;  %v284_v5 = vadd.f32 %v737_v0, %v283_v3  ;;  %v332_v6 = vpop.f32.mrf.mxu3 }
  0xce   :  { %v266_v7 = vpop.f32.mrf.mxu0 }
  0xcf   :  { %378 = vst.msk [vmem:[%s822_s3 + $0x14] sm:$0xf] %vm372_vm0, %v361_v4  ;;  %v333_v8 = vadd.f32 %v332_v6, %v284_v5  ;;  %v267_v9 = vadd.f32 %v737_v0, %v266_v7  ;;  %v315_v10 = vpop.f32.mrf.mxu1 }
  0xd1   :  { %v353_v11 = vmax.f32 %v333_v8, 0.0  ;;  %v316_v12 = vadd.f32 %v315_v10, %v267_v9 }
  0xd3   :  { %v369_v13 = vpack.c.bf16 %v353_v11, %v353_v11  ;;  %v346_v14 = vmax.f32 %v316_v12, 0.0 }
  0xd4   :  { %v286_v15 = vpop.f32.mrf.mxu2 }
  0xd5   :  { %386 = vst.msk [vmem:[%s822_s3 + $0x34] sm:$0xf] %vm372_vm0, %v369_v13  ;;  %v362_v16 = vpack.c.bf16 %v346_v14, %v346_v14  ;;  %v287_v17 = vadd.f32 %v737_v0, %v286_v15  ;;  %v335_v18 = vpop.f32.mrf.mxu3 }
  0xd6   :  { %v268_v19 = vpop.f32.mrf.mxu0 }
  0xd7   :  { %379 = vst.msk [vmem:[%s822_s3 + $0x18] sm:$0xf] %vm372_vm0, %v362_v16  ;;  %v336_v20 = vadd.f32 %v335_v18, %v287_v17  ;;  %v269_v21 = vadd.f32 %v737_v0, %v268_v19  ;;  %v317_v22 = vpop.f32.mrf.mxu1 }
  0xd9   :  { %v354_v23 = vmax.f32 %v336_v20, 0.0  ;;  %v318_v24 = vadd.f32 %v317_v22, %v269_v21 }
  0xdb   :  { %v370_v25 = vpack.c.bf16 %v354_v23, %v354_v23  ;;  %v347_v26 = vmax.f32 %v318_v24, 0.0 }
  0xdc   :  { %v288_v27 = vpop.f32.mrf.mxu2 }
  0xdd   :  { %387 = vst.msk [vmem:[%s822_s3 + $0x38] sm:$0xf] %vm372_vm0, %v370_v25  ;;  %v363_v28 = vpack.c.bf16 %v347_v26, %v347_v26  ;;  %v289_v29 = vadd.f32 %v737_v0, %v288_v27  ;;  %v337_v30 = vpop.f32.mrf.mxu3 }
  0xdf   :  { %380 = vst.msk [vmem:[%s822_s3 + $0x1c] sm:$0xf] %vm372_vm0, %v363_v28  ;;  %v338_v31 = vadd.f32 %v337_v30, %v289_v29 }
  0xe1   :  { %v355_v32 = vmax.f32 %v338_v31, 0.0 }
  0xe3   :  { %v371_v33 = vpack.c.bf16 %v355_v32, %v355_v32 }
  0xe5   :  { %388 = vst.msk [vmem:[%s822_s3 + $0x3c] sm:$0xf] %vm372_vm0, %v371_v33 }

// kernel: _lambda_.58
= control target key start
LH: loop header
LB: loop body
LE: loop exit
PB: predicated region body
PF: predicated region fallthrough
CT: control target
= control target key end

     0   :  { %vm315_vm0 = vcmask 261120   ;;  %vm519_vm1 = vcmask 257024   ;;  %s1086_s1 = inlined_call_operand.vmem [shape: bf16[288,32], index: 1, kind: input, shape index: {}]   ;;  %s1087_s0 = inlined_call_operand.vmem [shape: bf16[128,288], index: 0, kind: input, shape index: {}]   ;;  %s1088_s2 = inlined_call_operand.vmem [shape: f32[1,32], index: 2, kind: input, shape index: {}]   ;;  %s1089_s3 = inlined_call_operand.vmem [shape: bf16[128,32], index: 3, kind: output, shape index: {}]  }
   0x1   :  { %v747_v0 = vld [vmem:[%s1086_s1 + $0x38] sm:$0xff]  ;;  %v757_v1 = vld [vmem:[%s1086_s1 + $0x88] sm:$0xff]  ;;  %v746_v3 = vld [vmem:[%s1086_s1 + $0x30] sm:$0xff] }
   0x2   :  { %v755_v2 = vld [vmem:[%s1086_s1 + $0x78] sm:$0xff]  ;;  %340 = vmatpush.bf16.msra.mxu0 %v747_v0  ;;  %758 = vmatpush.bf16.msra.mxu3 %v747_v0  ;;  %v756_v4 = vld [vmem:[%s1086_s1 + $0x80] sm:$0xff]  ;;  %v754_v5 = vld [vmem:[%s1086_s1 + $0x70] sm:$0xff] }
   0x3   :  { %444 = vmatpush.bf16.msra.mxu2 %v757_v1  ;;  %389 = vmatpush.bf16.msra.mxu1 %v755_v2  ;;  %v550_v6 = vld [vmem:[%s1087_s0 + $0x8] sm:$0xf]  ;;  %v718_v7 = vld [vmem:[%s1087_s0 + $0x10] sm:$0xf0]  ;;  %v744_v11 = vld [vmem:[%s1086_s1 + $0x20] sm:$0xff] }
   0x4   :  { %v551_v8 = vor.u32 %v718_v7, %v550_v6  ;;  %v745_v9 = vld [vmem:[%s1086_s1 + $0x28] sm:$0xff]  ;;  %v752_v12 = vld [vmem:[%s1086_s1 + $0x60] sm:$0xff]  ;;  %v743_v13 = vld [vmem:[%s1086_s1 + $0x18] sm:$0xff] }
   0x5   :  { %v753_v10 = vld [vmem:[%s1086_s1 + $0x68] sm:$0xff]  ;;  %v751_v14 = vld [vmem:[%s1086_s1 + $0x58] sm:$0xff]  ;;  %v742_v15 = vld [vmem:[%s1086_s1 + $0x10] sm:$0xff] }
   0x6   :  { %341 = vmatpush.bf16.msra.mxu0 %v746_v3  ;;  %759 = vmatpush.bf16.msra.mxu3 %v746_v3  ;;  %v750_v16 = vld [vmem:[%s1086_s1 + $0x50] sm:$0xff]  ;;  %v562_v17 = vld [vmem:[%s1087_s0 + $0x20] sm:$0xf]  ;;  %v721_v18 = vld [vmem:[%s1087_s0 + $0x28] sm:$0xf0] }
   0x7   :  { %445 = vmatpush.bf16.msra.mxu2 %v756_v4  ;;  %390 = vmatpush.bf16.msra.mxu1 %v754_v5  ;;  %v563_v19 = vor.u32 %v721_v18, %v562_v17  ;;  %v741_v20 = vld [vmem:[%s1086_s1 + $0x8] sm:$0xff]  ;;  %v740_v22 = vld [vmem:[%s1086_s1] sm:$0xff]  ;;  %v614_v26 = vld [vmem:[%s1087_s0 + $0x90] sm:$0xf] }
   0x8   :  { %v749_v21 = vld [vmem:[%s1086_s1 + $0x48] sm:$0xff]  ;;  %v748_v23 = vld [vmem:[%s1086_s1 + $0x40] sm:$0xff]  ;;  %v735_v27 = vld [vmem:[%s1087_s0 + $0x98] sm:$0xf0] }
   0x9   :  { %v542_v24 = vld [vmem:[%s1087_s0] sm:$0xf]  ;;  %v717_v25 = vld [vmem:[%s1087_s0 + $0x8] sm:$0xf0]  ;;  %v716_v28 = vld [vmem:[%s1087_s0 + $0x4] sm:$0xf]  ;;  %v615_v31 = vor.u32 %v735_v27, %v614_v26 }
   0xa   :  { %708 = vmatmul.msk.bf16.vlgmr.msra.gmra.mxu2 %vm315_vm0, %v551_v8  ;;  %342 = vmatpush.bf16.msra.mxu0 %v745_v9  ;;  %v544_v29 = vld [vmem:[%s1087_s0 + $0xc] sm:$0xf0]  ;;  %v543_v30 = vor.u32 %v717_v25, %v542_v24  ;;  %v574_v33 = vld [vmem:[%s1087_s0 + $0x38] sm:$0xf]  ;;  %v724_v34 = vld [vmem:[%s1087_s0 + $0x40] sm:$0xf0] }
   0xb   :  { %760 = vmatpush.bf16.msra.mxu3 %v745_v9  ;;  %391 = vmatpush.bf16.msra.mxu1 %v753_v10  ;;  %v547_v32 = vor.u32 %v716_v28, %v544_v29  ;;  %v575_v35 = vor.u32 %v724_v34, %v574_v33  ;;  %v554_v36 = vld [vmem:[%s1087_s0 + $0x18] sm:$0xf]  ;;  %v720_v37 = vld [vmem:[%s1087_s0 + $0x20] sm:$0xf0]  ;;  %v626_v38 = vld [vmem:[%s1087_s0 + $0xa8] sm:$0xf] }
   0xc   :  { %v738_v39 = vld [vmem:[%s1087_s0 + $0xb0] sm:$0xf0]  ;;  %v719_v40 = vld [vmem:[%s1087_s0 + $0x1c] sm:$0xf]  ;;  %v556_v41 = vld [vmem:[%s1087_s0 + $0x24] sm:$0xf0]  ;;  %v555_v42 = vor.u32 %v720_v37, %v554_v36 }
   0xd   :  { %v627_v43 = vor.u32 %v738_v39, %v626_v38  ;;  %v559_v44 = vor.u32 %v719_v40, %v556_v41  ;;  %v586_v45 = vld [vmem:[%s1087_s0 + $0x50] sm:$0xf]  ;;  %v727_v46 = vld [vmem:[%s1087_s0 + $0x58] sm:$0xf0]  ;;  %v734_v50 = vld [vmem:[%s1087_s0 + $0x94] sm:$0xf] }
   0xe   :  { %343 = vmatpush.bf16.msra.mxu0 %v744_v11  ;;  %v587_v47 = vor.u32 %v727_v46, %v586_v45  ;;  %v566_v48 = vld [vmem:[%s1087_s0 + $0x30] sm:$0xf]  ;;  %v723_v49 = vld [vmem:[%s1087_s0 + $0x38] sm:$0xf0]  ;;  %v616_v51 = vld [vmem:[%s1087_s0 + $0x9c] sm:$0xf0] }
   0xf   :  { %761 = vmatpush.bf16.msra.mxu3 %v744_v11  ;;  %392 = vmatpush.bf16.msra.mxu1 %v752_v12  ;;  %v722_v52 = vld [vmem:[%s1087_s0 + $0x34] sm:$0xf]  ;;  %v568_v53 = vld [vmem:[%s1087_s0 + $0x3c] sm:$0xf0]  ;;  %v567_v54 = vor.u32 %v723_v49, %v566_v48  ;;  %v619_v55 = vor.u32 %v734_v50, %v616_v51  ;;  %v598_v57 = vld [vmem:[%s1087_s0 + $0x68] sm:$0xf] }
  0x10   :  { %v571_v56 = vor.u32 %v722_v52, %v568_v53  ;;  %v730_v58 = vld [vmem:[%s1087_s0 + $0x70] sm:$0xf0]  ;;  %v578_v60 = vld [vmem:[%s1087_s0 + $0x48] sm:$0xf]  ;;  %v737_v62 = vld [vmem:[%s1087_s0 + $0xac] sm:$0xf] }
  0x11   :  { %v599_v59 = vor.u32 %v730_v58, %v598_v57  ;;  %v726_v61 = vld [vmem:[%s1087_s0 + $0x50] sm:$0xf0]  ;;  %v628_v63 = vld [vmem:[%s1087_s0 + $0xb4] sm:$0xf0]  ;;  %v725_v0 = vld [vmem:[%s1087_s0 + $0x4c] sm:$0xf] }
  0x12   :  { %344 = vmatpush.bf16.msra.mxu0 %v743_v13  ;;  %v580_v1 = vld [vmem:[%s1087_s0 + $0x54] sm:$0xf0]  ;;  %v631_v3 = vor.u32 %v737_v62, %v628_v63  ;;  %v733_v6 = vld [vmem:[%s1087_s0 + $0x88] sm:$0xf0]  ;;  %v590_v8 = vld [vmem:[%s1087_s0 + $0x60] sm:$0xf] }
  0x13   :  { %762 = vmatpush.bf16.msra.mxu3 %v743_v13  ;;  %393 = vmatpush.bf16.msra.mxu1 %v751_v14  ;;  %v583_v4 = vor.u32 %v725_v0, %v580_v1  ;;  %v729_v9 = vld [vmem:[%s1087_s0 + $0x68] sm:$0xf0]  ;;  %v592_v11 = vld [vmem:[%s1087_s0 + $0x6c] sm:$0xf0]  ;;  %v602_v17 = vld [vmem:[%s1087_s0 + $0x78] sm:$0xf] }
  0x14   :  { %v732_v18 = vld [vmem:[%s1087_s0 + $0x80] sm:$0xf0]  ;;  %v739_v24 = vld [vmem:[%s1087_s0 + $0xb8] sm:$0xf0]  ;;  %v1004_v28 = vld [vmem:[%s1088_s2] ss:$0 sm:$0xff] }
  0x16   :  { %345 = vmatpush.bf16.msra.mxu0 %v742_v15 }
  0x17   :  { %763 = vmatpush.bf16.msra.mxu3 %v742_v15  ;;  %394 = vmatpush.bf16.msra.mxu1 %v750_v16  ;;  %v736_v15 = vld [vmem:[%s1087_s0 + $0xa0] sm:$0xf0] }
  0x1a   :  { %709 = vmatmul.msk.bf16.gmra.mxu2 %vm315_vm0, %v563_v19  ;;  %346 = vmatpush.bf16.msra.mxu0 %v741_v20  ;;  %v731_v19 = vld [vmem:[%s1087_s0 + $0x7c] sm:$0xf] }
  0x1b   :  { %764 = vmatpush.bf16.msra.mxu3 %v741_v20  ;;  %395 = vmatpush.bf16.msra.mxu1 %v749_v21  ;;  %v604_v20 = vld [vmem:[%s1087_s0 + $0x84] sm:$0xf0] }
  0x1e   :  { %347 = vmatpush.bf16.msra.mxu0 %v740_v22 }
  0x1f   :  { %765 = vmatpush.bf16.msra.mxu3 %v740_v22  ;;  %396 = vmatpush.bf16.msra.mxu1 %v748_v23  ;;  %v607_v22 = vor.u32 %v731_v19, %v604_v20 }
  0x21   :  { %348 = vmatmul.bf16.vlgmr.msra.gmra.mxu0 %v543_v30 }
  0x22   :  { %378 = vmatmul.bf16.vlgmr.msra.gmra.mxu3 %v615_v31  ;;  %397 = vmatmul.bf16.vlgmr.msra.gmra.mxu1 %v547_v32 }
  0x23   :  { %766 = vmatpush.bf16.msrb.mxu3 %v755_v2  ;;  %v579_v2 = vor.u32 %v726_v61, %v578_v60 }
  0x27   :  { %767 = vmatpush.bf16.msrb.mxu3 %v754_v5  ;;  %v610_v5 = vld [vmem:[%s1087_s0 + $0x80] sm:$0xf] }
  0x28   :  { %v611_v7 = vor.u32 %v733_v6, %v610_v5 }
  0x2a   :  { %710 = vmatmul.msk.bf16.gmra.mxu2 %vm315_vm0, %v575_v35 }
  0x2b   :  { %768 = vmatpush.bf16.msrb.mxu3 %v753_v10  ;;  %v728_v10 = vld [vmem:[%s1087_s0 + $0x64] sm:$0xf] }
  0x2c   :  { %v595_v13 = vor.u32 %v728_v10, %v592_v11 }
  0x2f   :  { %769 = vmatpush.bf16.msrb.mxu3 %v752_v12  ;;  %v591_v12 = vor.u32 %v729_v9, %v590_v8 }
  0x31   :  { %353 = vmatmul.bf16.gmra.mxu0 %v555_v42 }
  0x32   :  { %383 = vmatmul.bf16.gmra.mxu3 %v627_v43  ;;  %402 = vmatmul.bf16.gmra.mxu1 %v559_v44 }
  0x33   :  { %770 = vmatpush.bf16.msrb.mxu3 %v751_v14  ;;  %v622_v14 = vld [vmem:[%s1087_s0 + $0x98] sm:$0xf] }
  0x37   :  { %771 = vmatpush.bf16.msrb.mxu3 %v750_v16  ;;  %v623_v16 = vor.u32 %v736_v15, %v622_v14 }
  0x3a   :  { %711 = vmatmul.msk.bf16.gmra.mxu2 %vm315_vm0, %v587_v47 }
  0x3b   :  { %772 = vmatpush.bf16.msrb.mxu3 %v749_v21  ;;  %v603_v21 = vor.u32 %v732_v18, %v602_v17 }
  0x3f   :  { %773 = vmatpush.bf16.msrb.mxu3 %v748_v23  ;;  %v634_v23 = vld [vmem:[%s1087_s0 + $0xb0] sm:$0xf] }
  0x40   :  { %v635_v25 = vor.u32 %v739_v24, %v634_v23 }
  0x41   :  { %358 = vmatmul.bf16.gmra.mxu0 %v567_v54 }
  0x42   :  { %427 = vmatmul.bf16.vlgmr.msrb.gmra.mxu3 %v619_v55  ;;  %407 = vmatmul.bf16.gmra.mxu1 %v571_v56 }
  0x4a   :  { %712 = vmatmul.msk.bf16.gmra.mxu2 %vm315_vm0, %v599_v59 }
  0x51   :  { %363 = vmatmul.bf16.gmra.mxu0 %v579_v2 }
  0x52   :  { %432 = vmatmul.bf16.gmra.mxu3 %v631_v3  ;;  %412 = vmatmul.bf16.gmra.mxu1 %v583_v4 }
  0x5a   :  { %713 = vmatmul.msk.bf16.gmra.mxu2 %vm315_vm0, %v611_v7 }
  0x61   :  { %368 = vmatmul.bf16.gmra.mxu0 %v591_v12 }
  0x62   :  { %417 = vmatmul.bf16.gmra.mxu1 %v595_v13 }
  0x6a   :  { %714 = vmatmul.msk.bf16.gmra.mxu2 %vm315_vm0, %v623_v16 }
  0x71   :  { %373 = vmatmul.bf16.gmra.mxu0 %v603_v21 }
  0x72   :  { %422 = vmatmul.bf16.gmra.mxu1 %v607_v22 }
  0x7a   :  { %715 = vmatmul.msk.bf16.gmra.mxu2 %vm315_vm0, %v635_v25 }
  0x8d   :  { %v447_v26 = vpop.f32.mrf.mxu2 }
  0x95   :  { %v449_v27 = vpop.f32.mrf.mxu2 }
  0x9d   :  { %v452_v29 = vpop.f32.mrf.mxu2 }
  0x9e   :  { %v349_v30 = vpop.f32.mrf.mxu0 }
  0x9f   :  { %v350_v31 = vadd.f32 %v1004_v28, %v349_v30  ;;  %v398_v32 = vpop.f32.mrf.mxu1 }
  0xa1   :  { %v399_v33 = vadd.f32 %v398_v32, %v350_v31 }
  0xa3   :  { %v448_v34 = vadd.f32 %v447_v26, %v399_v33 }
  0xa5   :  { %v487_v35 = vmax.f32 %v448_v34, 0.0  ;;  %v454_v36 = vpop.f32.mrf.mxu2  ;;  %v379_v58 = vpop.f32.mrf.mxu3 }
  0xa6   :  { %v351_v37 = vpop.f32.mrf.mxu0 }
  0xa7   :  { %v503_v38 = vpack.c.bf16 %v487_v35, %v487_v35  ;;  %v352_v39 = vadd.f32 %v1004_v28, %v351_v37  ;;  %v400_v40 = vpop.f32.mrf.mxu1 }
  0xa9   :  { %520 = vst.msk [vmem:[%s1089_s3] sm:$0xf] %vm519_vm1, %v503_v38  ;;  %v401_v41 = vadd.f32 %v400_v40, %v352_v39 }
  0xab   :  { %v450_v42 = vadd.f32 %v449_v27, %v401_v41 }
  0xad   :  { %v488_v43 = vmax.f32 %v450_v42, 0.0  ;;  %v457_v44 = vpop.f32.mrf.mxu2  ;;  %v381_v4 = vpop.f32.mrf.mxu3 }
  0xae   :  { %v354_v45 = vpop.f32.mrf.mxu0 }
  0xaf   :  { %v504_v46 = vpack.c.bf16 %v488_v43, %v488_v43  ;;  %v355_v47 = vadd.f32 %v1004_v28, %v354_v45  ;;  %v403_v48 = vpop.f32.mrf.mxu1 }
  0xb1   :  { %521 = vst.msk [vmem:[%s1089_s3 + $0x4] sm:$0xf] %vm519_vm1, %v504_v46  ;;  %v404_v49 = vadd.f32 %v403_v48, %v355_v47  ;;  %v380_v47 = vadd.f32 %v1004_v28, %v379_v58 }
  0xb3   :  { %v453_v50 = vadd.f32 %v452_v29, %v404_v49 }
  0xb5   :  { %v489_v51 = vmax.f32 %v453_v50, 0.0  ;;  %v459_v52 = vpop.f32.mrf.mxu2  ;;  %v384_v16 = vpop.f32.mrf.mxu3 }
  0xb6   :  { %v356_v53 = vpop.f32.mrf.mxu0 }
  0xb7   :  { %v505_v54 = vpack.c.bf16 %v489_v51, %v489_v51  ;;  %v357_v55 = vadd.f32 %v1004_v28, %v356_v53  ;;  %v405_v56 = vpop.f32.mrf.mxu1 }
  0xb9   :  { %522 = vst.msk [vmem:[%s1089_s3 + $0x8] sm:$0xf] %vm519_vm1, %v505_v54  ;;  %v406_v57 = vadd.f32 %v405_v56, %v357_v55 }
  0xbb   :  { %v455_v59 = vadd.f32 %v454_v36, %v406_v57 }
  0xbd   :  { %v490_v60 = vmax.f32 %v455_v59, 0.0  ;;  %v462_v61 = vpop.f32.mrf.mxu2  ;;  %v386_v29 = vpop.f32.mrf.mxu3 }
  0xbe   :  { %v359_v62 = vpop.f32.mrf.mxu0 }
  0xbf   :  { %v506_v63 = vpack.c.bf16 %v490_v60, %v490_v60  ;;  %v360_v0 = vadd.f32 %v1004_v28, %v359_v62  ;;  %v408_v1 = vpop.f32.mrf.mxu1  ;;  %v382_v60 = vadd.f32 %v1004_v28, %v381_v4 }
  0xc1   :  { %523 = vst.msk [vmem:[%s1089_s3 + $0xc] sm:$0xf] %vm519_vm1, %v506_v63  ;;  %v409_v2 = vadd.f32 %v408_v1, %v360_v0 }
  0xc3   :  { %v458_v3 = vadd.f32 %v457_v44, %v409_v2 }
  0xc5   :  { %v491_v5 = vmax.f32 %v458_v3, 0.0  ;;  %v464_v6 = vpop.f32.mrf.mxu2  ;;  %v428_v39 = vpop.f32.mrf.mxu3 }
  0xc6   :  { %v361_v7 = vpop.f32.mrf.mxu0  ;;  %v429_v50 = vadd.f32 %v428_v39, %v380_v47 }
  0xc7   :  { %v507_v8 = vpack.c.bf16 %v491_v5, %v491_v5  ;;  %v362_v9 = vadd.f32 %v1004_v28, %v361_v7  ;;  %v410_v10 = vpop.f32.mrf.mxu1 }
  0xc9   :  { %524 = vst.msk [vmem:[%s1089_s3 + $0x10] sm:$0xf] %vm519_vm1, %v507_v8  ;;  %v411_v11 = vadd.f32 %v410_v10, %v362_v9  ;;  %v385_v9 = vadd.f32 %v1004_v28, %v384_v16  ;;  %v387_v16 = vadd.f32 %v1004_v28, %v386_v29 }
  0xcb   :  { %v460_v12 = vadd.f32 %v459_v52, %v411_v11 }
  0xcd   :  { %v492_v13 = vmax.f32 %v460_v12, 0.0  ;;  %v467_v14 = vpop.f32.mrf.mxu2  ;;  %v430_v51 = vpop.f32.mrf.mxu3 }
  0xce   :  { %v364_v15 = vpop.f32.mrf.mxu0  ;;  %v431_v0 = vadd.f32 %v430_v51, %v382_v60 }
  0xcf   :  { %v508_v17 = vpack.c.bf16 %v492_v13, %v492_v13  ;;  %v365_v18 = vadd.f32 %v1004_v28, %v364_v15  ;;  %v413_v19 = vpop.f32.mrf.mxu1 }
  0xd1   :  { %525 = vst.msk [vmem:[%s1089_s3 + $0x14] sm:$0xf] %vm519_vm1, %v508_v17  ;;  %v414_v20 = vadd.f32 %v413_v19, %v365_v18 }
  0xd3   :  { %v463_v21 = vadd.f32 %v462_v61, %v414_v20 }
  0xd5   :  { %v493_v22 = vmax.f32 %v463_v21, 0.0  ;;  %v469_v23 = vpop.f32.mrf.mxu2  ;;  %v433_v4 = vpop.f32.mrf.mxu3 }
  0xd6   :  { %v366_v24 = vpop.f32.mrf.mxu0 }
  0xd7   :  { %v509_v25 = vpack.c.bf16 %v493_v22, %v493_v22  ;;  %v367_v26 = vadd.f32 %v1004_v28, %v366_v24  ;;  %v415_v27 = vpop.f32.mrf.mxu1 }
  0xd9   :  { %526 = vst.msk [vmem:[%s1089_s3 + $0x18] sm:$0xf] %vm519_vm1, %v509_v25  ;;  %v416_v30 = vadd.f32 %v415_v27, %v367_v26 }
  0xdb   :  { %v465_v31 = vadd.f32 %v464_v6, %v416_v30 }
  0xdd   :  { %v494_v32 = vmax.f32 %v465_v31, 0.0  ;;  %v472_v33 = vpop.f32.mrf.mxu2  ;;  %v435_v21 = vpop.f32.mrf.mxu3 }
  0xde   :  { %v369_v34 = vpop.f32.mrf.mxu0 }
  0xdf   :  { %v510_v35 = vpack.c.bf16 %v494_v32, %v494_v32  ;;  %v370_v36 = vadd.f32 %v1004_v28, %v369_v34  ;;  %v418_v37 = vpop.f32.mrf.mxu1 }
  0xe1   :  { %527 = vst.msk [vmem:[%s1089_s3 + $0x1c] sm:$0xf] %vm519_vm1, %v510_v35  ;;  %v419_v38 = vadd.f32 %v418_v37, %v370_v36 }
  0xe3   :  { %v468_v40 = vadd.f32 %v467_v14, %v419_v38  ;;  %v434_v14 = vadd.f32 %v433_v4, %v385_v9 }
  0xe5   :  { %v495_v41 = vmax.f32 %v468_v40, 0.0  ;;  %v474_v42 = vpop.f32.mrf.mxu2 }
  0xe6   :  { %v371_v43 = vpop.f32.mrf.mxu0 }
  0xe7   :  { %v511_v44 = vpack.c.bf16 %v495_v41, %v495_v41  ;;  %v372_v45 = vadd.f32 %v1004_v28, %v371_v43  ;;  %v420_v46 = vpop.f32.mrf.mxu1 }
  0xe9   :  { %528 = vst.msk [vmem:[%s1089_s3 + $0x20] sm:$0xf] %vm519_vm1, %v511_v44  ;;  %v421_v48 = vadd.f32 %v420_v46, %v372_v45 }
  0xeb   :  { %v470_v49 = vadd.f32 %v469_v23, %v421_v48  ;;  %v436_v23 = vadd.f32 %v435_v21, %v387_v16 }
  0xed   :  { %v496_v52 = vmax.f32 %v470_v49, 0.0  ;;  %v477_v53 = vpop.f32.mrf.mxu2 }
  0xee   :  { %v478_v54 = vadd.f32 %v477_v53, %v429_v50  ;;  %v374_v55 = vpop.f32.mrf.mxu0 }
  0xef   :  { %v512_v56 = vpack.c.bf16 %v496_v52, %v496_v52  ;;  %v375_v57 = vadd.f32 %v1004_v28, %v374_v55  ;;  %v423_v59 = vpop.f32.mrf.mxu1 }
  0xf0   :  { %v499_v58 = vmax.f32 %v478_v54, 0.0 }
  0xf1   :  { %529 = vst.msk [vmem:[%s1089_s3 + $0x24] sm:$0xf] %vm519_vm1, %v512_v56  ;;  %v424_v61 = vadd.f32 %v423_v59, %v375_v57 }
  0xf2   :  { %v515_v62 = vpack.c.bf16 %v499_v58, %v499_v58 }
  0xf3   :  { %v473_v63 = vadd.f32 %v472_v33, %v424_v61 }
  0xf4   :  { %532 = vst.msk [vmem:[%s1089_s3 + $0x30] sm:$0xf] %vm519_vm1, %v515_v62 }
  0xf5   :  { %v497_v1 = vmax.f32 %v473_v63, 0.0  ;;  %v479_v2 = vpop.f32.mrf.mxu2 }
  0xf6   :  { %v480_v3 = vadd.f32 %v479_v2, %v431_v0  ;;  %v376_v5 = vpop.f32.mrf.mxu0 }
  0xf7   :  { %v513_v6 = vpack.c.bf16 %v497_v1, %v497_v1  ;;  %v377_v7 = vadd.f32 %v1004_v28, %v376_v5  ;;  %v425_v8 = vpop.f32.mrf.mxu1 }
  0xf8   :  { %v500_v10 = vmax.f32 %v480_v3, 0.0 }
  0xf9   :  { %530 = vst.msk [vmem:[%s1089_s3 + $0x28] sm:$0xf] %vm519_vm1, %v513_v6  ;;  %v426_v11 = vadd.f32 %v425_v8, %v377_v7 }
  0xfa   :  { %v516_v12 = vpack.c.bf16 %v500_v10, %v500_v10 }
  0xfb   :  { %v475_v13 = vadd.f32 %v474_v42, %v426_v11 }
  0xfc   :  { %533 = vst.msk [vmem:[%s1089_s3 + $0x34] sm:$0xf] %vm519_vm1, %v516_v12 }
  0xfd   :  { %v498_v15 = vmax.f32 %v475_v13, 0.0  ;;  %v482_v17 = vpop.f32.mrf.mxu2 }
  0xfe   :  { %v483_v18 = vadd.f32 %v482_v17, %v434_v14 }
  0xff   :  { %v514_v19 = vpack.c.bf16 %v498_v15, %v498_v15 }
 0x100   :  { %v501_v20 = vmax.f32 %v483_v18, 0.0 }
 0x101   :  { %531 = vst.msk [vmem:[%s1089_s3 + $0x2c] sm:$0xf] %vm519_vm1, %v514_v19 }
 0x102   :  { %v517_v22 = vpack.c.bf16 %v501_v20, %v501_v20 }
 0x104   :  { %534 = vst.msk [vmem:[%s1089_s3 + $0x38] sm:$0xf] %vm519_vm1, %v517_v22 }
 0x105   :  { %v484_v24 = vpop.f32.mrf.mxu2 }
 0x106   :  { %v485_v25 = vadd.f32 %v484_v24, %v436_v23 }
 0x108   :  { %v502_v26 = vmax.f32 %v485_v25, 0.0 }
 0x10a   :  { %v518_v27 = vpack.c.bf16 %v502_v26, %v502_v26 }
 0x10c   :  { %535 = vst.msk [vmem:[%s1089_s3 + $0x3c] sm:$0xf] %vm519_vm1, %v518_v27 }

// kernel: _lambda_.59
= control target key start
LH: loop header
LB: loop body
LE: loop exit
PB: predicated region body
PF: predicated region fallthrough
CT: control target
= control target key end

     0   :  { %vm318_vm0 = vcmask 261120   ;;  %vm570_vm1 = vcmask 257024   ;;  %s1217_s1 = inlined_call_operand.vmem [shape: bf16[288,32], index: 1, kind: input, shape index: {}]   ;;  %s1218_s0 = inlined_call_operand.vmem [shape: bf16[128,288], index: 0, kind: input, shape index: {}]   ;;  %s1219_s2 = inlined_call_operand.vmem [shape: f32[1,32], index: 2, kind: input, shape index: {}]   ;;  %s1220_s3 = inlined_call_operand.vmem [shape: bf16[128,32], index: 3, kind: input, shape index: {}]   ;;  %s1221_s4 = inlined_call_operand.vmem [shape: bf16[128,32], index: 4, kind: output, shape index: {}]  }
   0x1   :  { %v798_v0 = vld [vmem:[%s1217_s1 + $0x38] sm:$0xff]  ;;  %v808_v1 = vld [vmem:[%s1217_s1 + $0x88] sm:$0xff]  ;;  %v797_v3 = vld [vmem:[%s1217_s1 + $0x30] sm:$0xff] }
   0x2   :  { %v806_v2 = vld [vmem:[%s1217_s1 + $0x78] sm:$0xff]  ;;  %343 = vmatpush.bf16.msra.mxu0 %v798_v0  ;;  %848 = vmatpush.bf16.msra.mxu3 %v798_v0  ;;  %v807_v4 = vld [vmem:[%s1217_s1 + $0x80] sm:$0xff]  ;;  %v805_v5 = vld [vmem:[%s1217_s1 + $0x70] sm:$0xff] }
   0x3   :  { %447 = vmatpush.bf16.msra.mxu2 %v808_v1  ;;  %392 = vmatpush.bf16.msra.mxu1 %v806_v2  ;;  %v601_v6 = vld [vmem:[%s1218_s0 + $0x8] sm:$0xf]  ;;  %v769_v7 = vld [vmem:[%s1218_s0 + $0x10] sm:$0xf0]  ;;  %v795_v11 = vld [vmem:[%s1217_s1 + $0x20] sm:$0xff] }
   0x4   :  { %v602_v8 = vor.u32 %v769_v7, %v601_v6  ;;  %v796_v9 = vld [vmem:[%s1217_s1 + $0x28] sm:$0xff]  ;;  %v803_v12 = vld [vmem:[%s1217_s1 + $0x60] sm:$0xff]  ;;  %v794_v13 = vld [vmem:[%s1217_s1 + $0x18] sm:$0xff] }
   0x5   :  { %v804_v10 = vld [vmem:[%s1217_s1 + $0x68] sm:$0xff]  ;;  %v802_v14 = vld [vmem:[%s1217_s1 + $0x58] sm:$0xff]  ;;  %v793_v15 = vld [vmem:[%s1217_s1 + $0x10] sm:$0xff] }
   0x6   :  { %344 = vmatpush.bf16.msra.mxu0 %v797_v3  ;;  %849 = vmatpush.bf16.msra.mxu3 %v797_v3  ;;  %v801_v16 = vld [vmem:[%s1217_s1 + $0x50] sm:$0xff]  ;;  %v613_v17 = vld [vmem:[%s1218_s0 + $0x20] sm:$0xf]  ;;  %v772_v18 = vld [vmem:[%s1218_s0 + $0x28] sm:$0xf0] }
   0x7   :  { %448 = vmatpush.bf16.msra.mxu2 %v807_v4  ;;  %393 = vmatpush.bf16.msra.mxu1 %v805_v5  ;;  %v614_v19 = vor.u32 %v772_v18, %v613_v17  ;;  %v792_v20 = vld [vmem:[%s1217_s1 + $0x8] sm:$0xff]  ;;  %v791_v22 = vld [vmem:[%s1217_s1] sm:$0xff]  ;;  %v665_v26 = vld [vmem:[%s1218_s0 + $0x90] sm:$0xf] }
   0x8   :  { %v800_v21 = vld [vmem:[%s1217_s1 + $0x48] sm:$0xff]  ;;  %v799_v23 = vld [vmem:[%s1217_s1 + $0x40] sm:$0xff]  ;;  %v786_v27 = vld [vmem:[%s1218_s0 + $0x98] sm:$0xf0] }
   0x9   :  { %v593_v24 = vld [vmem:[%s1218_s0] sm:$0xf]  ;;  %v768_v25 = vld [vmem:[%s1218_s0 + $0x8] sm:$0xf0]  ;;  %v767_v28 = vld [vmem:[%s1218_s0 + $0x4] sm:$0xf]  ;;  %v666_v31 = vor.u32 %v786_v27, %v665_v26 }
   0xa   :  { %759 = vmatmul.msk.bf16.vlgmr.msra.gmra.mxu2 %vm318_vm0, %v602_v8  ;;  %345 = vmatpush.bf16.msra.mxu0 %v796_v9  ;;  %v595_v29 = vld [vmem:[%s1218_s0 + $0xc] sm:$0xf0]  ;;  %v594_v30 = vor.u32 %v768_v25, %v593_v24  ;;  %v625_v33 = vld [vmem:[%s1218_s0 + $0x38] sm:$0xf]  ;;  %v775_v34 = vld [vmem:[%s1218_s0 + $0x40] sm:$0xf0] }
   0xb   :  { %850 = vmatpush.bf16.msra.mxu3 %v796_v9  ;;  %394 = vmatpush.bf16.msra.mxu1 %v804_v10  ;;  %v598_v32 = vor.u32 %v767_v28, %v595_v29  ;;  %v626_v35 = vor.u32 %v775_v34, %v625_v33  ;;  %v605_v36 = vld [vmem:[%s1218_s0 + $0x18] sm:$0xf]  ;;  %v771_v37 = vld [vmem:[%s1218_s0 + $0x20] sm:$0xf0]  ;;  %v677_v38 = vld [vmem:[%s1218_s0 + $0xa8] sm:$0xf] }
   0xc   :  { %v789_v39 = vld [vmem:[%s1218_s0 + $0xb0] sm:$0xf0]  ;;  %v770_v40 = vld [vmem:[%s1218_s0 + $0x1c] sm:$0xf]  ;;  %v607_v41 = vld [vmem:[%s1218_s0 + $0x24] sm:$0xf0]  ;;  %v606_v42 = vor.u32 %v771_v37, %v605_v36 }
   0xd   :  { %v678_v43 = vor.u32 %v789_v39, %v677_v38  ;;  %v610_v44 = vor.u32 %v770_v40, %v607_v41  ;;  %v637_v45 = vld [vmem:[%s1218_s0 + $0x50] sm:$0xf]  ;;  %v778_v46 = vld [vmem:[%s1218_s0 + $0x58] sm:$0xf0]  ;;  %v785_v50 = vld [vmem:[%s1218_s0 + $0x94] sm:$0xf] }
   0xe   :  { %346 = vmatpush.bf16.msra.mxu0 %v795_v11  ;;  %v638_v47 = vor.u32 %v778_v46, %v637_v45  ;;  %v617_v48 = vld [vmem:[%s1218_s0 + $0x30] sm:$0xf]  ;;  %v774_v49 = vld [vmem:[%s1218_s0 + $0x38] sm:$0xf0]  ;;  %v667_v51 = vld [vmem:[%s1218_s0 + $0x9c] sm:$0xf0] }
   0xf   :  { %851 = vmatpush.bf16.msra.mxu3 %v795_v11  ;;  %395 = vmatpush.bf16.msra.mxu1 %v803_v12  ;;  %v773_v52 = vld [vmem:[%s1218_s0 + $0x34] sm:$0xf]  ;;  %v619_v53 = vld [vmem:[%s1218_s0 + $0x3c] sm:$0xf0]  ;;  %v618_v54 = vor.u32 %v774_v49, %v617_v48  ;;  %v670_v55 = vor.u32 %v785_v50, %v667_v51  ;;  %v649_v57 = vld [vmem:[%s1218_s0 + $0x68] sm:$0xf] }
  0x10   :  { %v622_v56 = vor.u32 %v773_v52, %v619_v53  ;;  %v781_v58 = vld [vmem:[%s1218_s0 + $0x70] sm:$0xf0]  ;;  %v629_v60 = vld [vmem:[%s1218_s0 + $0x48] sm:$0xf]  ;;  %v788_v62 = vld [vmem:[%s1218_s0 + $0xac] sm:$0xf] }
  0x11   :  { %v650_v59 = vor.u32 %v781_v58, %v649_v57  ;;  %v777_v61 = vld [vmem:[%s1218_s0 + $0x50] sm:$0xf0]  ;;  %v679_v63 = vld [vmem:[%s1218_s0 + $0xb4] sm:$0xf0]  ;;  %v776_v0 = vld [vmem:[%s1218_s0 + $0x4c] sm:$0xf] }
  0x12   :  { %347 = vmatpush.bf16.msra.mxu0 %v794_v13  ;;  %v631_v1 = vld [vmem:[%s1218_s0 + $0x54] sm:$0xf0]  ;;  %v682_v3 = vor.u32 %v788_v62, %v679_v63  ;;  %v784_v6 = vld [vmem:[%s1218_s0 + $0x88] sm:$0xf0]  ;;  %v641_v8 = vld [vmem:[%s1218_s0 + $0x60] sm:$0xf] }
  0x13   :  { %852 = vmatpush.bf16.msra.mxu3 %v794_v13  ;;  %396 = vmatpush.bf16.msra.mxu1 %v802_v14  ;;  %v634_v4 = vor.u32 %v776_v0, %v631_v1  ;;  %v780_v9 = vld [vmem:[%s1218_s0 + $0x68] sm:$0xf0]  ;;  %v643_v11 = vld [vmem:[%s1218_s0 + $0x6c] sm:$0xf0]  ;;  %v653_v17 = vld [vmem:[%s1218_s0 + $0x78] sm:$0xf] }
  0x14   :  { %v783_v18 = vld [vmem:[%s1218_s0 + $0x80] sm:$0xf0]  ;;  %v790_v24 = vld [vmem:[%s1218_s0 + $0xb8] sm:$0xf0]  ;;  %v1099_v28 = vld [vmem:[%s1219_s2] ss:$0 sm:$0xff] }
  0x15   :  { %v841_v50 = vld [vmem:[%s1220_s3 + $0x8] sm:$0xff]  }
  0x16   :  { %348 = vmatpush.bf16.msra.mxu0 %v793_v15 }
  0x17   :  { %853 = vmatpush.bf16.msra.mxu3 %v793_v15  ;;  %397 = vmatpush.bf16.msra.mxu1 %v801_v16  ;;  %v787_v15 = vld [vmem:[%s1218_s0 + $0xa0] sm:$0xf0] }
  0x1a   :  { %760 = vmatmul.msk.bf16.gmra.mxu2 %vm318_vm0, %v614_v19  ;;  %349 = vmatpush.bf16.msra.mxu0 %v792_v20  ;;  %v782_v19 = vld [vmem:[%s1218_s0 + $0x7c] sm:$0xf] }
  0x1b   :  { %854 = vmatpush.bf16.msra.mxu3 %v792_v20  ;;  %398 = vmatpush.bf16.msra.mxu1 %v800_v21  ;;  %v655_v20 = vld [vmem:[%s1218_s0 + $0x84] sm:$0xf0] }
  0x1e   :  { %350 = vmatpush.bf16.msra.mxu0 %v791_v22 }
  0x1f   :  { %855 = vmatpush.bf16.msra.mxu3 %v791_v22  ;;  %399 = vmatpush.bf16.msra.mxu1 %v799_v23  ;;  %v658_v22 = vor.u32 %v782_v19, %v655_v20 }
  0x21   :  { %351 = vmatmul.bf16.vlgmr.msra.gmra.mxu0 %v594_v30 }
  0x22   :  { %381 = vmatmul.bf16.vlgmr.msra.gmra.mxu3 %v666_v31  ;;  %400 = vmatmul.bf16.vlgmr.msra.gmra.mxu1 %v598_v32  ;;  %v810_v31 = vld [vmem:[%s1220_s3] sm:$0xff]  }
  0x23   :  { %856 = vmatpush.bf16.msrb.mxu3 %v806_v2  ;;  %v630_v2 = vor.u32 %v777_v61, %v629_v60  ;;  %v812_v45 = vunpack.c.h.bf16 %v810_v31 }
  0x27   :  { %857 = vmatpush.bf16.msrb.mxu3 %v805_v5  ;;  %v661_v5 = vld [vmem:[%s1218_s0 + $0x80] sm:$0xf] }
  0x28   :  { %v662_v7 = vor.u32 %v784_v6, %v661_v5 }
  0x2a   :  { %761 = vmatmul.msk.bf16.gmra.mxu2 %vm318_vm0, %v626_v35  ;;  %v811_v35 = vunpack.c.l.bf16 %v810_v31  ;;  %v843_v31 = vld [vmem:[%s1220_s3 + $0x18] sm:$0xff]  }
  0x2b   :  { %858 = vmatpush.bf16.msrb.mxu3 %v804_v10  ;;  %v779_v10 = vld [vmem:[%s1218_s0 + $0x64] sm:$0xf] }
  0x2c   :  { %v646_v13 = vor.u32 %v779_v10, %v643_v11 }
  0x2f   :  { %859 = vmatpush.bf16.msrb.mxu3 %v803_v12  ;;  %v642_v12 = vor.u32 %v780_v9, %v641_v8  ;;  %v842_v8 = vld [vmem:[%s1220_s3 + $0x10] sm:$0xff]  }
  0x31   :  { %356 = vmatmul.bf16.gmra.mxu0 %v606_v42 }
  0x32   :  { %386 = vmatmul.bf16.gmra.mxu3 %v678_v43  ;;  %405 = vmatmul.bf16.gmra.mxu1 %v610_v44 }
  0x33   :  { %860 = vmatpush.bf16.msrb.mxu3 %v802_v14  ;;  %v673_v14 = vld [vmem:[%s1218_s0 + $0x98] sm:$0xf] }
  0x37   :  { %861 = vmatpush.bf16.msrb.mxu3 %v801_v16  ;;  %v674_v16 = vor.u32 %v787_v15, %v673_v14  ;;  %v819_v14 = vunpack.c.l.bf16 %v842_v8 }
  0x3a   :  { %762 = vmatmul.msk.bf16.gmra.mxu2 %vm318_vm0, %v638_v47 }
  0x3b   :  { %862 = vmatpush.bf16.msrb.mxu3 %v800_v21  ;;  %v654_v21 = vor.u32 %v783_v18, %v653_v17 }
  0x3f   :  { %863 = vmatpush.bf16.msrb.mxu3 %v799_v23  ;;  %v685_v23 = vld [vmem:[%s1218_s0 + $0xb0] sm:$0xf] }
  0x40   :  { %v686_v25 = vor.u32 %v790_v24, %v685_v23 }
  0x41   :  { %361 = vmatmul.bf16.gmra.mxu0 %v618_v54 }
  0x42   :  { %430 = vmatmul.bf16.vlgmr.msrb.gmra.mxu3 %v670_v55  ;;  %410 = vmatmul.bf16.gmra.mxu1 %v622_v56  ;;  %v815_v56 = vunpack.c.l.bf16 %v841_v50 }
  0x4a   :  { %763 = vmatmul.msk.bf16.gmra.mxu2 %vm318_vm0, %v650_v59 }
  0x51   :  { %366 = vmatmul.bf16.gmra.mxu0 %v630_v2  ;;  %v816_v2 = vunpack.c.h.bf16 %v841_v50 }
  0x52   :  { %435 = vmatmul.bf16.gmra.mxu3 %v682_v3  ;;  %415 = vmatmul.bf16.gmra.mxu1 %v634_v4 }
  0x5a   :  { %764 = vmatmul.msk.bf16.gmra.mxu2 %vm318_vm0, %v662_v7 }
  0x61   :  { %371 = vmatmul.bf16.gmra.mxu0 %v642_v12 }
  0x62   :  { %420 = vmatmul.bf16.gmra.mxu1 %v646_v13 }
  0x6a   :  { %765 = vmatmul.msk.bf16.gmra.mxu2 %vm318_vm0, %v674_v16 }
  0x71   :  { %376 = vmatmul.bf16.gmra.mxu0 %v654_v21 }
  0x72   :  { %425 = vmatmul.bf16.gmra.mxu1 %v658_v22 }
  0x7a   :  { %766 = vmatmul.msk.bf16.gmra.mxu2 %vm318_vm0, %v686_v25  ;;  %v820_v25 = vunpack.c.h.bf16 %v842_v8 }
  0x8d   :  { %v450_v26 = vpop.f32.mrf.mxu2 }
  0x95   :  { %v452_v27 = vpop.f32.mrf.mxu2 }
  0x9d   :  { %v455_v29 = vpop.f32.mrf.mxu2 }
  0x9e   :  { %v352_v30 = vpop.f32.mrf.mxu0 }
  0x9f   :  { %v353_v32 = vadd.f32 %v1099_v28, %v352_v30  ;;  %v401_v33 = vpop.f32.mrf.mxu1 }
  0xa1   :  { %v402_v34 = vadd.f32 %v401_v33, %v353_v32 }
  0xa3   :  { %v451_v36 = vadd.f32 %v450_v26, %v402_v34 }
  0xa5   :  { %v522_v37 = vadd.f32 %v811_v35, %v451_v36  ;;  %v457_v38 = vpop.f32.mrf.mxu2  ;;  %v1119_v3 = vpop.f32.mrf.mxu3 }
  0xa6   :  { %v354_v39 = vpop.f32.mrf.mxu0 }
  0xa7   :  { %v538_v40 = vmax.f32 %v522_v37, 0.0  ;;  %v355_v41 = vadd.f32 %v1099_v28, %v354_v39  ;;  %v403_v42 = vpop.f32.mrf.mxu1 }
  0xa9   :  { %v554_v43 = vpack.c.bf16 %v538_v40, %v538_v40  ;;  %v404_v44 = vadd.f32 %v403_v42, %v355_v41 }
  0xab   :  { %571 = vst.msk [vmem:[%s1221_s4] sm:$0xf] %vm570_vm1, %v554_v43  ;;  %v453_v46 = vadd.f32 %v452_v27, %v404_v44 }
  0xad   :  { %v523_v47 = vadd.f32 %v812_v45, %v453_v46  ;;  %v460_v48 = vpop.f32.mrf.mxu2  ;;  %v1133_v16 = vpop.f32.mrf.mxu3 }
  0xae   :  { %v357_v49 = vpop.f32.mrf.mxu0 }
  0xaf   :  { %v539_v51 = vmax.f32 %v523_v47, 0.0  ;;  %v358_v52 = vadd.f32 %v1099_v28, %v357_v49  ;;  %v406_v53 = vpop.f32.mrf.mxu1  ;;  %v824_v49 = vunpack.c.h.bf16 %v843_v31 }
  0xb1   :  { %v555_v54 = vpack.c.bf16 %v539_v51, %v539_v51  ;;  %v407_v55 = vadd.f32 %v406_v53, %v358_v52 }
  0xb3   :  { %572 = vst.msk [vmem:[%s1221_s4 + $0x4] sm:$0xf] %vm570_vm1, %v555_v54  ;;  %v456_v57 = vadd.f32 %v455_v29, %v407_v55  ;;  %v844_v54 = vld [vmem:[%s1220_s3 + $0x20] sm:$0xff]  }
  0xb5   :  { %v524_v58 = vadd.f32 %v815_v56, %v456_v57  ;;  %v462_v59 = vpop.f32.mrf.mxu2  ;;  %v1143_v32 = vpop.f32.mrf.mxu3 }
  0xb6   :  { %v359_v60 = vpop.f32.mrf.mxu0 }
  0xb7   :  { %v540_v61 = vmax.f32 %v524_v58, 0.0  ;;  %v360_v62 = vadd.f32 %v1099_v28, %v359_v60  ;;  %v408_v63 = vpop.f32.mrf.mxu1  ;;  %v827_v60 = vunpack.c.l.bf16 %v844_v54 }
  0xb9   :  { %v556_v0 = vpack.c.bf16 %v540_v61, %v540_v61  ;;  %v409_v1 = vadd.f32 %v408_v63, %v360_v62 }
  0xbb   :  { %573 = vst.msk [vmem:[%s1221_s4 + $0x8] sm:$0xf] %vm570_vm1, %v556_v0  ;;  %v458_v4 = vadd.f32 %v457_v38, %v409_v1  ;;  %v823_v38 = vunpack.c.l.bf16 %v843_v31 }
  0xbd   :  { %v525_v5 = vadd.f32 %v816_v2, %v458_v4  ;;  %v465_v6 = vpop.f32.mrf.mxu2  ;;  %v1151_v46 = vpop.f32.mrf.mxu3 }
  0xbe   :  { %v362_v7 = vpop.f32.mrf.mxu0 }
  0xbf   :  { %v541_v9 = vmax.f32 %v525_v5, 0.0  ;;  %v363_v10 = vadd.f32 %v1099_v28, %v362_v7  ;;  %v411_v11 = vpop.f32.mrf.mxu1 }
  0xc1   :  { %v557_v12 = vpack.c.bf16 %v541_v9, %v541_v9  ;;  %v412_v13 = vadd.f32 %v411_v11, %v363_v10  ;;  %v828_v9 = vunpack.c.h.bf16 %v844_v54  ;;  %v846_v10 = vld [vmem:[%s1220_s3 + $0x30] sm:$0xff]  }
  0xc3   :  { %574 = vst.msk [vmem:[%s1221_s4 + $0xc] sm:$0xf] %vm570_vm1, %v557_v12  ;;  %v461_v15 = vadd.f32 %v460_v48, %v412_v13  ;;  %v835_v13 = vunpack.c.l.bf16 %v846_v10 }
  0xc5   :  { %v526_v17 = vadd.f32 %v819_v14, %v461_v15  ;;  %v467_v18 = vpop.f32.mrf.mxu2  ;;  %v431_v61 = vpop.f32.mrf.mxu3 }
  0xc6   :  { %v364_v19 = vpop.f32.mrf.mxu0 }
  0xc7   :  { %v542_v20 = vmax.f32 %v526_v17, 0.0  ;;  %v365_v21 = vadd.f32 %v1099_v28, %v364_v19  ;;  %v413_v22 = vpop.f32.mrf.mxu1  ;;  %v845_v19 = vld [vmem:[%s1220_s3 + $0x28] sm:$0xff]  }
  0xc9   :  { %v558_v23 = vpack.c.bf16 %v542_v20, %v542_v20  ;;  %v414_v24 = vadd.f32 %v413_v22, %v365_v21 }
  0xcb   :  { %575 = vst.msk [vmem:[%s1221_s4 + $0x10] sm:$0xf] %vm570_vm1, %v558_v23  ;;  %v463_v26 = vadd.f32 %v462_v59, %v414_v24  ;;  %v385_v23 = vadd.f32 %v1099_v28, %v1133_v16 }
  0xcd   :  { %v527_v27 = vadd.f32 %v820_v25, %v463_v26  ;;  %v470_v29 = vpop.f32.mrf.mxu2  ;;  %v433_v14 = vpop.f32.mrf.mxu3 }
  0xce   :  { %v367_v30 = vpop.f32.mrf.mxu0  ;;  %v434_v31 = vadd.f32 %v433_v14, %v385_v23 }
  0xcf   :  { %v543_v33 = vmax.f32 %v527_v27, 0.0  ;;  %v368_v34 = vadd.f32 %v1099_v28, %v367_v30  ;;  %v416_v35 = vpop.f32.mrf.mxu1  ;;  %v831_v27 = vunpack.c.l.bf16 %v845_v19 }
  0xd1   :  { %v559_v36 = vpack.c.bf16 %v543_v33, %v543_v33  ;;  %v417_v37 = vadd.f32 %v416_v35, %v368_v34  ;;  %v836_v34 = vunpack.c.h.bf16 %v846_v10 }
  0xd3   :  { %576 = vst.msk [vmem:[%s1221_s4 + $0x14] sm:$0xf] %vm570_vm1, %v559_v36  ;;  %v466_v39 = vadd.f32 %v465_v6, %v417_v37  ;;  %v383_v6 = vadd.f32 %v1099_v28, %v1119_v3 }
  0xd5   :  { %v528_v40 = vadd.f32 %v823_v38, %v466_v39  ;;  %v472_v41 = vpop.f32.mrf.mxu2  ;;  %v432_v12 = vadd.f32 %v431_v61, %v383_v6  ;;  %v436_v38 = vpop.f32.mrf.mxu3 }
  0xd6   :  { %v369_v42 = vpop.f32.mrf.mxu0 }
  0xd7   :  { %v544_v43 = vmax.f32 %v528_v40, 0.0  ;;  %v370_v44 = vadd.f32 %v1099_v28, %v369_v42  ;;  %v418_v45 = vpop.f32.mrf.mxu1  ;;  %v388_v42 = vadd.f32 %v1099_v28, %v1143_v32 }
  0xd9   :  { %v560_v47 = vpack.c.bf16 %v544_v43, %v544_v43  ;;  %v419_v48 = vadd.f32 %v418_v45, %v370_v44 }
  0xdb   :  { %577 = vst.msk [vmem:[%s1221_s4 + $0x18] sm:$0xf] %vm570_vm1, %v560_v47  ;;  %v468_v50 = vadd.f32 %v467_v18, %v419_v48  ;;  %v832_v47 = vunpack.c.h.bf16 %v845_v19  ;;  %v847_v48 = vld [vmem:[%s1220_s3 + $0x38] sm:$0xff]  }
  0xdd   :  { %v529_v51 = vadd.f32 %v824_v49, %v468_v50  ;;  %v475_v52 = vpop.f32.mrf.mxu2 }
  0xde   :  { %v372_v53 = vpop.f32.mrf.mxu0 }
  0xdf   :  { %v545_v55 = vmax.f32 %v529_v51, 0.0  ;;  %v373_v56 = vadd.f32 %v1099_v28, %v372_v53  ;;  %v421_v57 = vpop.f32.mrf.mxu1  ;;  %v437_v51 = vadd.f32 %v436_v38, %v388_v42  ;;  %v839_v53 = vunpack.c.l.bf16 %v847_v48 }
  0xe1   :  { %v561_v58 = vpack.c.bf16 %v545_v55, %v545_v55  ;;  %v422_v59 = vadd.f32 %v421_v57, %v373_v56  ;;  %v390_v57 = vadd.f32 %v1099_v28, %v1151_v46 }
  0xe3   :  { %578 = vst.msk [vmem:[%s1221_s4 + $0x1c] sm:$0xf] %vm570_vm1, %v561_v58  ;;  %v471_v62 = vadd.f32 %v470_v29, %v422_v59  ;;  %v438_v59 = vpop.f32.mrf.mxu3 }
  0xe5   :  { %v530_v63 = vadd.f32 %v827_v60, %v471_v62  ;;  %v477_v0 = vpop.f32.mrf.mxu2  ;;  %v439_v62 = vadd.f32 %v438_v59, %v390_v57 }
  0xe6   :  { %v374_v1 = vpop.f32.mrf.mxu0 }
  0xe7   :  { %v546_v2 = vmax.f32 %v530_v63, 0.0  ;;  %v375_v4 = vadd.f32 %v1099_v28, %v374_v1  ;;  %v423_v5 = vpop.f32.mrf.mxu1 }
  0xe9   :  { %v562_v7 = vpack.c.bf16 %v546_v2, %v546_v2  ;;  %v424_v8 = vadd.f32 %v423_v5, %v375_v4 }
  0xeb   :  { %579 = vst.msk [vmem:[%s1221_s4 + $0x20] sm:$0xf] %vm570_vm1, %v562_v7  ;;  %v473_v11 = vadd.f32 %v472_v41, %v424_v8 }
  0xed   :  { %v531_v15 = vadd.f32 %v828_v9, %v473_v11  ;;  %v480_v17 = vpop.f32.mrf.mxu2 }
  0xee   :  { %v481_v18 = vadd.f32 %v480_v17, %v432_v12  ;;  %v377_v3 = vpop.f32.mrf.mxu0 }
  0xef   :  { %v547_v20 = vmax.f32 %v531_v15, 0.0  ;;  %v378_v21 = vadd.f32 %v1099_v28, %v377_v3  ;;  %v426_v22 = vpop.f32.mrf.mxu1 }
  0xf0   :  { %v534_v24 = vadd.f32 %v835_v13, %v481_v18 }
  0xf1   :  { %v563_v25 = vpack.c.bf16 %v547_v20, %v547_v20  ;;  %v427_v26 = vadd.f32 %v426_v22, %v378_v21 }
  0xf2   :  { %v550_v29 = vmax.f32 %v534_v24, 0.0 }
  0xf3   :  { %580 = vst.msk [vmem:[%s1221_s4 + $0x24] sm:$0xf] %vm570_vm1, %v563_v25  ;;  %v476_v30 = vadd.f32 %v475_v52, %v427_v26 }
  0xf4   :  { %v566_v33 = vpack.c.bf16 %v550_v29, %v550_v29 }
  0xf5   :  { %v532_v35 = vadd.f32 %v831_v27, %v476_v30  ;;  %v482_v36 = vpop.f32.mrf.mxu2 }
  0xf6   :  { %583 = vst.msk [vmem:[%s1221_s4 + $0x30] sm:$0xf] %vm570_vm1, %v566_v33  ;;  %v483_v16 = vadd.f32 %v482_v36, %v434_v31  ;;  %v379_v37 = vpop.f32.mrf.mxu0 }
  0xf7   :  { %v548_v39 = vmax.f32 %v532_v35, 0.0  ;;  %v380_v40 = vadd.f32 %v1099_v28, %v379_v37  ;;  %v428_v41 = vpop.f32.mrf.mxu1 }
  0xf8   :  { %v535_v43 = vadd.f32 %v836_v34, %v483_v16 }
  0xf9   :  { %v564_v44 = vpack.c.bf16 %v548_v39, %v548_v39  ;;  %v429_v45 = vadd.f32 %v428_v41, %v380_v40 }
  0xfa   :  { %v551_v49 = vmax.f32 %v535_v43, 0.0 }
  0xfb   :  { %581 = vst.msk [vmem:[%s1221_s4 + $0x28] sm:$0xf] %vm570_vm1, %v564_v44  ;;  %v478_v50 = vadd.f32 %v477_v0, %v429_v45  ;;  %v840_v0 = vunpack.c.h.bf16 %v847_v48 }
  0xfc   :  { %v567_v52 = vpack.c.bf16 %v551_v49, %v551_v49 }
  0xfd   :  { %v533_v54 = vadd.f32 %v832_v47, %v478_v50  ;;  %v485_v32 = vpop.f32.mrf.mxu2 }
  0xfe   :  { %584 = vst.msk [vmem:[%s1221_s4 + $0x34] sm:$0xf] %vm570_vm1, %v567_v52  ;;  %v486_v55 = vadd.f32 %v485_v32, %v437_v51 }
  0xff   :  { %v549_v56 = vmax.f32 %v533_v54, 0.0 }
 0x100   :  { %v536_v58 = vadd.f32 %v839_v53, %v486_v55 }
 0x101   :  { %v565_v60 = vpack.c.bf16 %v549_v56, %v549_v56 }
 0x102   :  { %v552_v61 = vmax.f32 %v536_v58, 0.0 }
 0x103   :  { %582 = vst.msk [vmem:[%s1221_s4 + $0x2c] sm:$0xf] %vm570_vm1, %v565_v60 }
 0x104   :  { %v568_v63 = vpack.c.bf16 %v552_v61, %v552_v61 }
 0x105   :  { %v487_v1 = vpop.f32.mrf.mxu2 }
 0x106   :  { %585 = vst.msk [vmem:[%s1221_s4 + $0x38] sm:$0xf] %vm570_vm1, %v568_v63  ;;  %v488_v2 = vadd.f32 %v487_v1, %v439_v62 }
 0x108   :  { %v537_v28 = vadd.f32 %v840_v0, %v488_v2 }
 0x10a   :  { %v553_v46 = vmax.f32 %v537_v28, 0.0 }
 0x10c   :  { %v569_v4 = vpack.c.bf16 %v553_v46, %v553_v46 }
 0x10e   :  { %586 = vst.msk [vmem:[%s1221_s4 + $0x3c] sm:$0xf] %vm570_vm1, %v569_v4 }

// kernel: _lambda_.56
= control target key start
LH: loop header
LB: loop body
LE: loop exit
PB: predicated region body
PF: predicated region fallthrough
CT: control target
= control target key end

     0   :  { %vm2948_vm0 = vcmask 257024   ;;  %s6019_s1 = inlined_call_operand.vmem [shape: bf16[2304,32], index: 1, kind: input, shape index: {}]   ;;  %s6020_s2 = inlined_call_operand.vmem [shape: f32[1,32], index: 2, kind: input, shape index: {}]   ;;  %s6021_s0 = inlined_call_operand.vmem [shape: bf16[128,2304], index: 0, kind: input, shape index: {}]   ;;  %s6022_s3 = inlined_call_operand.vmem [shape: bf16[128,32], index: 3, kind: output, shape index: {}]  }
   0x1   :  { %v4272_v0 = vld [vmem:[%s6019_s1 + $0x38] sm:$0xff]  ;;  %v4271_v2 = vld [vmem:[%s6019_s1 + $0x30] sm:$0xff]  ;;  %v4270_v4 = vld [vmem:[%s6019_s1 + $0x28] sm:$0xff] }
   0x2   :  { %v4280_v1 = vld [vmem:[%s6019_s1 + $0x78] sm:$0xff]  ;;  %4409 = vmatpush.bf16.msra.mxu2 %v4272_v0  ;;  %v4279_v3 = vld [vmem:[%s6019_s1 + $0x70] sm:$0xff]  ;;  %2034 = vmatpush.bf16.msra.mxu0 %v4272_v0  ;;  %v4278_v5 = vld [vmem:[%s6019_s1 + $0x68] sm:$0xff] }
   0x3   :  { %4417 = vmatpush.bf16.msra.mxu3 %v4280_v1  ;;  %2083 = vmatpush.bf16.msra.mxu1 %v4280_v1  ;;  %v4269_v6 = vld [vmem:[%s6019_s1 + $0x20] sm:$0xff]  ;;  %v4268_v8 = vld [vmem:[%s6019_s1 + $0x18] sm:$0xff]  ;;  %v4267_v10 = vld [vmem:[%s6019_s1 + $0x10] sm:$0xff] }
   0x4   :  { %v4277_v7 = vld [vmem:[%s6019_s1 + $0x60] sm:$0xff]  ;;  %v4276_v9 = vld [vmem:[%s6019_s1 + $0x58] sm:$0xff]  ;;  %v4275_v11 = vld [vmem:[%s6019_s1 + $0x50] sm:$0xff] }
   0x5   :  { %v4266_v12 = vld [vmem:[%s6019_s1 + $0x8] sm:$0xff]  ;;  %v4265_v14 = vld [vmem:[%s6019_s1] sm:$0xff]  ;;  %v4288_v20 = vld [vmem:[%s6019_s1 + $0xb8] sm:$0xff] }
   0x6   :  { %4410 = vmatpush.bf16.msra.mxu2 %v4271_v2  ;;  %2035 = vmatpush.bf16.msra.mxu0 %v4271_v2  ;;  %v4274_v13 = vld [vmem:[%s6019_s1 + $0x48] sm:$0xff]  ;;  %v4273_v15 = vld [vmem:[%s6019_s1 + $0x40] sm:$0xff]  ;;  %v4296_v23 = vld [vmem:[%s6019_s1 + $0xf8] sm:$0xff] }
   0x7   :  { %4418 = vmatpush.bf16.msra.mxu3 %v4279_v3  ;;  %2084 = vmatpush.bf16.msra.mxu1 %v4279_v3  ;;  %v3259_v16 = vld [vmem:[%s6021_s0 + $0x240] sm:$0xf]  ;;  %v4202_v17 = vld [vmem:[%s6021_s0 + $0x284] sm:$0xf0]  ;;  %v4193_v18 = vld [vmem:[%s6021_s0 + $0x244] sm:$0xf] }
   0x8   :  { %v3261_v19 = vld [vmem:[%s6021_s0 + $0x288] sm:$0xf0]  ;;  %v2971_v21 = vld [vmem:[%s6021_s0] sm:$0xf]  ;;  %v4130_v22 = vld [vmem:[%s6021_s0 + $0x44] sm:$0xf0]  ;;  %v3260_v26 = vor.u32 %v4202_v17, %v3259_v16 }
   0x9   :  { %v4121_v24 = vld [vmem:[%s6021_s0 + $0x4] sm:$0xf]  ;;  %v2973_v25 = vld [vmem:[%s6021_s0 + $0x48] sm:$0xf0]  ;;  %v3264_v27 = vor.u32 %v4193_v18, %v3261_v19  ;;  %v2972_v28 = vor.u32 %v4130_v22, %v2971_v21  ;;  %v4312_v29 = vld [vmem:[%s6019_s1 + $0x178] sm:$0xff] }
   0xa   :  { %4411 = vmatpush.bf16.msra.mxu2 %v4270_v4  ;;  %2036 = vmatpush.bf16.msra.mxu0 %v4270_v4  ;;  %v2976_v30 = vor.u32 %v4121_v24, %v2973_v25  ;;  %v4287_v31 = vld [vmem:[%s6019_s1 + $0xb0] sm:$0xff]  ;;  %v4304_v33 = vld [vmem:[%s6019_s1 + $0x138] sm:$0xff]  ;;  %v4286_v35 = vld [vmem:[%s6019_s1 + $0xa8] sm:$0xff] }
   0xb   :  { %4419 = vmatpush.bf16.msra.mxu3 %v4278_v5  ;;  %2085 = vmatpush.bf16.msra.mxu1 %v4278_v5  ;;  %v4295_v32 = vld [vmem:[%s6019_s1 + $0xf0] sm:$0xff]  ;;  %v4294_v36 = vld [vmem:[%s6019_s1 + $0xe8] sm:$0xff]  ;;  %v4285_v39 = vld [vmem:[%s6019_s1 + $0xa0] sm:$0xff] }
   0xc   :  { %v4311_v34 = vld [vmem:[%s6019_s1 + $0x170] sm:$0xff]  ;;  %v4310_v38 = vld [vmem:[%s6019_s1 + $0x168] sm:$0xff]  ;;  %v4293_v40 = vld [vmem:[%s6019_s1 + $0xe0] sm:$0xff] }
   0xd   :  { %v4303_v37 = vld [vmem:[%s6019_s1 + $0x130] sm:$0xff]  ;;  %v4302_v41 = vld [vmem:[%s6019_s1 + $0x128] sm:$0xff]  ;;  %v4220_v43 = vld [vmem:[%s6021_s0 + $0x314] sm:$0xf0] }
   0xe   :  { %4412 = vmatpush.bf16.msra.mxu2 %v4269_v6  ;;  %2037 = vmatpush.bf16.msra.mxu0 %v4269_v6  ;;  %v3331_v42 = vld [vmem:[%s6021_s0 + $0x2d0] sm:$0xf]  ;;  %v4211_v44 = vld [vmem:[%s6021_s0 + $0x2d4] sm:$0xf]  ;;  %v3333_v45 = vld [vmem:[%s6021_s0 + $0x318] sm:$0xf0] }
   0xf   :  { %4420 = vmatpush.bf16.msra.mxu3 %v4277_v7  ;;  %2086 = vmatpush.bf16.msra.mxu1 %v4277_v7  ;;  %v3043_v46 = vld [vmem:[%s6021_s0 + $0x90] sm:$0xf]  ;;  %v4309_v47 = vld [vmem:[%s6019_s1 + $0x160] sm:$0xff]  ;;  %v4148_v48 = vld [vmem:[%s6021_s0 + $0xd4] sm:$0xf0]  ;;  %v3332_v54 = vor.u32 %v4220_v43, %v3331_v42  ;;  %v3336_v55 = vor.u32 %v4211_v44, %v3333_v45 }
  0x10   :  { %v4139_v49 = vld [vmem:[%s6021_s0 + $0x94] sm:$0xf]  ;;  %v4284_v50 = vld [vmem:[%s6019_s1 + $0x98] sm:$0xff]  ;;  %v4301_v53 = vld [vmem:[%s6019_s1 + $0x120] sm:$0xff]  ;;  %v3044_v56 = vor.u32 %v4148_v48, %v3043_v46 }
  0x11   :  { %v3045_v51 = vld [vmem:[%s6021_s0 + $0xd8] sm:$0xf0]  ;;  %v4283_v59 = vld [vmem:[%s6019_s1 + $0x90] sm:$0xff]  ;;  %v4282_v62 = vld [vmem:[%s6019_s1 + $0x88] sm:$0xff] }
  0x12   :  { %4413 = vmatpush.bf16.msra.mxu2 %v4268_v8  ;;  %2038 = vmatpush.bf16.msra.mxu0 %v4268_v8  ;;  %v4292_v52 = vld [vmem:[%s6019_s1 + $0xd8] sm:$0xff]  ;;  %v3048_v58 = vor.u32 %v4139_v49, %v3045_v51  ;;  %v4291_v60 = vld [vmem:[%s6019_s1 + $0xd0] sm:$0xff]  ;;  %v4290_v0 = vld [vmem:[%s6019_s1 + $0xc8] sm:$0xff] }
  0x13   :  { %4421 = vmatpush.bf16.msra.mxu3 %v4276_v9  ;;  %2087 = vmatpush.bf16.msra.mxu1 %v4276_v9  ;;  %v4308_v57 = vld [vmem:[%s6019_s1 + $0x158] sm:$0xff]  ;;  %v4307_v63 = vld [vmem:[%s6019_s1 + $0x150] sm:$0xff]  ;;  %v4306_v2 = vld [vmem:[%s6019_s1 + $0x148] sm:$0xff] }
  0x14   :  { %v4300_v61 = vld [vmem:[%s6019_s1 + $0x118] sm:$0xff]  ;;  %v4299_v1 = vld [vmem:[%s6019_s1 + $0x110] sm:$0xff]  ;;  %v4281_v3 = vld [vmem:[%s6019_s1 + $0x80] sm:$0xff] }
  0x15   :  { %v4289_v4 = vld [vmem:[%s6019_s1 + $0xc0] sm:$0xff]  ;;  %v4298_v5 = vld [vmem:[%s6019_s1 + $0x108] sm:$0xff]  ;;  %v4328_v21 = vld [vmem:[%s6019_s1 + $0x1f8] sm:$0xff] }
  0x16   :  { %4414 = vmatpush.bf16.msra.mxu2 %v4267_v10  ;;  %2039 = vmatpush.bf16.msra.mxu0 %v4267_v10  ;;  %v3403_v6 = vld [vmem:[%s6021_s0 + $0x360] sm:$0xf]  ;;  %v4238_v7 = vld [vmem:[%s6021_s0 + $0x3a4] sm:$0xf0]  ;;  %v4229_v8 = vld [vmem:[%s6021_s0 + $0x364] sm:$0xf] }
  0x17   :  { %4422 = vmatpush.bf16.msra.mxu3 %v4275_v11  ;;  %2088 = vmatpush.bf16.msra.mxu1 %v4275_v11  ;;  %v3405_v9 = vld [vmem:[%s6021_s0 + $0x3a8] sm:$0xf0]  ;;  %v3115_v10 = vld [vmem:[%s6021_s0 + $0x120] sm:$0xf]  ;;  %v4166_v11 = vld [vmem:[%s6021_s0 + $0x164] sm:$0xf0] }
  0x18   :  { %v3408_v16 = vor.u32 %v4229_v8, %v3405_v9  ;;  %v3116_v17 = vor.u32 %v4166_v11, %v3115_v10  ;;  %v4305_v19 = vld [vmem:[%s6019_s1 + $0x140] sm:$0xff]  ;;  %v4336_v22 = vld [vmem:[%s6019_s1 + $0x238] sm:$0xff]  ;;  %v3475_v24 = vld [vmem:[%s6021_s0 + $0x3f0] sm:$0xf] }
  0x19   :  { %v4256_v25 = vld [vmem:[%s6021_s0 + $0x434] sm:$0xf0]  ;;  %v4122_v42 = vld [vmem:[%s6021_s0 + $0xc] sm:$0xf]  ;;  %v2981_v43 = vld [vmem:[%s6021_s0 + $0x50] sm:$0xf0] }
  0x1a   :  { %4415 = vmatpush.bf16.msra.mxu2 %v4266_v12  ;;  %2040 = vmatpush.bf16.msra.mxu0 %v4266_v12  ;;  %v4157_v12 = vld [vmem:[%s6021_s0 + $0x124] sm:$0xf]  ;;  %v2987_v44 = vld [vmem:[%s6021_s0 + $0x10] sm:$0xf]  ;;  %v4132_v45 = vld [vmem:[%s6021_s0 + $0x54] sm:$0xf0]  ;;  %v2984_v49 = vor.u32 %v4122_v42, %v2981_v43 }
  0x1b   :  { %4423 = vmatpush.bf16.msra.mxu3 %v4274_v13  ;;  %2089 = vmatpush.bf16.msra.mxu1 %v4274_v13  ;;  %v3117_v13 = vld [vmem:[%s6021_s0 + $0x168] sm:$0xf0]  ;;  %v4123_v46 = vld [vmem:[%s6021_s0 + $0x14] sm:$0xf]  ;;  %v3123_v8 = vld [vmem:[%s6021_s0 + $0x128] sm:$0xf] }
  0x1c   :  { %v3120_v18 = vor.u32 %v4157_v12, %v3117_v13  ;;  %v4167_v9 = vld [vmem:[%s6021_s0 + $0x16c] sm:$0xf0]  ;;  %v4158_v10 = vld [vmem:[%s6021_s0 + $0x12c] sm:$0xf]  ;;  %v3125_v11 = vld [vmem:[%s6021_s0 + $0x170] sm:$0xf0] }
  0x1d   :  { %v3131_v12 = vld [vmem:[%s6021_s0 + $0x130] sm:$0xf]  ;;  %v4168_v13 = vld [vmem:[%s6021_s0 + $0x174] sm:$0xf0] }
  0x1e   :  { %4416 = vmatpush.bf16.msra.mxu2 %v4265_v14  ;;  %2041 = vmatpush.bf16.msra.mxu0 %v4265_v14  ;;  %v4297_v14 = vld [vmem:[%s6019_s1 + $0x100] sm:$0xff]  ;;  %v4331_v42 = vld [vmem:[%s6019_s1 + $0x210] sm:$0xff] }
  0x1f   :  { %4424 = vmatpush.bf16.msra.mxu3 %v4273_v15  ;;  %2090 = vmatpush.bf16.msra.mxu1 %v4273_v15  ;;  %v3404_v15 = vor.u32 %v4238_v7, %v3403_v6  ;;  %v4333_v6 = vld [vmem:[%s6019_s1 + $0x220] sm:$0xff]  ;;  %v3275_v43 = vld [vmem:[%s6021_s0 + $0x250] sm:$0xf] }
  0x20   :  { %v4341_v7 = vld [vmem:[%s6019_s1 + $0x260] sm:$0xff] }
  0x21   :  { %2062 = vmatmul.bf16.vlgmr.msra.gmra.mxu2 %v3260_v26  ;;  %2042 = vmatmul.bf16.vlgmr.msra.gmra.mxu0 %v2972_v28  ;;  %v4247_v26 = vld [vmem:[%s6021_s0 + $0x3f4] sm:$0xf]  ;;  %v3187_v28 = vld [vmem:[%s6021_s0 + $0x1b0] sm:$0xf] }
  0x22   :  { %2132 = vmatpush.bf16.msrb.mxu2 %v4288_v20  ;;  %2111 = vmatmul.bf16.vlgmr.msra.gmra.mxu3 %v3264_v27  ;;  %v4320_v20 = vld [vmem:[%s6019_s1 + $0x1b8] sm:$0xff] }
  0x23   :  { %2181 = vmatpush.bf16.msrb.mxu3 %v4296_v23  ;;  %2279 = vmatpush.bf16.msrb.mxu1 %v4312_v29  ;;  %v4344_v23 = vld [vmem:[%s6019_s1 + $0x278] sm:$0xff] }
  0x24   :  { %2091 = vmatmul.bf16.vlgmr.msra.gmra.mxu1 %v2976_v30  ;;  %2230 = vmatpush.bf16.msrb.mxu0 %v4304_v33  ;;  %v3477_v27 = vld [vmem:[%s6021_s0 + $0x438] sm:$0xf0]  ;;  %v4184_v29 = vld [vmem:[%s6021_s0 + $0x1f4] sm:$0xf0]  ;;  %v4175_v30 = vld [vmem:[%s6021_s0 + $0x1b4] sm:$0xf] }
  0x25   :  { %v3480_v33 = vor.u32 %v4247_v26, %v3477_v27  ;;  %v4332_v26 = vld [vmem:[%s6019_s1 + $0x218] sm:$0xff]  ;;  %v3203_v27 = vld [vmem:[%s6021_s0 + $0x1c0] sm:$0xf] }
  0x26   :  { %2133 = vmatpush.bf16.msrb.mxu2 %v4287_v31  ;;  %v3189_v31 = vld [vmem:[%s6021_s0 + $0x1f8] sm:$0xf0] }
  0x27   :  { %2182 = vmatpush.bf16.msrb.mxu3 %v4295_v32  ;;  %2280 = vmatpush.bf16.msrb.mxu1 %v4311_v34  ;;  %v3476_v32 = vor.u32 %v4256_v25, %v3475_v24  ;;  %v3188_v34 = vor.u32 %v4184_v29, %v3187_v28  ;;  %v4176_v24 = vld [vmem:[%s6021_s0 + $0x1bc] sm:$0xf]  ;;  %v3197_v25 = vld [vmem:[%s6021_s0 + $0x200] sm:$0xf0]  ;;  %v4186_v28 = vld [vmem:[%s6021_s0 + $0x204] sm:$0xf0] }
  0x28   :  { %2231 = vmatpush.bf16.msrb.mxu0 %v4303_v37  ;;  %v4327_v37 = vld [vmem:[%s6019_s1 + $0x1f0] sm:$0xff]  ;;  %v4177_v29 = vld [vmem:[%s6021_s0 + $0x1c4] sm:$0xf] }
  0x2a   :  { %2134 = vmatpush.bf16.msrb.mxu2 %v4286_v35  ;;  %v3192_v35 = vor.u32 %v4175_v30, %v3189_v31  ;;  %v3205_v30 = vld [vmem:[%s6021_s0 + $0x208] sm:$0xf0] }
  0x2b   :  { %2183 = vmatpush.bf16.msrb.mxu3 %v4294_v36  ;;  %2281 = vmatpush.bf16.msrb.mxu1 %v4310_v38  ;;  %v4319_v36 = vld [vmem:[%s6019_s1 + $0x1b0] sm:$0xff] }
  0x2c   :  { %2232 = vmatpush.bf16.msrb.mxu0 %v4302_v41  ;;  %v4335_v38 = vld [vmem:[%s6019_s1 + $0x230] sm:$0xff] }
  0x2d   :  { %v4131_v41 = vld [vmem:[%s6021_s0 + $0x4c] sm:$0xf0] }
  0x2e   :  { %2135 = vmatpush.bf16.msrb.mxu2 %v4285_v39  ;;  %v4343_v39 = vld [vmem:[%s6019_s1 + $0x270] sm:$0xff] }
  0x2f   :  { %2184 = vmatpush.bf16.msrb.mxu3 %v4293_v40  ;;  %2282 = vmatpush.bf16.msrb.mxu1 %v4309_v47  ;;  %v2979_v40 = vld [vmem:[%s6021_s0 + $0x8] sm:$0xf]  ;;  %v2989_v47 = vld [vmem:[%s6021_s0 + $0x58] sm:$0xf0] }
  0x30   :  { %2233 = vmatpush.bf16.msrb.mxu0 %v4301_v53  ;;  %v2980_v48 = vor.u32 %v4131_v41, %v2979_v40  ;;  %v2992_v51 = vor.u32 %v4123_v46, %v2989_v47  ;;  %v4326_v53 = vld [vmem:[%s6019_s1 + $0x1e8] sm:$0xff]  ;;  %v3269_v41 = vld [vmem:[%s6021_s0 + $0x290] sm:$0xf0]  ;;  %v3277_v46 = vld [vmem:[%s6021_s0 + $0x298] sm:$0xf0] }
  0x31   :  { %2067 = vmatmul.bf16.gmra.mxu2 %v3332_v54  ;;  %2047 = vmatmul.bf16.gmra.mxu0 %v3044_v56  ;;  %v4334_v54 = vld [vmem:[%s6019_s1 + $0x228] sm:$0xff]  ;;  %v3051_v56 = vld [vmem:[%s6021_s0 + $0x98] sm:$0xf] }
  0x32   :  { %2136 = vmatpush.bf16.msrb.mxu2 %v4284_v50  ;;  %2116 = vmatmul.bf16.gmra.mxu3 %v3336_v55  ;;  %v2988_v50 = vor.u32 %v4132_v45, %v2987_v44  ;;  %v4342_v55 = vld [vmem:[%s6019_s1 + $0x268] sm:$0xff]  ;;  %v4204_v44 = vld [vmem:[%s6021_s0 + $0x294] sm:$0xf0]  ;;  %v4195_v45 = vld [vmem:[%s6021_s0 + $0x254] sm:$0xf] }
  0x33   :  { %2185 = vmatpush.bf16.msrb.mxu3 %v4292_v52  ;;  %2283 = vmatpush.bf16.msrb.mxu1 %v4308_v57  ;;  %v4318_v52 = vld [vmem:[%s6019_s1 + $0x1a8] sm:$0xff]  ;;  %v4149_v57 = vld [vmem:[%s6021_s0 + $0xdc] sm:$0xf0] }
  0x34   :  { %2096 = vmatmul.bf16.gmra.mxu1 %v3048_v58  ;;  %2234 = vmatpush.bf16.msrb.mxu0 %v4300_v61  ;;  %v4140_v58 = vld [vmem:[%s6021_s0 + $0x9c] sm:$0xf]  ;;  %v4150_v61 = vld [vmem:[%s6021_s0 + $0xe4] sm:$0xf0]  ;;  %v4194_v40 = vld [vmem:[%s6021_s0 + $0x24c] sm:$0xf] }
  0x36   :  { %2137 = vmatpush.bf16.msrb.mxu2 %v4283_v59  ;;  %v3053_v59 = vld [vmem:[%s6021_s0 + $0xe0] sm:$0xf0] }
  0x37   :  { %2186 = vmatpush.bf16.msrb.mxu3 %v4291_v60  ;;  %2284 = vmatpush.bf16.msrb.mxu1 %v4307_v63  ;;  %v3059_v60 = vld [vmem:[%s6021_s0 + $0xa0] sm:$0xf]  ;;  %v3061_v63 = vld [vmem:[%s6021_s0 + $0xe8] sm:$0xf0] }
  0x38   :  { %2235 = vmatpush.bf16.msrb.mxu0 %v4299_v1  ;;  %v3056_v1 = vor.u32 %v4140_v58, %v3053_v59  ;;  %v4322_v58 = vld [vmem:[%s6019_s1 + $0x1c8] sm:$0xff] }
  0x3a   :  { %2138 = vmatpush.bf16.msrb.mxu2 %v4282_v62  ;;  %v4141_v62 = vld [vmem:[%s6021_s0 + $0xa4] sm:$0xf] }
  0x3b   :  { %2187 = vmatpush.bf16.msrb.mxu3 %v4290_v0  ;;  %2285 = vmatpush.bf16.msrb.mxu1 %v4306_v2  ;;  %v3052_v0 = vor.u32 %v4149_v57, %v3051_v56  ;;  %v3060_v2 = vor.u32 %v4150_v61, %v3059_v60  ;;  %v4314_v56 = vld [vmem:[%s6019_s1 + $0x188] sm:$0xff] }
  0x3c   :  { %2236 = vmatpush.bf16.msrb.mxu0 %v4298_v5  ;;  %v4325_v5 = vld [vmem:[%s6019_s1 + $0x1e0] sm:$0xff] }
  0x3e   :  { %2139 = vmatpush.bf16.msrb.mxu2 %v4281_v3  ;;  %v3064_v3 = vor.u32 %v4141_v62, %v3061_v63 }
  0x3f   :  { %2188 = vmatpush.bf16.msrb.mxu3 %v4289_v4  ;;  %2286 = vmatpush.bf16.msrb.mxu1 %v4305_v19  ;;  %v4317_v4 = vld [vmem:[%s6019_s1 + $0x1a0] sm:$0xff] }
  0x40   :  { %2237 = vmatpush.bf16.msrb.mxu0 %v4297_v14  ;;  %v4159_v14 = vld [vmem:[%s6021_s0 + $0x134] sm:$0xf] }
  0x41   :  { %2072 = vmatmul.bf16.gmra.mxu2 %v3404_v15  ;;  %2052 = vmatmul.bf16.gmra.mxu0 %v3116_v17  ;;  %v3133_v15 = vld [vmem:[%s6021_s0 + $0x178] sm:$0xf0]  ;;  %v3128_v17 = vor.u32 %v4158_v10, %v3125_v11 }
  0x42   :  { %2121 = vmatmul.bf16.gmra.mxu3 %v3408_v16  ;;  %2328 = vmatpush.bf16.msra.mxu2 %v4320_v20  ;;  %v3124_v16 = vor.u32 %v4167_v9, %v3123_v8  ;;  %v3136_v19 = vor.u32 %v4159_v14, %v3133_v15  ;;  %v4316_v20 = vld [vmem:[%s6019_s1 + $0x198] sm:$0xff]  ;;  %v3347_v8 = vld [vmem:[%s6021_s0 + $0x2e0] sm:$0xf]  ;;  %v4222_v9 = vld [vmem:[%s6021_s0 + $0x324] sm:$0xf0] }
  0x43   :  { %2377 = vmatpush.bf16.msra.mxu3 %v4328_v21  ;;  %2475 = vmatpush.bf16.msra.mxu1 %v4344_v23  ;;  %v4324_v21 = vld [vmem:[%s6019_s1 + $0x1d8] sm:$0xff]  ;;  %v4185_v23 = vld [vmem:[%s6021_s0 + $0x1fc] sm:$0xf0] }
  0x44   :  { %2101 = vmatmul.bf16.gmra.mxu1 %v3120_v18  ;;  %2426 = vmatpush.bf16.msra.mxu0 %v4336_v22  ;;  %v3132_v18 = vor.u32 %v4168_v13, %v3131_v12  ;;  %v3195_v22 = vld [vmem:[%s6021_s0 + $0x1b8] sm:$0xf]  ;;  %v4213_v12 = vld [vmem:[%s6021_s0 + $0x2e4] sm:$0xf]  ;;  %v3349_v13 = vld [vmem:[%s6021_s0 + $0x328] sm:$0xf0] }
  0x45   :  { %v3196_v31 = vor.u32 %v4185_v23, %v3195_v22 }
  0x46   :  { %2329 = vmatpush.bf16.msra.mxu2 %v4319_v36  ;;  %v4315_v36 = vld [vmem:[%s6019_s1 + $0x190] sm:$0xff] }
  0x47   :  { %2378 = vmatpush.bf16.msra.mxu3 %v4327_v37  ;;  %2476 = vmatpush.bf16.msra.mxu1 %v4343_v39  ;;  %v4323_v37 = vld [vmem:[%s6019_s1 + $0x1d0] sm:$0xff] }
  0x48   :  { %2427 = vmatpush.bf16.msra.mxu0 %v4335_v38  ;;  %v3267_v38 = vld [vmem:[%s6021_s0 + $0x248] sm:$0xf]  ;;  %v4203_v39 = vld [vmem:[%s6021_s0 + $0x28c] sm:$0xf0] }
  0x49   :  { %v3268_v47 = vor.u32 %v4203_v39, %v3267_v38  ;;  %v3413_v38 = vld [vmem:[%s6021_s0 + $0x3b0] sm:$0xf0]  ;;  %v4329_v39 = vld [vmem:[%s6019_s1 + $0x200] sm:$0xff] }
  0x4a   :  { %2330 = vmatpush.bf16.msra.mxu2 %v4318_v52  ;;  %v3280_v52 = vor.u32 %v4195_v45, %v3277_v46  ;;  %v3421_v45 = vld [vmem:[%s6021_s0 + $0x3b8] sm:$0xf0] }
  0x4b   :  { %2379 = vmatpush.bf16.msra.mxu3 %v4326_v53  ;;  %2477 = vmatpush.bf16.msra.mxu1 %v4342_v55  ;;  %v4339_v53 = vld [vmem:[%s6019_s1 + $0x250] sm:$0xff] }
  0x4c   :  { %2428 = vmatpush.bf16.msra.mxu0 %v4334_v54 }
  0x4e   :  { %2331 = vmatpush.bf16.msra.mxu2 %v4317_v4 }
  0x4f   :  { %2380 = vmatpush.bf16.msra.mxu3 %v4325_v5  ;;  %2478 = vmatpush.bf16.msra.mxu1 %v4341_v7  ;;  %v4212_v5 = vld [vmem:[%s6021_s0 + $0x2dc] sm:$0xf]  ;;  %v4330_v7 = vld [vmem:[%s6019_s1 + $0x208] sm:$0xff] }
  0x50   :  { %2429 = vmatpush.bf16.msra.mxu0 %v4333_v6  ;;  %v3341_v6 = vld [vmem:[%s6021_s0 + $0x320] sm:$0xf0] }
  0x51   :  { %2077 = vmatmul.bf16.gmra.mxu2 %v3476_v32  ;;  %2057 = vmatmul.bf16.gmra.mxu0 %v3188_v34  ;;  %v3200_v32 = vor.u32 %v4176_v24, %v3197_v25  ;;  %v3208_v34 = vor.u32 %v4177_v29, %v3205_v30  ;;  %v4313_v24 = vld [vmem:[%s6019_s1 + $0x180] sm:$0xff] }
  0x52   :  { %2126 = vmatmul.bf16.gmra.mxu3 %v3480_v33  ;;  %2332 = vmatpush.bf16.msra.mxu2 %v4316_v20  ;;  %v3204_v33 = vor.u32 %v4186_v28, %v3203_v27  ;;  %v3352_v20 = vor.u32 %v4213_v12, %v3349_v13  ;;  %v3491_v12 = vld [vmem:[%s6021_s0 + $0x400] sm:$0xf]  ;;  %v4258_v13 = vld [vmem:[%s6021_s0 + $0x444] sm:$0xf0] }
  0x53   :  { %2381 = vmatpush.bf16.msra.mxu3 %v4324_v21  ;;  %v4338_v21 = vld [vmem:[%s6019_s1 + $0x248] sm:$0xff] }
  0x54   :  { %2106 = vmatmul.bf16.gmra.mxu1 %v3192_v35  ;;  %2430 = vmatpush.bf16.msra.mxu0 %v4332_v26  ;;  %v4340_v35 = vld [vmem:[%s6019_s1 + $0x258] sm:$0xff]  ;;  %v4321_v26 = vld [vmem:[%s6019_s1 + $0x1c0] sm:$0xff] }
  0x55   :  { %2479 = vmatpush.bf16.msra.mxu1 %v4340_v35  ;;  %v4239_v35 = vld [vmem:[%s6021_s0 + $0x3ac] sm:$0xf0] }
  0x56   :  { %2333 = vmatpush.bf16.msra.mxu2 %v4315_v36 }
  0x57   :  { %2382 = vmatpush.bf16.msra.mxu3 %v4323_v37  ;;  %v4230_v37 = vld [vmem:[%s6021_s0 + $0x36c] sm:$0xf] }
  0x58   :  { %2431 = vmatpush.bf16.msra.mxu0 %v4331_v42 }
  0x59   :  { %2480 = vmatpush.bf16.msra.mxu1 %v4339_v53 }
  0x5a   :  { %2334 = vmatpush.bf16.msra.mxu2 %v4314_v56 }
  0x5b   :  { %2383 = vmatpush.bf16.msra.mxu3 %v4322_v58  ;;  %v4352_v58 = vld [vmem:[%s6019_s1 + $0x2b8] sm:$0xff] }
  0x5c   :  { %2432 = vmatpush.bf16.msra.mxu0 %v4330_v7  ;;  %v4368_v7 = vld [vmem:[%s6019_s1 + $0x338] sm:$0xff] }
  0x5d   :  { %2481 = vmatpush.bf16.msra.mxu1 %v4338_v21 }
  0x5e   :  { %2335 = vmatpush.bf16.msra.mxu2 %v4313_v24 }
  0x5f   :  { %2384 = vmatpush.bf16.msra.mxu3 %v4321_v26 }
  0x60   :  { %2433 = vmatpush.bf16.msra.mxu0 %v4329_v39 }
  0x61   :  { %2140 = vmatmul.bf16.vlgmr.msrb.gmra.mxu2 %v2980_v48  ;;  %2238 = vmatmul.bf16.vlgmr.msrb.gmra.mxu0 %v2988_v50  ;;  %v3272_v48 = vor.u32 %v4194_v40, %v3269_v41  ;;  %v3276_v50 = vor.u32 %v4204_v44, %v3275_v43  ;;  %v3419_v40 = vld [vmem:[%s6021_s0 + $0x370] sm:$0xf]  ;;  %v4240_v41 = vld [vmem:[%s6021_s0 + $0x3b4] sm:$0xf0]  ;;  %v4231_v44 = vld [vmem:[%s6021_s0 + $0x374] sm:$0xf] }
  0x62   :  { %2189 = vmatmul.bf16.vlgmr.msrb.gmra.mxu3 %v2984_v49  ;;  %v4878_v49 = vld [vmem:[%s6020_s2] ss:$0 sm:$0xff]  ;;  %v3424_v53 = vor.u32 %v4231_v44, %v3421_v45  ;;  %2524 = vmatpush.bf16.msrb.mxu2 %v4352_v58 }
  0x63   :  { %v4133_v45 = vld [vmem:[%s6021_s0 + $0x5c] sm:$0xf0] }
  0x64   :  { %2287 = vmatmul.bf16.vlgmr.msrb.gmra.mxu1 %v2992_v51  ;;  %2622 = vmatpush.bf16.msrb.mxu0 %v4368_v7 }
  0x71   :  { %2145 = vmatmul.bf16.gmra.mxu2 %v3052_v0  ;;  %2243 = vmatmul.bf16.gmra.mxu0 %v3060_v2  ;;  %v3339_v2 = vld [vmem:[%s6021_s0 + $0x2d8] sm:$0xf] }
  0x72   :  { %2194 = vmatmul.bf16.gmra.mxu3 %v3056_v1 }
  0x74   :  { %2292 = vmatmul.bf16.gmra.mxu1 %v3064_v3  ;;  %v4221_v3 = vld [vmem:[%s6021_s0 + $0x31c] sm:$0xf0] }
  0x75   :  { %v3340_v15 = vor.u32 %v4221_v3, %v3339_v2 }
  0x81   :  { %2150 = vmatmul.bf16.gmra.mxu2 %v3124_v16  ;;  %2248 = vmatmul.bf16.gmra.mxu0 %v3132_v18  ;;  %v3344_v16 = vor.u32 %v4212_v5, %v3341_v6  ;;  %v3483_v6 = vld [vmem:[%s6021_s0 + $0x3f8] sm:$0xf] }
  0x82   :  { %2199 = vmatmul.bf16.gmra.mxu3 %v3128_v17  ;;  %v3348_v17 = vor.u32 %v4222_v9, %v3347_v8  ;;  %v4257_v9 = vld [vmem:[%s6021_s0 + $0x43c] sm:$0xf0] }
  0x84   :  { %2297 = vmatmul.bf16.gmra.mxu1 %v3136_v19 }
  0x91   :  { %2155 = vmatmul.bf16.gmra.mxu2 %v3196_v31  ;;  %2253 = vmatmul.bf16.gmra.mxu0 %v3204_v33 }
  0x92   :  { %2204 = vmatmul.bf16.gmra.mxu3 %v3200_v32 }
  0x94   :  { %2302 = vmatmul.bf16.gmra.mxu1 %v3208_v34  ;;  %v3411_v34 = vld [vmem:[%s6021_s0 + $0x368] sm:$0xf] }
  0x9e   :  { %v2043_v51 = vpop.f32.mrf.mxu0 }
  0x9f   :  { %v2044_v54 = vadd.f32 %v4878_v49, %v2043_v51 }
  0xa1   :  { %v2092_v55 = vpop.f32.mrf.mxu1  ;;  %2160 = vmatmul.bf16.gmra.mxu2 %v3268_v47  ;;  %2258 = vmatmul.bf16.gmra.mxu0 %v3276_v50  ;;  %v3412_v47 = vor.u32 %v4239_v35, %v3411_v34  ;;  %v3420_v50 = vor.u32 %v4240_v41, %v3419_v40 }
  0xa2   :  { %2209 = vmatmul.bf16.gmra.mxu3 %v3272_v48  ;;  %v4887_v57 = vadd.f32 %v2092_v55, %v2044_v54  ;;  %v3416_v48 = vor.u32 %v4230_v37, %v3413_v38  ;;  %v4337_v54 = vld [vmem:[%s6019_s1 + $0x240] sm:$0xff] }
  0xa3   :  { %2482 = vmatpush.bf16.msra.mxu1 %v4337_v54  ;;  %v4125_v54 = vld [vmem:[%s6021_s0 + $0x24] sm:$0xf] }
  0xa4   :  { %2307 = vmatmul.bf16.gmra.mxu1 %v3280_v52  ;;  %v2063_v59 = vpop.f32.mrf.mxu2 }
  0xa5   :  { %v2112_v60 = vpop.f32.mrf.mxu3  ;;  %v2064_v61 = vadd.f32 %v4878_v49, %v2063_v59 }
  0xa6   :  { %v2045_v63 = vpop.f32.mrf.mxu0 }
  0xa7   :  { %v4893_v62 = vadd.f32 %v2112_v60, %v2064_v61  ;;  %v2046_v0 = vadd.f32 %v4878_v49, %v2045_v63  ;;  %v4360_v60 = vld [vmem:[%s6019_s1 + $0x2f8] sm:$0xff] }
  0xa8   :  { %2573 = vmatpush.bf16.msrb.mxu3 %v4360_v60 }
  0xa9   :  { %v2094_v1 = vpop.f32.mrf.mxu1 }
  0xaa   :  { %v4902_v4 = vadd.f32 %v2094_v1, %v2046_v0 }
  0xac   :  { %v2065_v10 = vpop.f32.mrf.mxu2 }
  0xad   :  { %v2114_v11 = vpop.f32.mrf.mxu3  ;;  %v2066_v14 = vadd.f32 %v4878_v49, %v2065_v10  ;;  %v4248_v10 = vld [vmem:[%s6021_s0 + $0x3fc] sm:$0xf] }
  0xae   :  { %v2048_v19 = vpop.f32.mrf.mxu0 }
  0xaf   :  { %v4926_v18 = vadd.f32 %v2114_v11, %v2066_v14  ;;  %v2049_v22 = vadd.f32 %v4878_v49, %v2048_v19  ;;  %v3485_v11 = vld [vmem:[%s6021_s0 + $0x440] sm:$0xf0] }
  0xb0   :  { %v3488_v21 = vor.u32 %v4248_v10, %v3485_v11 }
  0xb1   :  { %v2097_v23 = vpop.f32.mrf.mxu1  ;;  %2165 = vmatmul.bf16.gmra.mxu2 %v3340_v15  ;;  %2263 = vmatmul.bf16.gmra.mxu0 %v3348_v17  ;;  %v3493_v17 = vld [vmem:[%s6021_s0 + $0x448] sm:$0xf0] }
  0xb2   :  { %2214 = vmatmul.bf16.gmra.mxu3 %v3344_v16  ;;  %v4935_v25 = vadd.f32 %v2097_v23, %v2049_v22  ;;  %v4249_v16 = vld [vmem:[%s6021_s0 + $0x404] sm:$0xf]  ;;  %v3492_v22 = vor.u32 %v4258_v13, %v3491_v12 }
  0xb3   :  { %v3496_v26 = vor.u32 %v4249_v16, %v3493_v17  ;;  %v4366_v16 = vld [vmem:[%s6019_s1 + $0x328] sm:$0xff]  ;;  %v4151_v17 = vld [vmem:[%s6021_s0 + $0xec] sm:$0xf0] }
  0xb4   :  { %2312 = vmatmul.bf16.gmra.mxu1 %v3352_v20  ;;  %v2068_v27 = vpop.f32.mrf.mxu2  ;;  %v3484_v20 = vor.u32 %v4257_v9, %v3483_v6  ;;  %v4350_v6 = vld [vmem:[%s6019_s1 + $0x2a8] sm:$0xff] }
  0xb5   :  { %v2117_v28 = vpop.f32.mrf.mxu3  ;;  %v2069_v29 = vadd.f32 %v4878_v49, %v2068_v27 }
  0xb6   :  { %v2050_v31 = vpop.f32.mrf.mxu0 }
  0xb7   :  { %v4941_v30 = vadd.f32 %v2117_v28, %v2069_v29  ;;  %v2051_v32 = vadd.f32 %v4878_v49, %v2050_v31  ;;  %v4376_v29 = vld [vmem:[%s6019_s1 + $0x378] sm:$0xff]  ;;  %v4351_v31 = vld [vmem:[%s6019_s1 + $0x2b0] sm:$0xff] }
  0xb8   :  { %2525 = vmatpush.bf16.msrb.mxu2 %v4351_v31  ;;  %2671 = vmatpush.bf16.msrb.mxu1 %v4376_v29 }
  0xb9   :  { %v2099_v33 = vpop.f32.mrf.mxu1 }
  0xba   :  { %v4950_v36 = vadd.f32 %v2099_v33, %v2051_v32  ;;  %v4359_v33 = vld [vmem:[%s6019_s1 + $0x2f0] sm:$0xff] }
  0xbb   :  { %2574 = vmatpush.bf16.msrb.mxu3 %v4359_v33 }
  0xbc   :  { %v2070_v42 = vpop.f32.mrf.mxu2  ;;  %2526 = vmatpush.bf16.msrb.mxu2 %v4350_v6  ;;  %v4161_v6 = vld [vmem:[%s6021_s0 + $0x144] sm:$0xf] }
  0xbd   :  { %v2119_v43 = vpop.f32.mrf.mxu3  ;;  %v2071_v46 = vadd.f32 %v4878_v49, %v2070_v42  ;;  %v2995_v42 = vld [vmem:[%s6021_s0 + $0x18] sm:$0xf] }
  0xbe   :  { %v2053_v52 = vpop.f32.mrf.mxu0  ;;  %v2996_v58 = vor.u32 %v4133_v45, %v2995_v42  ;;  %v4374_v42 = vld [vmem:[%s6019_s1 + $0x368] sm:$0xff] }
  0xbf   :  { %v4974_v51 = vadd.f32 %v2119_v43, %v2071_v46  ;;  %v2054_v55 = vadd.f32 %v4878_v49, %v2053_v52  ;;  %v4367_v43 = vld [vmem:[%s6019_s1 + $0x330] sm:$0xff]  ;;  %v4124_v46 = vld [vmem:[%s6021_s0 + $0x1c] sm:$0xf] }
  0xc0   :  { %2623 = vmatpush.bf16.msrb.mxu0 %v4367_v43  ;;  %v4349_v43 = vld [vmem:[%s6019_s1 + $0x2a0] sm:$0xff] }
  0xc1   :  { %v2102_v56 = vpop.f32.mrf.mxu1  ;;  %2170 = vmatmul.bf16.gmra.mxu2 %v3412_v47  ;;  %2268 = vmatmul.bf16.gmra.mxu0 %v3420_v50  ;;  %v2997_v47 = vld [vmem:[%s6021_s0 + $0x60] sm:$0xf0]  ;;  %v4134_v50 = vld [vmem:[%s6021_s0 + $0x64] sm:$0xf0] }
  0xc2   :  { %2219 = vmatmul.bf16.gmra.mxu3 %v3416_v48  ;;  %v4983_v59 = vadd.f32 %v2102_v56, %v2054_v55  ;;  %v3003_v48 = vld [vmem:[%s6021_s0 + $0x20] sm:$0xf]  ;;  %v3005_v55 = vld [vmem:[%s6021_s0 + $0x68] sm:$0xf0]  ;;  %v3000_v60 = vor.u32 %v4124_v46, %v2997_v47  ;;  %2527 = vmatpush.bf16.msrb.mxu2 %v4349_v43  ;;  %v4179_v43 = vld [vmem:[%s6021_s0 + $0x1d4] sm:$0xf] }
  0xc4   :  { %2317 = vmatmul.bf16.gmra.mxu1 %v3424_v53  ;;  %v2073_v61 = vpop.f32.mrf.mxu2  ;;  %2624 = vmatpush.bf16.msrb.mxu0 %v4366_v16 }
  0xc5   :  { %v2122_v63 = vpop.f32.mrf.mxu3  ;;  %v2074_v0 = vadd.f32 %v4878_v49, %v2073_v61  ;;  %v3004_v61 = vor.u32 %v4134_v50, %v3003_v48 }
  0xc6   :  { %v2055_v2 = vpop.f32.mrf.mxu0 }
  0xc7   :  { %v4989_v1 = vadd.f32 %v2122_v63, %v2074_v0  ;;  %v2056_v3 = vadd.f32 %v4878_v49, %v2055_v2  ;;  %v3008_v2 = vor.u32 %v4125_v54, %v3005_v55  ;;  %v3139_v55 = vld [vmem:[%s6021_s0 + $0x138] sm:$0xf] }
  0xc9   :  { %v2104_v5 = vpop.f32.mrf.mxu1 }
  0xca   :  { %v4998_v8 = vadd.f32 %v2104_v5, %v2056_v3  ;;  %v4375_v5 = vld [vmem:[%s6019_s1 + $0x370] sm:$0xff] }
  0xcb   :  { %2672 = vmatpush.bf16.msrb.mxu1 %v4375_v5 }
  0xcc   :  { %v2075_v14 = vpop.f32.mrf.mxu2 }
  0xcd   :  { %v2124_v15 = vpop.f32.mrf.mxu3  ;;  %v2076_v19 = vadd.f32 %v4878_v49, %v2075_v14 }
  0xce   :  { %v2058_v24 = vpop.f32.mrf.mxu0 }
  0xcf   :  { %v5022_v23 = vadd.f32 %v2124_v15, %v2076_v19  ;;  %v2059_v27 = vadd.f32 %v4878_v49, %v2058_v24  ;;  %v3067_v15 = vld [vmem:[%s6021_s0 + $0xa8] sm:$0xf]  ;;  %v3069_v19 = vld [vmem:[%s6021_s0 + $0xf0] sm:$0xf0]  ;;  %2673 = vmatpush.bf16.msrb.mxu1 %v4374_v42 }
  0xd0   :  { %v3068_v31 = vor.u32 %v4151_v17, %v3067_v15  ;;  %v4373_v17 = vld [vmem:[%s6019_s1 + $0x360] sm:$0xff] }
  0xd1   :  { %v2107_v28 = vpop.f32.mrf.mxu1  ;;  %2175 = vmatmul.bf16.gmra.mxu2 %v3484_v20  ;;  %2273 = vmatmul.bf16.gmra.mxu0 %v3492_v22  ;;  %v3075_v20 = vld [vmem:[%s6021_s0 + $0xb0] sm:$0xf] }
  0xd2   :  { %2224 = vmatmul.bf16.gmra.mxu3 %v3488_v21  ;;  %v5031_v32 = vadd.f32 %v2107_v28, %v2059_v27  ;;  %v4152_v21 = vld [vmem:[%s6021_s0 + $0xf4] sm:$0xf0]  ;;  %v4143_v27 = vld [vmem:[%s6021_s0 + $0xb4] sm:$0xf]  ;;  %v3077_v28 = vld [vmem:[%s6021_s0 + $0xf8] sm:$0xf0] }
  0xd3   :  { %2674 = vmatpush.bf16.msrb.mxu1 %v4373_v17 }
  0xd4   :  { %2322 = vmatmul.bf16.gmra.mxu1 %v3496_v26  ;;  %v2078_v34 = vpop.f32.mrf.mxu2 }
  0xd5   :  { %v2127_v35 = vpop.f32.mrf.mxu3  ;;  %v2079_v37 = vadd.f32 %v4878_v49, %v2078_v34  ;;  %v3076_v34 = vor.u32 %v4152_v21, %v3075_v20 }
  0xd6   :  { %v2060_v39 = vpop.f32.mrf.mxu0 }
  0xd7   :  { %v5037_v38 = vadd.f32 %v2127_v35, %v2079_v37  ;;  %v2061_v40 = vadd.f32 %v4878_v49, %v2060_v39  ;;  %v3080_v39 = vor.u32 %v4143_v27, %v3077_v28 }
  0xd9   :  { %v2109_v41 = vpop.f32.mrf.mxu1 }
  0xda   :  { %v5046_v44 = vadd.f32 %v2109_v41, %v2061_v40 }
  0xdc   :  { %v2080_v52 = vpop.f32.mrf.mxu2 }
  0xdd   :  { %v2129_v53 = vpop.f32.mrf.mxu3  ;;  %v2081_v56 = vadd.f32 %v4878_v49, %v2080_v52  ;;  %v4358_v49 = vld [vmem:[%s6019_s1 + $0x2e8] sm:$0xff] }
  0xde   :  { %v2239_v0 = vpop.f32.mrf.mxu0  ;;  %2575 = vmatpush.bf16.msrb.mxu3 %v4358_v49  ;;  %v3149_v49 = vld [vmem:[%s6021_s0 + $0x188] sm:$0xf0] }
  0xdf   :  { %v5070_v63 = vadd.f32 %v2129_v53, %v2081_v56  ;;  %v4365_v56 = vld [vmem:[%s6019_s1 + $0x320] sm:$0xff] }
  0xe0   :  { %2625 = vmatpush.bf16.msrb.mxu0 %v4365_v56 }
  0xe1   :  { %v2288_v3 = vpop.f32.mrf.mxu1  ;;  %2336 = vmatmul.bf16.vlgmr.msra.gmra.mxu2 %v2996_v58  ;;  %2434 = vmatmul.bf16.vlgmr.msra.gmra.mxu0 %v3004_v61  ;;  %v4169_v58 = vld [vmem:[%s6021_s0 + $0x17c] sm:$0xf0] }
  0xe2   :  { %2385 = vmatmul.bf16.vlgmr.msra.gmra.mxu3 %v3000_v60  ;;  %v3141_v60 = vld [vmem:[%s6021_s0 + $0x180] sm:$0xf0]  ;;  %v3147_v61 = vld [vmem:[%s6021_s0 + $0x140] sm:$0xf] }
  0xe4   :  { %2483 = vmatmul.bf16.vlgmr.msra.gmra.mxu1 %v3008_v2  ;;  %v2141_v7 = vpop.f32.mrf.mxu2 }
  0xe5   :  { %v2190_v9 = vpop.f32.mrf.mxu3  ;;  %v2142_v10 = vadd.f32 %v2141_v7, %v4887_v57  ;;  %v4142_v57 = vld [vmem:[%s6021_s0 + $0xac] sm:$0xf] }
  0xe6   :  { %v2241_v12 = vpop.f32.mrf.mxu0  ;;  %v3072_v33 = vor.u32 %v4142_v57, %v3069_v19  ;;  %v4348_v57 = vld [vmem:[%s6019_s1 + $0x298] sm:$0xff] }
  0xe7   :  { %v2191_v11 = vadd.f32 %v2190_v9, %v2142_v10  ;;  %v3140_v9 = vor.u32 %v4169_v58, %v3139_v55  ;;  %2528 = vmatpush.bf16.msrb.mxu2 %v4348_v57  ;;  %v4372_v58 = vld [vmem:[%s6019_s1 + $0x358] sm:$0xff]  ;;  %v4197_v57 = vld [vmem:[%s6021_s0 + $0x264] sm:$0xf] }
  0xe8   :  { %2675 = vmatpush.bf16.msrb.mxu1 %v4372_v58 }
  0xe9   :  { %v2290_v13 = vpop.f32.mrf.mxu1  ;;  %v2240_v14 = vadd.f32 %v2239_v0, %v2191_v11  ;;  %v4170_v0 = vld [vmem:[%s6021_s0 + $0x184] sm:$0xf0] }
  0xea   :  { %v3148_v11 = vor.u32 %v4170_v0, %v3147_v61 }
  0xeb   :  { %v5103_v22 = vadd.f32 %v2288_v3, %v2240_v14  ;;  %v3152_v14 = vor.u32 %v4161_v6, %v3149_v49 }
  0xec   :  { %v2143_v24 = vpop.f32.mrf.mxu2 }
  0xed   :  { %v2192_v26 = vpop.f32.mrf.mxu3  ;;  %v2144_v29 = vadd.f32 %v2143_v24, %v4902_v4  ;;  %v4357_v4 = vld [vmem:[%s6019_s1 + $0x2e0] sm:$0xff] }
  0xee   :  { %v2244_v37 = vpop.f32.mrf.mxu0  ;;  %2576 = vmatpush.bf16.msrb.mxu3 %v4357_v4  ;;  %v3221_v4 = vld [vmem:[%s6021_s0 + $0x218] sm:$0xf0] }
  0xef   :  { %v2193_v35 = vadd.f32 %v2192_v26, %v2144_v29 }
  0xf1   :  { %v2293_v40 = vpop.f32.mrf.mxu1  ;;  %v2242_v41 = vadd.f32 %v2241_v12, %v2193_v35  ;;  %2341 = vmatmul.bf16.gmra.mxu2 %v3068_v31  ;;  %2439 = vmatmul.bf16.gmra.mxu0 %v3076_v34  ;;  %v3211_v31 = vld [vmem:[%s6021_s0 + $0x1c8] sm:$0xf]  ;;  %v4187_v34 = vld [vmem:[%s6021_s0 + $0x20c] sm:$0xf0]  ;;  %v3213_v35 = vld [vmem:[%s6021_s0 + $0x210] sm:$0xf0] }
  0xf2   :  { %2390 = vmatmul.bf16.gmra.mxu3 %v3072_v33  ;;  %v4364_v33 = vld [vmem:[%s6019_s1 + $0x318] sm:$0xff] }
  0xf3   :  { %v5121_v45 = vadd.f32 %v2290_v13, %v2242_v41  ;;  %2626 = vmatpush.bf16.msrb.mxu0 %v4364_v33 }
  0xf4   :  { %2488 = vmatmul.bf16.gmra.mxu1 %v3080_v39  ;;  %v2146_v46 = vpop.f32.mrf.mxu2  ;;  %v4188_v39 = vld [vmem:[%s6021_s0 + $0x214] sm:$0xf0] }
  0xf5   :  { %v2195_v47 = vpop.f32.mrf.mxu3  ;;  %v2147_v48 = vadd.f32 %v2146_v46, %v4935_v25  ;;  %v4160_v25 = vld [vmem:[%s6021_s0 + $0x13c] sm:$0xf] }
  0xf6   :  { %v2246_v52 = vpop.f32.mrf.mxu0  ;;  %v3144_v10 = vor.u32 %v4160_v25, %v3141_v60  ;;  %v4347_v25 = vld [vmem:[%s6019_s1 + $0x290] sm:$0xff] }
  0xf7   :  { %v2196_v50 = vadd.f32 %v2195_v47, %v2147_v48  ;;  %v3212_v47 = vor.u32 %v4187_v34, %v3211_v31  ;;  %2529 = vmatpush.bf16.msrb.mxu2 %v4347_v25  ;;  %v4371_v34 = vld [vmem:[%s6019_s1 + $0x350] sm:$0xff] }
  0xf8   :  { %2676 = vmatpush.bf16.msrb.mxu1 %v4371_v34  ;;  %v4215_v25 = vld [vmem:[%s6021_s0 + $0x2f4] sm:$0xf] }
  0xf9   :  { %v2295_v53 = vpop.f32.mrf.mxu1  ;;  %v2245_v54 = vadd.f32 %v2244_v37, %v2196_v50  ;;  %v3219_v37 = vld [vmem:[%s6021_s0 + $0x1d0] sm:$0xf] }
  0xfa   :  { %v3220_v50 = vor.u32 %v4188_v39, %v3219_v37 }
  0xfb   :  { %v5145_v2 = vadd.f32 %v2293_v40, %v2245_v54  ;;  %v3224_v54 = vor.u32 %v4179_v43, %v3221_v4 }
  0xfc   :  { %v2148_v3 = vpop.f32.mrf.mxu2 }
  0xfd   :  { %v2197_v5 = vpop.f32.mrf.mxu3  ;;  %v2149_v7 = vadd.f32 %v2148_v3, %v4950_v36  ;;  %v4356_v36 = vld [vmem:[%s6019_s1 + $0x2d8] sm:$0xff] }
  0xfe   :  { %v2249_v13 = vpop.f32.mrf.mxu0  ;;  %2577 = vmatpush.bf16.msrb.mxu3 %v4356_v36  ;;  %v3293_v36 = vld [vmem:[%s6021_s0 + $0x2a8] sm:$0xf0] }
  0xff   :  { %v2198_v12 = vadd.f32 %v2197_v5, %v2149_v7 }
 0x101   :  { %v2298_v15 = vpop.f32.mrf.mxu1  ;;  %v2247_v16 = vadd.f32 %v2246_v52, %v2198_v12  ;;  %2346 = vmatmul.bf16.gmra.mxu2 %v3140_v9  ;;  %2444 = vmatmul.bf16.gmra.mxu0 %v3148_v11  ;;  %v3283_v9 = vld [vmem:[%s6021_s0 + $0x258] sm:$0xf]  ;;  %v4205_v11 = vld [vmem:[%s6021_s0 + $0x29c] sm:$0xf0]  ;;  %v3285_v12 = vld [vmem:[%s6021_s0 + $0x2a0] sm:$0xf0] }
 0x102   :  { %2395 = vmatmul.bf16.gmra.mxu3 %v3144_v10  ;;  %v4363_v10 = vld [vmem:[%s6019_s1 + $0x310] sm:$0xff] }
 0x103   :  { %v5163_v19 = vadd.f32 %v2295_v53, %v2247_v16  ;;  %2627 = vmatpush.bf16.msrb.mxu0 %v4363_v10 }
 0x104   :  { %2493 = vmatmul.bf16.gmra.mxu1 %v3152_v14  ;;  %v2151_v20 = vpop.f32.mrf.mxu2  ;;  %v4206_v14 = vld [vmem:[%s6021_s0 + $0x2a4] sm:$0xf0] }
 0x105   :  { %v2200_v21 = vpop.f32.mrf.mxu3  ;;  %v2152_v24 = vadd.f32 %v2151_v20, %v4983_v59  ;;  %v4178_v59 = vld [vmem:[%s6021_s0 + $0x1cc] sm:$0xf] }
 0x106   :  { %v2251_v27 = vpop.f32.mrf.mxu0  ;;  %v3216_v48 = vor.u32 %v4178_v59, %v3213_v35  ;;  %v4346_v59 = vld [vmem:[%s6019_s1 + $0x288] sm:$0xff] }
 0x107   :  { %v2201_v26 = vadd.f32 %v2200_v21, %v2152_v24  ;;  %v3284_v21 = vor.u32 %v4205_v11, %v3283_v9  ;;  %2530 = vmatpush.bf16.msrb.mxu2 %v4346_v59  ;;  %v4370_v11 = vld [vmem:[%s6019_s1 + $0x348] sm:$0xff]  ;;  %v4233_v59 = vld [vmem:[%s6021_s0 + $0x384] sm:$0xf] }
 0x108   :  { %2677 = vmatpush.bf16.msrb.mxu1 %v4370_v11 }
 0x109   :  { %v2300_v28 = vpop.f32.mrf.mxu1  ;;  %v2250_v29 = vadd.f32 %v2249_v13, %v2201_v26  ;;  %v3291_v13 = vld [vmem:[%s6021_s0 + $0x260] sm:$0xf] }
 0x10a   :  { %v3292_v26 = vor.u32 %v4206_v14, %v3291_v13 }
 0x10b   :  { %v5187_v40 = vadd.f32 %v2298_v15, %v2250_v29  ;;  %v3296_v29 = vor.u32 %v4197_v57, %v3293_v36 }
 0x10c   :  { %v2153_v41 = vpop.f32.mrf.mxu2 }
 0x10d   :  { %v2202_v42 = vpop.f32.mrf.mxu3  ;;  %v2154_v46 = vadd.f32 %v2153_v41, %v4998_v8  ;;  %v4355_v8 = vld [vmem:[%s6019_s1 + $0x2d0] sm:$0xff] }
 0x10e   :  { %v2254_v53 = vpop.f32.mrf.mxu0  ;;  %2578 = vmatpush.bf16.msrb.mxu3 %v4355_v8  ;;  %v3365_v8 = vld [vmem:[%s6021_s0 + $0x338] sm:$0xf0] }
 0x10f   :  { %v2203_v52 = vadd.f32 %v2202_v42, %v2154_v46 }
 0x111   :  { %v2303_v55 = vpop.f32.mrf.mxu1  ;;  %v2252_v56 = vadd.f32 %v2251_v27, %v2203_v52  ;;  %2351 = vmatmul.bf16.gmra.mxu2 %v3212_v47  ;;  %2449 = vmatmul.bf16.gmra.mxu0 %v3220_v50  ;;  %v3355_v47 = vld [vmem:[%s6021_s0 + $0x2e8] sm:$0xf]  ;;  %v4223_v50 = vld [vmem:[%s6021_s0 + $0x32c] sm:$0xf0]  ;;  %v3357_v52 = vld [vmem:[%s6021_s0 + $0x330] sm:$0xf0] }
 0x112   :  { %2400 = vmatmul.bf16.gmra.mxu3 %v3216_v48  ;;  %v4362_v48 = vld [vmem:[%s6019_s1 + $0x308] sm:$0xff] }
 0x113   :  { %v5205_v60 = vadd.f32 %v2300_v28, %v2252_v56  ;;  %2628 = vmatpush.bf16.msrb.mxu0 %v4362_v48  ;;  %v4369_v48 = vld [vmem:[%s6019_s1 + $0x340] sm:$0xff] }
 0x114   :  { %2498 = vmatmul.bf16.gmra.mxu1 %v3224_v54  ;;  %v2156_v61 = vpop.f32.mrf.mxu2  ;;  %v4224_v54 = vld [vmem:[%s6021_s0 + $0x334] sm:$0xf0] }
 0x115   :  { %v2205_v0 = vpop.f32.mrf.mxu3  ;;  %v2157_v3 = vadd.f32 %v2156_v61, %v5031_v32  ;;  %v4196_v32 = vld [vmem:[%s6021_s0 + $0x25c] sm:$0xf]  ;;  %2678 = vmatpush.bf16.msrb.mxu1 %v4369_v48 }
 0x116   :  { %v2256_v6 = vpop.f32.mrf.mxu0  ;;  %v3288_v24 = vor.u32 %v4196_v32, %v3285_v12  ;;  %v4345_v32 = vld [vmem:[%s6019_s1 + $0x280] sm:$0xff] }
 0x117   :  { %v2206_v5 = vadd.f32 %v2205_v0, %v2157_v3  ;;  %v3356_v0 = vor.u32 %v4223_v50, %v3355_v47  ;;  %2531 = vmatpush.bf16.msrb.mxu2 %v4345_v32  ;;  %v4251_v32 = vld [vmem:[%s6021_s0 + $0x414] sm:$0xf] }
 0x119   :  { %v2305_v49 = vpop.f32.mrf.mxu1  ;;  %v2255_v7 = vadd.f32 %v2254_v53, %v2206_v5  ;;  %v3363_v53 = vld [vmem:[%s6021_s0 + $0x2f0] sm:$0xf] }
 0x11a   :  { %v3364_v5 = vor.u32 %v4224_v54, %v3363_v53 }
 0x11b   :  { %v5229_v15 = vadd.f32 %v2303_v55, %v2255_v7  ;;  %v3368_v7 = vor.u32 %v4215_v25, %v3365_v8 }
 0x11c   :  { %v2158_v16 = vpop.f32.mrf.mxu2 }
 0x11d   :  { %v2207_v17 = vpop.f32.mrf.mxu3  ;;  %v2159_v20 = vadd.f32 %v2158_v16, %v5046_v44  ;;  %v4354_v44 = vld [vmem:[%s6019_s1 + $0x2c8] sm:$0xff] }
 0x11e   :  { %v2259_v28 = vpop.f32.mrf.mxu0  ;;  %2579 = vmatpush.bf16.msrb.mxu3 %v4354_v44  ;;  %v3437_v44 = vld [vmem:[%s6021_s0 + $0x3c8] sm:$0xf0] }
 0x11f   :  { %v2208_v27 = vadd.f32 %v2207_v17, %v2159_v20 }
 0x121   :  { %v2308_v31 = vpop.f32.mrf.mxu1  ;;  %v2257_v33 = vadd.f32 %v2256_v6, %v2208_v27  ;;  %2356 = vmatmul.bf16.gmra.mxu2 %v3284_v21  ;;  %2454 = vmatmul.bf16.gmra.mxu0 %v3292_v26  ;;  %v3427_v21 = vld [vmem:[%s6021_s0 + $0x378] sm:$0xf]  ;;  %v4241_v26 = vld [vmem:[%s6021_s0 + $0x3bc] sm:$0xf0]  ;;  %v3429_v27 = vld [vmem:[%s6021_s0 + $0x3c0] sm:$0xf0] }
 0x122   :  { %2405 = vmatmul.bf16.gmra.mxu3 %v3288_v24  ;;  %v4361_v24 = vld [vmem:[%s6019_s1 + $0x300] sm:$0xff] }
 0x123   :  { %v5247_v35 = vadd.f32 %v2305_v49, %v2257_v33  ;;  %2629 = vmatpush.bf16.msrb.mxu0 %v4361_v24 }
 0x124   :  { %2503 = vmatmul.bf16.gmra.mxu1 %v3296_v29  ;;  %v2161_v37 = vpop.f32.mrf.mxu2  ;;  %v4242_v29 = vld [vmem:[%s6021_s0 + $0x3c4] sm:$0xf0] }
 0x125   :  { %v2210_v39 = vpop.f32.mrf.mxu3  ;;  %v2162_v41 = vadd.f32 %v2161_v37, %v4893_v62  ;;  %v4214_v62 = vld [vmem:[%s6021_s0 + $0x2ec] sm:$0xf] }
 0x126   :  { %v2261_v43 = vpop.f32.mrf.mxu0  ;;  %v3360_v3 = vor.u32 %v4214_v62, %v3357_v52  ;;  %v4384_v62 = vld [vmem:[%s6019_s1 + $0x3b8] sm:$0xff] }
 0x127   :  { %v2211_v42 = vadd.f32 %v2210_v39, %v2162_v41  ;;  %v3428_v39 = vor.u32 %v4241_v26, %v3427_v21  ;;  %2720 = vmatpush.bf16.msra.mxu2 %v4384_v62  ;;  %v4408_v26 = vld [vmem:[%s6019_s1 + $0x478] sm:$0xff]  ;;  %v4127_v62 = vld [vmem:[%s6021_s0 + $0x34] sm:$0xf] }
 0x128   :  { %2867 = vmatpush.bf16.msra.mxu1 %v4408_v26 }
 0x129   :  { %v2310_v4 = vpop.f32.mrf.mxu1  ;;  %v2260_v46 = vadd.f32 %v2259_v28, %v2211_v42  ;;  %v3435_v28 = vld [vmem:[%s6021_s0 + $0x380] sm:$0xf] }
 0x12a   :  { %v3436_v42 = vor.u32 %v4242_v29, %v3435_v28 }
 0x12b   :  { %v5271_v55 = vadd.f32 %v2308_v31, %v2260_v46  ;;  %v3440_v46 = vor.u32 %v4233_v59, %v3437_v44 }
 0x12c   :  { %v2163_v56 = vpop.f32.mrf.mxu2 }
 0x12d   :  { %v2212_v58 = vpop.f32.mrf.mxu3  ;;  %v2164_v61 = vadd.f32 %v2163_v56, %v4926_v18  ;;  %v4353_v18 = vld [vmem:[%s6019_s1 + $0x2c0] sm:$0xff] }
 0x12e   :  { %v2264_v49 = vpop.f32.mrf.mxu0  ;;  %2580 = vmatpush.bf16.msrb.mxu3 %v4353_v18  ;;  %v3509_v18 = vld [vmem:[%s6021_s0 + $0x458] sm:$0xf0] }
 0x12f   :  { %v2213_v6 = vadd.f32 %v2212_v58, %v2164_v61 }
 0x131   :  { %v2313_v9 = vpop.f32.mrf.mxu1  ;;  %v2262_v10 = vadd.f32 %v2261_v43, %v2213_v6  ;;  %2361 = vmatmul.bf16.gmra.mxu2 %v3356_v0  ;;  %2459 = vmatmul.bf16.gmra.mxu0 %v3364_v5  ;;  %v3499_v0 = vld [vmem:[%s6021_s0 + $0x408] sm:$0xf]  ;;  %v4259_v5 = vld [vmem:[%s6021_s0 + $0x44c] sm:$0xf0]  ;;  %v3501_v6 = vld [vmem:[%s6021_s0 + $0x450] sm:$0xf0] }
 0x132   :  { %2410 = vmatmul.bf16.gmra.mxu3 %v3360_v3  ;;  %v4400_v3 = vld [vmem:[%s6019_s1 + $0x438] sm:$0xff] }
 0x133   :  { %v5289_v12 = vadd.f32 %v2310_v4, %v2262_v10  ;;  %2818 = vmatpush.bf16.msra.mxu0 %v4400_v3 }
 0x134   :  { %2508 = vmatmul.bf16.gmra.mxu1 %v3368_v7  ;;  %v2166_v13 = vpop.f32.mrf.mxu2  ;;  %v4260_v7 = vld [vmem:[%s6021_s0 + $0x454] sm:$0xf0] }
 0x135   :  { %v2215_v14 = vpop.f32.mrf.mxu3  ;;  %v2167_v16 = vadd.f32 %v2166_v13, %v4941_v30  ;;  %v4232_v30 = vld [vmem:[%s6021_s0 + $0x37c] sm:$0xf] }
 0x136   :  { %v2266_v57 = vpop.f32.mrf.mxu0  ;;  %v3432_v41 = vor.u32 %v4232_v30, %v3429_v27  ;;  %v4383_v30 = vld [vmem:[%s6019_s1 + $0x3b0] sm:$0xff] }
 0x137   :  { %v2216_v17 = vadd.f32 %v2215_v14, %v2167_v16  ;;  %v3500_v14 = vor.u32 %v4259_v5, %v3499_v0  ;;  %2721 = vmatpush.bf16.msra.mxu2 %v4383_v30  ;;  %v4407_v5 = vld [vmem:[%s6019_s1 + $0x470] sm:$0xff]  ;;  %v4145_v30 = vld [vmem:[%s6021_s0 + $0xc4] sm:$0xf] }
 0x138   :  { %2868 = vmatpush.bf16.msra.mxu1 %v4407_v5 }
 0x139   :  { %v2315_v36 = vpop.f32.mrf.mxu1  ;;  %v2265_v20 = vadd.f32 %v2264_v49, %v2216_v17  ;;  %v3507_v49 = vld [vmem:[%s6021_s0 + $0x410] sm:$0xf] }
 0x13a   :  { %v3508_v17 = vor.u32 %v4260_v7, %v3507_v49 }
 0x13b   :  { %v5313_v31 = vadd.f32 %v2313_v9, %v2265_v20  ;;  %v3512_v20 = vor.u32 %v4251_v32, %v3509_v18 }
 0x13c   :  { %v2168_v33 = vpop.f32.mrf.mxu2 }
 0x13d   :  { %v2217_v34 = vpop.f32.mrf.mxu3  ;;  %v2169_v37 = vadd.f32 %v2168_v33, %v4974_v51  ;;  %v4392_v51 = vld [vmem:[%s6019_s1 + $0x3f8] sm:$0xff] }
 0x13e   :  { %v2269_v4 = vpop.f32.mrf.mxu0  ;;  %2769 = vmatpush.bf16.msra.mxu3 %v4392_v51  ;;  %v3021_v51 = vld [vmem:[%s6021_s0 + $0x78] sm:$0xf0] }
 0x13f   :  { %v2218_v43 = vadd.f32 %v2217_v34, %v2169_v37 }
 0x141   :  { %v2318_v47 = vpop.f32.mrf.mxu1  ;;  %v2267_v50 = vadd.f32 %v2266_v57, %v2218_v43  ;;  %2366 = vmatmul.bf16.gmra.mxu2 %v3428_v39  ;;  %2464 = vmatmul.bf16.gmra.mxu0 %v3436_v42  ;;  %v3011_v39 = vld [vmem:[%s6021_s0 + $0x28] sm:$0xf]  ;;  %v4135_v42 = vld [vmem:[%s6021_s0 + $0x6c] sm:$0xf0]  ;;  %v3013_v43 = vld [vmem:[%s6021_s0 + $0x70] sm:$0xf0] }
 0x142   :  { %2415 = vmatmul.bf16.gmra.mxu3 %v3432_v41  ;;  %v4399_v41 = vld [vmem:[%s6019_s1 + $0x430] sm:$0xff] }
 0x143   :  { %v5331_v52 = vadd.f32 %v2315_v36, %v2267_v50  ;;  %2819 = vmatpush.bf16.msra.mxu0 %v4399_v41 }
 0x144   :  { %2513 = vmatmul.bf16.gmra.mxu1 %v3440_v46  ;;  %v2171_v53 = vpop.f32.mrf.mxu2  ;;  %v4136_v46 = vld [vmem:[%s6021_s0 + $0x74] sm:$0xf0] }
 0x145   :  { %v2220_v54 = vpop.f32.mrf.mxu3  ;;  %v2172_v56 = vadd.f32 %v2171_v53, %v4989_v1  ;;  %v4250_v1 = vld [vmem:[%s6021_s0 + $0x40c] sm:$0xf] }
 0x146   :  { %v2271_v25 = vpop.f32.mrf.mxu0  ;;  %v3504_v16 = vor.u32 %v4250_v1, %v3501_v6  ;;  %v4382_v1 = vld [vmem:[%s6019_s1 + $0x3a8] sm:$0xff] }
 0x147   :  { %v2221_v58 = vadd.f32 %v2220_v54, %v2172_v56  ;;  %v3012_v54 = vor.u32 %v4135_v42, %v3011_v39  ;;  %2722 = vmatpush.bf16.msra.mxu2 %v4382_v1  ;;  %v4406_v42 = vld [vmem:[%s6019_s1 + $0x468] sm:$0xff]  ;;  %v4163_v1 = vld [vmem:[%s6021_s0 + $0x154] sm:$0xf] }
 0x148   :  { %2869 = vmatpush.bf16.msra.mxu1 %v4406_v42 }
 0x149   :  { %v2320_v8 = vpop.f32.mrf.mxu1  ;;  %v2270_v61 = vadd.f32 %v2269_v4, %v2221_v58  ;;  %v3019_v4 = vld [vmem:[%s6021_s0 + $0x30] sm:$0xf] }
 0x14a   :  { %v3020_v58 = vor.u32 %v4136_v46, %v3019_v4 }
 0x14b   :  { %v5355_v9 = vadd.f32 %v2318_v47, %v2270_v61  ;;  %v3024_v61 = vor.u32 %v4127_v62, %v3021_v51 }
 0x14c   :  { %v2173_v10 = vpop.f32.mrf.mxu2 }
 0x14d   :  { %v2222_v11 = vpop.f32.mrf.mxu3  ;;  %v2174_v13 = vadd.f32 %v2173_v10, %v5022_v23  ;;  %v4391_v23 = vld [vmem:[%s6019_s1 + $0x3f0] sm:$0xff] }
 0x14e   :  { %v2274_v36 = vpop.f32.mrf.mxu0  ;;  %2770 = vmatpush.bf16.msra.mxu3 %v4391_v23  ;;  %v3093_v23 = vld [vmem:[%s6021_s0 + $0x108] sm:$0xf0] }
 0x14f   :  { %v2223_v57 = vadd.f32 %v2222_v11, %v2174_v13 }
 0x151   :  { %v2323_v21 = vpop.f32.mrf.mxu1  ;;  %v2272_v24 = vadd.f32 %v2271_v25, %v2223_v57  ;;  %2371 = vmatmul.bf16.gmra.mxu2 %v3500_v14  ;;  %2469 = vmatmul.bf16.gmra.mxu0 %v3508_v17  ;;  %v3083_v14 = vld [vmem:[%s6021_s0 + $0xb8] sm:$0xf]  ;;  %v4153_v17 = vld [vmem:[%s6021_s0 + $0xfc] sm:$0xf0]  ;;  %v3085_v57 = vld [vmem:[%s6021_s0 + $0x100] sm:$0xf0] }
 0x152   :  { %2420 = vmatmul.bf16.gmra.mxu3 %v3504_v16  ;;  %v4398_v16 = vld [vmem:[%s6019_s1 + $0x428] sm:$0xff] }
 0x153   :  { %v5373_v27 = vadd.f32 %v2320_v8, %v2272_v24  ;;  %2820 = vmatpush.bf16.msra.mxu0 %v4398_v16 }
 0x154   :  { %2518 = vmatmul.bf16.gmra.mxu1 %v3512_v20  ;;  %v2176_v28 = vpop.f32.mrf.mxu2  ;;  %v4154_v20 = vld [vmem:[%s6021_s0 + $0x104] sm:$0xf0] }
 0x155   :  { %v2225_v29 = vpop.f32.mrf.mxu3  ;;  %v2177_v33 = vadd.f32 %v2176_v28, %v5037_v38  ;;  %v4126_v38 = vld [vmem:[%s6021_s0 + $0x2c] sm:$0xf] }
 0x156   :  { %v2276_v59 = vpop.f32.mrf.mxu0  ;;  %v3016_v56 = vor.u32 %v4126_v38, %v3013_v43  ;;  %v4381_v38 = vld [vmem:[%s6019_s1 + $0x3a0] sm:$0xff] }
 0x157   :  { %v2226_v34 = vadd.f32 %v2225_v29, %v2177_v33  ;;  %v3084_v29 = vor.u32 %v4153_v17, %v3083_v14  ;;  %2723 = vmatpush.bf16.msra.mxu2 %v4381_v38  ;;  %v4405_v17 = vld [vmem:[%s6019_s1 + $0x460] sm:$0xff] }
 0x158   :  { %2870 = vmatpush.bf16.msra.mxu1 %v4405_v17  ;;  %v4181_v38 = vld [vmem:[%s6021_s0 + $0x1e4] sm:$0xf] }
 0x159   :  { %v2325_v44 = vpop.f32.mrf.mxu1  ;;  %v2275_v37 = vadd.f32 %v2274_v36, %v2226_v34  ;;  %v3091_v36 = vld [vmem:[%s6021_s0 + $0xc0] sm:$0xf] }
 0x15a   :  { %v3092_v34 = vor.u32 %v4154_v20, %v3091_v36 }
 0x15b   :  { %v5397_v47 = vadd.f32 %v2323_v21, %v2275_v37  ;;  %v3096_v37 = vor.u32 %v4145_v30, %v3093_v23 }
 0x15c   :  { %v2178_v48 = vpop.f32.mrf.mxu2 }
 0x15d   :  { %v2227_v50 = vpop.f32.mrf.mxu3  ;;  %v2179_v53 = vadd.f32 %v2178_v48, %v5070_v63  ;;  %v4390_v63 = vld [vmem:[%s6019_s1 + $0x3e8] sm:$0xff] }
 0x15e   :  { %v2435_v8 = vpop.f32.mrf.mxu0  ;;  %2771 = vmatpush.bf16.msra.mxu3 %v4390_v63  ;;  %v3165_v63 = vld [vmem:[%s6021_s0 + $0x198] sm:$0xf0] }
 0x15f   :  { %v2228_v25 = vadd.f32 %v2227_v50, %v2179_v53 }
 0x161   :  { %v2484_v0 = vpop.f32.mrf.mxu1  ;;  %v2277_v3 = vadd.f32 %v2276_v59, %v2228_v25  ;;  %2532 = vmatmul.bf16.vlgmr.msrb.gmra.mxu2 %v3012_v54  ;;  %2630 = vmatmul.bf16.vlgmr.msrb.gmra.mxu0 %v3020_v58  ;;  %v3155_v54 = vld [vmem:[%s6021_s0 + $0x148] sm:$0xf]  ;;  %v4171_v58 = vld [vmem:[%s6021_s0 + $0x18c] sm:$0xf0]  ;;  %v3157_v25 = vld [vmem:[%s6021_s0 + $0x190] sm:$0xf0] }
 0x162   :  { %2581 = vmatmul.bf16.vlgmr.msrb.gmra.mxu3 %v3016_v56  ;;  %v4397_v56 = vld [vmem:[%s6019_s1 + $0x420] sm:$0xff] }
 0x163   :  { %v5415_v6 = vadd.f32 %v2325_v44, %v2277_v3  ;;  %2821 = vmatpush.bf16.msra.mxu0 %v4397_v56 }
 0x164   :  { %2679 = vmatmul.bf16.vlgmr.msrb.gmra.mxu1 %v3024_v61  ;;  %v2337_v49 = vpop.f32.mrf.mxu2  ;;  %v4172_v61 = vld [vmem:[%s6021_s0 + $0x194] sm:$0xf0] }
 0x165   :  { %v2386_v7 = vpop.f32.mrf.mxu3  ;;  %v2338_v10 = vadd.f32 %v2337_v49, %v5103_v22  ;;  %v4144_v22 = vld [vmem:[%s6021_s0 + $0xbc] sm:$0xf] }
 0x166   :  { %v2437_v32 = vpop.f32.mrf.mxu0  ;;  %v3088_v33 = vor.u32 %v4144_v22, %v3085_v57  ;;  %v4380_v22 = vld [vmem:[%s6019_s1 + $0x398] sm:$0xff] }
 0x167   :  { %v2387_v11 = vadd.f32 %v2386_v7, %v2338_v10  ;;  %v3156_v7 = vor.u32 %v4171_v58, %v3155_v54  ;;  %2724 = vmatpush.bf16.msra.mxu2 %v4380_v22  ;;  %v4404_v58 = vld [vmem:[%s6019_s1 + $0x458] sm:$0xff]  ;;  %v4199_v22 = vld [vmem:[%s6021_s0 + $0x274] sm:$0xf] }
 0x168   :  { %2871 = vmatpush.bf16.msra.mxu1 %v4404_v58 }
 0x169   :  { %v2486_v18 = vpop.f32.mrf.mxu1  ;;  %v2436_v13 = vadd.f32 %v2435_v8, %v2387_v11  ;;  %v3163_v8 = vld [vmem:[%s6021_s0 + $0x150] sm:$0xf] }
 0x16a   :  { %v3164_v11 = vor.u32 %v4172_v61, %v3163_v8 }
 0x16b   :  { %v5439_v21 = vadd.f32 %v2484_v0, %v2436_v13  ;;  %v3168_v13 = vor.u32 %v4163_v1, %v3165_v63 }
 0x16c   :  { %v2339_v24 = vpop.f32.mrf.mxu2 }
 0x16d   :  { %v2388_v26 = vpop.f32.mrf.mxu3  ;;  %v2340_v28 = vadd.f32 %v2339_v24, %v5121_v45  ;;  %v4389_v45 = vld [vmem:[%s6019_s1 + $0x3e0] sm:$0xff] }
 0x16e   :  { %v2440_v44 = vpop.f32.mrf.mxu0  ;;  %2772 = vmatpush.bf16.msra.mxu3 %v4389_v45  ;;  %v3237_v45 = vld [vmem:[%s6021_s0 + $0x228] sm:$0xf0] }
 0x16f   :  { %v2389_v59 = vadd.f32 %v2388_v26, %v2340_v28 }
 0x171   :  { %v2489_v39 = vpop.f32.mrf.mxu1  ;;  %v2438_v41 = vadd.f32 %v2437_v32, %v2389_v59  ;;  %2537 = vmatmul.bf16.gmra.mxu2 %v3084_v29  ;;  %2635 = vmatmul.bf16.gmra.mxu0 %v3092_v34  ;;  %v3227_v29 = vld [vmem:[%s6021_s0 + $0x1d8] sm:$0xf]  ;;  %v4189_v34 = vld [vmem:[%s6021_s0 + $0x21c] sm:$0xf0]  ;;  %v3229_v59 = vld [vmem:[%s6021_s0 + $0x220] sm:$0xf0] }
 0x172   :  { %2586 = vmatmul.bf16.gmra.mxu3 %v3088_v33  ;;  %v4396_v33 = vld [vmem:[%s6019_s1 + $0x418] sm:$0xff] }
 0x173   :  { %v5457_v43 = vadd.f32 %v2486_v18, %v2438_v41  ;;  %2822 = vmatpush.bf16.msra.mxu0 %v4396_v33 }
 0x174   :  { %2684 = vmatmul.bf16.gmra.mxu1 %v3096_v37  ;;  %v2342_v4 = vpop.f32.mrf.mxu2  ;;  %v4190_v37 = vld [vmem:[%s6021_s0 + $0x224] sm:$0xf0] }
 0x175   :  { %v2391_v46 = vpop.f32.mrf.mxu3  ;;  %v2343_v48 = vadd.f32 %v2342_v4, %v5145_v2  ;;  %v4162_v2 = vld [vmem:[%s6021_s0 + $0x14c] sm:$0xf] }
 0x176   :  { %v2442_v62 = vpop.f32.mrf.mxu0  ;;  %v3160_v10 = vor.u32 %v4162_v2, %v3157_v25  ;;  %v4379_v2 = vld [vmem:[%s6019_s1 + $0x390] sm:$0xff] }
 0x177   :  { %v2392_v50 = vadd.f32 %v2391_v46, %v2343_v48  ;;  %v3228_v46 = vor.u32 %v4189_v34, %v3227_v29  ;;  %2725 = vmatpush.bf16.msra.mxu2 %v4379_v2  ;;  %v4403_v34 = vld [vmem:[%s6019_s1 + $0x450] sm:$0xff]  ;;  %v4217_v2 = vld [vmem:[%s6021_s0 + $0x304] sm:$0xf] }
 0x178   :  { %2872 = vmatpush.bf16.msra.mxu1 %v4403_v34 }
 0x179   :  { %v2491_v51 = vpop.f32.mrf.mxu1  ;;  %v2441_v53 = vadd.f32 %v2440_v44, %v2392_v50  ;;  %v3235_v44 = vld [vmem:[%s6021_s0 + $0x1e0] sm:$0xf] }
 0x17a   :  { %v3236_v50 = vor.u32 %v4190_v37, %v3235_v44 }
 0x17b   :  { %v5481_v0 = vadd.f32 %v2489_v39, %v2441_v53  ;;  %v3240_v53 = vor.u32 %v4181_v38, %v3237_v45 }
 0x17c   :  { %v2344_v3 = vpop.f32.mrf.mxu2 }
 0x17d   :  { %v2393_v5 = vpop.f32.mrf.mxu3  ;;  %v2345_v49 = vadd.f32 %v2344_v3, %v5163_v19  ;;  %v4388_v19 = vld [vmem:[%s6019_s1 + $0x3d8] sm:$0xff] }
 0x17e   :  { %v2445_v18 = vpop.f32.mrf.mxu0  ;;  %2773 = vmatpush.bf16.msra.mxu3 %v4388_v19  ;;  %v3309_v19 = vld [vmem:[%s6021_s0 + $0x2b8] sm:$0xf0] }
 0x17f   :  { %v2394_v32 = vadd.f32 %v2393_v5, %v2345_v49 }
 0x181   :  { %v2494_v14 = vpop.f32.mrf.mxu1  ;;  %v2443_v16 = vadd.f32 %v2442_v62, %v2394_v32  ;;  %2542 = vmatmul.bf16.gmra.mxu2 %v3156_v7  ;;  %2640 = vmatmul.bf16.gmra.mxu0 %v3164_v11  ;;  %v3299_v7 = vld [vmem:[%s6021_s0 + $0x268] sm:$0xf]  ;;  %v4207_v11 = vld [vmem:[%s6021_s0 + $0x2ac] sm:$0xf0]  ;;  %v3301_v32 = vld [vmem:[%s6021_s0 + $0x2b0] sm:$0xf0] }
 0x182   :  { %2591 = vmatmul.bf16.gmra.mxu3 %v3160_v10  ;;  %v4395_v10 = vld [vmem:[%s6019_s1 + $0x410] sm:$0xff] }
 0x183   :  { %v5499_v57 = vadd.f32 %v2491_v51, %v2443_v16  ;;  %2823 = vmatpush.bf16.msra.mxu0 %v4395_v10 }
 0x184   :  { %2689 = vmatmul.bf16.gmra.mxu1 %v3168_v13  ;;  %v2347_v36 = vpop.f32.mrf.mxu2  ;;  %v4208_v13 = vld [vmem:[%s6021_s0 + $0x2b4] sm:$0xf0] }
 0x185   :  { %v2396_v20 = vpop.f32.mrf.mxu3  ;;  %v2348_v24 = vadd.f32 %v2347_v36, %v5187_v40  ;;  %v4180_v40 = vld [vmem:[%s6021_s0 + $0x1dc] sm:$0xf] }
 0x186   :  { %v2447_v30 = vpop.f32.mrf.mxu0  ;;  %v3232_v48 = vor.u32 %v4180_v40, %v3229_v59  ;;  %v4378_v40 = vld [vmem:[%s6019_s1 + $0x388] sm:$0xff] }
 0x187   :  { %v2397_v26 = vadd.f32 %v2396_v20, %v2348_v24  ;;  %v3300_v20 = vor.u32 %v4207_v11, %v3299_v7  ;;  %2726 = vmatpush.bf16.msra.mxu2 %v4378_v40  ;;  %v4402_v11 = vld [vmem:[%s6019_s1 + $0x448] sm:$0xff]  ;;  %v4235_v40 = vld [vmem:[%s6021_s0 + $0x394] sm:$0xf] }
 0x188   :  { %2873 = vmatpush.bf16.msra.mxu1 %v4402_v11 }
 0x189   :  { %v2496_v23 = vpop.f32.mrf.mxu1  ;;  %v2446_v28 = vadd.f32 %v2445_v18, %v2397_v26  ;;  %v3307_v18 = vld [vmem:[%s6021_s0 + $0x270] sm:$0xf] }
 0x18a   :  { %v3308_v26 = vor.u32 %v4208_v13, %v3307_v18 }
 0x18b   :  { %v5523_v39 = vadd.f32 %v2494_v14, %v2446_v28  ;;  %v3312_v28 = vor.u32 %v4199_v22, %v3309_v19 }
 0x18c   :  { %v2349_v41 = vpop.f32.mrf.mxu2 }
 0x18d   :  { %v2398_v42 = vpop.f32.mrf.mxu3  ;;  %v2350_v4 = vadd.f32 %v2349_v41, %v5205_v60  ;;  %v4387_v60 = vld [vmem:[%s6019_s1 + $0x3d0] sm:$0xff] }
 0x18e   :  { %v2450_v51 = vpop.f32.mrf.mxu0  ;;  %2774 = vmatpush.bf16.msra.mxu3 %v4387_v60  ;;  %v3381_v60 = vld [vmem:[%s6021_s0 + $0x348] sm:$0xf0] }
 0x18f   :  { %v2399_v62 = vadd.f32 %v2398_v42, %v2350_v4 }
 0x191   :  { %v2499_v54 = vpop.f32.mrf.mxu1  ;;  %v2448_v56 = vadd.f32 %v2447_v30, %v2399_v62  ;;  %2547 = vmatmul.bf16.gmra.mxu2 %v3228_v46  ;;  %2645 = vmatmul.bf16.gmra.mxu0 %v3236_v50  ;;  %v3371_v46 = vld [vmem:[%s6021_s0 + $0x2f8] sm:$0xf]  ;;  %v4225_v50 = vld [vmem:[%s6021_s0 + $0x33c] sm:$0xf0]  ;;  %v3373_v62 = vld [vmem:[%s6021_s0 + $0x340] sm:$0xf0] }
 0x192   :  { %2596 = vmatmul.bf16.gmra.mxu3 %v3232_v48  ;;  %v4394_v48 = vld [vmem:[%s6019_s1 + $0x408] sm:$0xff] }
 0x193   :  { %v5541_v25 = vadd.f32 %v2496_v23, %v2448_v56  ;;  %2824 = vmatpush.bf16.msra.mxu0 %v4394_v48  ;;  %v4401_v48 = vld [vmem:[%s6019_s1 + $0x440] sm:$0xff] }
 0x194   :  { %2694 = vmatmul.bf16.gmra.mxu1 %v3240_v53  ;;  %v2352_v8 = vpop.f32.mrf.mxu2  ;;  %v4226_v53 = vld [vmem:[%s6021_s0 + $0x344] sm:$0xf0] }
 0x195   :  { %v2401_v61 = vpop.f32.mrf.mxu3  ;;  %v2353_v3 = vadd.f32 %v2352_v8, %v5229_v15  ;;  %v4198_v15 = vld [vmem:[%s6021_s0 + $0x26c] sm:$0xf]  ;;  %2874 = vmatpush.bf16.msra.mxu1 %v4401_v48 }
 0x196   :  { %v2452_v1 = vpop.f32.mrf.mxu0  ;;  %v3304_v24 = vor.u32 %v4198_v15, %v3301_v32  ;;  %v4377_v15 = vld [vmem:[%s6019_s1 + $0x380] sm:$0xff] }
 0x197   :  { %v2402_v5 = vadd.f32 %v2401_v61, %v2353_v3  ;;  %v3372_v61 = vor.u32 %v4225_v50, %v3371_v46  ;;  %2727 = vmatpush.bf16.msra.mxu2 %v4377_v15 }
 0x199   :  { %v2501_v63 = vpop.f32.mrf.mxu1  ;;  %v2451_v49 = vadd.f32 %v2450_v51, %v2402_v5  ;;  %v3379_v51 = vld [vmem:[%s6021_s0 + $0x300] sm:$0xf] }
 0x19a   :  { %v3380_v5 = vor.u32 %v4226_v53, %v3379_v51 }
 0x19b   :  { %v5565_v14 = vadd.f32 %v2499_v54, %v2451_v49  ;;  %v3384_v49 = vor.u32 %v4217_v2, %v3381_v60  ;;  %v3515_v60 = vld [vmem:[%s6021_s0 + $0x418] sm:$0xf] }
 0x19c   :  { %v2354_v16 = vpop.f32.mrf.mxu2 }
 0x19d   :  { %v2403_v17 = vpop.f32.mrf.mxu3  ;;  %v2355_v36 = vadd.f32 %v2354_v16, %v5247_v35  ;;  %v4386_v35 = vld [vmem:[%s6019_s1 + $0x3c8] sm:$0xff] }
 0x19e   :  { %v2455_v23 = vpop.f32.mrf.mxu0  ;;  %2775 = vmatpush.bf16.msra.mxu3 %v4386_v35  ;;  %v3453_v35 = vld [vmem:[%s6021_s0 + $0x3d8] sm:$0xf0] }
 0x19f   :  { %v2404_v30 = vadd.f32 %v2403_v17, %v2355_v36 }
 0x1a1   :  { %v2504_v29 = vpop.f32.mrf.mxu1  ;;  %v2453_v33 = vadd.f32 %v2452_v1, %v2404_v30  ;;  %2552 = vmatmul.bf16.gmra.mxu2 %v3300_v20  ;;  %2650 = vmatmul.bf16.gmra.mxu0 %v3308_v26  ;;  %v3443_v20 = vld [vmem:[%s6021_s0 + $0x388] sm:$0xf]  ;;  %v4243_v26 = vld [vmem:[%s6021_s0 + $0x3cc] sm:$0xf0]  ;;  %v3445_v30 = vld [vmem:[%s6021_s0 + $0x3d0] sm:$0xf0] }
 0x1a2   :  { %2601 = vmatmul.bf16.gmra.mxu3 %v3304_v24  ;;  %v4393_v24 = vld [vmem:[%s6019_s1 + $0x400] sm:$0xff] }
 0x1a3   :  { %v5583_v59 = vadd.f32 %v2501_v63, %v2453_v33  ;;  %2825 = vmatpush.bf16.msra.mxu0 %v4393_v24 }
 0x1a4   :  { %2699 = vmatmul.bf16.gmra.mxu1 %v3312_v28  ;;  %v2357_v44 = vpop.f32.mrf.mxu2  ;;  %v4244_v28 = vld [vmem:[%s6021_s0 + $0x3d4] sm:$0xf0] }
 0x1a5   :  { %v2406_v37 = vpop.f32.mrf.mxu3  ;;  %v2358_v41 = vadd.f32 %v2357_v44, %v5271_v55  ;;  %v4216_v55 = vld [vmem:[%s6021_s0 + $0x2fc] sm:$0xf] }
 0x1a6   :  { %v2457_v38 = vpop.f32.mrf.mxu0  ;;  %v3376_v3 = vor.u32 %v4216_v55, %v3373_v62 }
 0x1a7   :  { %v2407_v42 = vadd.f32 %v2406_v37, %v2358_v41  ;;  %v3444_v37 = vor.u32 %v4243_v26, %v3443_v20 }
 0x1a9   :  { %v2506_v45 = vpop.f32.mrf.mxu1  ;;  %v2456_v4 = vadd.f32 %v2455_v23, %v2407_v42  ;;  %v3451_v23 = vld [vmem:[%s6021_s0 + $0x390] sm:$0xf] }
 0x1aa   :  { %v3452_v42 = vor.u32 %v4244_v28, %v3451_v23  ;;  %v3027_v28 = vld [vmem:[%s6021_s0 + $0x38] sm:$0xf] }
 0x1ab   :  { %v5607_v54 = vadd.f32 %v2504_v29, %v2456_v4  ;;  %v3456_v4 = vor.u32 %v4235_v40, %v3453_v35  ;;  %v3035_v40 = vld [vmem:[%s6021_s0 + $0x40] sm:$0xf]  ;;  %v4138_v35 = vld [vmem:[%s6021_s0 + $0x84] sm:$0xf0] }
 0x1ac   :  { %v2359_v56 = vpop.f32.mrf.mxu2  ;;  %v3036_v48 = vor.u32 %v4138_v35, %v3035_v40  ;;  %v3171_v40 = vld [vmem:[%s6021_s0 + $0x158] sm:$0xf]  ;;  %v4173_v35 = vld [vmem:[%s6021_s0 + $0x19c] sm:$0xf0] }
 0x1ad   :  { %v2408_v58 = vpop.f32.mrf.mxu3  ;;  %v2360_v8 = vadd.f32 %v2359_v56, %v5289_v12  ;;  %v4385_v12 = vld [vmem:[%s6019_s1 + $0x3c0] sm:$0xff] }
 0x1ae   :  { %v2460_v63 = vpop.f32.mrf.mxu0  ;;  %2776 = vmatpush.bf16.msra.mxu3 %v4385_v12 }
 0x1af   :  { %v2409_v1 = vadd.f32 %v2408_v58, %v2360_v8  ;;  %v4261_v8 = vld [vmem:[%s6021_s0 + $0x45c] sm:$0xf0] }
 0x1b0   :  { %v3516_v15 = vor.u32 %v4261_v8, %v3515_v60 }
 0x1b1   :  { %v2509_v7 = vpop.f32.mrf.mxu1  ;;  %v2458_v10 = vadd.f32 %v2457_v38, %v2409_v1  ;;  %2557 = vmatmul.bf16.gmra.mxu2 %v3372_v61  ;;  %2655 = vmatmul.bf16.gmra.mxu0 %v3380_v5  ;;  %v4252_v61 = vld [vmem:[%s6021_s0 + $0x41c] sm:$0xf]  ;;  %v4262_v5 = vld [vmem:[%s6021_s0 + $0x464] sm:$0xf0] }
 0x1b2   :  { %2606 = vmatmul.bf16.gmra.mxu3 %v3376_v3  ;;  %v3523_v3 = vld [vmem:[%s6021_s0 + $0x420] sm:$0xf] }
 0x1b3   :  { %v5625_v32 = vadd.f32 %v2506_v45, %v2458_v10  ;;  %v3525_v10 = vld [vmem:[%s6021_s0 + $0x468] sm:$0xf0] }
 0x1b4   :  { %2704 = vmatmul.bf16.gmra.mxu1 %v3384_v49  ;;  %v2362_v18 = vpop.f32.mrf.mxu2 }
 0x1b5   :  { %v2411_v13 = vpop.f32.mrf.mxu3  ;;  %v2363_v16 = vadd.f32 %v2362_v18, %v5313_v31  ;;  %v4234_v31 = vld [vmem:[%s6021_s0 + $0x38c] sm:$0xf]  ;;  %v3524_v18 = vor.u32 %v4262_v5, %v3523_v3  ;;  %v3099_v3 = vld [vmem:[%s6021_s0 + $0xc8] sm:$0xf]  ;;  %v4155_v5 = vld [vmem:[%s6021_s0 + $0x10c] sm:$0xf0] }
 0x1b6   :  { %v2462_v22 = vpop.f32.mrf.mxu0  ;;  %v3448_v41 = vor.u32 %v4234_v31, %v3445_v30 }
 0x1b7   :  { %v2412_v17 = vadd.f32 %v2411_v13, %v2363_v16 }
 0x1b9   :  { %v2511_v19 = vpop.f32.mrf.mxu1  ;;  %v2461_v36 = vadd.f32 %v2460_v63, %v2412_v17 }
 0x1bb   :  { %v5649_v29 = vadd.f32 %v2509_v7, %v2461_v36  ;;  %v4253_v7 = vld [vmem:[%s6021_s0 + $0x424] sm:$0xf] }
 0x1bc   :  { %v2364_v33 = vpop.f32.mrf.mxu2  ;;  %v3528_v17 = vor.u32 %v4253_v7, %v3525_v10  ;;  %v4156_v7 = vld [vmem:[%s6021_s0 + $0x114] sm:$0xf0] }
 0x1bd   :  { %v2413_v34 = vpop.f32.mrf.mxu3  ;;  %v2365_v44 = vadd.f32 %v2364_v33, %v5331_v52  ;;  %v4137_v33 = vld [vmem:[%s6021_s0 + $0x7c] sm:$0xf0] }
 0x1be   :  { %v2465_v45 = vpop.f32.mrf.mxu0 }
 0x1bf   :  { %v2414_v38 = vadd.f32 %v2413_v34, %v2365_v44  ;;  %v4128_v34 = vld [vmem:[%s6021_s0 + $0x3c] sm:$0xf] }
 0x1c1   :  { %v2514_v46 = vpop.f32.mrf.mxu1  ;;  %v2463_v50 = vadd.f32 %v2462_v22, %v2414_v38  ;;  %2562 = vmatmul.bf16.gmra.mxu2 %v3444_v37  ;;  %2660 = vmatmul.bf16.gmra.mxu0 %v3452_v42  ;;  %v4129_v42 = vld [vmem:[%s6021_s0 + $0x44] sm:$0xf]  ;;  %v3037_v38 = vld [vmem:[%s6021_s0 + $0x88] sm:$0xf0] }
 0x1c2   :  { %2611 = vmatmul.bf16.gmra.mxu3 %v3448_v41 }
 0x1c3   :  { %v5661_v55 = vadd.f32 %v2511_v19, %v2463_v50 }
 0x1c4   :  { %2709 = vmatmul.bf16.gmra.mxu1 %v3456_v4  ;;  %v2367_v52 = vpop.f32.mrf.mxu2  ;;  %v3028_v4 = vor.u32 %v4137_v33, %v3027_v28 }
 0x1c5   :  { %v2416_v62 = vpop.f32.mrf.mxu3  ;;  %v2368_v51 = vadd.f32 %v2367_v52, %v5355_v9  ;;  %v3517_v9 = vld [vmem:[%s6021_s0 + $0x460] sm:$0xf0] }
 0x1c6   :  { %v2467_v56 = vpop.f32.mrf.mxu0  ;;  %v3520_v12 = vor.u32 %v4252_v61, %v3517_v9 }
 0x1c7   :  { %v2417_v53 = vadd.f32 %v2416_v62, %v2368_v51  ;;  %v3040_v62 = vor.u32 %v4129_v42, %v3037_v38  ;;  %v4174_v42 = vld [vmem:[%s6021_s0 + $0x1a4] sm:$0xf0] }
 0x1c9   :  { %v2516_v58 = vpop.f32.mrf.mxu1  ;;  %v2466_v2 = vadd.f32 %v2465_v45, %v2417_v53 }
 0x1cb   :  { %v5682_v1 = vadd.f32 %v2514_v46, %v2466_v2 }
 0x1cc   :  { %v2369_v63 = vpop.f32.mrf.mxu2 }
 0x1cd   :  { %v2418_v49 = vpop.f32.mrf.mxu3  ;;  %v2370_v11 = vadd.f32 %v2369_v63, %v5373_v27  ;;  %v4146_v63 = vld [vmem:[%s6021_s0 + $0xcc] sm:$0xf] }
 0x1ce   :  { %v2470_v16 = vpop.f32.mrf.mxu0 }
 0x1cf   :  { %v2419_v13 = vadd.f32 %v2418_v49, %v2370_v11  ;;  %v3107_v49 = vld [vmem:[%s6021_s0 + $0xd0] sm:$0xf] }
 0x1d1   :  { %v2519_v22 = vpop.f32.mrf.mxu1  ;;  %v2468_v19 = vadd.f32 %v2467_v56, %v2419_v13  ;;  %2567 = vmatmul.bf16.gmra.mxu2 %v3516_v15  ;;  %2665 = vmatmul.bf16.gmra.mxu0 %v3524_v18  ;;  %v3109_v18 = vld [vmem:[%s6021_s0 + $0x118] sm:$0xf0] }
 0x1d2   :  { %2616 = vmatmul.bf16.gmra.mxu3 %v3520_v12  ;;  %v4147_v12 = vld [vmem:[%s6021_s0 + $0xd4] sm:$0xf] }
 0x1d3   :  { %v5691_v36 = vadd.f32 %v2516_v58, %v2468_v19 }
 0x1d4   :  { %2714 = vmatmul.bf16.gmra.mxu1 %v3528_v17  ;;  %v2372_v20 = vpop.f32.mrf.mxu2 }
 0x1d5   :  { %v2421_v24 = vpop.f32.mrf.mxu3  ;;  %v2373_v26 = vadd.f32 %v2372_v20, %v5397_v47  ;;  %v3029_v47 = vld [vmem:[%s6021_s0 + $0x80] sm:$0xf0] }
 0x1d6   :  { %v2472_v27 = vpop.f32.mrf.mxu0  ;;  %v3032_v46 = vor.u32 %v4128_v34, %v3029_v47 }
 0x1d7   :  { %v2422_v31 = vadd.f32 %v2421_v24, %v2373_v26  ;;  %v3112_v24 = vor.u32 %v4147_v12, %v3109_v18  ;;  %v4192_v12 = vld [vmem:[%s6021_s0 + $0x234] sm:$0xf0] }
 0x1d9   :  { %v2521_v30 = vpop.f32.mrf.mxu1  ;;  %v2471_v23 = vadd.f32 %v2470_v16, %v2422_v31  ;;  %v3100_v16 = vor.u32 %v4155_v5, %v3099_v3 }
 0x1db   :  { %v5712_v44 = vadd.f32 %v2519_v22, %v2471_v23  ;;  %v3108_v22 = vor.u32 %v4156_v7, %v3107_v49  ;;  %v3243_v49 = vld [vmem:[%s6021_s0 + $0x1e8] sm:$0xf]  ;;  %v4191_v7 = vld [vmem:[%s6021_s0 + $0x22c] sm:$0xf0] }
 0x1dc   :  { %v2374_v37 = vpop.f32.mrf.mxu2 }
 0x1dd   :  { %v2423_v41 = vpop.f32.mrf.mxu3  ;;  %v2375_v45 = vadd.f32 %v2374_v37, %v5415_v6  ;;  %v4164_v37 = vld [vmem:[%s6021_s0 + $0x15c] sm:$0xf] }
 0x1de   :  { %v2631_v52 = vpop.f32.mrf.mxu0 }
 0x1df   :  { %v2424_v50 = vadd.f32 %v2423_v41, %v2375_v45  ;;  %v3179_v41 = vld [vmem:[%s6021_s0 + $0x160] sm:$0xf] }
 0x1e1   :  { %v2680_v51 = vpop.f32.mrf.mxu1  ;;  %v2473_v53 = vadd.f32 %v2472_v27, %v2424_v50  ;;  %2728 = vmatmul.bf16.vlgmr.msra.gmra.mxu2 %v3028_v4  ;;  %2826 = vmatmul.bf16.vlgmr.msra.gmra.mxu0 %v3036_v48  ;;  %v3181_v48 = vld [vmem:[%s6021_s0 + $0x1a8] sm:$0xf0] }
 0x1e2   :  { %2777 = vmatmul.bf16.vlgmr.msra.gmra.mxu3 %v3032_v46  ;;  %v4165_v46 = vld [vmem:[%s6021_s0 + $0x164] sm:$0xf] }
 0x1e3   :  { %v5721_v56 = vadd.f32 %v2521_v30, %v2473_v53 }
 0x1e4   :  { %2875 = vmatmul.bf16.vlgmr.msra.gmra.mxu1 %v3040_v62  ;;  %v2533_v58 = vpop.f32.mrf.mxu2 }
 0x1e5   :  { %v2582_v2 = vpop.f32.mrf.mxu3  ;;  %v2534_v60 = vadd.f32 %v2533_v58, %v5439_v21  ;;  %v3101_v21 = vld [vmem:[%s6021_s0 + $0x110] sm:$0xf0] }
 0x1e6   :  { %v2633_v6 = vpop.f32.mrf.mxu0  ;;  %v3104_v17 = vor.u32 %v4146_v63, %v3101_v21 }
 0x1e7   :  { %v2583_v8 = vadd.f32 %v2582_v2, %v2534_v60  ;;  %v3184_v2 = vor.u32 %v4165_v46, %v3181_v48  ;;  %v4210_v46 = vld [vmem:[%s6021_s0 + $0x2c4] sm:$0xf0] }
 0x1e9   :  { %v2682_v61 = vpop.f32.mrf.mxu1  ;;  %v2632_v9 = vadd.f32 %v2631_v52, %v2583_v8  ;;  %v3172_v52 = vor.u32 %v4173_v35, %v3171_v40 }
 0x1eb   :  { %v5742_v10 = vadd.f32 %v2680_v51, %v2632_v9  ;;  %v3180_v51 = vor.u32 %v4174_v42, %v3179_v41  ;;  %v3315_v41 = vld [vmem:[%s6021_s0 + $0x278] sm:$0xf]  ;;  %v4209_v42 = vld [vmem:[%s6021_s0 + $0x2bc] sm:$0xf0] }
 0x1ec   :  { %v2535_v11 = vpop.f32.mrf.mxu2 }
 0x1ed   :  { %v2584_v15 = vpop.f32.mrf.mxu3  ;;  %v2536_v13 = vadd.f32 %v2535_v11, %v5457_v43  ;;  %v4182_v11 = vld [vmem:[%s6021_s0 + $0x1ec] sm:$0xf] }
 0x1ee   :  { %v2636_v20 = vpop.f32.mrf.mxu0 }
 0x1ef   :  { %v2585_v19 = vadd.f32 %v2584_v15, %v2536_v13  ;;  %v3251_v15 = vld [vmem:[%s6021_s0 + $0x1f0] sm:$0xf] }
 0x1f1   :  { %v2685_v26 = vpop.f32.mrf.mxu1  ;;  %v2634_v31 = vadd.f32 %v2633_v6, %v2585_v19  ;;  %2733 = vmatmul.bf16.gmra.mxu2 %v3100_v16  ;;  %2831 = vmatmul.bf16.gmra.mxu0 %v3108_v22  ;;  %v3253_v22 = vld [vmem:[%s6021_s0 + $0x238] sm:$0xf0] }
 0x1f2   :  { %2782 = vmatmul.bf16.gmra.mxu3 %v3104_v17  ;;  %v4183_v17 = vld [vmem:[%s6021_s0 + $0x1f4] sm:$0xf] }
 0x1f3   :  { %v5751_v27 = vadd.f32 %v2682_v61, %v2634_v31 }
 0x1f4   :  { %2880 = vmatmul.bf16.gmra.mxu1 %v3112_v24  ;;  %v2538_v30 = vpop.f32.mrf.mxu2 }
 0x1f5   :  { %v2587_v23 = vpop.f32.mrf.mxu3  ;;  %v2539_v28 = vadd.f32 %v2538_v30, %v5481_v0  ;;  %v3173_v0 = vld [vmem:[%s6021_s0 + $0x1a0] sm:$0xf0] }
 0x1f6   :  { %v2638_v43 = vpop.f32.mrf.mxu0  ;;  %v3176_v62 = vor.u32 %v4164_v37, %v3173_v0 }
 0x1f7   :  { %v2588_v33 = vadd.f32 %v2587_v23, %v2539_v28  ;;  %v3256_v23 = vor.u32 %v4183_v17, %v3253_v22  ;;  %v4228_v17 = vld [vmem:[%s6021_s0 + $0x354] sm:$0xf0] }
 0x1f9   :  { %v2687_v34 = vpop.f32.mrf.mxu1  ;;  %v2637_v47 = vadd.f32 %v2636_v20, %v2588_v33  ;;  %v3244_v20 = vor.u32 %v4191_v7, %v3243_v49 }
 0x1fb   :  { %v5772_v38 = vadd.f32 %v2685_v26, %v2637_v47  ;;  %v3252_v26 = vor.u32 %v4192_v12, %v3251_v15  ;;  %v3387_v15 = vld [vmem:[%s6021_s0 + $0x308] sm:$0xf]  ;;  %v4227_v12 = vld [vmem:[%s6021_s0 + $0x34c] sm:$0xf0] }
 0x1fc   :  { %v2540_v45 = vpop.f32.mrf.mxu2 }
 0x1fd   :  { %v2589_v4 = vpop.f32.mrf.mxu3  ;;  %v2541_v50 = vadd.f32 %v2540_v45, %v5499_v57  ;;  %v4200_v45 = vld [vmem:[%s6021_s0 + $0x27c] sm:$0xf] }
 0x1fe   :  { %v2641_v58 = vpop.f32.mrf.mxu0 }
 0x1ff   :  { %v2590_v53 = vadd.f32 %v2589_v4, %v2541_v50  ;;  %v3323_v4 = vld [vmem:[%s6021_s0 + $0x280] sm:$0xf] }
 0x201   :  { %v2690_v60 = vpop.f32.mrf.mxu1  ;;  %v2639_v8 = vadd.f32 %v2638_v43, %v2590_v53  ;;  %2738 = vmatmul.bf16.gmra.mxu2 %v3172_v52  ;;  %2836 = vmatmul.bf16.gmra.mxu0 %v3180_v51  ;;  %v3325_v51 = vld [vmem:[%s6021_s0 + $0x2c8] sm:$0xf0] }
 0x202   :  { %2787 = vmatmul.bf16.gmra.mxu3 %v3176_v62  ;;  %v4201_v62 = vld [vmem:[%s6021_s0 + $0x284] sm:$0xf] }
 0x203   :  { %v5781_v6 = vadd.f32 %v2687_v34, %v2639_v8 }
 0x204   :  { %2885 = vmatmul.bf16.gmra.mxu1 %v3184_v2  ;;  %v2543_v61 = vpop.f32.mrf.mxu2 }
 0x205   :  { %v2592_v9 = vpop.f32.mrf.mxu3  ;;  %v2544_v3 = vadd.f32 %v2543_v61, %v5523_v39  ;;  %v3245_v39 = vld [vmem:[%s6021_s0 + $0x230] sm:$0xf0] }
 0x206   :  { %v2643_v57 = vpop.f32.mrf.mxu0  ;;  %v3248_v24 = vor.u32 %v4182_v11, %v3245_v39 }
 0x207   :  { %v2593_v5 = vadd.f32 %v2592_v9, %v2544_v3  ;;  %v3328_v9 = vor.u32 %v4201_v62, %v3325_v51  ;;  %v4246_v62 = vld [vmem:[%s6021_s0 + $0x3e4] sm:$0xf0] }
 0x209   :  { %v2692_v63 = vpop.f32.mrf.mxu1  ;;  %v2642_v21 = vadd.f32 %v2641_v58, %v2593_v5  ;;  %v3316_v58 = vor.u32 %v4209_v42, %v3315_v41 }
 0x20b   :  { %v5802_v18 = vadd.f32 %v2690_v60, %v2642_v21  ;;  %v3324_v60 = vor.u32 %v4210_v46, %v3323_v4  ;;  %v3459_v4 = vld [vmem:[%s6021_s0 + $0x398] sm:$0xf]  ;;  %v4245_v46 = vld [vmem:[%s6021_s0 + $0x3dc] sm:$0xf0] }
 0x20c   :  { %v2545_v13 = vpop.f32.mrf.mxu2 }
 0x20d   :  { %v2594_v16 = vpop.f32.mrf.mxu3  ;;  %v2546_v19 = vadd.f32 %v2545_v13, %v5541_v25  ;;  %v4218_v13 = vld [vmem:[%s6021_s0 + $0x30c] sm:$0xf] }
 0x20e   :  { %v2646_v30 = vpop.f32.mrf.mxu0 }
 0x20f   :  { %v2595_v31 = vadd.f32 %v2594_v16, %v2546_v19  ;;  %v3395_v16 = vld [vmem:[%s6021_s0 + $0x310] sm:$0xf] }
 0x211   :  { %v2695_v28 = vpop.f32.mrf.mxu1  ;;  %v2644_v33 = vadd.f32 %v2643_v57, %v2595_v31  ;;  %2743 = vmatmul.bf16.gmra.mxu2 %v3244_v20  ;;  %2841 = vmatmul.bf16.gmra.mxu0 %v3252_v26  ;;  %v3397_v26 = vld [vmem:[%s6021_s0 + $0x358] sm:$0xf0] }
 0x212   :  { %2792 = vmatmul.bf16.gmra.mxu3 %v3248_v24  ;;  %v4219_v24 = vld [vmem:[%s6021_s0 + $0x314] sm:$0xf] }
 0x213   :  { %v5811_v43 = vadd.f32 %v2692_v63, %v2644_v33 }
 0x214   :  { %2890 = vmatmul.bf16.gmra.mxu1 %v3256_v23  ;;  %v2548_v34 = vpop.f32.mrf.mxu2 }
 0x215   :  { %v2597_v47 = vpop.f32.mrf.mxu3  ;;  %v2549_v40 = vadd.f32 %v2548_v34, %v5565_v14  ;;  %v3317_v14 = vld [vmem:[%s6021_s0 + $0x2c0] sm:$0xf0] }
 0x216   :  { %v2648_v25 = vpop.f32.mrf.mxu0  ;;  %v3320_v2 = vor.u32 %v4200_v45, %v3317_v14 }
 0x217   :  { %v2598_v35 = vadd.f32 %v2597_v47, %v2549_v40  ;;  %v3400_v47 = vor.u32 %v4219_v24, %v3397_v26  ;;  %v4264_v24 = vld [vmem:[%s6021_s0 + $0x474] sm:$0xf0] }
 0x219   :  { %v2697_v37 = vpop.f32.mrf.mxu1  ;;  %v2647_v0 = vadd.f32 %v2646_v30, %v2598_v35  ;;  %v3388_v30 = vor.u32 %v4227_v12, %v3387_v15 }
 0x21b   :  { %v5832_v48 = vadd.f32 %v2695_v28, %v2647_v0  ;;  %v3396_v28 = vor.u32 %v4228_v17, %v3395_v16  ;;  %v3531_v16 = vld [vmem:[%s6021_s0 + $0x428] sm:$0xf]  ;;  %v4263_v17 = vld [vmem:[%s6021_s0 + $0x46c] sm:$0xf0] }
 0x21c   :  { %v2550_v50 = vpop.f32.mrf.mxu2 }
 0x21d   :  { %v2599_v52 = vpop.f32.mrf.mxu3  ;;  %v2551_v53 = vadd.f32 %v2550_v50, %v5583_v59  ;;  %v4236_v50 = vld [vmem:[%s6021_s0 + $0x39c] sm:$0xf] }
 0x21e   :  { %v2651_v61 = vpop.f32.mrf.mxu0 }
 0x21f   :  { %v2600_v8 = vadd.f32 %v2599_v52, %v2551_v53  ;;  %v3467_v52 = vld [vmem:[%s6021_s0 + $0x3a0] sm:$0xf] }
 0x221   :  { %v2700_v3 = vpop.f32.mrf.mxu1  ;;  %v2649_v5 = vadd.f32 %v2648_v25, %v2600_v8  ;;  %2748 = vmatmul.bf16.gmra.mxu2 %v3316_v58  ;;  %2846 = vmatmul.bf16.gmra.mxu0 %v3324_v60  ;;  %v3469_v60 = vld [vmem:[%s6021_s0 + $0x3e8] sm:$0xf0] }
 0x222   :  { %2797 = vmatmul.bf16.gmra.mxu3 %v3320_v2  ;;  %v4237_v2 = vld [vmem:[%s6021_s0 + $0x3a4] sm:$0xf] }
 0x223   :  { %v5841_v57 = vadd.f32 %v2697_v37, %v2649_v5 }
 0x224   :  { %2895 = vmatmul.bf16.gmra.mxu1 %v3328_v9  ;;  %v2553_v63 = vpop.f32.mrf.mxu2 }
 0x225   :  { %v2602_v21 = vpop.f32.mrf.mxu3  ;;  %v2554_v49 = vadd.f32 %v2553_v63, %v5607_v54  ;;  %v3389_v54 = vld [vmem:[%s6021_s0 + $0x350] sm:$0xf0] }
 0x226   :  { %v2653_v59 = vpop.f32.mrf.mxu0  ;;  %v3392_v23 = vor.u32 %v4218_v13, %v3389_v54 }
 0x227   :  { %v2603_v7 = vadd.f32 %v2602_v21, %v2554_v49  ;;  %v3472_v21 = vor.u32 %v4237_v2, %v3469_v60 }
 0x229   :  { %v2702_v11 = vpop.f32.mrf.mxu1  ;;  %v2652_v39 = vadd.f32 %v2651_v61, %v2603_v7  ;;  %v3460_v61 = vor.u32 %v4245_v46, %v3459_v4 }
 0x22b   :  { %v5862_v22 = vadd.f32 %v2700_v3, %v2652_v39  ;;  %v3468_v3 = vor.u32 %v4246_v62, %v3467_v52 }
 0x22c   :  { %v2555_v19 = vpop.f32.mrf.mxu2 }
 0x22d   :  { %v2604_v20 = vpop.f32.mrf.mxu3  ;;  %v2556_v31 = vadd.f32 %v2555_v19, %v5625_v32  ;;  %v4254_v19 = vld [vmem:[%s6021_s0 + $0x42c] sm:$0xf] }
 0x22e   :  { %v2656_v34 = vpop.f32.mrf.mxu0 }
 0x22f   :  { %v2605_v33 = vadd.f32 %v2604_v20, %v2556_v31  ;;  %v3539_v20 = vld [vmem:[%s6021_s0 + $0x430] sm:$0xf] }
 0x231   :  { %v2705_v40 = vpop.f32.mrf.mxu1  ;;  %v2654_v35 = vadd.f32 %v2653_v59, %v2605_v33  ;;  %2753 = vmatmul.bf16.gmra.mxu2 %v3388_v30  ;;  %2851 = vmatmul.bf16.gmra.mxu0 %v3396_v28  ;;  %v3541_v28 = vld [vmem:[%s6021_s0 + $0x478] sm:$0xf0] }
 0x232   :  { %2802 = vmatmul.bf16.gmra.mxu3 %v3392_v23  ;;  %v4255_v23 = vld [vmem:[%s6021_s0 + $0x434] sm:$0xf] }
 0x233   :  { %v5871_v25 = vadd.f32 %v2702_v11, %v2654_v35 }
 0x234   :  { %2900 = vmatmul.bf16.gmra.mxu1 %v3400_v47  ;;  %v2558_v37 = vpop.f32.mrf.mxu2 }
 0x235   :  { %v2607_v0 = vpop.f32.mrf.mxu3  ;;  %v2559_v41 = vadd.f32 %v2558_v37, %v5649_v29  ;;  %v3461_v29 = vld [vmem:[%s6021_s0 + $0x3e0] sm:$0xf0] }
 0x236   :  { %v2658_v32 = vpop.f32.mrf.mxu0  ;;  %v3464_v9 = vor.u32 %v4236_v50, %v3461_v29 }
 0x237   :  { %v2608_v42 = vadd.f32 %v2607_v0, %v2559_v41  ;;  %v3544_v0 = vor.u32 %v4255_v23, %v3541_v28 }
 0x239   :  { %v2707_v45 = vpop.f32.mrf.mxu1  ;;  %v2657_v14 = vadd.f32 %v2656_v34, %v2608_v42  ;;  %v3532_v34 = vor.u32 %v4263_v17, %v3531_v16 }
 0x23b   :  { %v5892_v51 = vadd.f32 %v2705_v40, %v2657_v14  ;;  %v3540_v40 = vor.u32 %v4264_v24, %v3539_v20 }
 0x23c   :  { %v2560_v53 = vpop.f32.mrf.mxu2 }
 0x23d   :  { %v2609_v58 = vpop.f32.mrf.mxu3  ;;  %v2561_v8 = vadd.f32 %v2560_v53, %v5661_v55 }
 0x23e   :  { %v2661_v63 = vpop.f32.mrf.mxu0 }
 0x23f   :  { %v2610_v5 = vadd.f32 %v2609_v58, %v2561_v8 }
 0x241   :  { %v2710_v49 = vpop.f32.mrf.mxu1  ;;  %v2659_v7 = vadd.f32 %v2658_v32, %v2610_v5  ;;  %2758 = vmatmul.bf16.gmra.mxu2 %v3460_v61  ;;  %2856 = vmatmul.bf16.gmra.mxu0 %v3468_v3 }
 0x242   :  { %2807 = vmatmul.bf16.gmra.mxu3 %v3464_v9 }
 0x243   :  { %v5901_v59 = vadd.f32 %v2707_v45, %v2659_v7 }
 0x244   :  { %2905 = vmatmul.bf16.gmra.mxu1 %v3472_v21  ;;  %v2563_v11 = vpop.f32.mrf.mxu2 }
 0x245   :  { %v2612_v39 = vpop.f32.mrf.mxu3  ;;  %v2564_v15 = vadd.f32 %v2563_v11, %v5682_v1  ;;  %v3533_v1 = vld [vmem:[%s6021_s0 + $0x470] sm:$0xf0] }
 0x246   :  { %v2663_v55 = vpop.f32.mrf.mxu0  ;;  %v3536_v47 = vor.u32 %v4254_v19, %v3533_v1 }
 0x247   :  { %v2613_v12 = vadd.f32 %v2612_v39, %v2564_v15 }
 0x249   :  { %v2712_v13 = vpop.f32.mrf.mxu1  ;;  %v2662_v54 = vadd.f32 %v2661_v63, %v2613_v12 }
 0x24b   :  { %v5922_v26 = vadd.f32 %v2710_v49, %v2662_v54 }
 0x24c   :  { %v2565_v31 = vpop.f32.mrf.mxu2 }
 0x24d   :  { %v2614_v30 = vpop.f32.mrf.mxu3  ;;  %v2566_v33 = vadd.f32 %v2565_v31, %v5691_v36 }
 0x24e   :  { %v2666_v37 = vpop.f32.mrf.mxu0 }
 0x24f   :  { %v2615_v35 = vadd.f32 %v2614_v30, %v2566_v33 }
 0x251   :  { %v2715_v41 = vpop.f32.mrf.mxu1  ;;  %v2664_v42 = vadd.f32 %v2663_v55, %v2615_v35  ;;  %2763 = vmatmul.bf16.gmra.mxu2 %v3532_v34  ;;  %2861 = vmatmul.bf16.gmra.mxu0 %v3540_v40 }
 0x252   :  { %2812 = vmatmul.bf16.gmra.mxu3 %v3536_v47 }
 0x253   :  { %v5931_v32 = vadd.f32 %v2712_v13, %v2664_v42 }
 0x254   :  { %2910 = vmatmul.bf16.gmra.mxu1 %v3544_v0  ;;  %v2568_v45 = vpop.f32.mrf.mxu2 }
 0x255   :  { %v2617_v14 = vpop.f32.mrf.mxu3  ;;  %v2569_v4 = vadd.f32 %v2568_v45, %v5712_v44 }
 0x256   :  { %v2668_v36 = vpop.f32.mrf.mxu0 }
 0x257   :  { %v2618_v46 = vadd.f32 %v2617_v14, %v2569_v4 }
 0x259   :  { %v2717_v50 = vpop.f32.mrf.mxu1  ;;  %v2667_v29 = vadd.f32 %v2666_v37, %v2618_v46 }
 0x25b   :  { %v5934_v52 = vadd.f32 %v2715_v41, %v2667_v29 }
 0x25c   :  { %v2570_v62 = vpop.f32.mrf.mxu2 }
 0x25d   :  { %v2619_v53 = vpop.f32.mrf.mxu3  ;;  %v2571_v58 = vadd.f32 %v2570_v62, %v5721_v56 }
 0x25e   :  { %v2827_v60 = vpop.f32.mrf.mxu0 }
 0x25f   :  { %v2620_v2 = vadd.f32 %v2619_v53, %v2571_v58 }
 0x261   :  { %v2876_v8 = vpop.f32.mrf.mxu1  ;;  %v2669_v61 = vadd.f32 %v2668_v36, %v2620_v2 }
 0x263   :  { %v5937_v9 = vadd.f32 %v2717_v50, %v2669_v61 }
 0x264   :  { %v2729_v3 = vpop.f32.mrf.mxu2 }
 0x265   :  { %v2778_v5 = vpop.f32.mrf.mxu3  ;;  %v2730_v44 = vadd.f32 %v2729_v3, %v5742_v10 }
 0x266   :  { %v2829_v21 = vpop.f32.mrf.mxu0 }
 0x267   :  { %v2779_v63 = vadd.f32 %v2778_v5, %v2730_v44 }
 0x269   :  { %v2878_v49 = vpop.f32.mrf.mxu1  ;;  %v2828_v7 = vadd.f32 %v2827_v60, %v2779_v63 }
 0x26b   :  { %v2877_v11 = vadd.f32 %v2876_v8, %v2828_v7 }
 0x26c   :  { %v2731_v39 = vpop.f32.mrf.mxu2 }
 0x26d   :  { %v2780_v15 = vpop.f32.mrf.mxu3  ;;  %v2916_v12 = vmax.f32 %v2877_v11, 0.0  ;;  %v2732_v56 = vadd.f32 %v2731_v39, %v5751_v27 }
 0x26e   :  { %v2832_v54 = vpop.f32.mrf.mxu0 }
 0x26f   :  { %v2932_v55 = vpack.c.bf16 %v2916_v12, %v2916_v12  ;;  %v2781_v13 = vadd.f32 %v2780_v15, %v2732_v56 }
 0x271   :  { %v2881_v16 = vpop.f32.mrf.mxu1  ;;  %2949 = vst.msk [vmem:[%s6022_s3] sm:$0xf] %vm2948_vm0, %v2932_v55  ;;  %v2830_v10 = vadd.f32 %v2829_v21, %v2781_v13 }
 0x273   :  { %v2879_v17 = vadd.f32 %v2878_v49, %v2830_v10 }
 0x274   :  { %v2734_v19 = vpop.f32.mrf.mxu2 }
 0x275   :  { %v2783_v1 = vpop.f32.mrf.mxu3  ;;  %v2917_v20 = vmax.f32 %v2879_v17, 0.0  ;;  %v2735_v24 = vadd.f32 %v2734_v19, %v5772_v38 }
 0x276   :  { %v2834_v27 = vpop.f32.mrf.mxu0 }
 0x277   :  { %v2933_v31 = vpack.c.bf16 %v2917_v20, %v2917_v20  ;;  %v2784_v30 = vadd.f32 %v2783_v1, %v2735_v24 }
 0x279   :  { %v2883_v23 = vpop.f32.mrf.mxu1  ;;  %2950 = vst.msk [vmem:[%s6022_s3 + $0x4] sm:$0xf] %vm2948_vm0, %v2933_v31  ;;  %v2833_v28 = vadd.f32 %v2832_v54, %v2784_v30 }
 0x27b   :  { %v2882_v33 = vadd.f32 %v2881_v16, %v2833_v28 }
 0x27c   :  { %v2736_v34 = vpop.f32.mrf.mxu2 }
 0x27d   :  { %v2785_v47 = vpop.f32.mrf.mxu3  ;;  %v2918_v40 = vmax.f32 %v2882_v33, 0.0  ;;  %v2737_v35 = vadd.f32 %v2736_v34, %v5781_v6 }
 0x27e   :  { %v2837_v41 = vpop.f32.mrf.mxu0 }
 0x27f   :  { %v2934_v37 = vpack.c.bf16 %v2918_v40, %v2918_v40  ;;  %v2786_v0 = vadd.f32 %v2785_v47, %v2737_v35 }
 0x281   :  { %v2886_v38 = vpop.f32.mrf.mxu1  ;;  %2951 = vst.msk [vmem:[%s6022_s3 + $0x8] sm:$0xf] %vm2948_vm0, %v2934_v37  ;;  %v2835_v42 = vadd.f32 %v2834_v27, %v2786_v0 }
 0x283   :  { %v2884_v45 = vadd.f32 %v2883_v23, %v2835_v42 }
 0x284   :  { %v2739_v14 = vpop.f32.mrf.mxu2 }
 0x285   :  { %v2788_v4 = vpop.f32.mrf.mxu3  ;;  %v2919_v46 = vmax.f32 %v2884_v45, 0.0  ;;  %v2740_v36 = vadd.f32 %v2739_v14, %v5802_v18 }
 0x286   :  { %v2839_v62 = vpop.f32.mrf.mxu0 }
 0x287   :  { %v2935_v50 = vpack.c.bf16 %v2919_v46, %v2919_v46  ;;  %v2789_v29 = vadd.f32 %v2788_v4, %v2740_v36 }
 0x289   :  { %v2888_v6 = vpop.f32.mrf.mxu1  ;;  %2952 = vst.msk [vmem:[%s6022_s3 + $0xc] sm:$0xf] %vm2948_vm0, %v2935_v50  ;;  %v2838_v53 = vadd.f32 %v2837_v41, %v2789_v29 }
 0x28b   :  { %v2887_v58 = vadd.f32 %v2886_v38, %v2838_v53 }
 0x28c   :  { %v2741_v2 = vpop.f32.mrf.mxu2 }
 0x28d   :  { %v2790_v60 = vpop.f32.mrf.mxu3  ;;  %v2920_v8 = vmax.f32 %v2887_v58, 0.0  ;;  %v2742_v61 = vadd.f32 %v2741_v2, %v5811_v43 }
 0x28e   :  { %v2842_v44 = vpop.f32.mrf.mxu0 }
 0x28f   :  { %v2936_v3 = vpack.c.bf16 %v2920_v8, %v2920_v8  ;;  %v2791_v5 = vadd.f32 %v2790_v60, %v2742_v61 }
 0x291   :  { %v2891_v18 = vpop.f32.mrf.mxu1  ;;  %2953 = vst.msk [vmem:[%s6022_s3 + $0x10] sm:$0xf] %vm2948_vm0, %v2936_v3  ;;  %v2840_v63 = vadd.f32 %v2839_v62, %v2791_v5 }
 0x293   :  { %v2889_v21 = vadd.f32 %v2888_v6, %v2840_v63 }
 0x294   :  { %v2744_v49 = vpop.f32.mrf.mxu2 }
 0x295   :  { %v2793_v7 = vpop.f32.mrf.mxu3  ;;  %v2921_v11 = vmax.f32 %v2889_v21, 0.0  ;;  %v2745_v39 = vadd.f32 %v2744_v49, %v5832_v48 }
 0x296   :  { %v2844_v56 = vpop.f32.mrf.mxu0 }
 0x297   :  { %v2937_v15 = vpack.c.bf16 %v2921_v11, %v2921_v11  ;;  %v2794_v12 = vadd.f32 %v2793_v7, %v2745_v39 }
 0x299   :  { %v2893_v43 = vpop.f32.mrf.mxu1  ;;  %2954 = vst.msk [vmem:[%s6022_s3 + $0x14] sm:$0xf] %vm2948_vm0, %v2937_v15  ;;  %v2843_v55 = vadd.f32 %v2842_v44, %v2794_v12 }
 0x29b   :  { %v2892_v13 = vadd.f32 %v2891_v18, %v2843_v55 }
 0x29c   :  { %v2746_v54 = vpop.f32.mrf.mxu2 }
 0x29d   :  { %v2795_v16 = vpop.f32.mrf.mxu3  ;;  %v2922_v10 = vmax.f32 %v2892_v13, 0.0  ;;  %v2747_v17 = vadd.f32 %v2746_v54, %v5841_v57 }
 0x29e   :  { %v2847_v20 = vpop.f32.mrf.mxu0 }
 0x29f   :  { %v2938_v19 = vpack.c.bf16 %v2922_v10, %v2922_v10  ;;  %v2796_v1 = vadd.f32 %v2795_v16, %v2747_v17 }
 0x2a1   :  { %v2896_v48 = vpop.f32.mrf.mxu1  ;;  %2955 = vst.msk [vmem:[%s6022_s3 + $0x18] sm:$0xf] %vm2948_vm0, %v2938_v19  ;;  %v2845_v24 = vadd.f32 %v2844_v56, %v2796_v1 }
 0x2a3   :  { %v2894_v31 = vadd.f32 %v2893_v43, %v2845_v24 }
 0x2a4   :  { %v2749_v30 = vpop.f32.mrf.mxu2 }
 0x2a5   :  { %v2798_v27 = vpop.f32.mrf.mxu3  ;;  %v2923_v23 = vmax.f32 %v2894_v31, 0.0  ;;  %v2750_v28 = vadd.f32 %v2749_v30, %v5862_v22 }
 0x2a6   :  { %v2849_v47 = vpop.f32.mrf.mxu0 }
 0x2a7   :  { %v2939_v33 = vpack.c.bf16 %v2923_v23, %v2923_v23  ;;  %v2799_v34 = vadd.f32 %v2798_v27, %v2750_v28 }
 0x2a9   :  { %v2898_v57 = vpop.f32.mrf.mxu1  ;;  %2956 = vst.msk [vmem:[%s6022_s3 + $0x1c] sm:$0xf] %vm2948_vm0, %v2939_v33  ;;  %v2848_v40 = vadd.f32 %v2847_v20, %v2799_v34 }
 0x2ab   :  { %v2897_v35 = vadd.f32 %v2896_v48, %v2848_v40 }
 0x2ac   :  { %v2751_v37 = vpop.f32.mrf.mxu2 }
 0x2ad   :  { %v2800_v0 = vpop.f32.mrf.mxu3  ;;  %v2924_v41 = vmax.f32 %v2897_v35, 0.0  ;;  %v2752_v38 = vadd.f32 %v2751_v37, %v5871_v25 }
 0x2ae   :  { %v2852_v14 = vpop.f32.mrf.mxu0 }
 0x2af   :  { %v2940_v42 = vpack.c.bf16 %v2924_v41, %v2924_v41  ;;  %v2801_v45 = vadd.f32 %v2800_v0, %v2752_v38 }
 0x2b1   :  { %v2901_v22 = vpop.f32.mrf.mxu1  ;;  %2957 = vst.msk [vmem:[%s6022_s3 + $0x20] sm:$0xf] %vm2948_vm0, %v2940_v42  ;;  %v2850_v4 = vadd.f32 %v2849_v47, %v2801_v45 }
 0x2b3   :  { %v2899_v46 = vadd.f32 %v2898_v57, %v2850_v4 }
 0x2b4   :  { %v2754_v36 = vpop.f32.mrf.mxu2 }
 0x2b5   :  { %v2803_v50 = vpop.f32.mrf.mxu3  ;;  %v2925_v29 = vmax.f32 %v2899_v46, 0.0  ;;  %v2755_v62 = vadd.f32 %v2754_v36, %v5892_v51 }
 0x2b6   :  { %v2854_v58 = vpop.f32.mrf.mxu0 }
 0x2b7   :  { %v2941_v6 = vpack.c.bf16 %v2925_v29, %v2925_v29  ;;  %v2804_v53 = vadd.f32 %v2803_v50, %v2755_v62 }
 0x2b9   :  { %2958 = vst.msk [vmem:[%s6022_s3 + $0x24] sm:$0xf] %vm2948_vm0, %v2941_v6  ;;  %v2853_v25 = vadd.f32 %v2852_v14, %v2804_v53  ;;  %v2903_v2 = vpop.f32.mrf.mxu1 }
 0x2bb   :  { %v2902_v60 = vadd.f32 %v2901_v22, %v2853_v25 }
 0x2bc   :  { %v2756_v8 = vpop.f32.mrf.mxu2 }
 0x2bd   :  { %v2805_v61 = vpop.f32.mrf.mxu3  ;;  %v2926_v3 = vmax.f32 %v2902_v60, 0.0  ;;  %v2757_v5 = vadd.f32 %v2756_v8, %v5901_v59 }
 0x2be   :  { %v2857_v63 = vpop.f32.mrf.mxu0 }
 0x2bf   :  { %v2942_v44 = vpack.c.bf16 %v2926_v3, %v2926_v3  ;;  %v2806_v18 = vadd.f32 %v2805_v61, %v2757_v5 }
 0x2c1   :  { %2959 = vst.msk [vmem:[%s6022_s3 + $0x28] sm:$0xf] %vm2948_vm0, %v2942_v44  ;;  %v2855_v51 = vadd.f32 %v2854_v58, %v2806_v18  ;;  %v2906_v49 = vpop.f32.mrf.mxu1 }
 0x2c3   :  { %v2904_v21 = vadd.f32 %v2903_v2, %v2855_v51 }
 0x2c4   :  { %v2759_v7 = vpop.f32.mrf.mxu2 }
 0x2c5   :  { %v2808_v11 = vpop.f32.mrf.mxu3  ;;  %v2927_v39 = vmax.f32 %v2904_v21, 0.0  ;;  %v2760_v15 = vadd.f32 %v2759_v7, %v5922_v26 }
 0x2c6   :  { %v2859_v55 = vpop.f32.mrf.mxu0 }
 0x2c7   :  { %v2943_v12 = vpack.c.bf16 %v2927_v39, %v2927_v39  ;;  %v2809_v56 = vadd.f32 %v2808_v11, %v2760_v15 }
 0x2c9   :  { %2960 = vst.msk [vmem:[%s6022_s3 + $0x2c] sm:$0xf] %vm2948_vm0, %v2943_v12  ;;  %v2858_v59 = vadd.f32 %v2857_v63, %v2809_v56  ;;  %v2908_v17 = vpop.f32.mrf.mxu1 }
 0x2cb   :  { %v2907_v43 = vadd.f32 %v2906_v49, %v2858_v59 }
 0x2cc   :  { %v2761_v13 = vpop.f32.mrf.mxu2 }
 0x2cd   :  { %v2810_v54 = vpop.f32.mrf.mxu3  ;;  %v2928_v16 = vmax.f32 %v2907_v43, 0.0  ;;  %v2762_v10 = vadd.f32 %v2761_v13, %v5931_v32 }
 0x2ce   :  { %v2862_v27 = vpop.f32.mrf.mxu0 }
 0x2cf   :  { %v2944_v19 = vpack.c.bf16 %v2928_v16, %v2928_v16  ;;  %v2811_v1 = vadd.f32 %v2810_v54, %v2762_v10 }
 0x2d1   :  { %2961 = vst.msk [vmem:[%s6022_s3 + $0x30] sm:$0xf] %vm2948_vm0, %v2944_v19  ;;  %v2860_v26 = vadd.f32 %v2859_v55, %v2811_v1  ;;  %v2911_v33 = vpop.f32.mrf.mxu1 }
 0x2d3   :  { %v2909_v20 = vadd.f32 %v2908_v17, %v2860_v26 }
 0x2d4   :  { %v2764_v48 = vpop.f32.mrf.mxu2 }
 0x2d5   :  { %v2813_v24 = vpop.f32.mrf.mxu3  ;;  %v2929_v31 = vmax.f32 %v2909_v20, 0.0  ;;  %v2765_v30 = vadd.f32 %v2764_v48, %v5934_v52 }
 0x2d6   :  { %v2864_v41 = vpop.f32.mrf.mxu0 }
 0x2d7   :  { %v2945_v23 = vpack.c.bf16 %v2929_v31, %v2929_v31  ;;  %v2814_v28 = vadd.f32 %v2813_v24, %v2765_v30 }
 0x2d9   :  { %2962 = vst.msk [vmem:[%s6022_s3 + $0x34] sm:$0xf] %vm2948_vm0, %v2945_v23  ;;  %v2863_v32 = vadd.f32 %v2862_v27, %v2814_v28  ;;  %v2913_v38 = vpop.f32.mrf.mxu1 }
 0x2db   :  { %v2912_v34 = vadd.f32 %v2911_v33, %v2863_v32 }
 0x2dc   :  { %v2766_v47 = vpop.f32.mrf.mxu2 }
 0x2dd   :  { %v2930_v57 = vmax.f32 %v2912_v34, 0.0  ;;  %v2767_v40 = vadd.f32 %v2766_v47, %v5937_v9  ;;  %v2815_v35 = vpop.f32.mrf.mxu3 }
 0x2df   :  { %v2946_v37 = vpack.c.bf16 %v2930_v57, %v2930_v57  ;;  %v2816_v0 = vadd.f32 %v2815_v35, %v2767_v40 }
 0x2e1   :  { %2963 = vst.msk [vmem:[%s6022_s3 + $0x38] sm:$0xf] %vm2948_vm0, %v2946_v37  ;;  %v2865_v52 = vadd.f32 %v2864_v41, %v2816_v0 }
 0x2e3   :  { %v2914_v42 = vadd.f32 %v2913_v38, %v2865_v52 }
 0x2e5   :  { %v2931_v45 = vmax.f32 %v2914_v42, 0.0 }
 0x2e7   :  { %v2947_v14 = vpack.c.bf16 %v2931_v45, %v2931_v45 }
 0x2e9   :  { %2964 = vst.msk [vmem:[%s6022_s3 + $0x3c] sm:$0xf] %vm2948_vm0, %v2947_v14 }

// kernel: _lambda_.64
= control target key start
LH: loop header
LB: loop body
LE: loop exit
PB: predicated region body
PF: predicated region fallthrough
CT: control target
= control target key end

     0   :  { %vm204_vm0 = vcmask 261120   ;;  %vm288_vm1 = vcmask 519168   ;;  %s579_s1 = inlined_call_operand.vmem [shape: bf16[288,64], index: 1, kind: input, shape index: {}]   ;;  %s580_s0 = inlined_call_operand.vmem [shape: bf16[32,288], index: 0, kind: input, shape index: {}]   ;;  %s581_s2 = inlined_call_operand.vmem [shape: f32[1,64], index: 2, kind: input, shape index: {}]   ;;  %s582_s3 = inlined_call_operand.vmem [shape: bf16[32,64], index: 3, kind: input, shape index: {}]   ;;  %s583_s4 = inlined_call_operand.vmem [shape: bf16[32,64], index: 4, kind: output, shape index: {}]  }
   0x1   :  { %v408_v0 = vld [vmem:[%s579_s1 + $0x38] sm:$0xff]  ;;  %v407_v2 = vld [vmem:[%s579_s1 + $0x30] sm:$0xff]  ;;  %v418_v3 = vld [vmem:[%s579_s1 + $0x88] sm:$0xff] }
   0x2   :  { %v416_v1 = vld [vmem:[%s579_s1 + $0x78] sm:$0xff]  ;;  %211 = vmatpush.bf16.msra.mxu0 %v408_v0  ;;  %428 = vmatpush.bf16.msra.mxu3 %v408_v0  ;;  %v415_v4 = vld [vmem:[%s579_s1 + $0x70] sm:$0xff]  ;;  %v417_v5 = vld [vmem:[%s579_s1 + $0x80] sm:$0xff] }
   0x3   :  { %230 = vmatpush.bf16.msra.mxu1 %v416_v1  ;;  %255 = vmatpush.bf16.msra.mxu2 %v418_v3  ;;  %v307_v6 = vld [vmem:[%s580_s0 + $0x8] sm:$0xf]  ;;  %v397_v7 = vld [vmem:[%s580_s0 + $0x10] sm:$0xf0]  ;;  %v405_v11 = vld [vmem:[%s579_s1 + $0x20] sm:$0xff] }
   0x4   :  { %v406_v8 = vld [vmem:[%s579_s1 + $0x28] sm:$0xff]  ;;  %v308_v10 = vor.u32 %v397_v7, %v307_v6  ;;  %v413_v12 = vld [vmem:[%s579_s1 + $0x60] sm:$0xff]  ;;  %v404_v13 = vld [vmem:[%s579_s1 + $0x18] sm:$0xff] }
   0x5   :  { %v414_v9 = vld [vmem:[%s579_s1 + $0x68] sm:$0xff]  ;;  %v412_v14 = vld [vmem:[%s579_s1 + $0x58] sm:$0xff]  ;;  %v403_v15 = vld [vmem:[%s579_s1 + $0x10] sm:$0xff] }
   0x6   :  { %212 = vmatpush.bf16.msra.mxu0 %v407_v2  ;;  %429 = vmatpush.bf16.msra.mxu3 %v407_v2  ;;  %v411_v16 = vld [vmem:[%s579_s1 + $0x50] sm:$0xff]  ;;  %v319_v17 = vld [vmem:[%s580_s0 + $0x20] sm:$0xf]  ;;  %v400_v18 = vld [vmem:[%s580_s0 + $0x28] sm:$0xf0] }
   0x7   :  { %231 = vmatpush.bf16.msra.mxu1 %v415_v4  ;;  %256 = vmatpush.bf16.msra.mxu2 %v417_v5  ;;  %v402_v19 = vld [vmem:[%s579_s1 + $0x8] sm:$0xff]  ;;  %v320_v21 = vor.u32 %v400_v18, %v319_v17  ;;  %v401_v22 = vld [vmem:[%s579_s1] sm:$0xff]  ;;  %v311_v25 = vld [vmem:[%s580_s0 + $0x18] sm:$0xf] }
   0x8   :  { %v410_v20 = vld [vmem:[%s579_s1 + $0x48] sm:$0xff]  ;;  %v299_v23 = vld [vmem:[%s580_s0] sm:$0xf]  ;;  %v399_v26 = vld [vmem:[%s580_s0 + $0x20] sm:$0xf0] }
   0x9   :  { %v396_v24 = vld [vmem:[%s580_s0 + $0x8] sm:$0xf0]  ;;  %v409_v27 = vld [vmem:[%s579_s1 + $0x40] sm:$0xff]  ;;  %v301_v29 = vld [vmem:[%s580_s0 + $0xc] sm:$0xf0]  ;;  %v312_v31 = vor.u32 %v399_v26, %v311_v25 }
   0xa   :  { %213 = vmatpush.bf16.msra.mxu0 %v406_v8  ;;  %430 = vmatpush.bf16.msra.mxu3 %v406_v8  ;;  %v395_v28 = vld [vmem:[%s580_s0 + $0x4] sm:$0xf]  ;;  %v300_v30 = vor.u32 %v396_v24, %v299_v23  ;;  %v398_v33 = vld [vmem:[%s580_s0 + $0x1c] sm:$0xf]  ;;  %v313_v34 = vld [vmem:[%s580_s0 + $0x24] sm:$0xf0] }
   0xb   :  { %232 = vmatpush.bf16.msra.mxu1 %v414_v9  ;;  %393 = vmatmul.msk.bf16.vlgmr.msra.gmra.mxu2 %vm204_vm0, %v308_v10  ;;  %v304_v32 = vor.u32 %v395_v28, %v301_v29  ;;  %v316_v35 = vor.u32 %v398_v33, %v313_v34  ;;  %v436_v37 = vld [vmem:[%s581_s2] ss:$0 sm:$0xff]  ;;  %v427_v58 = vld [vmem:[%s582_s3 + $0x8] sm:$0xff]  }
   0xc   :  { %v420_v39 = vld [vmem:[%s582_s3] sm:$0xff]   ;;  %v425_v63 = vunpack.c.l.bf16 %v427_v58  ;;  %v426_v9 = vunpack.c.h.bf16 %v427_v58 }
   0xd   :  { %v421_v43 = vunpack.c.l.bf16 %v420_v39  ;;  %v422_v54 = vunpack.c.h.bf16 %v420_v39 }
   0xe   :  { %214 = vmatpush.bf16.msra.mxu0 %v405_v11  ;;  %431 = vmatpush.bf16.msra.mxu3 %v405_v11 }
   0xf   :  { %233 = vmatpush.bf16.msra.mxu1 %v413_v12 }
  0x12   :  { %215 = vmatpush.bf16.msra.mxu0 %v404_v13  ;;  %432 = vmatpush.bf16.msra.mxu3 %v404_v13 }
  0x13   :  { %234 = vmatpush.bf16.msra.mxu1 %v412_v14 }
  0x16   :  { %216 = vmatpush.bf16.msra.mxu0 %v403_v15  ;;  %433 = vmatpush.bf16.msra.mxu3 %v403_v15 }
  0x17   :  { %235 = vmatpush.bf16.msra.mxu1 %v411_v16 }
  0x1a   :  { %217 = vmatpush.bf16.msra.mxu0 %v402_v19  ;;  %434 = vmatpush.bf16.msra.mxu3 %v402_v19 }
  0x1b   :  { %236 = vmatpush.bf16.msra.mxu1 %v410_v20  ;;  %394 = vmatmul.msk.bf16.gmra.mxu2 %vm204_vm0, %v320_v21 }
  0x1e   :  { %218 = vmatpush.bf16.msra.mxu0 %v401_v22  ;;  %435 = vmatpush.bf16.msra.mxu3 %v401_v22 }
  0x1f   :  { %237 = vmatpush.bf16.msra.mxu1 %v409_v27 }
  0x21   :  { %219 = vmatmul.bf16.vlgmr.msra.gmra.mxu0 %v300_v30  ;;  %224 = vmatmul.bf16.vlgmr.msra.gmra.mxu3 %v312_v31 }
  0x22   :  { %238 = vmatmul.bf16.vlgmr.msra.gmra.mxu1 %v304_v32 }
  0x32   :  { %243 = vmatmul.bf16.gmra.mxu1 %v316_v35 }
  0x8e   :  { %v258_v36 = vpop.f32.mrf.mxu2 }
  0x96   :  { %v260_v46 = vpop.f32.mrf.mxu2 }
  0x9e   :  { %v220_v38 = vpop.f32.mrf.mxu0  ;;  %v263_v60 = vpop.f32.mrf.mxu2 }
  0x9f   :  { %v221_v40 = vadd.f32 %v436_v37, %v220_v38  ;;  %v239_v41 = vpop.f32.mrf.mxu1 }
  0xa1   :  { %v240_v42 = vadd.f32 %v239_v41, %v221_v40 }
  0xa3   :  { %v259_v44 = vadd.f32 %v258_v36, %v240_v42 }
  0xa4   :  { %v225_v52 = vpop.f32.mrf.mxu3 }
  0xa5   :  { %v276_v45 = vadd.f32 %v421_v43, %v259_v44  ;;  %v226_v56 = vadd.f32 %v436_v37, %v225_v52 }
  0xa6   :  { %v222_v47 = vpop.f32.mrf.mxu0  ;;  %v265_v10 = vpop.f32.mrf.mxu2 }
  0xa7   :  { %v280_v48 = vmax.f32 %v276_v45, 0.0  ;;  %v223_v49 = vadd.f32 %v436_v37, %v222_v47  ;;  %v241_v50 = vpop.f32.mrf.mxu1 }
  0xa9   :  { %v284_v51 = vpack.c.bf16 %v280_v48, %v280_v48  ;;  %v242_v53 = vadd.f32 %v241_v50, %v223_v49 }
  0xab   :  { %289 = vst.msk [vmem:[%s583_s4] sm:$0xf] %vm288_vm1, %v284_v51  ;;  %v261_v55 = vadd.f32 %v260_v46, %v242_v53 }
  0xac   :  { %v227_v2 = vpop.f32.mrf.mxu3 }
  0xad   :  { %v277_v57 = vadd.f32 %v422_v54, %v261_v55  ;;  %v228_v4 = vadd.f32 %v436_v37, %v227_v2 }
  0xaf   :  { %v281_v59 = vmax.f32 %v277_v57, 0.0  ;;  %v244_v61 = vpop.f32.mrf.mxu1 }
  0xb0   :  { %v245_v62 = vadd.f32 %v244_v61, %v226_v56 }
  0xb1   :  { %v285_v0 = vpack.c.bf16 %v281_v59, %v281_v59 }
  0xb2   :  { %v264_v1 = vadd.f32 %v263_v60, %v245_v62 }
  0xb3   :  { %290 = vst.msk [vmem:[%s583_s4 + $0x4] sm:$0xf] %vm288_vm1, %v285_v0 }
  0xb4   :  { %v278_v3 = vadd.f32 %v425_v63, %v264_v1 }
  0xb6   :  { %v282_v5 = vmax.f32 %v278_v3, 0.0 }
  0xb7   :  { %v246_v6 = vpop.f32.mrf.mxu1 }
  0xb8   :  { %v286_v7 = vpack.c.bf16 %v282_v5, %v282_v5  ;;  %v247_v8 = vadd.f32 %v246_v6, %v228_v4 }
  0xba   :  { %291 = vst.msk [vmem:[%s583_s4 + $0x8] sm:$0xf] %vm288_vm1, %v286_v7  ;;  %v266_v11 = vadd.f32 %v265_v10, %v247_v8 }
  0xbc   :  { %v279_v12 = vadd.f32 %v426_v9, %v266_v11 }
  0xbe   :  { %v283_v13 = vmax.f32 %v279_v12, 0.0 }
  0xc0   :  { %v287_v14 = vpack.c.bf16 %v283_v13, %v283_v13 }
  0xc2   :  { %292 = vst.msk [vmem:[%s583_s4 + $0xc] sm:$0xf] %vm288_vm1, %v287_v14 }

// kernel: _lambda_.61
= control target key start
LH: loop header
LB: loop body
LE: loop exit
PB: predicated region body
PF: predicated region fallthrough
CT: control target
= control target key end

     0   :  { %vm372_vm0 = vcmask 523264   ;;  %vm494_vm1 = vcmask 519168   ;;  %s967_s1 = inlined_call_operand.vmem [shape: bf16[576,64], index: 1, kind: input, shape index: {}]   ;;  %s968_s2 = inlined_call_operand.vmem [shape: f32[1,64], index: 2, kind: input, shape index: {}]   ;;  %s969_s0 = inlined_call_operand.vmem [shape: bf16[32,576], index: 0, kind: input, shape index: {}]   ;;  %s970_s3 = inlined_call_operand.vmem [shape: bf16[32,64], index: 3, kind: input, shape index: {}]   ;;  %s971_s4 = inlined_call_operand.vmem [shape: bf16[32,64], index: 4, kind: output, shape index: {}]  }
   0x1   :  { %v706_v0 = vld [vmem:[%s967_s1 + $0x38] sm:$0xff]  ;;  %v705_v4 = vld [vmem:[%s967_s1 + $0x30] sm:$0xff]  ;;  %v704_v8 = vld [vmem:[%s967_s1 + $0x28] sm:$0xff] }
   0x2   :  { %v714_v1 = vld [vmem:[%s967_s1 + $0x78] sm:$0xff]  ;;  %379 = vmatpush.bf16.msra.mxu0 %v706_v0  ;;  %v713_v5 = vld [vmem:[%s967_s1 + $0x70] sm:$0xff]  ;;  %v712_v9 = vld [vmem:[%s967_s1 + $0x68] sm:$0xff] }
   0x3   :  { %v722_v2 = vld [vmem:[%s967_s1 + $0xb8] sm:$0xff]  ;;  %398 = vmatpush.bf16.msra.mxu1 %v714_v1  ;;  %v721_v6 = vld [vmem:[%s967_s1 + $0xb0] sm:$0xff]  ;;  %v720_v10 = vld [vmem:[%s967_s1 + $0xa8] sm:$0xff] }
   0x4   :  { %v730_v3 = vld [vmem:[%s967_s1 + $0xf8] sm:$0xff]  ;;  %417 = vmatpush.bf16.msra.mxu2 %v722_v2  ;;  %v729_v7 = vld [vmem:[%s967_s1 + $0xf0] sm:$0xff]  ;;  %v728_v11 = vld [vmem:[%s967_s1 + $0xe8] sm:$0xff] }
   0x5   :  { %436 = vmatpush.bf16.msra.mxu3 %v730_v3  ;;  %v703_v12 = vld [vmem:[%s967_s1 + $0x20] sm:$0xff]  ;;  %v702_v16 = vld [vmem:[%s967_s1 + $0x18] sm:$0xff]  ;;  %v701_v20 = vld [vmem:[%s967_s1 + $0x10] sm:$0xff] }
   0x6   :  { %380 = vmatpush.bf16.msra.mxu0 %v705_v4  ;;  %v711_v13 = vld [vmem:[%s967_s1 + $0x60] sm:$0xff]  ;;  %v710_v17 = vld [vmem:[%s967_s1 + $0x58] sm:$0xff]  ;;  %v709_v21 = vld [vmem:[%s967_s1 + $0x50] sm:$0xff] }
   0x7   :  { %399 = vmatpush.bf16.msra.mxu1 %v713_v5  ;;  %v719_v14 = vld [vmem:[%s967_s1 + $0xa0] sm:$0xff]  ;;  %v718_v18 = vld [vmem:[%s967_s1 + $0x98] sm:$0xff]  ;;  %v717_v22 = vld [vmem:[%s967_s1 + $0x90] sm:$0xff] }
   0x8   :  { %418 = vmatpush.bf16.msra.mxu2 %v721_v6  ;;  %v727_v15 = vld [vmem:[%s967_s1 + $0xe0] sm:$0xff]  ;;  %v726_v19 = vld [vmem:[%s967_s1 + $0xd8] sm:$0xff]  ;;  %v725_v23 = vld [vmem:[%s967_s1 + $0xd0] sm:$0xff] }
   0x9   :  { %437 = vmatpush.bf16.msra.mxu3 %v729_v7  ;;  %v700_v24 = vld [vmem:[%s967_s1 + $0x8] sm:$0xff]  ;;  %v699_v28 = vld [vmem:[%s967_s1] sm:$0xff]  ;;  %v691_v33 = vld [vmem:[%s969_s0 + $0x10] sm:$0xf0] }
   0xa   :  { %381 = vmatpush.bf16.msra.mxu0 %v704_v8  ;;  %v708_v25 = vld [vmem:[%s967_s1 + $0x48] sm:$0xff]  ;;  %v707_v29 = vld [vmem:[%s967_s1 + $0x40] sm:$0xff]  ;;  %v507_v35 = vld [vmem:[%s969_s0 + $0x14] sm:$0xf0] }
   0xb   :  { %400 = vmatpush.bf16.msra.mxu1 %v712_v9  ;;  %v716_v26 = vld [vmem:[%s967_s1 + $0x88] sm:$0xff]  ;;  %v715_v30 = vld [vmem:[%s967_s1 + $0x80] sm:$0xff]  ;;  %v692_v37 = vld [vmem:[%s969_s0 + $0x18] sm:$0xf0] }
   0xc   :  { %419 = vmatpush.bf16.msra.mxu2 %v720_v10  ;;  %v724_v27 = vld [vmem:[%s967_s1 + $0xc8] sm:$0xff]  ;;  %v723_v31 = vld [vmem:[%s967_s1 + $0xc0] sm:$0xff]  ;;  %v734_v40 = vld [vmem:[%s967_s1 + $0x118] sm:$0xff] }
   0xd   :  { %438 = vmatpush.bf16.msra.mxu3 %v728_v11  ;;  %v505_v32 = vld [vmem:[%s969_s0] sm:$0xf]  ;;  %v689_v34 = vld [vmem:[%s969_s0 + $0x4] sm:$0xf]  ;;  %v513_v36 = vld [vmem:[%s969_s0 + $0x8] sm:$0xf] }
   0xe   :  { %382 = vmatpush.bf16.msra.mxu0 %v703_v12  ;;  %v690_v38 = vld [vmem:[%s969_s0 + $0xc] sm:$0xf]  ;;  %v515_v39 = vld [vmem:[%s969_s0 + $0x1c] sm:$0xf0]  ;;  %v506_v41 = vor.u32 %v691_v33, %v505_v32  ;;  %v510_v42 = vor.u32 %v689_v34, %v507_v35  ;;  %v514_v43 = vor.u32 %v692_v37, %v513_v36  ;;  %v733_v45 = vld [vmem:[%s967_s1 + $0x110] sm:$0xff] }
   0xf   :  { %401 = vmatpush.bf16.msra.mxu1 %v711_v13  ;;  %v518_v44 = vor.u32 %v690_v38, %v515_v39  ;;  %v732_v46 = vld [vmem:[%s967_s1 + $0x108] sm:$0xff]  ;;  %v731_v47 = vld [vmem:[%s967_s1 + $0x100] sm:$0xff]  ;;  %v696_v49 = vld [vmem:[%s969_s0 + $0x38] sm:$0xf0] }
  0x10   :  { %420 = vmatpush.bf16.msra.mxu2 %v719_v14  ;;  %v525_v48 = vld [vmem:[%s969_s0 + $0x28] sm:$0xf]  ;;  %v694_v50 = vld [vmem:[%s969_s0 + $0x2c] sm:$0xf]  ;;  %v527_v51 = vld [vmem:[%s969_s0 + $0x3c] sm:$0xf0] }
  0x11   :  { %439 = vmatpush.bf16.msra.mxu3 %v727_v15  ;;  %v533_v52 = vld [vmem:[%s969_s0 + $0x30] sm:$0xf]  ;;  %v697_v53 = vld [vmem:[%s969_s0 + $0x40] sm:$0xf0]  ;;  %v695_v54 = vld [vmem:[%s969_s0 + $0x34] sm:$0xf]  ;;  %v526_v56 = vor.u32 %v696_v49, %v525_v48  ;;  %v530_v57 = vor.u32 %v694_v50, %v527_v51 }
  0x12   :  { %383 = vmatpush.bf16.msra.mxu0 %v702_v16  ;;  %v535_v55 = vld [vmem:[%s969_s0 + $0x44] sm:$0xf0]  ;;  %v534_v58 = vor.u32 %v697_v53, %v533_v52  ;;  %v521_v60 = vld [vmem:[%s969_s0 + $0x10] sm:$0xf]  ;;  %v693_v61 = vld [vmem:[%s969_s0 + $0x20] sm:$0xf0] }
  0x13   :  { %402 = vmatpush.bf16.msra.mxu1 %v710_v17  ;;  %v538_v59 = vor.u32 %v695_v54, %v535_v55  ;;  %v541_v62 = vld [vmem:[%s969_s0 + $0x38] sm:$0xf]  ;;  %v698_v63 = vld [vmem:[%s969_s0 + $0x48] sm:$0xf0]  ;;  %v522_v0 = vor.u32 %v693_v61, %v521_v60  ;;  %v748_v11 = vld [vmem:[%s968_s2] ss:$0 sm:$0xff] }
  0x14   :  { %421 = vmatpush.bf16.msra.mxu2 %v718_v18  ;;  %v542_v1 = vor.u32 %v698_v63, %v541_v62 }
  0x15   :  { %440 = vmatpush.bf16.msra.mxu3 %v726_v19 }
  0x16   :  { %384 = vmatpush.bf16.msra.mxu0 %v701_v20 }
  0x17   :  { %403 = vmatpush.bf16.msra.mxu1 %v709_v21 }
  0x18   :  { %422 = vmatpush.bf16.msra.mxu2 %v717_v22 }
  0x19   :  { %441 = vmatpush.bf16.msra.mxu3 %v725_v23  ;;  %v736_v23 = vld [vmem:[%s970_s3] sm:$0xff]  }
  0x1a   :  { %385 = vmatpush.bf16.msra.mxu0 %v700_v24  ;;  %v743_v24 = vld [vmem:[%s970_s3 + $0x8] sm:$0xff]  }
  0x1b   :  { %404 = vmatpush.bf16.msra.mxu1 %v708_v25 }
  0x1c   :  { %423 = vmatpush.bf16.msra.mxu2 %v716_v26 }
  0x1d   :  { %442 = vmatpush.bf16.msra.mxu3 %v724_v27 }
  0x1e   :  { %386 = vmatpush.bf16.msra.mxu0 %v699_v28 }
  0x1f   :  { %405 = vmatpush.bf16.msra.mxu1 %v707_v29 }
  0x20   :  { %424 = vmatpush.bf16.msra.mxu2 %v715_v30  ;;  %v737_v30 = vunpack.c.l.bf16 %v736_v23 }
  0x21   :  { %443 = vmatpush.bf16.msra.mxu3 %v723_v31  ;;  %387 = vmatmul.bf16.vlgmr.msra.gmra.mxu0 %v506_v41  ;;  %v741_v31 = vunpack.c.l.bf16 %v743_v24 }
  0x22   :  { %459 = vmatpush.bf16.msrb.mxu0 %v734_v40  ;;  %406 = vmatmul.bf16.vlgmr.msra.gmra.mxu1 %v510_v42 }
  0x23   :  { %744 = vmatpush.bf16.msrb.mxu1 %v734_v40  ;;  %425 = vmatmul.bf16.vlgmr.msra.gmra.mxu2 %v514_v43 }
  0x24   :  { %444 = vmatmul.bf16.vlgmr.msra.gmra.mxu3 %v518_v44 }
  0x26   :  { %460 = vmatpush.bf16.msrb.mxu0 %v733_v45 }
  0x27   :  { %745 = vmatpush.bf16.msrb.mxu1 %v733_v45  ;;  %v738_v45 = vunpack.c.h.bf16 %v736_v23 }
  0x2a   :  { %461 = vmatpush.bf16.msrb.mxu0 %v732_v46 }
  0x2b   :  { %746 = vmatpush.bf16.msrb.mxu1 %v732_v46  ;;  %v742_v46 = vunpack.c.h.bf16 %v743_v24 }
  0x2e   :  { %462 = vmatpush.bf16.msrb.mxu0 %v731_v47 }
  0x2f   :  { %747 = vmatpush.bf16.msrb.mxu1 %v731_v47 }
  0x31   :  { %392 = vmatmul.bf16.gmra.mxu0 %v526_v56 }
  0x32   :  { %411 = vmatmul.bf16.gmra.mxu1 %v530_v57 }
  0x33   :  { %430 = vmatmul.bf16.gmra.mxu2 %v534_v58 }
  0x34   :  { %449 = vmatmul.bf16.gmra.mxu3 %v538_v59 }
  0x41   :  { %687 = vmatmul.msk.bf16.vlgmr.msrb.gmra.mxu0 %vm372_vm0, %v522_v0 }
  0x42   :  { %688 = vmatmul.msk.bf16.vlgmr.msrb.gmra.mxu1 %vm372_vm0, %v542_v1 }
  0x9e   :  { %v388_v2 = vpop.f32.mrf.mxu0 }
  0x9f   :  { %v407_v3 = vpop.f32.mrf.mxu1  ;;  %v389_v13 = vadd.f32 %v748_v11, %v388_v2 }
  0xa1   :  { %v408_v18 = vadd.f32 %v407_v3, %v389_v13 }
  0xa6   :  { %v426_v4 = vpop.f32.mrf.mxu2  ;;  %v390_v6 = vpop.f32.mrf.mxu0 }
  0xa7   :  { %v445_v5 = vpop.f32.mrf.mxu3  ;;  %v409_v7 = vpop.f32.mrf.mxu1  ;;  %v427_v20 = vadd.f32 %v426_v4, %v408_v18  ;;  %v391_v25 = vadd.f32 %v748_v11, %v390_v6 }
  0xa9   :  { %v446_v27 = vadd.f32 %v445_v5, %v427_v20  ;;  %v410_v34 = vadd.f32 %v409_v7, %v391_v25 }
  0xae   :  { %v428_v8 = vpop.f32.mrf.mxu2  ;;  %v393_v9 = vpop.f32.mrf.mxu0 }
  0xaf   :  { %v412_v10 = vpop.f32.mrf.mxu1  ;;  %v447_v12 = vpop.f32.mrf.mxu3  ;;  %v394_v14 = vadd.f32 %v748_v11, %v393_v9  ;;  %v429_v38 = vadd.f32 %v428_v8, %v410_v34 }
  0xb1   :  { %v413_v19 = vadd.f32 %v412_v10, %v394_v14  ;;  %v448_v47 = vadd.f32 %v447_v12, %v429_v38 }
  0xb6   :  { %v431_v15 = vpop.f32.mrf.mxu2  ;;  %v395_v16 = vpop.f32.mrf.mxu0 }
  0xb7   :  { %v414_v17 = vpop.f32.mrf.mxu1  ;;  %v432_v21 = vadd.f32 %v431_v15, %v413_v19  ;;  %v450_v22 = vpop.f32.mrf.mxu3  ;;  %v396_v26 = vadd.f32 %v748_v11, %v395_v16 }
  0xb9   :  { %v451_v28 = vadd.f32 %v450_v22, %v432_v21  ;;  %v415_v35 = vadd.f32 %v414_v17, %v396_v26 }
  0xbe   :  { %v433_v29 = vpop.f32.mrf.mxu2  ;;  %v464_v32 = vpop.f32.mrf.mxu0 }
  0xbf   :  { %v469_v33 = vpop.f32.mrf.mxu1  ;;  %v465_v36 = vadd.f32 %v464_v32, %v446_v27  ;;  %v434_v39 = vadd.f32 %v433_v29, %v415_v35  ;;  %v452_v44 = vpop.f32.mrf.mxu3 }
  0xc0   :  { %v470_v37 = vadd.f32 %v469_v33, %v451_v28 }
  0xc1   :  { %v482_v40 = vadd.f32 %v737_v30, %v465_v36  ;;  %v453_v48 = vadd.f32 %v452_v44, %v434_v39 }
  0xc2   :  { %v484_v41 = vadd.f32 %v741_v31, %v470_v37 }
  0xc3   :  { %v486_v42 = vmax.f32 %v482_v40, 0.0 }
  0xc4   :  { %v488_v43 = vmax.f32 %v484_v41, 0.0 }
  0xc5   :  { %v490_v49 = vpack.c.bf16 %v486_v42, %v486_v42 }
  0xc6   :  { %v492_v50 = vpack.c.bf16 %v488_v43, %v488_v43  ;;  %v466_v51 = vpop.f32.mrf.mxu0 }
  0xc7   :  { %v471_v52 = vpop.f32.mrf.mxu1  ;;  %495 = vst.msk [vmem:[%s971_s4] sm:$0xf] %vm494_vm1, %v490_v49  ;;  %v467_v53 = vadd.f32 %v466_v51, %v448_v47 }
  0xc8   :  { %v472_v54 = vadd.f32 %v471_v52, %v453_v48  ;;  %497 = vst.msk [vmem:[%s971_s4 + $0x8] sm:$0xf] %vm494_vm1, %v492_v50 }
  0xc9   :  { %v483_v55 = vadd.f32 %v738_v45, %v467_v53 }
  0xca   :  { %v485_v56 = vadd.f32 %v742_v46, %v472_v54 }
  0xcb   :  { %v487_v57 = vmax.f32 %v483_v55, 0.0 }
  0xcc   :  { %v489_v58 = vmax.f32 %v485_v56, 0.0 }
  0xcd   :  { %v491_v59 = vpack.c.bf16 %v487_v57, %v487_v57 }
  0xce   :  { %v493_v60 = vpack.c.bf16 %v489_v58, %v489_v58 }
  0xcf   :  { %496 = vst.msk [vmem:[%s971_s4 + $0x4] sm:$0xf] %vm494_vm1, %v491_v59 }
  0xd0   :  { %498 = vst.msk [vmem:[%s971_s4 + $0xc] sm:$0xf] %vm494_vm1, %v493_v60 }

// kernel: _lambda_.71
= control target key start
LH: loop header
LB: loop body
LE: loop exit
PB: predicated region body
PF: predicated region fallthrough
CT: control target
= control target key end

     0   :  { %vm35_vm0 = vcmask 519168   ;;  %s101_s0 = inlined_call_operand.vmem [shape: bf16[32,64], index: 0, kind: input, shape index: {}]   ;;  %s102_s1 = inlined_call_operand.vmem [shape: bf16[32,64], index: 1, kind: input, shape index: {}]   ;;  %s103_s2 = inlined_call_operand.vmem [shape: bf16[32,64], index: 2, kind: output, shape index: {}]  }
   0x1   :  { %v45_v0 = vld [vmem:[%s101_s0] sm:$0xff]   ;;  %v60_v2 = vld [vmem:[%s101_s0 + $0x8] sm:$0xff]  }
   0x2   :  { %v53_v1 = vld [vmem:[%s102_s1] sm:$0xff]   ;;  %v46_v3 = vunpack.c.l.bf16 %v45_v0  ;;  %v47_v5 = vunpack.c.h.bf16 %v45_v0  ;;  %v61_v7 = vld [vmem:[%s102_s1 + $0x8] sm:$0xff]   ;;  %v50_v8 = vunpack.c.l.bf16 %v60_v2  ;;  %v51_v10 = vunpack.c.h.bf16 %v60_v2 }
   0x3   :  { %v54_v4 = vunpack.c.l.bf16 %v53_v1  ;;  %v55_v6 = vunpack.c.h.bf16 %v53_v1  ;;  %v58_v9 = vunpack.c.l.bf16 %v61_v7  ;;  %v59_v11 = vunpack.c.h.bf16 %v61_v7 }
   0x5   :  { %v27_v12 = vadd.f32 %v54_v4, %v46_v3  ;;  %v28_v13 = vadd.f32 %v55_v6, %v47_v5  ;;  %v29_v14 = vadd.f32 %v58_v9, %v50_v8  ;;  %v30_v15 = vadd.f32 %v59_v11, %v51_v10 }
   0x7   :  { %v31_v16 = vpack.c.bf16 %v27_v12, %v27_v12  ;;  %v32_v17 = vpack.c.bf16 %v28_v13, %v28_v13  ;;  %v33_v18 = vpack.c.bf16 %v29_v14, %v29_v14  ;;  %v34_v19 = vpack.c.bf16 %v30_v15, %v30_v15 }
   0x9   :  { %36 = vst.msk [vmem:[%s103_s2] sm:$0xf] %vm35_vm0, %v31_v16 }
   0xa   :  { %37 = vst.msk [vmem:[%s103_s2 + $0x4] sm:$0xf] %vm35_vm0, %v32_v17 }
   0xb   :  { %38 = vst.msk [vmem:[%s103_s2 + $0x8] sm:$0xf] %vm35_vm0, %v33_v18 }
   0xc   :  { %39 = vst.msk [vmem:[%s103_s2 + $0xc] sm:$0xf] %vm35_vm0, %v34_v19 }

// kernel: _lambda_.60
= control target key start
LH: loop header
LB: loop body
LE: loop exit
PB: predicated region body
PF: predicated region fallthrough
CT: control target
= control target key end

     0   :  { %vm369_vm0 = vcmask 523264   ;;  %vm479_vm1 = vcmask 519168   ;;  %s932_s1 = inlined_call_operand.vmem [shape: bf16[576,64], index: 1, kind: input, shape index: {}]   ;;  %s933_s2 = inlined_call_operand.vmem [shape: f32[1,64], index: 2, kind: input, shape index: {}]   ;;  %s934_s0 = inlined_call_operand.vmem [shape: bf16[32,576], index: 0, kind: input, shape index: {}]   ;;  %s935_s3 = inlined_call_operand.vmem [shape: bf16[32,64], index: 3, kind: output, shape index: {}]  }
   0x1   :  { %v691_v0 = vld [vmem:[%s932_s1 + $0x38] sm:$0xff]  ;;  %v690_v4 = vld [vmem:[%s932_s1 + $0x30] sm:$0xff]  ;;  %v689_v8 = vld [vmem:[%s932_s1 + $0x28] sm:$0xff] }
   0x2   :  { %v699_v1 = vld [vmem:[%s932_s1 + $0x78] sm:$0xff]  ;;  %376 = vmatpush.bf16.msra.mxu0 %v691_v0  ;;  %v698_v5 = vld [vmem:[%s932_s1 + $0x70] sm:$0xff]  ;;  %v697_v9 = vld [vmem:[%s932_s1 + $0x68] sm:$0xff] }
   0x3   :  { %v707_v2 = vld [vmem:[%s932_s1 + $0xb8] sm:$0xff]  ;;  %395 = vmatpush.bf16.msra.mxu1 %v699_v1  ;;  %v706_v6 = vld [vmem:[%s932_s1 + $0xb0] sm:$0xff]  ;;  %v705_v10 = vld [vmem:[%s932_s1 + $0xa8] sm:$0xff] }
   0x4   :  { %v715_v3 = vld [vmem:[%s932_s1 + $0xf8] sm:$0xff]  ;;  %414 = vmatpush.bf16.msra.mxu2 %v707_v2  ;;  %v714_v7 = vld [vmem:[%s932_s1 + $0xf0] sm:$0xff]  ;;  %v713_v11 = vld [vmem:[%s932_s1 + $0xe8] sm:$0xff] }
   0x5   :  { %433 = vmatpush.bf16.msra.mxu3 %v715_v3  ;;  %v688_v12 = vld [vmem:[%s932_s1 + $0x20] sm:$0xff]  ;;  %v687_v16 = vld [vmem:[%s932_s1 + $0x18] sm:$0xff]  ;;  %v686_v20 = vld [vmem:[%s932_s1 + $0x10] sm:$0xff] }
   0x6   :  { %377 = vmatpush.bf16.msra.mxu0 %v690_v4  ;;  %v696_v13 = vld [vmem:[%s932_s1 + $0x60] sm:$0xff]  ;;  %v695_v17 = vld [vmem:[%s932_s1 + $0x58] sm:$0xff]  ;;  %v694_v21 = vld [vmem:[%s932_s1 + $0x50] sm:$0xff] }
   0x7   :  { %396 = vmatpush.bf16.msra.mxu1 %v698_v5  ;;  %v704_v14 = vld [vmem:[%s932_s1 + $0xa0] sm:$0xff]  ;;  %v703_v18 = vld [vmem:[%s932_s1 + $0x98] sm:$0xff]  ;;  %v702_v22 = vld [vmem:[%s932_s1 + $0x90] sm:$0xff] }
   0x8   :  { %415 = vmatpush.bf16.msra.mxu2 %v706_v6  ;;  %v712_v15 = vld [vmem:[%s932_s1 + $0xe0] sm:$0xff]  ;;  %v711_v19 = vld [vmem:[%s932_s1 + $0xd8] sm:$0xff]  ;;  %v710_v23 = vld [vmem:[%s932_s1 + $0xd0] sm:$0xff] }
   0x9   :  { %434 = vmatpush.bf16.msra.mxu3 %v714_v7  ;;  %v685_v24 = vld [vmem:[%s932_s1 + $0x8] sm:$0xff]  ;;  %v684_v28 = vld [vmem:[%s932_s1] sm:$0xff]  ;;  %v676_v33 = vld [vmem:[%s934_s0 + $0x10] sm:$0xf0] }
   0xa   :  { %378 = vmatpush.bf16.msra.mxu0 %v689_v8  ;;  %v693_v25 = vld [vmem:[%s932_s1 + $0x48] sm:$0xff]  ;;  %v692_v29 = vld [vmem:[%s932_s1 + $0x40] sm:$0xff]  ;;  %v492_v35 = vld [vmem:[%s934_s0 + $0x14] sm:$0xf0] }
   0xb   :  { %397 = vmatpush.bf16.msra.mxu1 %v697_v9  ;;  %v701_v26 = vld [vmem:[%s932_s1 + $0x88] sm:$0xff]  ;;  %v700_v30 = vld [vmem:[%s932_s1 + $0x80] sm:$0xff]  ;;  %v677_v37 = vld [vmem:[%s934_s0 + $0x18] sm:$0xf0] }
   0xc   :  { %416 = vmatpush.bf16.msra.mxu2 %v705_v10  ;;  %v709_v27 = vld [vmem:[%s932_s1 + $0xc8] sm:$0xff]  ;;  %v708_v31 = vld [vmem:[%s932_s1 + $0xc0] sm:$0xff]  ;;  %v719_v40 = vld [vmem:[%s932_s1 + $0x118] sm:$0xff] }
   0xd   :  { %435 = vmatpush.bf16.msra.mxu3 %v713_v11  ;;  %v490_v32 = vld [vmem:[%s934_s0] sm:$0xf]  ;;  %v674_v34 = vld [vmem:[%s934_s0 + $0x4] sm:$0xf]  ;;  %v498_v36 = vld [vmem:[%s934_s0 + $0x8] sm:$0xf] }
   0xe   :  { %379 = vmatpush.bf16.msra.mxu0 %v688_v12  ;;  %v675_v38 = vld [vmem:[%s934_s0 + $0xc] sm:$0xf]  ;;  %v500_v39 = vld [vmem:[%s934_s0 + $0x1c] sm:$0xf0]  ;;  %v491_v41 = vor.u32 %v676_v33, %v490_v32  ;;  %v495_v42 = vor.u32 %v674_v34, %v492_v35  ;;  %v499_v43 = vor.u32 %v677_v37, %v498_v36  ;;  %v718_v45 = vld [vmem:[%s932_s1 + $0x110] sm:$0xff] }
   0xf   :  { %398 = vmatpush.bf16.msra.mxu1 %v696_v13  ;;  %v503_v44 = vor.u32 %v675_v38, %v500_v39  ;;  %v717_v46 = vld [vmem:[%s932_s1 + $0x108] sm:$0xff]  ;;  %v716_v47 = vld [vmem:[%s932_s1 + $0x100] sm:$0xff]  ;;  %v681_v49 = vld [vmem:[%s934_s0 + $0x38] sm:$0xf0] }
  0x10   :  { %417 = vmatpush.bf16.msra.mxu2 %v704_v14  ;;  %v510_v48 = vld [vmem:[%s934_s0 + $0x28] sm:$0xf]  ;;  %v679_v50 = vld [vmem:[%s934_s0 + $0x2c] sm:$0xf]  ;;  %v512_v51 = vld [vmem:[%s934_s0 + $0x3c] sm:$0xf0] }
  0x11   :  { %436 = vmatpush.bf16.msra.mxu3 %v712_v15  ;;  %v518_v52 = vld [vmem:[%s934_s0 + $0x30] sm:$0xf]  ;;  %v682_v53 = vld [vmem:[%s934_s0 + $0x40] sm:$0xf0]  ;;  %v680_v54 = vld [vmem:[%s934_s0 + $0x34] sm:$0xf]  ;;  %v511_v56 = vor.u32 %v681_v49, %v510_v48  ;;  %v515_v57 = vor.u32 %v679_v50, %v512_v51 }
  0x12   :  { %380 = vmatpush.bf16.msra.mxu0 %v687_v16  ;;  %v520_v55 = vld [vmem:[%s934_s0 + $0x44] sm:$0xf0]  ;;  %v519_v58 = vor.u32 %v682_v53, %v518_v52  ;;  %v506_v60 = vld [vmem:[%s934_s0 + $0x10] sm:$0xf]  ;;  %v678_v61 = vld [vmem:[%s934_s0 + $0x20] sm:$0xf0] }
  0x13   :  { %399 = vmatpush.bf16.msra.mxu1 %v695_v17  ;;  %v523_v59 = vor.u32 %v680_v54, %v520_v55  ;;  %v526_v62 = vld [vmem:[%s934_s0 + $0x38] sm:$0xf]  ;;  %v683_v63 = vld [vmem:[%s934_s0 + $0x48] sm:$0xf0]  ;;  %v507_v0 = vor.u32 %v678_v61, %v506_v60  ;;  %v724_v11 = vld [vmem:[%s933_s2] ss:$0 sm:$0xff] }
  0x14   :  { %418 = vmatpush.bf16.msra.mxu2 %v703_v18  ;;  %v527_v1 = vor.u32 %v683_v63, %v526_v62 }
  0x15   :  { %437 = vmatpush.bf16.msra.mxu3 %v711_v19 }
  0x16   :  { %381 = vmatpush.bf16.msra.mxu0 %v686_v20 }
  0x17   :  { %400 = vmatpush.bf16.msra.mxu1 %v694_v21 }
  0x18   :  { %419 = vmatpush.bf16.msra.mxu2 %v702_v22 }
  0x19   :  { %438 = vmatpush.bf16.msra.mxu3 %v710_v23 }
  0x1a   :  { %382 = vmatpush.bf16.msra.mxu0 %v685_v24 }
  0x1b   :  { %401 = vmatpush.bf16.msra.mxu1 %v693_v25 }
  0x1c   :  { %420 = vmatpush.bf16.msra.mxu2 %v701_v26 }
  0x1d   :  { %439 = vmatpush.bf16.msra.mxu3 %v709_v27 }
  0x1e   :  { %383 = vmatpush.bf16.msra.mxu0 %v684_v28 }
  0x1f   :  { %402 = vmatpush.bf16.msra.mxu1 %v692_v29 }
  0x20   :  { %421 = vmatpush.bf16.msra.mxu2 %v700_v30 }
  0x21   :  { %440 = vmatpush.bf16.msra.mxu3 %v708_v31  ;;  %384 = vmatmul.bf16.vlgmr.msra.gmra.mxu0 %v491_v41 }
  0x22   :  { %456 = vmatpush.bf16.msrb.mxu0 %v719_v40  ;;  %403 = vmatmul.bf16.vlgmr.msra.gmra.mxu1 %v495_v42 }
  0x23   :  { %720 = vmatpush.bf16.msrb.mxu1 %v719_v40  ;;  %422 = vmatmul.bf16.vlgmr.msra.gmra.mxu2 %v499_v43 }
  0x24   :  { %441 = vmatmul.bf16.vlgmr.msra.gmra.mxu3 %v503_v44 }
  0x26   :  { %457 = vmatpush.bf16.msrb.mxu0 %v718_v45 }
  0x27   :  { %721 = vmatpush.bf16.msrb.mxu1 %v718_v45 }
  0x2a   :  { %458 = vmatpush.bf16.msrb.mxu0 %v717_v46 }
  0x2b   :  { %722 = vmatpush.bf16.msrb.mxu1 %v717_v46 }
  0x2e   :  { %459 = vmatpush.bf16.msrb.mxu0 %v716_v47 }
  0x2f   :  { %723 = vmatpush.bf16.msrb.mxu1 %v716_v47 }
  0x31   :  { %389 = vmatmul.bf16.gmra.mxu0 %v511_v56 }
  0x32   :  { %408 = vmatmul.bf16.gmra.mxu1 %v515_v57 }
  0x33   :  { %427 = vmatmul.bf16.gmra.mxu2 %v519_v58 }
  0x34   :  { %446 = vmatmul.bf16.gmra.mxu3 %v523_v59 }
  0x41   :  { %672 = vmatmul.msk.bf16.vlgmr.msrb.gmra.mxu0 %vm369_vm0, %v507_v0 }
  0x42   :  { %673 = vmatmul.msk.bf16.vlgmr.msrb.gmra.mxu1 %vm369_vm0, %v527_v1 }
  0x9e   :  { %v385_v2 = vpop.f32.mrf.mxu0 }
  0x9f   :  { %v404_v3 = vpop.f32.mrf.mxu1  ;;  %v386_v13 = vadd.f32 %v724_v11, %v385_v2 }
  0xa1   :  { %v405_v18 = vadd.f32 %v404_v3, %v386_v13 }
  0xa6   :  { %v423_v4 = vpop.f32.mrf.mxu2  ;;  %v387_v6 = vpop.f32.mrf.mxu0 }
  0xa7   :  { %v442_v5 = vpop.f32.mrf.mxu3  ;;  %v406_v7 = vpop.f32.mrf.mxu1  ;;  %v424_v20 = vadd.f32 %v423_v4, %v405_v18  ;;  %v388_v23 = vadd.f32 %v724_v11, %v387_v6 }
  0xa9   :  { %v443_v25 = vadd.f32 %v442_v5, %v424_v20  ;;  %v407_v30 = vadd.f32 %v406_v7, %v388_v23 }
  0xae   :  { %v425_v8 = vpop.f32.mrf.mxu2  ;;  %v390_v9 = vpop.f32.mrf.mxu0 }
  0xaf   :  { %v409_v10 = vpop.f32.mrf.mxu1  ;;  %v444_v12 = vpop.f32.mrf.mxu3  ;;  %v391_v14 = vadd.f32 %v724_v11, %v390_v9  ;;  %v426_v34 = vadd.f32 %v425_v8, %v407_v30 }
  0xb1   :  { %v410_v19 = vadd.f32 %v409_v10, %v391_v14  ;;  %v445_v41 = vadd.f32 %v444_v12, %v426_v34 }
  0xb6   :  { %v428_v15 = vpop.f32.mrf.mxu2  ;;  %v392_v16 = vpop.f32.mrf.mxu0 }
  0xb7   :  { %v411_v17 = vpop.f32.mrf.mxu1  ;;  %v429_v21 = vadd.f32 %v428_v15, %v410_v19  ;;  %v447_v22 = vpop.f32.mrf.mxu3  ;;  %v393_v24 = vadd.f32 %v724_v11, %v392_v16 }
  0xb9   :  { %v448_v26 = vadd.f32 %v447_v22, %v429_v21  ;;  %v412_v31 = vadd.f32 %v411_v17, %v393_v24 }
  0xbe   :  { %v430_v27 = vpop.f32.mrf.mxu2  ;;  %v461_v28 = vpop.f32.mrf.mxu0 }
  0xbf   :  { %v466_v29 = vpop.f32.mrf.mxu1  ;;  %v462_v32 = vadd.f32 %v461_v28, %v443_v25  ;;  %v431_v35 = vadd.f32 %v430_v27, %v412_v31  ;;  %v449_v40 = vpop.f32.mrf.mxu3 }
  0xc0   :  { %v467_v33 = vadd.f32 %v466_v29, %v448_v26 }
  0xc1   :  { %v471_v36 = vmax.f32 %v462_v32, 0.0  ;;  %v450_v42 = vadd.f32 %v449_v40, %v431_v35 }
  0xc2   :  { %v473_v37 = vmax.f32 %v467_v33, 0.0 }
  0xc3   :  { %v475_v38 = vpack.c.bf16 %v471_v36, %v471_v36 }
  0xc4   :  { %v477_v39 = vpack.c.bf16 %v473_v37, %v473_v37 }
  0xc5   :  { %480 = vst.msk [vmem:[%s935_s3] sm:$0xf] %vm479_vm1, %v475_v38 }
  0xc6   :  { %482 = vst.msk [vmem:[%s935_s3 + $0x8] sm:$0xf] %vm479_vm1, %v477_v39  ;;  %v463_v43 = vpop.f32.mrf.mxu0 }
  0xc7   :  { %v468_v44 = vpop.f32.mrf.mxu1  ;;  %v464_v45 = vadd.f32 %v463_v43, %v445_v41 }
  0xc8   :  { %v469_v46 = vadd.f32 %v468_v44, %v450_v42 }
  0xc9   :  { %v472_v47 = vmax.f32 %v464_v45, 0.0 }
  0xca   :  { %v474_v48 = vmax.f32 %v469_v46, 0.0 }
  0xcb   :  { %v476_v49 = vpack.c.bf16 %v472_v47, %v472_v47 }
  0xcc   :  { %v478_v50 = vpack.c.bf16 %v474_v48, %v474_v48 }
  0xcd   :  { %481 = vst.msk [vmem:[%s935_s3 + $0x4] sm:$0xf] %vm479_vm1, %v476_v49 }
  0xce   :  { %483 = vst.msk [vmem:[%s935_s3 + $0xc] sm:$0xf] %vm479_vm1, %v478_v50 }

// kernel: _lambda_.57
= control target key start
LH: loop header
LB: loop body
LE: loop exit
PB: predicated region body
PF: predicated region fallthrough
CT: control target
= control target key end

     0   :  { %vm1736_vm0 = vcmask 519168   ;;  %s3349_s1 = inlined_call_operand.vmem [shape: bf16[2304,64], index: 1, kind: input, shape index: {}]   ;;  %s3350_s0 = inlined_call_operand.vmem [shape: bf16[32,2304], index: 0, kind: input, shape index: {}]   ;;  %s3351_s2 = inlined_call_operand.vmem [shape: f32[1,64], index: 2, kind: input, shape index: {}]   ;;  %s3352_s3 = inlined_call_operand.vmem [shape: bf16[32,64], index: 3, kind: output, shape index: {}]  }
   0x1   :  { %v2508_v0 = vld [vmem:[%s3349_s1 + $0x38] sm:$0xff]  ;;  %v2507_v4 = vld [vmem:[%s3349_s1 + $0x30] sm:$0xff]  ;;  %v2506_v8 = vld [vmem:[%s3349_s1 + $0x28] sm:$0xff] }
   0x2   :  { %v2516_v1 = vld [vmem:[%s3349_s1 + $0x78] sm:$0xff]  ;;  %1386 = vmatpush.bf16.msra.mxu0 %v2508_v0  ;;  %v2515_v5 = vld [vmem:[%s3349_s1 + $0x70] sm:$0xff]  ;;  %v2514_v9 = vld [vmem:[%s3349_s1 + $0x68] sm:$0xff] }
   0x3   :  { %v2524_v2 = vld [vmem:[%s3349_s1 + $0xb8] sm:$0xff]  ;;  %1405 = vmatpush.bf16.msra.mxu1 %v2516_v1  ;;  %v2523_v6 = vld [vmem:[%s3349_s1 + $0xb0] sm:$0xff]  ;;  %v2522_v10 = vld [vmem:[%s3349_s1 + $0xa8] sm:$0xff] }
   0x4   :  { %v2532_v3 = vld [vmem:[%s3349_s1 + $0xf8] sm:$0xff]  ;;  %1424 = vmatpush.bf16.msra.mxu2 %v2524_v2  ;;  %v2531_v7 = vld [vmem:[%s3349_s1 + $0xf0] sm:$0xff]  ;;  %v2530_v11 = vld [vmem:[%s3349_s1 + $0xe8] sm:$0xff] }
   0x5   :  { %1443 = vmatpush.bf16.msra.mxu3 %v2532_v3  ;;  %v2505_v12 = vld [vmem:[%s3349_s1 + $0x20] sm:$0xff]  ;;  %v2504_v16 = vld [vmem:[%s3349_s1 + $0x18] sm:$0xff]  ;;  %v2503_v20 = vld [vmem:[%s3349_s1 + $0x10] sm:$0xff] }
   0x6   :  { %1387 = vmatpush.bf16.msra.mxu0 %v2507_v4  ;;  %v2513_v13 = vld [vmem:[%s3349_s1 + $0x60] sm:$0xff]  ;;  %v2512_v17 = vld [vmem:[%s3349_s1 + $0x58] sm:$0xff]  ;;  %v2511_v21 = vld [vmem:[%s3349_s1 + $0x50] sm:$0xff] }
   0x7   :  { %1406 = vmatpush.bf16.msra.mxu1 %v2515_v5  ;;  %v2521_v14 = vld [vmem:[%s3349_s1 + $0xa0] sm:$0xff]  ;;  %v2520_v18 = vld [vmem:[%s3349_s1 + $0x98] sm:$0xff]  ;;  %v2519_v22 = vld [vmem:[%s3349_s1 + $0x90] sm:$0xff] }
   0x8   :  { %1425 = vmatpush.bf16.msra.mxu2 %v2523_v6  ;;  %v2529_v15 = vld [vmem:[%s3349_s1 + $0xe0] sm:$0xff]  ;;  %v2528_v19 = vld [vmem:[%s3349_s1 + $0xd8] sm:$0xff]  ;;  %v2527_v23 = vld [vmem:[%s3349_s1 + $0xd0] sm:$0xff] }
   0x9   :  { %1444 = vmatpush.bf16.msra.mxu3 %v2531_v7  ;;  %v2502_v24 = vld [vmem:[%s3349_s1 + $0x8] sm:$0xff]  ;;  %v2501_v28 = vld [vmem:[%s3349_s1] sm:$0xff]  ;;  %v2475_v37 = vld [vmem:[%s3350_s0 + $0x4c] sm:$0xf0] }
   0xa   :  { %1388 = vmatpush.bf16.msra.mxu0 %v2506_v8  ;;  %v2510_v25 = vld [vmem:[%s3349_s1 + $0x48] sm:$0xff]  ;;  %v2509_v29 = vld [vmem:[%s3349_s1 + $0x40] sm:$0xff]  ;;  %v1757_v39 = vld [vmem:[%s3350_s0 + $0x50] sm:$0xf0] }
   0xb   :  { %1407 = vmatpush.bf16.msra.mxu1 %v2514_v9  ;;  %v2518_v26 = vld [vmem:[%s3349_s1 + $0x88] sm:$0xff]  ;;  %v2517_v30 = vld [vmem:[%s3349_s1 + $0x80] sm:$0xff]  ;;  %v2556_v40 = vld [vmem:[%s3349_s1 + $0x1b8] sm:$0xff] }
   0xc   :  { %1426 = vmatpush.bf16.msra.mxu2 %v2522_v10  ;;  %v2526_v27 = vld [vmem:[%s3349_s1 + $0xc8] sm:$0xff]  ;;  %v2525_v31 = vld [vmem:[%s3349_s1 + $0xc0] sm:$0xff]  ;;  %v2540_v41 = vld [vmem:[%s3349_s1 + $0x138] sm:$0xff] }
   0xd   :  { %1445 = vmatpush.bf16.msra.mxu3 %v2530_v11  ;;  %v1747_v32 = vld [vmem:[%s3350_s0] sm:$0xf]  ;;  %v2474_v33 = vld [vmem:[%s3350_s0 + $0x44] sm:$0xf0]  ;;  %v2465_v34 = vld [vmem:[%s3350_s0 + $0x4] sm:$0xf] }
   0xe   :  { %1389 = vmatpush.bf16.msra.mxu0 %v2505_v12  ;;  %v1749_v35 = vld [vmem:[%s3350_s0 + $0x48] sm:$0xf0]  ;;  %v1755_v36 = vld [vmem:[%s3350_s0 + $0x8] sm:$0xf]  ;;  %v1748_v42 = vor.u32 %v2474_v33, %v1747_v32  ;;  %v2548_v46 = vld [vmem:[%s3349_s1 + $0x178] sm:$0xff] }
   0xf   :  { %1408 = vmatpush.bf16.msra.mxu1 %v2513_v13  ;;  %v2466_v38 = vld [vmem:[%s3350_s0 + $0xc] sm:$0xf]  ;;  %v1752_v43 = vor.u32 %v2465_v34, %v1749_v35  ;;  %v1756_v44 = vor.u32 %v2475_v37, %v1755_v36  ;;  %v2564_v47 = vld [vmem:[%s3349_s1 + $0x1f8] sm:$0xff]  ;;  %v2555_v48 = vld [vmem:[%s3349_s1 + $0x1b0] sm:$0xff] }
  0x10   :  { %1427 = vmatpush.bf16.msra.mxu2 %v2521_v14  ;;  %v1760_v45 = vor.u32 %v2466_v38, %v1757_v39  ;;  %v2539_v49 = vld [vmem:[%s3349_s1 + $0x130] sm:$0xff]  ;;  %v2554_v52 = vld [vmem:[%s3349_s1 + $0x1a8] sm:$0xff]  ;;  %v2553_v56 = vld [vmem:[%s3349_s1 + $0x1a0] sm:$0xff] }
  0x11   :  { %1446 = vmatpush.bf16.msra.mxu3 %v2529_v15  ;;  %v2547_v50 = vld [vmem:[%s3349_s1 + $0x170] sm:$0xff]  ;;  %v2538_v53 = vld [vmem:[%s3349_s1 + $0x128] sm:$0xff]  ;;  %v2537_v57 = vld [vmem:[%s3349_s1 + $0x120] sm:$0xff] }
  0x12   :  { %1390 = vmatpush.bf16.msra.mxu0 %v2504_v16  ;;  %v2563_v51 = vld [vmem:[%s3349_s1 + $0x1f0] sm:$0xff]  ;;  %v2546_v54 = vld [vmem:[%s3349_s1 + $0x168] sm:$0xff]  ;;  %v2545_v58 = vld [vmem:[%s3349_s1 + $0x160] sm:$0xff] }
  0x13   :  { %1409 = vmatpush.bf16.msra.mxu1 %v2512_v17  ;;  %v2562_v55 = vld [vmem:[%s3349_s1 + $0x1e8] sm:$0xff]  ;;  %v2561_v59 = vld [vmem:[%s3349_s1 + $0x1e0] sm:$0xff]  ;;  %v1819_v60 = vld [vmem:[%s3350_s0 + $0x90] sm:$0xf] }
  0x14   :  { %1428 = vmatpush.bf16.msra.mxu2 %v2520_v18  ;;  %v2492_v61 = vld [vmem:[%s3350_s0 + $0xd4] sm:$0xf0]  ;;  %v2483_v62 = vld [vmem:[%s3350_s0 + $0x94] sm:$0xf]  ;;  %v1821_v63 = vld [vmem:[%s3350_s0 + $0xd8] sm:$0xf0] }
  0x15   :  { %1447 = vmatpush.bf16.msra.mxu3 %v2528_v19  ;;  %v1827_v0 = vld [vmem:[%s3350_s0 + $0x98] sm:$0xf]  ;;  %v2493_v1 = vld [vmem:[%s3350_s0 + $0xdc] sm:$0xf0]  ;;  %v2484_v2 = vld [vmem:[%s3350_s0 + $0x9c] sm:$0xf]  ;;  %v1820_v6 = vor.u32 %v2492_v61, %v1819_v60  ;;  %v1824_v7 = vor.u32 %v2483_v62, %v1821_v63 }
  0x16   :  { %1391 = vmatpush.bf16.msra.mxu0 %v2503_v20  ;;  %v1829_v3 = vld [vmem:[%s3350_s0 + $0xe0] sm:$0xf0]  ;;  %v2552_v4 = vld [vmem:[%s3349_s1 + $0x198] sm:$0xff]  ;;  %v1828_v8 = vor.u32 %v2493_v1, %v1827_v0  ;;  %v2551_v12 = vld [vmem:[%s3349_s1 + $0x190] sm:$0xff] }
  0x17   :  { %1410 = vmatpush.bf16.msra.mxu1 %v2511_v21  ;;  %v2536_v5 = vld [vmem:[%s3349_s1 + $0x118] sm:$0xff]  ;;  %v1832_v9 = vor.u32 %v2484_v2, %v1829_v3  ;;  %v2535_v13 = vld [vmem:[%s3349_s1 + $0x110] sm:$0xff]  ;;  %v2550_v16 = vld [vmem:[%s3349_s1 + $0x188] sm:$0xff] }
  0x18   :  { %1429 = vmatpush.bf16.msra.mxu2 %v2519_v22  ;;  %v2544_v10 = vld [vmem:[%s3349_s1 + $0x158] sm:$0xff]  ;;  %v2543_v14 = vld [vmem:[%s3349_s1 + $0x150] sm:$0xff]  ;;  %v2534_v17 = vld [vmem:[%s3349_s1 + $0x108] sm:$0xff] }
  0x19   :  { %1448 = vmatpush.bf16.msra.mxu3 %v2527_v23  ;;  %v2560_v11 = vld [vmem:[%s3349_s1 + $0x1d8] sm:$0xff]  ;;  %v2559_v15 = vld [vmem:[%s3349_s1 + $0x1d0] sm:$0xff]  ;;  %v2542_v18 = vld [vmem:[%s3349_s1 + $0x148] sm:$0xff] }
  0x1a   :  { %1392 = vmatpush.bf16.msra.mxu0 %v2502_v24  ;;  %v2558_v19 = vld [vmem:[%s3349_s1 + $0x1c8] sm:$0xff]  ;;  %v2549_v20 = vld [vmem:[%s3349_s1 + $0x180] sm:$0xff]  ;;  %v1763_v24 = vld [vmem:[%s3350_s0 + $0x10] sm:$0xf] }
  0x1b   :  { %1411 = vmatpush.bf16.msra.mxu1 %v2510_v25  ;;  %v2533_v21 = vld [vmem:[%s3349_s1 + $0x100] sm:$0xff]  ;;  %v2588_v25 = vld [vmem:[%s3349_s1 + $0x2b8] sm:$0xff]  ;;  %v2587_v37 = vld [vmem:[%s3349_s1 + $0x2b0] sm:$0xff] }
  0x1c   :  { %1430 = vmatpush.bf16.msra.mxu2 %v2518_v26  ;;  %v2541_v22 = vld [vmem:[%s3349_s1 + $0x140] sm:$0xff]  ;;  %v2572_v26 = vld [vmem:[%s3349_s1 + $0x238] sm:$0xff]  ;;  %v1845_v61 = vld [vmem:[%s3350_s0 + $0xf0] sm:$0xf0] }
  0x1d   :  { %1449 = vmatpush.bf16.msra.mxu3 %v2526_v27  ;;  %v2557_v23 = vld [vmem:[%s3349_s1 + $0x1c0] sm:$0xff]  ;;  %v2476_v27 = vld [vmem:[%s3350_s0 + $0x54] sm:$0xf0]  ;;  %v2468_v32 = vld [vmem:[%s3350_s0 + $0x1c] sm:$0xf] }
  0x1e   :  { %1393 = vmatpush.bf16.msra.mxu0 %v2501_v28  ;;  %v2467_v28 = vld [vmem:[%s3350_s0 + $0x14] sm:$0xf]  ;;  %v1773_v33 = vld [vmem:[%s3350_s0 + $0x60] sm:$0xf0]  ;;  %v2580_v34 = vld [vmem:[%s3349_s1 + $0x278] sm:$0xff]  ;;  %v1764_v36 = vor.u32 %v2476_v27, %v1763_v24 }
  0x1f   :  { %1412 = vmatpush.bf16.msra.mxu1 %v2509_v29  ;;  %v1765_v29 = vld [vmem:[%s3350_s0 + $0x58] sm:$0xf0]  ;;  %v2583_v1 = vld [vmem:[%s3349_s1 + $0x290] sm:$0xff]  ;;  %v1781_v24 = vld [vmem:[%s3350_s0 + $0x68] sm:$0xf0] }
  0x20   :  { %1431 = vmatpush.bf16.msra.mxu2 %v2517_v30  ;;  %v1771_v30 = vld [vmem:[%s3350_s0 + $0x18] sm:$0xf]  ;;  %v1768_v38 = vor.u32 %v2467_v28, %v1765_v29  ;;  %v2470_v27 = vld [vmem:[%s3350_s0 + $0x2c] sm:$0xf]  ;;  %v1789_v28 = vld [vmem:[%s3350_s0 + $0x70] sm:$0xf0] }
  0x21   :  { %1450 = vmatpush.bf16.msra.mxu3 %v2525_v31  ;;  %1394 = vmatmul.bf16.vlgmr.msra.gmra.mxu0 %v1748_v42  ;;  %v2477_v31 = vld [vmem:[%s3350_s0 + $0x5c] sm:$0xf0]  ;;  %v2596_v35 = vld [vmem:[%s3349_s1 + $0x2f8] sm:$0xff]  ;;  %v2579_v42 = vld [vmem:[%s3349_s1 + $0x270] sm:$0xff] }
  0x22   :  { %1462 = vmatpush.bf16.msrb.mxu0 %v2540_v41  ;;  %1413 = vmatmul.bf16.vlgmr.msra.gmra.mxu1 %v1752_v43  ;;  %v1772_v39 = vor.u32 %v2477_v31, %v1771_v30  ;;  %v2571_v41 = vld [vmem:[%s3349_s1 + $0x230] sm:$0xff]  ;;  %v2568_v60 = vld [vmem:[%s3349_s1 + $0x218] sm:$0xff] }
  0x23   :  { %1432 = vmatmul.bf16.vlgmr.msra.gmra.mxu2 %v1756_v44  ;;  %1481 = vmatpush.bf16.msrb.mxu1 %v2548_v46  ;;  %v2595_v43 = vld [vmem:[%s3349_s1 + $0x2f0] sm:$0xff]  ;;  %v2586_v44 = vld [vmem:[%s3349_s1 + $0x2a8] sm:$0xff]  ;;  %v2576_v62 = vld [vmem:[%s3349_s1 + $0x258] sm:$0xff] }
  0x24   :  { %1500 = vmatpush.bf16.msrb.mxu2 %v2556_v40  ;;  %1451 = vmatmul.bf16.vlgmr.msra.gmra.mxu3 %v1760_v45  ;;  %v1776_v40 = vor.u32 %v2468_v32, %v1773_v33  ;;  %v2570_v45 = vld [vmem:[%s3349_s1 + $0x228] sm:$0xff]  ;;  %v2592_v63 = vld [vmem:[%s3349_s1 + $0x2d8] sm:$0xff]  ;;  %v2611_v30 = vld [vmem:[%s3349_s1 + $0x370] sm:$0xff]  ;;  %v1792_v33 = vor.u32 %v2470_v27, %v1789_v28 }
  0x25   :  { %1519 = vmatpush.bf16.msrb.mxu3 %v2564_v47  ;;  %v2578_v46 = vld [vmem:[%s3349_s1 + $0x268] sm:$0xff]  ;;  %v2641_v27 = vld [vmem:[%s3349_s1 + $0x460] sm:$0xff]  ;;  %v2632_v28 = vld [vmem:[%s3349_s1 + $0x418] sm:$0xff] }
  0x26   :  { %1463 = vmatpush.bf16.msrb.mxu0 %v2539_v49  ;;  %v2594_v47 = vld [vmem:[%s3349_s1 + $0x2e8] sm:$0xff]  ;;  %v2569_v49 = vld [vmem:[%s3349_s1 + $0x220] sm:$0xff] }
  0x27   :  { %1482 = vmatpush.bf16.msrb.mxu1 %v2547_v50  ;;  %v2577_v50 = vld [vmem:[%s3349_s1 + $0x260] sm:$0xff] }
  0x28   :  { %1501 = vmatpush.bf16.msrb.mxu2 %v2555_v48  ;;  %v2585_v48 = vld [vmem:[%s3349_s1 + $0x2a0] sm:$0xff] }
  0x29   :  { %1520 = vmatpush.bf16.msrb.mxu3 %v2563_v51  ;;  %v2593_v51 = vld [vmem:[%s3349_s1 + $0x2e0] sm:$0xff] }
  0x2a   :  { %1464 = vmatpush.bf16.msrb.mxu0 %v2538_v53  ;;  %v2494_v53 = vld [vmem:[%s3350_s0 + $0xe4] sm:$0xf0] }
  0x2b   :  { %1483 = vmatpush.bf16.msrb.mxu1 %v2546_v54  ;;  %v2584_v54 = vld [vmem:[%s3349_s1 + $0x298] sm:$0xff] }
  0x2c   :  { %1502 = vmatpush.bf16.msrb.mxu2 %v2554_v52  ;;  %v1835_v52 = vld [vmem:[%s3350_s0 + $0xa0] sm:$0xf] }
  0x2d   :  { %1521 = vmatpush.bf16.msrb.mxu3 %v2562_v55  ;;  %v2485_v55 = vld [vmem:[%s3350_s0 + $0xa4] sm:$0xf]  ;;  %v1836_v0 = vor.u32 %v2494_v53, %v1835_v52  ;;  %v2488_v52 = vld [vmem:[%s3350_s0 + $0xbc] sm:$0xf] }
  0x2e   :  { %1465 = vmatpush.bf16.msrb.mxu0 %v2537_v57  ;;  %v1843_v57 = vld [vmem:[%s3350_s0 + $0xa8] sm:$0xf]  ;;  %v2600_v53 = vld [vmem:[%s3349_s1 + $0x318] sm:$0xff] }
  0x2f   :  { %1484 = vmatpush.bf16.msrb.mxu1 %v2545_v58  ;;  %v2495_v58 = vld [vmem:[%s3350_s0 + $0xec] sm:$0xf0] }
  0x30   :  { %1503 = vmatpush.bf16.msrb.mxu2 %v2553_v56  ;;  %v1837_v56 = vld [vmem:[%s3350_s0 + $0xe8] sm:$0xf0]  ;;  %v1844_v3 = vor.u32 %v2495_v58, %v1843_v57  ;;  %v2607_v58 = vld [vmem:[%s3349_s1 + $0x350] sm:$0xff] }
  0x31   :  { %1522 = vmatpush.bf16.msrb.mxu3 %v2561_v59  ;;  %1399 = vmatmul.bf16.gmra.mxu0 %v1820_v6  ;;  %v2486_v59 = vld [vmem:[%s3350_s0 + $0xac] sm:$0xf]  ;;  %v1840_v2 = vor.u32 %v2485_v55, %v1837_v56  ;;  %v2575_v6 = vld [vmem:[%s3349_s1 + $0x250] sm:$0xff]  ;;  %v2624_v55 = vld [vmem:[%s3349_s1 + $0x3d8] sm:$0xff] }
  0x32   :  { %1466 = vmatpush.bf16.msrb.mxu0 %v2536_v5  ;;  %1418 = vmatmul.bf16.gmra.mxu1 %v1824_v7  ;;  %v2567_v5 = vld [vmem:[%s3349_s1 + $0x210] sm:$0xff] }
  0x33   :  { %1437 = vmatmul.bf16.gmra.mxu2 %v1828_v8  ;;  %1485 = vmatpush.bf16.msrb.mxu1 %v2544_v10  ;;  %v2591_v7 = vld [vmem:[%s3349_s1 + $0x2d0] sm:$0xff]  ;;  %v2582_v8 = vld [vmem:[%s3349_s1 + $0x288] sm:$0xff] }
  0x34   :  { %1504 = vmatpush.bf16.msrb.mxu2 %v2552_v4  ;;  %1456 = vmatmul.bf16.gmra.mxu3 %v1832_v9  ;;  %v1848_v4 = vor.u32 %v2486_v59, %v1845_v61  ;;  %v2566_v9 = vld [vmem:[%s3349_s1 + $0x208] sm:$0xff]  ;;  %v2615_v56 = vld [vmem:[%s3349_s1 + $0x390] sm:$0xff] }
  0x35   :  { %1523 = vmatpush.bf16.msrb.mxu3 %v2560_v11  ;;  %v2574_v10 = vld [vmem:[%s3349_s1 + $0x248] sm:$0xff] }
  0x36   :  { %1467 = vmatpush.bf16.msrb.mxu0 %v2535_v13  ;;  %v2590_v11 = vld [vmem:[%s3349_s1 + $0x2c8] sm:$0xff]  ;;  %v2620_v13 = vld [vmem:[%s3349_s1 + $0x3b8] sm:$0xff] }
  0x37   :  { %1486 = vmatpush.bf16.msrb.mxu1 %v2543_v14  ;;  %v2565_v14 = vld [vmem:[%s3349_s1 + $0x200] sm:$0xff] }
  0x38   :  { %1505 = vmatpush.bf16.msrb.mxu2 %v2551_v12  ;;  %v2581_v12 = vld [vmem:[%s3349_s1 + $0x280] sm:$0xff] }
  0x39   :  { %1524 = vmatpush.bf16.msrb.mxu3 %v2559_v15  ;;  %v2573_v15 = vld [vmem:[%s3349_s1 + $0x240] sm:$0xff] }
  0x3a   :  { %1468 = vmatpush.bf16.msrb.mxu0 %v2534_v17  ;;  %v1779_v17 = vld [vmem:[%s3350_s0 + $0x20] sm:$0xf] }
  0x3b   :  { %1487 = vmatpush.bf16.msrb.mxu1 %v2542_v18  ;;  %v2478_v18 = vld [vmem:[%s3350_s0 + $0x64] sm:$0xf0] }
  0x3c   :  { %1506 = vmatpush.bf16.msrb.mxu2 %v2550_v16  ;;  %v2589_v16 = vld [vmem:[%s3349_s1 + $0x2c0] sm:$0xff]  ;;  %v1780_v29 = vor.u32 %v2478_v18, %v1779_v17  ;;  %v2472_v18 = vld [vmem:[%s3350_s0 + $0x3c] sm:$0xf] }
  0x3d   :  { %1525 = vmatpush.bf16.msrb.mxu3 %v2558_v19  ;;  %v2604_v19 = vld [vmem:[%s3349_s1 + $0x338] sm:$0xff]  ;;  %v2481_v17 = vld [vmem:[%s3350_s0 + $0x7c] sm:$0xf0] }
  0x3e   :  { %1469 = vmatpush.bf16.msrb.mxu0 %v2533_v21  ;;  %v2469_v21 = vld [vmem:[%s3350_s0 + $0x24] sm:$0xf] }
  0x3f   :  { %1488 = vmatpush.bf16.msrb.mxu1 %v2541_v22  ;;  %v2628_v22 = vld [vmem:[%s3349_s1 + $0x3f8] sm:$0xff]  ;;  %v1784_v31 = vor.u32 %v2469_v21, %v1781_v24  ;;  %v2634_v24 = vld [vmem:[%s3349_s1 + $0x428] sm:$0xff] }
  0x40   :  { %1507 = vmatpush.bf16.msrb.mxu2 %v2549_v20  ;;  %v2612_v20 = vld [vmem:[%s3349_s1 + $0x378] sm:$0xff] }
  0x41   :  { %1526 = vmatpush.bf16.msrb.mxu3 %v2557_v23  ;;  %1470 = vmatmul.bf16.vlgmr.msrb.gmra.mxu0 %v1764_v36  ;;  %v2619_v23 = vld [vmem:[%s3349_s1 + $0x3b0] sm:$0xff]  ;;  %v2618_v36 = vld [vmem:[%s3349_s1 + $0x3a8] sm:$0xff] }
  0x42   :  { %1538 = vmatpush.bf16.msra.mxu0 %v2572_v26  ;;  %1489 = vmatmul.bf16.vlgmr.msrb.gmra.mxu1 %v1768_v38  ;;  %v2479_v26 = vld [vmem:[%s3350_s0 + $0x6c] sm:$0xf0]  ;;  %v2602_v38 = vld [vmem:[%s3349_s1 + $0x328] sm:$0xff] }
  0x43   :  { %1557 = vmatpush.bf16.msra.mxu1 %v2580_v34  ;;  %1508 = vmatmul.bf16.vlgmr.msrb.gmra.mxu2 %v1772_v39  ;;  %v2603_v34 = vld [vmem:[%s3349_s1 + $0x330] sm:$0xff]  ;;  %v2626_v39 = vld [vmem:[%s3349_s1 + $0x3e8] sm:$0xff] }
  0x44   :  { %1576 = vmatpush.bf16.msra.mxu2 %v2588_v25  ;;  %1527 = vmatmul.bf16.vlgmr.msrb.gmra.mxu3 %v1776_v40  ;;  %v1787_v25 = vld [vmem:[%s3350_s0 + $0x28] sm:$0xf]  ;;  %v2617_v40 = vld [vmem:[%s3349_s1 + $0x3a0] sm:$0xff] }
  0x45   :  { %1595 = vmatpush.bf16.msra.mxu3 %v2596_v35  ;;  %v1788_v32 = vor.u32 %v2479_v26, %v1787_v25  ;;  %v2627_v35 = vld [vmem:[%s3349_s1 + $0x3f0] sm:$0xff]  ;;  %v2642_v25 = vld [vmem:[%s3349_s1 + $0x468] sm:$0xff]  ;;  %v2633_v26 = vld [vmem:[%s3349_s1 + $0x420] sm:$0xff] }
  0x46   :  { %1539 = vmatpush.bf16.msra.mxu0 %v2571_v41  ;;  %v2609_v41 = vld [vmem:[%s3349_s1 + $0x360] sm:$0xff] }
  0x47   :  { %1558 = vmatpush.bf16.msra.mxu1 %v2579_v42  ;;  %v2601_v42 = vld [vmem:[%s3349_s1 + $0x320] sm:$0xff] }
  0x48   :  { %1577 = vmatpush.bf16.msra.mxu2 %v2587_v37  ;;  %v2610_v37 = vld [vmem:[%s3349_s1 + $0x368] sm:$0xff] }
  0x49   :  { %1596 = vmatpush.bf16.msra.mxu3 %v2595_v43  ;;  %v2625_v43 = vld [vmem:[%s3349_s1 + $0x3e0] sm:$0xff] }
  0x4a   :  { %1540 = vmatpush.bf16.msra.mxu0 %v2570_v45  ;;  %v1851_v45 = vld [vmem:[%s3350_s0 + $0xb0] sm:$0xf] }
  0x4b   :  { %1559 = vmatpush.bf16.msra.mxu1 %v2578_v46  ;;  %v2496_v46 = vld [vmem:[%s3350_s0 + $0xf4] sm:$0xf0] }
  0x4c   :  { %1578 = vmatpush.bf16.msra.mxu2 %v2586_v44  ;;  %v2616_v44 = vld [vmem:[%s3349_s1 + $0x398] sm:$0xff]  ;;  %v1852_v57 = vor.u32 %v2496_v46, %v1851_v45  ;;  %v2638_v45 = vld [vmem:[%s3349_s1 + $0x448] sm:$0xff]  ;;  %v2629_v46 = vld [vmem:[%s3349_s1 + $0x400] sm:$0xff] }
  0x4d   :  { %1597 = vmatpush.bf16.msra.mxu3 %v2594_v47  ;;  %v2608_v47 = vld [vmem:[%s3349_s1 + $0x358] sm:$0xff] }
  0x4e   :  { %1541 = vmatpush.bf16.msra.mxu0 %v2569_v49  ;;  %v1853_v49 = vld [vmem:[%s3350_s0 + $0xf8] sm:$0xf0] }
  0x4f   :  { %1560 = vmatpush.bf16.msra.mxu1 %v2577_v50  ;;  %v1859_v50 = vld [vmem:[%s3350_s0 + $0xb8] sm:$0xf] }
  0x50   :  { %1579 = vmatpush.bf16.msra.mxu2 %v2585_v48  ;;  %v2487_v48 = vld [vmem:[%s3350_s0 + $0xb4] sm:$0xf] }
  0x51   :  { %1598 = vmatpush.bf16.msra.mxu3 %v2593_v51  ;;  %1475 = vmatmul.bf16.gmra.mxu0 %v1836_v0  ;;  %v2497_v51 = vld [vmem:[%s3350_s0 + $0xfc] sm:$0xf0]  ;;  %v1856_v59 = vor.u32 %v2487_v48, %v1853_v49  ;;  %v2614_v0 = vld [vmem:[%s3349_s1 + $0x388] sm:$0xff] }
  0x52   :  { %1542 = vmatpush.bf16.msra.mxu0 %v2568_v60  ;;  %1494 = vmatmul.bf16.gmra.mxu1 %v1840_v2  ;;  %v1860_v60 = vor.u32 %v2497_v51, %v1859_v50  ;;  %v2598_v2 = vld [vmem:[%s3349_s1 + $0x308] sm:$0xff]  ;;  %v2661_v48 = vld [vmem:[%s3351_s2] ss:$0 sm:$0xff]  ;;  %v1883_v51 = vld [vmem:[%s3350_s0 + $0xd0] sm:$0xf] }
  0x53   :  { %1561 = vmatpush.bf16.msra.mxu1 %v2576_v62  ;;  %1513 = vmatmul.bf16.gmra.mxu2 %v1844_v3  ;;  %v2599_v62 = vld [vmem:[%s3349_s1 + $0x310] sm:$0xff]  ;;  %v2622_v3 = vld [vmem:[%s3349_s1 + $0x3c8] sm:$0xff]  ;;  %v1811_v49 = vld [vmem:[%s3350_s0 + $0x40] sm:$0xf] }
  0x54   :  { %1580 = vmatpush.bf16.msra.mxu2 %v2584_v54  ;;  %1532 = vmatmul.bf16.gmra.mxu3 %v1848_v4  ;;  %v1861_v54 = vld [vmem:[%s3350_s0 + $0x100] sm:$0xf0]  ;;  %v2482_v50 = vld [vmem:[%s3350_s0 + $0x84] sm:$0xf0] }
  0x55   :  { %1599 = vmatpush.bf16.msra.mxu3 %v2592_v63  ;;  %v1864_v61 = vor.u32 %v2488_v52, %v1861_v54  ;;  %v2623_v63 = vld [vmem:[%s3349_s1 + $0x3d0] sm:$0xff]  ;;  %v2613_v4 = vld [vmem:[%s3349_s1 + $0x380] sm:$0xff]  ;;  %v2500_v52 = vld [vmem:[%s3350_s0 + $0x114] sm:$0xf0] }
  0x56   :  { %1543 = vmatpush.bf16.msra.mxu0 %v2567_v5  ;;  %v2605_v5 = vld [vmem:[%s3349_s1 + $0x340] sm:$0xff]  ;;  %v1813_v54 = vld [vmem:[%s3350_s0 + $0x88] sm:$0xf0] }
  0x57   :  { %1562 = vmatpush.bf16.msra.mxu1 %v2575_v6  ;;  %v2636_v6 = vld [vmem:[%s3349_s1 + $0x438] sm:$0xff] }
  0x58   :  { %1581 = vmatpush.bf16.msra.mxu2 %v2583_v1  ;;  %v2606_v1 = vld [vmem:[%s3349_s1 + $0x348] sm:$0xff] }
  0x59   :  { %1600 = vmatpush.bf16.msra.mxu3 %v2591_v7  ;;  %v2644_v7 = vld [vmem:[%s3349_s1 + $0x478] sm:$0xff] }
  0x5a   :  { %1544 = vmatpush.bf16.msra.mxu0 %v2566_v9  ;;  %v2621_v9 = vld [vmem:[%s3349_s1 + $0x3c0] sm:$0xff] }
  0x5b   :  { %1563 = vmatpush.bf16.msra.mxu1 %v2574_v10  ;;  %v1795_v10 = vld [vmem:[%s3350_s0 + $0x30] sm:$0xf] }
  0x5c   :  { %1582 = vmatpush.bf16.msra.mxu2 %v2582_v8  ;;  %v2597_v8 = vld [vmem:[%s3349_s1 + $0x300] sm:$0xff] }
  0x5d   :  { %1601 = vmatpush.bf16.msra.mxu3 %v2590_v11  ;;  %v2635_v11 = vld [vmem:[%s3349_s1 + $0x430] sm:$0xff] }
  0x5e   :  { %1545 = vmatpush.bf16.msra.mxu0 %v2565_v14  ;;  %v2643_v14 = vld [vmem:[%s3349_s1 + $0x470] sm:$0xff] }
  0x5f   :  { %1564 = vmatpush.bf16.msra.mxu1 %v2573_v15  ;;  %v1797_v15 = vld [vmem:[%s3350_s0 + $0x78] sm:$0xf0] }
  0x60   :  { %1583 = vmatpush.bf16.msra.mxu2 %v2581_v12  ;;  %v2480_v12 = vld [vmem:[%s3350_s0 + $0x74] sm:$0xf0] }
  0x61   :  { %1602 = vmatpush.bf16.msra.mxu3 %v2589_v16  ;;  %1546 = vmatmul.bf16.vlgmr.msra.gmra.mxu0 %v1780_v29  ;;  %v1803_v16 = vld [vmem:[%s3350_s0 + $0x38] sm:$0xf] }
  0x62   :  { %1614 = vmatpush.bf16.msrb.mxu0 %v2604_v19  ;;  %1565 = vmatmul.bf16.vlgmr.msra.gmra.mxu1 %v1784_v31  ;;  %v1805_v19 = vld [vmem:[%s3350_s0 + $0x80] sm:$0xf0]  ;;  %v2640_v29 = vld [vmem:[%s3349_s1 + $0x458] sm:$0xff]  ;;  %v2498_v31 = vld [vmem:[%s3350_s0 + $0x104] sm:$0xf0] }
  0x63   :  { %1633 = vmatpush.bf16.msrb.mxu1 %v2612_v20  ;;  %1584 = vmatmul.bf16.vlgmr.msra.gmra.mxu2 %v1788_v32  ;;  %v1796_v20 = vor.u32 %v2480_v12, %v1795_v10  ;;  %v2489_v32 = vld [vmem:[%s3350_s0 + $0xc4] sm:$0xf] }
  0x64   :  { %1652 = vmatpush.bf16.msrb.mxu2 %v2620_v13  ;;  %1603 = vmatmul.bf16.vlgmr.msra.gmra.mxu3 %v1792_v33  ;;  %v2471_v13 = vld [vmem:[%s3350_s0 + $0x34] sm:$0xf]  ;;  %v1869_v33 = vld [vmem:[%s3350_s0 + $0x108] sm:$0xf0] }
  0x65   :  { %1671 = vmatpush.bf16.msrb.mxu3 %v2628_v22  ;;  %v1800_v21 = vor.u32 %v2471_v13, %v1797_v15  ;;  %v1804_v22 = vor.u32 %v2481_v17, %v1803_v16 }
  0x66   :  { %1615 = vmatpush.bf16.msrb.mxu0 %v2603_v34  ;;  %v1875_v34 = vld [vmem:[%s3350_s0 + $0xc8] sm:$0xf] }
  0x67   :  { %1634 = vmatpush.bf16.msrb.mxu1 %v2611_v30  ;;  %v1867_v30 = vld [vmem:[%s3350_s0 + $0xc0] sm:$0xf] }
  0x68   :  { %1653 = vmatpush.bf16.msrb.mxu2 %v2619_v23  ;;  %v1808_v23 = vor.u32 %v2472_v18, %v1805_v19 }
  0x69   :  { %1672 = vmatpush.bf16.msrb.mxu3 %v2627_v35  ;;  %v2499_v35 = vld [vmem:[%s3350_s0 + $0x10c] sm:$0xf0] }
  0x6a   :  { %1616 = vmatpush.bf16.msrb.mxu0 %v2602_v38  ;;  %v1877_v38 = vld [vmem:[%s3350_s0 + $0x110] sm:$0xf0] }
  0x6b   :  { %1635 = vmatpush.bf16.msrb.mxu1 %v2610_v37  ;;  %v2490_v37 = vld [vmem:[%s3350_s0 + $0xcc] sm:$0xf] }
  0x6c   :  { %1654 = vmatpush.bf16.msrb.mxu2 %v2618_v36  ;;  %v2631_v36 = vld [vmem:[%s3349_s1 + $0x410] sm:$0xff] }
  0x6d   :  { %1673 = vmatpush.bf16.msrb.mxu3 %v2626_v39  ;;  %v2639_v39 = vld [vmem:[%s3349_s1 + $0x450] sm:$0xff] }
  0x6e   :  { %1617 = vmatpush.bf16.msrb.mxu0 %v2601_v42  ;;  %v1876_v42 = vor.u32 %v2499_v35, %v1875_v34 }
  0x6f   :  { %1636 = vmatpush.bf16.msrb.mxu1 %v2609_v41  ;;  %v1872_v41 = vor.u32 %v2489_v32, %v1869_v33 }
  0x70   :  { %1655 = vmatpush.bf16.msrb.mxu2 %v2617_v40  ;;  %v1868_v40 = vor.u32 %v2498_v31, %v1867_v30 }
  0x71   :  { %1674 = vmatpush.bf16.msrb.mxu3 %v2625_v43  ;;  %1551 = vmatmul.bf16.gmra.mxu0 %v1852_v57  ;;  %v1880_v43 = vor.u32 %v2490_v37, %v1877_v38  ;;  %v1812_v57 = vor.u32 %v2482_v50, %v1811_v49 }
  0x72   :  { %1618 = vmatpush.bf16.msrb.mxu0 %v2600_v53  ;;  %1570 = vmatmul.bf16.gmra.mxu1 %v1856_v59  ;;  %v2473_v53 = vld [vmem:[%s3350_s0 + $0x44] sm:$0xf] }
  0x73   :  { %1637 = vmatpush.bf16.msrb.mxu1 %v2608_v47  ;;  %1589 = vmatmul.bf16.gmra.mxu2 %v1860_v60  ;;  %v2637_v47 = vld [vmem:[%s3349_s1 + $0x440] sm:$0xff]  ;;  %v1884_v60 = vor.u32 %v2500_v52, %v1883_v51 }
  0x74   :  { %1656 = vmatpush.bf16.msrb.mxu2 %v2616_v44  ;;  %1608 = vmatmul.bf16.gmra.mxu3 %v1864_v61  ;;  %v2630_v44 = vld [vmem:[%s3349_s1 + $0x408] sm:$0xff]  ;;  %v1816_v61 = vor.u32 %v2473_v53, %v1813_v54 }
  0x75   :  { %1675 = vmatpush.bf16.msrb.mxu3 %v2624_v55  ;;  %v2491_v55 = vld [vmem:[%s3350_s0 + $0xd4] sm:$0xf] }
  0x76   :  { %1619 = vmatpush.bf16.msrb.mxu0 %v2599_v62 }
  0x77   :  { %1638 = vmatpush.bf16.msrb.mxu1 %v2607_v58 }
  0x78   :  { %1657 = vmatpush.bf16.msrb.mxu2 %v2615_v56  ;;  %v1885_v56 = vld [vmem:[%s3350_s0 + $0x118] sm:$0xf0] }
  0x79   :  { %1676 = vmatpush.bf16.msrb.mxu3 %v2623_v63  ;;  %v1888_v63 = vor.u32 %v2491_v55, %v1885_v56 }
  0x7a   :  { %1620 = vmatpush.bf16.msrb.mxu0 %v2598_v2 }
  0x7b   :  { %1639 = vmatpush.bf16.msrb.mxu1 %v2606_v1 }
  0x7c   :  { %1658 = vmatpush.bf16.msrb.mxu2 %v2614_v0 }
  0x7d   :  { %1677 = vmatpush.bf16.msrb.mxu3 %v2622_v3 }
  0x7e   :  { %1621 = vmatpush.bf16.msrb.mxu0 %v2597_v8 }
  0x7f   :  { %1640 = vmatpush.bf16.msrb.mxu1 %v2605_v5 }
  0x80   :  { %1659 = vmatpush.bf16.msrb.mxu2 %v2613_v4 }
  0x81   :  { %1678 = vmatpush.bf16.msrb.mxu3 %v2621_v9  ;;  %1622 = vmatmul.bf16.vlgmr.msrb.gmra.mxu0 %v1796_v20 }
  0x82   :  { %1690 = vmatpush.bf16.msra.mxu0 %v2636_v6  ;;  %1641 = vmatmul.bf16.vlgmr.msrb.gmra.mxu1 %v1800_v21 }
  0x83   :  { %1709 = vmatpush.bf16.msra.mxu1 %v2644_v7  ;;  %1660 = vmatmul.bf16.vlgmr.msrb.gmra.mxu2 %v1804_v22 }
  0x84   :  { %2645 = vmatpush.bf16.msra.mxu2 %v2636_v6  ;;  %1679 = vmatmul.bf16.vlgmr.msrb.gmra.mxu3 %v1808_v23 }
  0x85   :  { %2653 = vmatpush.bf16.msra.mxu3 %v2644_v7 }
  0x86   :  { %1691 = vmatpush.bf16.msra.mxu0 %v2635_v11 }
  0x87   :  { %1710 = vmatpush.bf16.msra.mxu1 %v2643_v14 }
  0x88   :  { %2646 = vmatpush.bf16.msra.mxu2 %v2635_v11 }
  0x89   :  { %2654 = vmatpush.bf16.msra.mxu3 %v2643_v14 }
  0x8a   :  { %1692 = vmatpush.bf16.msra.mxu0 %v2634_v24 }
  0x8b   :  { %1711 = vmatpush.bf16.msra.mxu1 %v2642_v25 }
  0x8c   :  { %2647 = vmatpush.bf16.msra.mxu2 %v2634_v24 }
  0x8d   :  { %2655 = vmatpush.bf16.msra.mxu3 %v2642_v25 }
  0x8e   :  { %1693 = vmatpush.bf16.msra.mxu0 %v2633_v26 }
  0x8f   :  { %1712 = vmatpush.bf16.msra.mxu1 %v2641_v27 }
  0x90   :  { %2648 = vmatpush.bf16.msra.mxu2 %v2633_v26 }
  0x91   :  { %2656 = vmatpush.bf16.msra.mxu3 %v2641_v27  ;;  %1627 = vmatmul.bf16.gmra.mxu0 %v1868_v40 }
  0x92   :  { %1694 = vmatpush.bf16.msra.mxu0 %v2632_v28  ;;  %1646 = vmatmul.bf16.gmra.mxu1 %v1872_v41 }
  0x93   :  { %1713 = vmatpush.bf16.msra.mxu1 %v2640_v29  ;;  %1665 = vmatmul.bf16.gmra.mxu2 %v1876_v42 }
  0x94   :  { %2649 = vmatpush.bf16.msra.mxu2 %v2632_v28  ;;  %1684 = vmatmul.bf16.gmra.mxu3 %v1880_v43 }
  0x95   :  { %2657 = vmatpush.bf16.msra.mxu3 %v2640_v29 }
  0x96   :  { %1695 = vmatpush.bf16.msra.mxu0 %v2631_v36 }
  0x97   :  { %1714 = vmatpush.bf16.msra.mxu1 %v2639_v39 }
  0x98   :  { %2650 = vmatpush.bf16.msra.mxu2 %v2631_v36 }
  0x99   :  { %2658 = vmatpush.bf16.msra.mxu3 %v2639_v39 }
  0x9a   :  { %1696 = vmatpush.bf16.msra.mxu0 %v2630_v44 }
  0x9b   :  { %1715 = vmatpush.bf16.msra.mxu1 %v2638_v45 }
  0x9c   :  { %2651 = vmatpush.bf16.msra.mxu2 %v2630_v44 }
  0x9d   :  { %2659 = vmatpush.bf16.msra.mxu3 %v2638_v45 }
  0x9e   :  { %1697 = vmatpush.bf16.msra.mxu0 %v2629_v46  ;;  %v1395_v58 = vpop.f32.mrf.mxu0 }
  0x9f   :  { %1716 = vmatpush.bf16.msra.mxu1 %v2637_v47  ;;  %v1414_v59 = vpop.f32.mrf.mxu1  ;;  %v1396_v62 = vadd.f32 %v2661_v48, %v1395_v58 }
  0xa0   :  { %2652 = vmatpush.bf16.msra.mxu2 %v2629_v46 }
  0xa1   :  { %2660 = vmatpush.bf16.msra.mxu3 %v2637_v47  ;;  %v1415_v0 = vadd.f32 %v1414_v59, %v1396_v62  ;;  %1698 = vmatmul.bf16.vlgmr.msra.gmra.mxu0 %v1812_v57 }
  0xa2   :  { %1717 = vmatmul.bf16.vlgmr.msra.gmra.mxu1 %v1816_v61 }
  0xa3   :  { %1703 = vmatmul.bf16.vlgmr.msra.gmra.mxu2 %v1884_v60 }
  0xa4   :  { %1722 = vmatmul.bf16.vlgmr.msra.gmra.mxu3 %v1888_v63 }
  0xa6   :  { %v1433_v1 = vpop.f32.mrf.mxu2  ;;  %v1397_v4 = vpop.f32.mrf.mxu0 }
  0xa7   :  { %v1452_v2 = vpop.f32.mrf.mxu3  ;;  %v1434_v3 = vadd.f32 %v1433_v1, %v1415_v0  ;;  %v1416_v5 = vpop.f32.mrf.mxu1  ;;  %v1398_v6 = vadd.f32 %v2661_v48, %v1397_v4 }
  0xa9   :  { %v1453_v7 = vadd.f32 %v1452_v2, %v1434_v3  ;;  %v1417_v8 = vadd.f32 %v1416_v5, %v1398_v6 }
  0xae   :  { %v1435_v9 = vpop.f32.mrf.mxu2  ;;  %v1400_v12 = vpop.f32.mrf.mxu0 }
  0xaf   :  { %v1454_v10 = vpop.f32.mrf.mxu3  ;;  %v1436_v11 = vadd.f32 %v1435_v9, %v1417_v8  ;;  %v1419_v13 = vpop.f32.mrf.mxu1  ;;  %v1401_v14 = vadd.f32 %v2661_v48, %v1400_v12 }
  0xb1   :  { %v1455_v15 = vadd.f32 %v1454_v10, %v1436_v11  ;;  %v1420_v16 = vadd.f32 %v1419_v13, %v1401_v14 }
  0xb6   :  { %v1438_v17 = vpop.f32.mrf.mxu2  ;;  %v1402_v20 = vpop.f32.mrf.mxu0 }
  0xb7   :  { %v1457_v18 = vpop.f32.mrf.mxu3  ;;  %v1439_v19 = vadd.f32 %v1438_v17, %v1420_v16  ;;  %v1421_v21 = vpop.f32.mrf.mxu1  ;;  %v1403_v22 = vadd.f32 %v2661_v48, %v1402_v20 }
  0xb9   :  { %v1458_v23 = vadd.f32 %v1457_v18, %v1439_v19  ;;  %v1422_v24 = vadd.f32 %v1421_v21, %v1403_v22 }
  0xbe   :  { %v1440_v25 = vpop.f32.mrf.mxu2  ;;  %v1471_v28 = vpop.f32.mrf.mxu0 }
  0xbf   :  { %v1459_v26 = vpop.f32.mrf.mxu3  ;;  %v1441_v27 = vadd.f32 %v1440_v25, %v1422_v24  ;;  %v1472_v29 = vadd.f32 %v1471_v28, %v1453_v7  ;;  %v1490_v30 = vpop.f32.mrf.mxu1 }
  0xc1   :  { %v1460_v31 = vadd.f32 %v1459_v26, %v1441_v27  ;;  %v1491_v32 = vadd.f32 %v1490_v30, %v1472_v29 }
  0xc6   :  { %v1509_v33 = vpop.f32.mrf.mxu2  ;;  %v1473_v36 = vpop.f32.mrf.mxu0 }
  0xc7   :  { %v1510_v34 = vadd.f32 %v1509_v33, %v1491_v32  ;;  %v1528_v35 = vpop.f32.mrf.mxu3  ;;  %v1474_v37 = vadd.f32 %v1473_v36, %v1455_v15  ;;  %v1492_v38 = vpop.f32.mrf.mxu1 }
  0xc9   :  { %v1529_v39 = vadd.f32 %v1528_v35, %v1510_v34  ;;  %v1493_v40 = vadd.f32 %v1492_v38, %v1474_v37 }
  0xce   :  { %v1511_v41 = vpop.f32.mrf.mxu2  ;;  %v1476_v44 = vpop.f32.mrf.mxu0 }
  0xcf   :  { %v1512_v42 = vadd.f32 %v1511_v41, %v1493_v40  ;;  %v1530_v43 = vpop.f32.mrf.mxu3  ;;  %v1495_v45 = vpop.f32.mrf.mxu1  ;;  %v1477_v7 = vadd.f32 %v1476_v44, %v1458_v23 }
  0xd1   :  { %v1531_v46 = vadd.f32 %v1530_v43, %v1512_v42  ;;  %v1496_v9 = vadd.f32 %v1495_v45, %v1477_v7 }
  0xd6   :  { %v1514_v47 = vpop.f32.mrf.mxu2  ;;  %v1478_v49 = vpop.f32.mrf.mxu0 }
  0xd7   :  { %v1533_v48 = vpop.f32.mrf.mxu3  ;;  %v1497_v50 = vpop.f32.mrf.mxu1  ;;  %v1515_v14 = vadd.f32 %v1514_v47, %v1496_v9  ;;  %v1479_v15 = vadd.f32 %v1478_v49, %v1460_v31 }
  0xd9   :  { %v1534_v17 = vadd.f32 %v1533_v48, %v1515_v14  ;;  %v1498_v20 = vadd.f32 %v1497_v50, %v1479_v15 }
  0xde   :  { %v1516_v51 = vpop.f32.mrf.mxu2  ;;  %v1547_v53 = vpop.f32.mrf.mxu0 }
  0xdf   :  { %v1535_v52 = vpop.f32.mrf.mxu3  ;;  %v1566_v54 = vpop.f32.mrf.mxu1  ;;  %v1548_v12 = vadd.f32 %v1547_v53, %v1529_v39  ;;  %v1517_v27 = vadd.f32 %v1516_v51, %v1498_v20 }
  0xe1   :  { %v1567_v16 = vadd.f32 %v1566_v54, %v1548_v12  ;;  %v1536_v32 = vadd.f32 %v1535_v52, %v1517_v27 }
  0xe6   :  { %v1585_v55 = vpop.f32.mrf.mxu2  ;;  %v1549_v57 = vpop.f32.mrf.mxu0 }
  0xe7   :  { %v1604_v56 = vpop.f32.mrf.mxu3  ;;  %v1568_v58 = vpop.f32.mrf.mxu1  ;;  %v1586_v18 = vadd.f32 %v1585_v55, %v1567_v16  ;;  %v1550_v25 = vadd.f32 %v1549_v57, %v1531_v46 }
  0xe9   :  { %v1605_v23 = vadd.f32 %v1604_v56, %v1586_v18  ;;  %v1569_v29 = vadd.f32 %v1568_v58, %v1550_v25 }
  0xee   :  { %v1587_v59 = vpop.f32.mrf.mxu2  ;;  %v1552_v61 = vpop.f32.mrf.mxu0 }
  0xef   :  { %v1606_v60 = vpop.f32.mrf.mxu3  ;;  %v1571_v62 = vpop.f32.mrf.mxu1  ;;  %v1553_v21 = vadd.f32 %v1552_v61, %v1534_v17  ;;  %v1588_v34 = vadd.f32 %v1587_v59, %v1569_v29 }
  0xf1   :  { %v1572_v28 = vadd.f32 %v1571_v62, %v1553_v21  ;;  %v1607_v41 = vadd.f32 %v1606_v60, %v1588_v34 }
  0xf6   :  { %v1590_v63 = vpop.f32.mrf.mxu2  ;;  %v1554_v1 = vpop.f32.mrf.mxu0 }
  0xf7   :  { %v1609_v0 = vpop.f32.mrf.mxu3  ;;  %v1573_v2 = vpop.f32.mrf.mxu1  ;;  %v1591_v33 = vadd.f32 %v1590_v63, %v1572_v28  ;;  %v1555_v31 = vadd.f32 %v1554_v1, %v1536_v32 }
  0xf9   :  { %v1610_v40 = vadd.f32 %v1609_v0, %v1591_v33  ;;  %v1574_v43 = vadd.f32 %v1573_v2, %v1555_v31 }
  0xfe   :  { %v1592_v3 = vpop.f32.mrf.mxu2  ;;  %v1623_v5 = vpop.f32.mrf.mxu0 }
  0xff   :  { %v1611_v4 = vpop.f32.mrf.mxu3  ;;  %v1642_v6 = vpop.f32.mrf.mxu1  ;;  %v1624_v30 = vadd.f32 %v1623_v5, %v1605_v23  ;;  %v1593_v46 = vadd.f32 %v1592_v3, %v1574_v43 }
 0x101   :  { %v1643_v38 = vadd.f32 %v1642_v6, %v1624_v30  ;;  %v1612_v55 = vadd.f32 %v1611_v4, %v1593_v46 }
 0x106   :  { %v1661_v8 = vpop.f32.mrf.mxu2  ;;  %v1625_v11 = vpop.f32.mrf.mxu0 }
 0x107   :  { %v1680_v10 = vpop.f32.mrf.mxu3  ;;  %v1644_v13 = vpop.f32.mrf.mxu1  ;;  %v1662_v42 = vadd.f32 %v1661_v8, %v1643_v38  ;;  %v1626_v45 = vadd.f32 %v1625_v11, %v1607_v41 }
 0x109   :  { %v1681_v47 = vadd.f32 %v1680_v10, %v1662_v42  ;;  %v1645_v52 = vadd.f32 %v1644_v13, %v1626_v45 }
 0x10e   :  { %v1663_v19 = vpop.f32.mrf.mxu2  ;;  %v1628_v24 = vpop.f32.mrf.mxu0 }
 0x10f   :  { %v1682_v22 = vpop.f32.mrf.mxu3  ;;  %v1647_v26 = vpop.f32.mrf.mxu1  ;;  %v1629_v44 = vadd.f32 %v1628_v24, %v1610_v40  ;;  %v1664_v57 = vadd.f32 %v1663_v19, %v1645_v52 }
 0x111   :  { %v1648_v49 = vadd.f32 %v1647_v26, %v1629_v44  ;;  %v1683_v62 = vadd.f32 %v1682_v22, %v1664_v57 }
 0x116   :  { %v1666_v35 = vpop.f32.mrf.mxu2  ;;  %v1630_v37 = vpop.f32.mrf.mxu0 }
 0x117   :  { %v1685_v36 = vpop.f32.mrf.mxu3  ;;  %v1649_v39 = vpop.f32.mrf.mxu1  ;;  %v1667_v56 = vadd.f32 %v1666_v35, %v1648_v49  ;;  %v1631_v59 = vadd.f32 %v1630_v37, %v1612_v55 }
 0x119   :  { %v1686_v60 = vadd.f32 %v1685_v36, %v1667_v56  ;;  %v1650_v1 = vadd.f32 %v1649_v39, %v1631_v59 }
 0x11e   :  { %v1668_v48 = vpop.f32.mrf.mxu2  ;;  %v1699_v51 = vpop.f32.mrf.mxu0 }
 0x11f   :  { %v1687_v50 = vpop.f32.mrf.mxu3  ;;  %v1700_v53 = vadd.f32 %v1699_v51, %v1681_v47  ;;  %v1718_v54 = vpop.f32.mrf.mxu1  ;;  %v1669_v6 = vadd.f32 %v1668_v48, %v1650_v1 }
 0x121   :  { %v1719_v58 = vadd.f32 %v1718_v54, %v1700_v53  ;;  %v1688_v12 = vadd.f32 %v1687_v50, %v1669_v6 }
 0x123   :  { %v1728_v61 = vmax.f32 %v1719_v58, 0.0 }
 0x125   :  { %v1732_v63 = vpack.c.bf16 %v1728_v61, %v1728_v61 }
 0x126   :  { %v1704_v0 = vpop.f32.mrf.mxu2  ;;  %v1701_v5 = vpop.f32.mrf.mxu0 }
 0x127   :  { %v1705_v2 = vadd.f32 %v1704_v0, %v1686_v60  ;;  %v1723_v3 = vpop.f32.mrf.mxu3  ;;  %1737 = vst.msk [vmem:[%s3352_s3] sm:$0xf] %vm1736_vm0, %v1732_v63  ;;  %v1702_v4 = vadd.f32 %v1701_v5, %v1683_v62  ;;  %v1720_v8 = vpop.f32.mrf.mxu1 }
 0x129   :  { %v1724_v7 = vadd.f32 %v1723_v3, %v1705_v2  ;;  %v1721_v9 = vadd.f32 %v1720_v8, %v1702_v4 }
 0x12b   :  { %v1730_v10 = vmax.f32 %v1724_v7, 0.0  ;;  %v1729_v11 = vmax.f32 %v1721_v9, 0.0 }
 0x12d   :  { %v1734_v13 = vpack.c.bf16 %v1730_v10, %v1730_v10  ;;  %v1733_v14 = vpack.c.bf16 %v1729_v11, %v1729_v11 }
 0x12e   :  { %v1706_v15 = vpop.f32.mrf.mxu2 }
 0x12f   :  { %1739 = vst.msk [vmem:[%s3352_s3 + $0x8] sm:$0xf] %vm1736_vm0, %v1734_v13  ;;  %v1707_v16 = vadd.f32 %v1706_v15, %v1688_v12  ;;  %v1725_v17 = vpop.f32.mrf.mxu3 }
 0x130   :  { %1738 = vst.msk [vmem:[%s3352_s3 + $0x4] sm:$0xf] %vm1736_vm0, %v1733_v14 }
 0x131   :  { %v1726_v18 = vadd.f32 %v1725_v17, %v1707_v16 }
 0x133   :  { %v1731_v19 = vmax.f32 %v1726_v18, 0.0 }
 0x135   :  { %v1735_v20 = vpack.c.bf16 %v1731_v19, %v1731_v19 }
 0x137   :  { %1740 = vst.msk [vmem:[%s3352_s3 + $0xc] sm:$0xf] %vm1736_vm0, %v1735_v20 }

// kernel: _lambda_.76
= control target key start
LH: loop header
LB: loop body
LE: loop exit
PB: predicated region body
PF: predicated region fallthrough
CT: control target
= control target key end

     0   :  { %vm65_vm0 = vcmask 523264   ;;  %vm95_vm1 = vcmask 257024   ;;  %s194_s1 = inlined_call_operand.vmem [shape: bf16[64,32], index: 1, kind: input, shape index: {}]   ;;  %s195_s2 = inlined_call_operand.vmem [shape: f32[1,32], index: 2, kind: input, shape index: {}]   ;;  %s196_s0 = inlined_call_operand.vmem [shape: bf16[32,64], index: 0, kind: input, shape index: {}]   ;;  %s197_s3 = inlined_call_operand.vmem [shape: bf16[32,32], index: 3, kind: output, shape index: {}]  }
   0x1   :  { %v135_v0 = vld [vmem:[%s194_s1 + $0x18] sm:$0xff]  ;;  %v134_v1 = vld [vmem:[%s194_s1 + $0x10] sm:$0xff]  ;;  %v133_v2 = vld [vmem:[%s194_s1 + $0x8] sm:$0xff] }
   0x2   :  { %76 = vmatpush.bf16.msra.mxu0 %v135_v0  ;;  %136 = vmatpush.bf16.msra.mxu1 %v135_v0  ;;  %v132_v3 = vld [vmem:[%s194_s1] sm:$0xff]  ;;  %v131_v5 = vld [vmem:[%s196_s0 + $0x8] sm:$0xff] }
   0x3   :  { %v130_v4 = vld [vmem:[%s196_s0] sm:$0xff] }
   0x4   :  { %v140_v6 = vld [vmem:[%s195_s2] ss:$0 sm:$0xff] }
   0x6   :  { %77 = vmatpush.bf16.msra.mxu0 %v134_v1  ;;  %137 = vmatpush.bf16.msra.mxu1 %v134_v1 }
   0xa   :  { %78 = vmatpush.bf16.msra.mxu0 %v133_v2  ;;  %138 = vmatpush.bf16.msra.mxu1 %v133_v2 }
   0xe   :  { %79 = vmatpush.bf16.msra.mxu0 %v132_v3  ;;  %139 = vmatpush.bf16.msra.mxu1 %v132_v3 }
  0x11   :  { %128 = vmatmul.msk.bf16.vlgmr.msra.gmra.mxu0 %vm65_vm0, %v130_v4  ;;  %129 = vmatmul.msk.bf16.vlgmr.msra.gmra.mxu1 %vm65_vm0, %v131_v5 }
  0x8e   :  { %v81_v7 = vpop.f32.mrf.mxu0  ;;  %v86_v8 = vpop.f32.mrf.mxu1 }
  0x8f   :  { %v82_v9 = vadd.f32 %v140_v6, %v81_v7  ;;  %v87_v10 = vadd.f32 %v140_v6, %v86_v8 }
  0x91   :  { %v91_v11 = vpack.c.bf16 %v82_v9, %v82_v9  ;;  %v93_v12 = vpack.c.bf16 %v87_v10, %v87_v10 }
  0x93   :  { %96 = vst.msk [vmem:[%s197_s3] sm:$0xf] %vm95_vm1, %v91_v11 }
  0x94   :  { %98 = vst.msk [vmem:[%s197_s3 + $0x8] sm:$0xf] %vm95_vm1, %v93_v12 }
  0x96   :  { %v83_v13 = vpop.f32.mrf.mxu0  ;;  %v88_v14 = vpop.f32.mrf.mxu1 }
  0x97   :  { %v84_v15 = vadd.f32 %v140_v6, %v83_v13  ;;  %v89_v16 = vadd.f32 %v140_v6, %v88_v14 }
  0x99   :  { %v92_v17 = vpack.c.bf16 %v84_v15, %v84_v15  ;;  %v94_v18 = vpack.c.bf16 %v89_v16, %v89_v16 }
  0x9b   :  { %97 = vst.msk [vmem:[%s197_s3 + $0x4] sm:$0xf] %vm95_vm1, %v92_v17 }
  0x9c   :  { %99 = vst.msk [vmem:[%s197_s3 + $0xc] sm:$0xf] %vm95_vm1, %v94_v18 }

// kernel: _lambda_.63
= control target key start
LH: loop header
LB: loop body
LE: loop exit
PB: predicated region body
PF: predicated region fallthrough
CT: control target
= control target key end

     0   :  { %vm123_vm0 = vcmask 257024   ;;  %s349_s0 = inlined_call_operand.vmem [shape: bf16[128,32], index: 0, kind: input, shape index: {}]   ;;  %s350_s1 = inlined_call_operand.vmem [shape: bf16[128,32], index: 1, kind: input, shape index: {}]   ;;  %s351_s2 = inlined_call_operand.vmem [shape: bf16[128,32], index: 2, kind: output, shape index: {}]  }
   0x1   :  { %v145_v0 = vld [vmem:[%s349_s0] sm:$0xff]   ;;  %v208_v2 = vld [vmem:[%s349_s0 + $0x8] sm:$0xff]   ;;  %v209_v8 = vld [vmem:[%s349_s0 + $0x10] sm:$0xff]  }
   0x2   :  { %v177_v1 = vld [vmem:[%s350_s1] sm:$0xff]   ;;  %v146_v3 = vunpack.c.l.bf16 %v145_v0  ;;  %v147_v5 = vunpack.c.h.bf16 %v145_v0  ;;  %v215_v7 = vld [vmem:[%s350_s1 + $0x8] sm:$0xff]   ;;  %v216_v9 = vld [vmem:[%s350_s1 + $0x10] sm:$0xff]   ;;  %v150_v10 = vunpack.c.l.bf16 %v208_v2  ;;  %v151_v12 = vunpack.c.h.bf16 %v208_v2 }
   0x3   :  { %v178_v4 = vunpack.c.l.bf16 %v177_v1  ;;  %v179_v6 = vunpack.c.h.bf16 %v177_v1  ;;  %v182_v11 = vunpack.c.l.bf16 %v215_v7  ;;  %v183_v13 = vunpack.c.h.bf16 %v215_v7  ;;  %v210_v14 = vld [vmem:[%s349_s0 + $0x18] sm:$0xff]   ;;  %v211_v32 = vld [vmem:[%s349_s0 + $0x20] sm:$0xff]   ;;  %v212_v42 = vld [vmem:[%s349_s0 + $0x28] sm:$0xff]  }
   0x4   :  { %v154_v17 = vunpack.c.l.bf16 %v209_v8  ;;  %v186_v18 = vunpack.c.l.bf16 %v216_v9  ;;  %v217_v19 = vld [vmem:[%s350_s1 + $0x18] sm:$0xff]   ;;  %v155_v22 = vunpack.c.h.bf16 %v209_v8  ;;  %v187_v23 = vunpack.c.h.bf16 %v216_v9  ;;  %v218_v33 = vld [vmem:[%s350_s1 + $0x20] sm:$0xff]   ;;  %v219_v43 = vld [vmem:[%s350_s1 + $0x28] sm:$0xff]  }
   0x5   :  { %v75_v15 = vadd.f32 %v178_v4, %v146_v3  ;;  %v76_v16 = vadd.f32 %v179_v6, %v147_v5  ;;  %v77_v20 = vadd.f32 %v182_v11, %v150_v10  ;;  %v78_v21 = vadd.f32 %v183_v13, %v151_v12  ;;  %v213_v52 = vld [vmem:[%s349_s0 + $0x30] sm:$0xff]   ;;  %v214_v2 = vld [vmem:[%s349_s0 + $0x38] sm:$0xff]  }
   0x6   :  { %v79_v26 = vadd.f32 %v186_v18, %v154_v17  ;;  %v158_v27 = vunpack.c.l.bf16 %v210_v14  ;;  %v80_v30 = vadd.f32 %v187_v23, %v155_v22  ;;  %v190_v31 = vunpack.c.l.bf16 %v217_v19  ;;  %v220_v57 = vld [vmem:[%s350_s1 + $0x30] sm:$0xff]   ;;  %v221_v7 = vld [vmem:[%s350_s1 + $0x38] sm:$0xff]  }
   0x7   :  { %v91_v24 = vmax.f32 %v75_v15, 0.0  ;;  %v92_v25 = vmax.f32 %v76_v16, 0.0  ;;  %v93_v28 = vmax.f32 %v77_v20, 0.0  ;;  %v94_v29 = vmax.f32 %v78_v21, 0.0 }
   0x8   :  { %v95_v36 = vmax.f32 %v79_v26, 0.0  ;;  %v159_v37 = vunpack.c.h.bf16 %v210_v14  ;;  %v96_v40 = vmax.f32 %v80_v30, 0.0  ;;  %v81_v41 = vadd.f32 %v190_v31, %v158_v27 }
   0x9   :  { %v107_v34 = vpack.c.bf16 %v91_v24, %v91_v24  ;;  %v108_v35 = vpack.c.bf16 %v92_v25, %v92_v25  ;;  %v109_v38 = vpack.c.bf16 %v93_v28, %v93_v28  ;;  %v110_v39 = vpack.c.bf16 %v94_v29, %v94_v29 }
   0xa   :  { %v111_v44 = vpack.c.bf16 %v95_v36, %v95_v36  ;;  %v191_v45 = vunpack.c.h.bf16 %v217_v19  ;;  %v162_v46 = vunpack.c.l.bf16 %v211_v32  ;;  %v194_v47 = vunpack.c.l.bf16 %v218_v33 }
   0xb   :  { %124 = vst.msk [vmem:[%s351_s2] sm:$0xf] %vm123_vm0, %v107_v34  ;;  %v112_v48 = vpack.c.bf16 %v96_v40, %v96_v40  ;;  %v97_v49 = vmax.f32 %v81_v41, 0.0  ;;  %v163_v50 = vunpack.c.h.bf16 %v211_v32  ;;  %v195_v51 = vunpack.c.h.bf16 %v218_v33 }
   0xc   :  { %125 = vst.msk [vmem:[%s351_s2 + $0x4] sm:$0xf] %vm123_vm0, %v108_v35  ;;  %v82_v53 = vadd.f32 %v191_v45, %v159_v37  ;;  %v83_v54 = vadd.f32 %v194_v47, %v162_v46  ;;  %v166_v55 = vunpack.c.l.bf16 %v212_v42  ;;  %v198_v56 = vunpack.c.l.bf16 %v219_v43 }
   0xd   :  { %126 = vst.msk [vmem:[%s351_s2 + $0x8] sm:$0xf] %vm123_vm0, %v109_v38  ;;  %v113_v58 = vpack.c.bf16 %v97_v49, %v97_v49  ;;  %v84_v59 = vadd.f32 %v195_v51, %v163_v50  ;;  %v167_v60 = vunpack.c.h.bf16 %v212_v42  ;;  %v199_v61 = vunpack.c.h.bf16 %v219_v43 }
   0xe   :  { %127 = vst.msk [vmem:[%s351_s2 + $0xc] sm:$0xf] %vm123_vm0, %v110_v39  ;;  %v98_v62 = vmax.f32 %v82_v53, 0.0  ;;  %v99_v63 = vmax.f32 %v83_v54, 0.0  ;;  %v85_v0 = vadd.f32 %v198_v56, %v166_v55  ;;  %v170_v1 = vunpack.c.l.bf16 %v213_v52 }
   0xf   :  { %128 = vst.msk [vmem:[%s351_s2 + $0x10] sm:$0xf] %vm123_vm0, %v111_v44  ;;  %v100_v3 = vmax.f32 %v84_v59, 0.0  ;;  %v86_v4 = vadd.f32 %v199_v61, %v167_v60  ;;  %v202_v5 = vunpack.c.l.bf16 %v220_v57  ;;  %v171_v6 = vunpack.c.h.bf16 %v213_v52 }
  0x10   :  { %129 = vst.msk [vmem:[%s351_s2 + $0x14] sm:$0xf] %vm123_vm0, %v112_v48  ;;  %v114_v8 = vpack.c.bf16 %v98_v62, %v98_v62  ;;  %v115_v9 = vpack.c.bf16 %v99_v63, %v99_v63  ;;  %v101_v10 = vmax.f32 %v85_v0, 0.0  ;;  %v203_v11 = vunpack.c.h.bf16 %v220_v57 }
  0x11   :  { %130 = vst.msk [vmem:[%s351_s2 + $0x18] sm:$0xf] %vm123_vm0, %v113_v58  ;;  %v116_v12 = vpack.c.bf16 %v100_v3, %v100_v3  ;;  %v102_v13 = vmax.f32 %v86_v4, 0.0  ;;  %v87_v14 = vadd.f32 %v202_v5, %v170_v1  ;;  %v174_v15 = vunpack.c.l.bf16 %v214_v2 }
  0x12   :  { %131 = vst.msk [vmem:[%s351_s2 + $0x1c] sm:$0xf] %vm123_vm0, %v114_v8  ;;  %v117_v16 = vpack.c.bf16 %v101_v10, %v101_v10  ;;  %v88_v17 = vadd.f32 %v203_v11, %v171_v6  ;;  %v206_v18 = vunpack.c.l.bf16 %v221_v7  ;;  %v175_v19 = vunpack.c.h.bf16 %v214_v2 }
  0x13   :  { %132 = vst.msk [vmem:[%s351_s2 + $0x20] sm:$0xf] %vm123_vm0, %v115_v9  ;;  %v118_v20 = vpack.c.bf16 %v102_v13, %v102_v13  ;;  %v103_v21 = vmax.f32 %v87_v14, 0.0  ;;  %v207_v22 = vunpack.c.h.bf16 %v221_v7 }
  0x14   :  { %133 = vst.msk [vmem:[%s351_s2 + $0x24] sm:$0xf] %vm123_vm0, %v116_v12  ;;  %v104_v23 = vmax.f32 %v88_v17, 0.0  ;;  %v89_v24 = vadd.f32 %v206_v18, %v174_v15 }
  0x15   :  { %134 = vst.msk [vmem:[%s351_s2 + $0x28] sm:$0xf] %vm123_vm0, %v117_v16  ;;  %v119_v25 = vpack.c.bf16 %v103_v21, %v103_v21  ;;  %v90_v26 = vadd.f32 %v207_v22, %v175_v19 }
  0x16   :  { %135 = vst.msk [vmem:[%s351_s2 + $0x2c] sm:$0xf] %vm123_vm0, %v118_v20  ;;  %v120_v27 = vpack.c.bf16 %v104_v23, %v104_v23  ;;  %v105_v28 = vmax.f32 %v89_v24, 0.0 }
  0x17   :  { %136 = vst.msk [vmem:[%s351_s2 + $0x30] sm:$0xf] %vm123_vm0, %v119_v25  ;;  %v106_v29 = vmax.f32 %v90_v26, 0.0 }
  0x18   :  { %137 = vst.msk [vmem:[%s351_s2 + $0x34] sm:$0xf] %vm123_vm0, %v120_v27  ;;  %v121_v30 = vpack.c.bf16 %v105_v28, %v105_v28 }
  0x19   :  { %v122_v31 = vpack.c.bf16 %v106_v29, %v106_v29 }
  0x1a   :  { %138 = vst.msk [vmem:[%s351_s2 + $0x38] sm:$0xf] %vm123_vm0, %v121_v30 }
  0x1b   :  { %139 = vst.msk [vmem:[%s351_s2 + $0x3c] sm:$0xf] %vm123_vm0, %v122_v31 }

// kernel: _lambda_.65
= control target key start
LH: loop header
LB: loop body
LE: loop exit
PB: predicated region body
PF: predicated region fallthrough
CT: control target
= control target key end

     0   :  { %vm91_vm0 = vcmask 261120   ;;  %vm197_vm1 = vcmask 257024   ;;  %s426_s1 = inlined_call_operand.vmem [shape: bf16[32,32], index: 1, kind: input, shape index: {}]   ;;  %s427_s0 = inlined_call_operand.vmem [shape: bf16[128,32], index: 0, kind: input, shape index: {}]   ;;  %s428_s2 = inlined_call_operand.vmem [shape: f32[1,32], index: 2, kind: input, shape index: {}]   ;;  %s429_s3 = inlined_call_operand.vmem [shape: bf16[128,32], index: 3, kind: output, shape index: {}]  }
   0x1   :  { %v275_v0 = vld [vmem:[%s426_s1 + $0x8] sm:$0xff]  ;;  %v274_v1 = vld [vmem:[%s426_s1] sm:$0xff]  ;;  %v268_v3 = vld [vmem:[%s427_s0 + $0x10] sm:$0xff] }
   0x2   :  { %122 = vmatpush.bf16.msra.mxu0 %v275_v0  ;;  %276 = vmatpush.bf16.msra.mxu1 %v275_v0  ;;  %v266_v2 = vld [vmem:[%s427_s0] sm:$0xff]  ;;  %v272_v5 = vld [vmem:[%s427_s0 + $0x30] sm:$0xff]  ;;  %v267_v6 = vld [vmem:[%s427_s0 + $0x8] sm:$0xff] }
   0x3   :  { %277 = vmatpush.bf16.msra.mxu2 %v275_v0  ;;  %278 = vmatpush.bf16.msra.mxu3 %v275_v0  ;;  %v270_v4 = vld [vmem:[%s427_s0 + $0x20] sm:$0xff]  ;;  %v269_v7 = vld [vmem:[%s427_s0 + $0x18] sm:$0xff]  ;;  %v271_v8 = vld [vmem:[%s427_s0 + $0x28] sm:$0xff] }
   0x4   :  { %v273_v9 = vld [vmem:[%s427_s0 + $0x38] sm:$0xff]  ;;  %v344_v10 = vld [vmem:[%s428_s2] ss:$0 sm:$0xff] }
   0x6   :  { %123 = vmatpush.bf16.msra.mxu0 %v274_v1  ;;  %279 = vmatpush.bf16.msra.mxu1 %v274_v1 }
   0x7   :  { %280 = vmatpush.bf16.msra.mxu2 %v274_v1  ;;  %281 = vmatpush.bf16.msra.mxu3 %v274_v1 }
   0x9   :  { %258 = vmatmul.msk.bf16.vlgmr.msra.gmra.mxu0 %vm91_vm0, %v266_v2  ;;  %260 = vmatmul.msk.bf16.vlgmr.msra.gmra.mxu1 %vm91_vm0, %v268_v3 }
   0xa   :  { %262 = vmatmul.msk.bf16.vlgmr.msra.gmra.mxu2 %vm91_vm0, %v270_v4  ;;  %264 = vmatmul.msk.bf16.vlgmr.msra.gmra.mxu3 %vm91_vm0, %v272_v5 }
  0x19   :  { %259 = vmatmul.msk.bf16.gmra.mxu0 %vm91_vm0, %v267_v6  ;;  %261 = vmatmul.msk.bf16.gmra.mxu1 %vm91_vm0, %v269_v7 }
  0x1a   :  { %263 = vmatmul.msk.bf16.gmra.mxu2 %vm91_vm0, %v271_v8  ;;  %265 = vmatmul.msk.bf16.gmra.mxu3 %vm91_vm0, %v273_v9 }
  0x86   :  { %v125_v11 = vpop.f32.mrf.mxu0  ;;  %v135_v12 = vpop.f32.mrf.mxu1 }
  0x87   :  { %v126_v13 = vadd.f32 %v344_v10, %v125_v11  ;;  %v136_v14 = vadd.f32 %v344_v10, %v135_v12 }
  0x89   :  { %v165_v15 = vmax.f32 %v126_v13, 0.0  ;;  %v169_v16 = vmax.f32 %v136_v14, 0.0 }
  0x8b   :  { %v181_v17 = vpack.c.bf16 %v165_v15, %v165_v15  ;;  %v185_v18 = vpack.c.bf16 %v169_v16, %v169_v16 }
  0x8d   :  { %198 = vst.msk [vmem:[%s429_s3] sm:$0xf] %vm197_vm1, %v181_v17  ;;  %v145_v19 = vpop.f32.mrf.mxu2  ;;  %v155_v20 = vpop.f32.mrf.mxu3 }
  0x8e   :  { %202 = vst.msk [vmem:[%s429_s3 + $0x10] sm:$0xf] %vm197_vm1, %v185_v18  ;;  %v146_v21 = vadd.f32 %v344_v10, %v145_v19  ;;  %v156_v22 = vadd.f32 %v344_v10, %v155_v20  ;;  %v127_v23 = vpop.f32.mrf.mxu0  ;;  %v137_v24 = vpop.f32.mrf.mxu1 }
  0x8f   :  { %v128_v25 = vadd.f32 %v344_v10, %v127_v23  ;;  %v138_v26 = vadd.f32 %v344_v10, %v137_v24 }
  0x90   :  { %v173_v27 = vmax.f32 %v146_v21, 0.0  ;;  %v177_v28 = vmax.f32 %v156_v22, 0.0 }
  0x91   :  { %v166_v29 = vmax.f32 %v128_v25, 0.0  ;;  %v170_v30 = vmax.f32 %v138_v26, 0.0 }
  0x92   :  { %v189_v31 = vpack.c.bf16 %v173_v27, %v173_v27  ;;  %v193_v32 = vpack.c.bf16 %v177_v28, %v177_v28 }
  0x93   :  { %v182_v33 = vpack.c.bf16 %v166_v29, %v166_v29  ;;  %v186_v34 = vpack.c.bf16 %v170_v30, %v170_v30 }
  0x94   :  { %206 = vst.msk [vmem:[%s429_s3 + $0x20] sm:$0xf] %vm197_vm1, %v189_v31 }
  0x95   :  { %210 = vst.msk [vmem:[%s429_s3 + $0x30] sm:$0xf] %vm197_vm1, %v193_v32  ;;  %v147_v35 = vpop.f32.mrf.mxu2  ;;  %v157_v36 = vpop.f32.mrf.mxu3 }
  0x96   :  { %199 = vst.msk [vmem:[%s429_s3 + $0x4] sm:$0xf] %vm197_vm1, %v182_v33  ;;  %v148_v37 = vadd.f32 %v344_v10, %v147_v35  ;;  %v158_v38 = vadd.f32 %v344_v10, %v157_v36  ;;  %v130_v39 = vpop.f32.mrf.mxu0  ;;  %v140_v40 = vpop.f32.mrf.mxu1 }
  0x97   :  { %203 = vst.msk [vmem:[%s429_s3 + $0x14] sm:$0xf] %vm197_vm1, %v186_v34  ;;  %v131_v41 = vadd.f32 %v344_v10, %v130_v39  ;;  %v141_v42 = vadd.f32 %v344_v10, %v140_v40 }
  0x98   :  { %v174_v43 = vmax.f32 %v148_v37, 0.0  ;;  %v178_v44 = vmax.f32 %v158_v38, 0.0 }
  0x99   :  { %v167_v45 = vmax.f32 %v131_v41, 0.0  ;;  %v171_v46 = vmax.f32 %v141_v42, 0.0 }
  0x9a   :  { %v190_v47 = vpack.c.bf16 %v174_v43, %v174_v43  ;;  %v194_v48 = vpack.c.bf16 %v178_v44, %v178_v44 }
  0x9b   :  { %v183_v49 = vpack.c.bf16 %v167_v45, %v167_v45  ;;  %v187_v50 = vpack.c.bf16 %v171_v46, %v171_v46 }
  0x9c   :  { %207 = vst.msk [vmem:[%s429_s3 + $0x24] sm:$0xf] %vm197_vm1, %v190_v47 }
  0x9d   :  { %211 = vst.msk [vmem:[%s429_s3 + $0x34] sm:$0xf] %vm197_vm1, %v194_v48  ;;  %v150_v51 = vpop.f32.mrf.mxu2  ;;  %v160_v52 = vpop.f32.mrf.mxu3 }
  0x9e   :  { %200 = vst.msk [vmem:[%s429_s3 + $0x8] sm:$0xf] %vm197_vm1, %v183_v49  ;;  %v151_v53 = vadd.f32 %v344_v10, %v150_v51  ;;  %v161_v54 = vadd.f32 %v344_v10, %v160_v52  ;;  %v132_v55 = vpop.f32.mrf.mxu0  ;;  %v142_v56 = vpop.f32.mrf.mxu1 }
  0x9f   :  { %204 = vst.msk [vmem:[%s429_s3 + $0x18] sm:$0xf] %vm197_vm1, %v187_v50  ;;  %v133_v57 = vadd.f32 %v344_v10, %v132_v55  ;;  %v143_v58 = vadd.f32 %v344_v10, %v142_v56 }
  0xa0   :  { %v175_v59 = vmax.f32 %v151_v53, 0.0  ;;  %v179_v60 = vmax.f32 %v161_v54, 0.0 }
  0xa1   :  { %v168_v61 = vmax.f32 %v133_v57, 0.0  ;;  %v172_v62 = vmax.f32 %v143_v58, 0.0 }
  0xa2   :  { %v191_v63 = vpack.c.bf16 %v175_v59, %v175_v59  ;;  %v195_v0 = vpack.c.bf16 %v179_v60, %v179_v60 }
  0xa3   :  { %v184_v1 = vpack.c.bf16 %v168_v61, %v168_v61  ;;  %v188_v2 = vpack.c.bf16 %v172_v62, %v172_v62 }
  0xa4   :  { %208 = vst.msk [vmem:[%s429_s3 + $0x28] sm:$0xf] %vm197_vm1, %v191_v63 }
  0xa5   :  { %212 = vst.msk [vmem:[%s429_s3 + $0x38] sm:$0xf] %vm197_vm1, %v195_v0  ;;  %v152_v3 = vpop.f32.mrf.mxu2  ;;  %v162_v4 = vpop.f32.mrf.mxu3 }
  0xa6   :  { %201 = vst.msk [vmem:[%s429_s3 + $0xc] sm:$0xf] %vm197_vm1, %v184_v1  ;;  %v153_v5 = vadd.f32 %v344_v10, %v152_v3  ;;  %v163_v6 = vadd.f32 %v344_v10, %v162_v4 }
  0xa7   :  { %205 = vst.msk [vmem:[%s429_s3 + $0x1c] sm:$0xf] %vm197_vm1, %v188_v2 }
  0xa8   :  { %v176_v7 = vmax.f32 %v153_v5, 0.0  ;;  %v180_v8 = vmax.f32 %v163_v6, 0.0 }
  0xaa   :  { %v192_v9 = vpack.c.bf16 %v176_v7, %v176_v7  ;;  %v196_v11 = vpack.c.bf16 %v180_v8, %v180_v8 }
  0xac   :  { %209 = vst.msk [vmem:[%s429_s3 + $0x2c] sm:$0xf] %vm197_vm1, %v192_v9 }
  0xad   :  { %213 = vst.msk [vmem:[%s429_s3 + $0x3c] sm:$0xf] %vm197_vm1, %v196_v11 }

// kernel: _lambda_.68
= control target key start
LH: loop header
LB: loop body
LE: loop exit
PB: predicated region body
PF: predicated region fallthrough
CT: control target
= control target key end

     0   :  { %vm91_vm0 = vcmask 261120   ;;  %vm181_vm1 = vcmask 27648   ;;  %s392_s1 = inlined_call_operand.vmem [shape: bf16[32,4], index: 1, kind: input, shape index: {}]   ;;  %s393_s0 = inlined_call_operand.vmem [shape: bf16[128,32], index: 0, kind: input, shape index: {}]   ;;  %s394_s2 = inlined_call_operand.vmem [shape: f32[1,4], index: 2, kind: input, shape index: {}]   ;;  %s395_s3 = inlined_call_operand.vmem [shape: bf16[128,4], index: 3, kind: output, shape index: {}]  }
   0x1   :  { %v259_v0 = vld [vmem:[%s392_s1 + $0x8] sm:$0xff]  ;;  %v258_v1 = vld [vmem:[%s392_s1] sm:$0xff]  ;;  %v252_v3 = vld [vmem:[%s393_s0 + $0x10] sm:$0xff] }
   0x2   :  { %122 = vmatpush.bf16.msra.mxu0 %v259_v0  ;;  %260 = vmatpush.bf16.msra.mxu1 %v259_v0  ;;  %v250_v2 = vld [vmem:[%s393_s0] sm:$0xff]  ;;  %v256_v5 = vld [vmem:[%s393_s0 + $0x30] sm:$0xff]  ;;  %v251_v6 = vld [vmem:[%s393_s0 + $0x8] sm:$0xff] }
   0x3   :  { %261 = vmatpush.bf16.msra.mxu2 %v259_v0  ;;  %262 = vmatpush.bf16.msra.mxu3 %v259_v0  ;;  %v254_v4 = vld [vmem:[%s393_s0 + $0x20] sm:$0xff]  ;;  %v253_v7 = vld [vmem:[%s393_s0 + $0x18] sm:$0xff]  ;;  %v255_v8 = vld [vmem:[%s393_s0 + $0x28] sm:$0xff] }
   0x4   :  { %v257_v9 = vld [vmem:[%s393_s0 + $0x38] sm:$0xff]  ;;  %v266_v10 = vld [vmem:[%s394_s2] ss:$0 sm:$0xff] }
   0x6   :  { %123 = vmatpush.bf16.msra.mxu0 %v258_v1  ;;  %263 = vmatpush.bf16.msra.mxu1 %v258_v1 }
   0x7   :  { %264 = vmatpush.bf16.msra.mxu2 %v258_v1  ;;  %265 = vmatpush.bf16.msra.mxu3 %v258_v1 }
   0x9   :  { %242 = vmatmul.msk.bf16.vlgmr.msra.gmra.mxu0 %vm91_vm0, %v250_v2  ;;  %244 = vmatmul.msk.bf16.vlgmr.msra.gmra.mxu1 %vm91_vm0, %v252_v3 }
   0xa   :  { %246 = vmatmul.msk.bf16.vlgmr.msra.gmra.mxu2 %vm91_vm0, %v254_v4  ;;  %248 = vmatmul.msk.bf16.vlgmr.msra.gmra.mxu3 %vm91_vm0, %v256_v5 }
  0x19   :  { %243 = vmatmul.msk.bf16.gmra.mxu0 %vm91_vm0, %v251_v6  ;;  %245 = vmatmul.msk.bf16.gmra.mxu1 %vm91_vm0, %v253_v7 }
  0x1a   :  { %247 = vmatmul.msk.bf16.gmra.mxu2 %vm91_vm0, %v255_v8  ;;  %249 = vmatmul.msk.bf16.gmra.mxu3 %vm91_vm0, %v257_v9 }
  0x86   :  { %v125_v11 = vpop.f32.mrf.mxu0  ;;  %v135_v12 = vpop.f32.mrf.mxu1 }
  0x87   :  { %v126_v13 = vadd.f32 %v266_v10, %v125_v11  ;;  %v136_v14 = vadd.f32 %v266_v10, %v135_v12 }
  0x89   :  { %v165_v15 = vpack.c.bf16 %v126_v13, %v126_v13  ;;  %v169_v16 = vpack.c.bf16 %v136_v14, %v136_v14 }
  0x8b   :  { %182 = vst.msk [vmem:[%s395_s3] sm:$0xf] %vm181_vm1, %v165_v15 }
  0x8c   :  { %186 = vst.msk [vmem:[%s395_s3 + $0x10] sm:$0xf] %vm181_vm1, %v169_v16 }
  0x8d   :  { %v145_v17 = vpop.f32.mrf.mxu2  ;;  %v155_v18 = vpop.f32.mrf.mxu3 }
  0x8e   :  { %v146_v19 = vadd.f32 %v266_v10, %v145_v17  ;;  %v156_v20 = vadd.f32 %v266_v10, %v155_v18  ;;  %v127_v21 = vpop.f32.mrf.mxu0  ;;  %v137_v22 = vpop.f32.mrf.mxu1 }
  0x8f   :  { %v128_v23 = vadd.f32 %v266_v10, %v127_v21  ;;  %v138_v24 = vadd.f32 %v266_v10, %v137_v22 }
  0x90   :  { %v173_v25 = vpack.c.bf16 %v146_v19, %v146_v19  ;;  %v177_v26 = vpack.c.bf16 %v156_v20, %v156_v20 }
  0x91   :  { %v166_v27 = vpack.c.bf16 %v128_v23, %v128_v23  ;;  %v170_v28 = vpack.c.bf16 %v138_v24, %v138_v24 }
  0x92   :  { %190 = vst.msk [vmem:[%s395_s3 + $0x20] sm:$0xf] %vm181_vm1, %v173_v25 }
  0x93   :  { %194 = vst.msk [vmem:[%s395_s3 + $0x30] sm:$0xf] %vm181_vm1, %v177_v26 }
  0x94   :  { %183 = vst.msk [vmem:[%s395_s3 + $0x4] sm:$0xf] %vm181_vm1, %v166_v27 }
  0x95   :  { %187 = vst.msk [vmem:[%s395_s3 + $0x14] sm:$0xf] %vm181_vm1, %v170_v28  ;;  %v147_v29 = vpop.f32.mrf.mxu2  ;;  %v157_v30 = vpop.f32.mrf.mxu3 }
  0x96   :  { %v148_v31 = vadd.f32 %v266_v10, %v147_v29  ;;  %v158_v32 = vadd.f32 %v266_v10, %v157_v30  ;;  %v130_v33 = vpop.f32.mrf.mxu0  ;;  %v140_v34 = vpop.f32.mrf.mxu1 }
  0x97   :  { %v131_v35 = vadd.f32 %v266_v10, %v130_v33  ;;  %v141_v36 = vadd.f32 %v266_v10, %v140_v34 }
  0x98   :  { %v174_v37 = vpack.c.bf16 %v148_v31, %v148_v31  ;;  %v178_v38 = vpack.c.bf16 %v158_v32, %v158_v32 }
  0x99   :  { %v167_v39 = vpack.c.bf16 %v131_v35, %v131_v35  ;;  %v171_v40 = vpack.c.bf16 %v141_v36, %v141_v36 }
  0x9a   :  { %191 = vst.msk [vmem:[%s395_s3 + $0x24] sm:$0xf] %vm181_vm1, %v174_v37 }
  0x9b   :  { %195 = vst.msk [vmem:[%s395_s3 + $0x34] sm:$0xf] %vm181_vm1, %v178_v38 }
  0x9c   :  { %184 = vst.msk [vmem:[%s395_s3 + $0x8] sm:$0xf] %vm181_vm1, %v167_v39 }
  0x9d   :  { %188 = vst.msk [vmem:[%s395_s3 + $0x18] sm:$0xf] %vm181_vm1, %v171_v40  ;;  %v150_v41 = vpop.f32.mrf.mxu2  ;;  %v160_v42 = vpop.f32.mrf.mxu3 }
  0x9e   :  { %v151_v43 = vadd.f32 %v266_v10, %v150_v41  ;;  %v161_v44 = vadd.f32 %v266_v10, %v160_v42  ;;  %v132_v45 = vpop.f32.mrf.mxu0  ;;  %v142_v46 = vpop.f32.mrf.mxu1 }
  0x9f   :  { %v133_v47 = vadd.f32 %v266_v10, %v132_v45  ;;  %v143_v48 = vadd.f32 %v266_v10, %v142_v46 }
  0xa0   :  { %v175_v49 = vpack.c.bf16 %v151_v43, %v151_v43  ;;  %v179_v50 = vpack.c.bf16 %v161_v44, %v161_v44 }
  0xa1   :  { %v168_v51 = vpack.c.bf16 %v133_v47, %v133_v47  ;;  %v172_v52 = vpack.c.bf16 %v143_v48, %v143_v48 }
  0xa2   :  { %192 = vst.msk [vmem:[%s395_s3 + $0x28] sm:$0xf] %vm181_vm1, %v175_v49 }
  0xa3   :  { %196 = vst.msk [vmem:[%s395_s3 + $0x38] sm:$0xf] %vm181_vm1, %v179_v50 }
  0xa4   :  { %185 = vst.msk [vmem:[%s395_s3 + $0xc] sm:$0xf] %vm181_vm1, %v168_v51 }
  0xa5   :  { %189 = vst.msk [vmem:[%s395_s3 + $0x1c] sm:$0xf] %vm181_vm1, %v172_v52  ;;  %v152_v53 = vpop.f32.mrf.mxu2  ;;  %v162_v54 = vpop.f32.mrf.mxu3 }
  0xa6   :  { %v153_v55 = vadd.f32 %v266_v10, %v152_v53  ;;  %v163_v56 = vadd.f32 %v266_v10, %v162_v54 }
  0xa8   :  { %v176_v57 = vpack.c.bf16 %v153_v55, %v153_v55  ;;  %v180_v58 = vpack.c.bf16 %v163_v56, %v163_v56 }
  0xaa   :  { %193 = vst.msk [vmem:[%s395_s3 + $0x2c] sm:$0xf] %vm181_vm1, %v176_v57 }
  0xab   :  { %197 = vst.msk [vmem:[%s395_s3 + $0x3c] sm:$0xf] %vm181_vm1, %v180_v58 }

// kernel: _lambda_.69
= control target key start
LH: loop header
LB: loop body
LE: loop exit
PB: predicated region body
PF: predicated region fallthrough
CT: control target
= control target key end

     0   :  { %vm94_vm0 = vcmask 261120   ;;  %vm232_vm1 = vcmask 257024   ;;  %s529_s1 = inlined_call_operand.vmem [shape: bf16[32,32], index: 1, kind: input, shape index: {}]   ;;  %s530_s0 = inlined_call_operand.vmem [shape: bf16[128,32], index: 0, kind: input, shape index: {}]   ;;  %s531_s2 = inlined_call_operand.vmem [shape: f32[1,32], index: 2, kind: input, shape index: {}]   ;;  %s532_s3 = inlined_call_operand.vmem [shape: bf16[128,32], index: 3, kind: input, shape index: {}]   ;;  %s533_s4 = inlined_call_operand.vmem [shape: bf16[128,32], index: 4, kind: output, shape index: {}]  }
   0x1   :  { %v310_v0 = vld [vmem:[%s529_s1 + $0x8] sm:$0xff]  ;;  %v309_v1 = vld [vmem:[%s529_s1] sm:$0xff]  ;;  %v303_v3 = vld [vmem:[%s530_s0 + $0x10] sm:$0xff] }
   0x2   :  { %125 = vmatpush.bf16.msra.mxu0 %v310_v0  ;;  %350 = vmatpush.bf16.msra.mxu1 %v310_v0  ;;  %v301_v2 = vld [vmem:[%s530_s0] sm:$0xff]  ;;  %v307_v5 = vld [vmem:[%s530_s0 + $0x30] sm:$0xff]  ;;  %v302_v6 = vld [vmem:[%s530_s0 + $0x8] sm:$0xff] }
   0x3   :  { %351 = vmatpush.bf16.msra.mxu2 %v310_v0  ;;  %352 = vmatpush.bf16.msra.mxu3 %v310_v0  ;;  %v305_v4 = vld [vmem:[%s530_s0 + $0x20] sm:$0xff]  ;;  %v304_v7 = vld [vmem:[%s530_s0 + $0x18] sm:$0xff]  ;;  %v306_v8 = vld [vmem:[%s530_s0 + $0x28] sm:$0xff] }
   0x4   :  { %v308_v9 = vld [vmem:[%s530_s0 + $0x38] sm:$0xff]  ;;  %v312_v10 = vld [vmem:[%s532_s3] sm:$0xff]   ;;  %v344_v11 = vld [vmem:[%s532_s3 + $0x10] sm:$0xff]  }
   0x5   :  { %v429_v12 = vld [vmem:[%s531_s2] ss:$0 sm:$0xff]  ;;  %v313_v13 = vunpack.c.l.bf16 %v312_v10  ;;  %v321_v14 = vunpack.c.l.bf16 %v344_v11  ;;  %v348_v22 = vld [vmem:[%s532_s3 + $0x30] sm:$0xff]   ;;  %v314_v29 = vunpack.c.h.bf16 %v312_v10  ;;  %v322_v30 = vunpack.c.h.bf16 %v344_v11  ;;  %v343_v43 = vld [vmem:[%s532_s3 + $0x8] sm:$0xff]  }
   0x6   :  { %126 = vmatpush.bf16.msra.mxu0 %v309_v1  ;;  %353 = vmatpush.bf16.msra.mxu1 %v309_v1  ;;  %v346_v21 = vld [vmem:[%s532_s3 + $0x20] sm:$0xff]   ;;  %v337_v26 = vunpack.c.l.bf16 %v348_v22  ;;  %v345_v44 = vld [vmem:[%s532_s3 + $0x18] sm:$0xff]   ;;  %v338_v48 = vunpack.c.h.bf16 %v348_v22  ;;  %v317_v51 = vunpack.c.l.bf16 %v343_v43  ;;  %v347_v63 = vld [vmem:[%s532_s3 + $0x28] sm:$0xff]  }
   0x7   :  { %354 = vmatpush.bf16.msra.mxu2 %v309_v1  ;;  %355 = vmatpush.bf16.msra.mxu3 %v309_v1  ;;  %v329_v25 = vunpack.c.l.bf16 %v346_v21  ;;  %v330_v47 = vunpack.c.h.bf16 %v346_v21  ;;  %v325_v52 = vunpack.c.l.bf16 %v345_v44  ;;  %v349_v0 = vld [vmem:[%s532_s3 + $0x38] sm:$0xff]   ;;  %v326_v10 = vunpack.c.h.bf16 %v345_v44 }
   0x9   :  { %293 = vmatmul.msk.bf16.vlgmr.msra.gmra.mxu0 %vm94_vm0, %v301_v2  ;;  %295 = vmatmul.msk.bf16.vlgmr.msra.gmra.mxu1 %vm94_vm0, %v303_v3 }
   0xa   :  { %297 = vmatmul.msk.bf16.vlgmr.msra.gmra.mxu2 %vm94_vm0, %v305_v4  ;;  %299 = vmatmul.msk.bf16.vlgmr.msra.gmra.mxu3 %vm94_vm0, %v307_v5  ;;  %v333_v5 = vunpack.c.l.bf16 %v347_v63 }
  0x19   :  { %294 = vmatmul.msk.bf16.gmra.mxu0 %vm94_vm0, %v302_v6  ;;  %296 = vmatmul.msk.bf16.gmra.mxu1 %vm94_vm0, %v304_v7  ;;  %v341_v6 = vunpack.c.l.bf16 %v349_v0 }
  0x1a   :  { %298 = vmatmul.msk.bf16.gmra.mxu2 %vm94_vm0, %v306_v8  ;;  %300 = vmatmul.msk.bf16.gmra.mxu3 %vm94_vm0, %v308_v9  ;;  %v318_v9 = vunpack.c.h.bf16 %v343_v43 }
  0x86   :  { %v128_v15 = vpop.f32.mrf.mxu0  ;;  %v138_v16 = vpop.f32.mrf.mxu1 }
  0x87   :  { %v129_v17 = vadd.f32 %v429_v12, %v128_v15  ;;  %v139_v18 = vadd.f32 %v429_v12, %v138_v16 }
  0x89   :  { %v200_v19 = vadd.f32 %v313_v13, %v129_v17  ;;  %v204_v20 = vadd.f32 %v321_v14, %v139_v18 }
  0x8b   :  { %v216_v23 = vpack.c.bf16 %v200_v19, %v200_v19  ;;  %v220_v24 = vpack.c.bf16 %v204_v20, %v204_v20 }
  0x8d   :  { %233 = vst.msk [vmem:[%s533_s4] sm:$0xf] %vm232_vm1, %v216_v23  ;;  %v148_v27 = vpop.f32.mrf.mxu2  ;;  %v158_v28 = vpop.f32.mrf.mxu3 }
  0x8e   :  { %237 = vst.msk [vmem:[%s533_s4 + $0x10] sm:$0xf] %vm232_vm1, %v220_v24  ;;  %v149_v31 = vadd.f32 %v429_v12, %v148_v27  ;;  %v159_v32 = vadd.f32 %v429_v12, %v158_v28  ;;  %v130_v33 = vpop.f32.mrf.mxu0  ;;  %v140_v34 = vpop.f32.mrf.mxu1  ;;  %v342_v27 = vunpack.c.h.bf16 %v349_v0 }
  0x8f   :  { %v131_v35 = vadd.f32 %v429_v12, %v130_v33  ;;  %v141_v36 = vadd.f32 %v429_v12, %v140_v34 }
  0x90   :  { %v208_v37 = vadd.f32 %v329_v25, %v149_v31  ;;  %v212_v38 = vadd.f32 %v337_v26, %v159_v32  ;;  %v334_v26 = vunpack.c.h.bf16 %v347_v63 }
  0x91   :  { %v201_v39 = vadd.f32 %v314_v29, %v131_v35  ;;  %v205_v40 = vadd.f32 %v322_v30, %v141_v36 }
  0x92   :  { %v224_v41 = vpack.c.bf16 %v208_v37, %v208_v37  ;;  %v228_v42 = vpack.c.bf16 %v212_v38, %v212_v38 }
  0x93   :  { %v217_v45 = vpack.c.bf16 %v201_v39, %v201_v39  ;;  %v221_v46 = vpack.c.bf16 %v205_v40, %v205_v40 }
  0x94   :  { %241 = vst.msk [vmem:[%s533_s4 + $0x20] sm:$0xf] %vm232_vm1, %v224_v41 }
  0x95   :  { %245 = vst.msk [vmem:[%s533_s4 + $0x30] sm:$0xf] %vm232_vm1, %v228_v42  ;;  %v150_v49 = vpop.f32.mrf.mxu2  ;;  %v160_v50 = vpop.f32.mrf.mxu3 }
  0x96   :  { %234 = vst.msk [vmem:[%s533_s4 + $0x4] sm:$0xf] %vm232_vm1, %v217_v45  ;;  %v151_v53 = vadd.f32 %v429_v12, %v150_v49  ;;  %v161_v54 = vadd.f32 %v429_v12, %v160_v50  ;;  %v133_v55 = vpop.f32.mrf.mxu0  ;;  %v143_v56 = vpop.f32.mrf.mxu1 }
  0x97   :  { %238 = vst.msk [vmem:[%s533_s4 + $0x14] sm:$0xf] %vm232_vm1, %v221_v46  ;;  %v134_v57 = vadd.f32 %v429_v12, %v133_v55  ;;  %v144_v58 = vadd.f32 %v429_v12, %v143_v56 }
  0x98   :  { %v209_v59 = vadd.f32 %v330_v47, %v151_v53  ;;  %v213_v60 = vadd.f32 %v338_v48, %v161_v54 }
  0x99   :  { %v202_v61 = vadd.f32 %v317_v51, %v134_v57  ;;  %v206_v62 = vadd.f32 %v325_v52, %v144_v58 }
  0x9a   :  { %v225_v1 = vpack.c.bf16 %v209_v59, %v209_v59  ;;  %v229_v2 = vpack.c.bf16 %v213_v60, %v213_v60 }
  0x9b   :  { %v218_v3 = vpack.c.bf16 %v202_v61, %v202_v61  ;;  %v222_v4 = vpack.c.bf16 %v206_v62, %v206_v62 }
  0x9c   :  { %242 = vst.msk [vmem:[%s533_s4 + $0x24] sm:$0xf] %vm232_vm1, %v225_v1 }
  0x9d   :  { %246 = vst.msk [vmem:[%s533_s4 + $0x34] sm:$0xf] %vm232_vm1, %v229_v2  ;;  %v153_v7 = vpop.f32.mrf.mxu2  ;;  %v163_v8 = vpop.f32.mrf.mxu3 }
  0x9e   :  { %235 = vst.msk [vmem:[%s533_s4 + $0x8] sm:$0xf] %vm232_vm1, %v218_v3  ;;  %v154_v11 = vadd.f32 %v429_v12, %v153_v7  ;;  %v164_v13 = vadd.f32 %v429_v12, %v163_v8  ;;  %v135_v14 = vpop.f32.mrf.mxu0  ;;  %v145_v15 = vpop.f32.mrf.mxu1 }
  0x9f   :  { %239 = vst.msk [vmem:[%s533_s4 + $0x18] sm:$0xf] %vm232_vm1, %v222_v4  ;;  %v136_v16 = vadd.f32 %v429_v12, %v135_v14  ;;  %v146_v17 = vadd.f32 %v429_v12, %v145_v15 }
  0xa0   :  { %v210_v18 = vadd.f32 %v333_v5, %v154_v11  ;;  %v214_v19 = vadd.f32 %v341_v6, %v164_v13 }
  0xa1   :  { %v203_v20 = vadd.f32 %v318_v9, %v136_v16  ;;  %v207_v21 = vadd.f32 %v326_v10, %v146_v17 }
  0xa2   :  { %v226_v22 = vpack.c.bf16 %v210_v18, %v210_v18  ;;  %v230_v23 = vpack.c.bf16 %v214_v19, %v214_v19 }
  0xa3   :  { %v219_v24 = vpack.c.bf16 %v203_v20, %v203_v20  ;;  %v223_v25 = vpack.c.bf16 %v207_v21, %v207_v21 }
  0xa4   :  { %243 = vst.msk [vmem:[%s533_s4 + $0x28] sm:$0xf] %vm232_vm1, %v226_v22 }
  0xa5   :  { %247 = vst.msk [vmem:[%s533_s4 + $0x38] sm:$0xf] %vm232_vm1, %v230_v23  ;;  %v155_v28 = vpop.f32.mrf.mxu2  ;;  %v165_v29 = vpop.f32.mrf.mxu3 }
  0xa6   :  { %236 = vst.msk [vmem:[%s533_s4 + $0xc] sm:$0xf] %vm232_vm1, %v219_v24  ;;  %v156_v30 = vadd.f32 %v429_v12, %v155_v28  ;;  %v166_v31 = vadd.f32 %v429_v12, %v165_v29 }
  0xa7   :  { %240 = vst.msk [vmem:[%s533_s4 + $0x1c] sm:$0xf] %vm232_vm1, %v223_v25 }
  0xa8   :  { %v211_v32 = vadd.f32 %v334_v26, %v156_v30  ;;  %v215_v33 = vadd.f32 %v342_v27, %v166_v31 }
  0xaa   :  { %v227_v34 = vpack.c.bf16 %v211_v32, %v211_v32  ;;  %v231_v35 = vpack.c.bf16 %v215_v33, %v215_v33 }
  0xac   :  { %244 = vst.msk [vmem:[%s533_s4 + $0x2c] sm:$0xf] %vm232_vm1, %v227_v34 }
  0xad   :  { %248 = vst.msk [vmem:[%s533_s4 + $0x3c] sm:$0xf] %vm232_vm1, %v231_v35 }

// kernel: _lambda_.70
= control target key start
LH: loop header
LB: loop body
LE: loop exit
PB: predicated region body
PF: predicated region fallthrough
CT: control target
= control target key end

     0   :  { %vm104_vm0 = vcmask 1041408   ;;  %vm79_vm1 = vcmask 31744   ;;  %vm221_vm2 = vcmask 257024   ;;  %s502_s1 = inlined_call_operand.vmem [shape: bf16[4,32], index: 1, kind: input, shape index: {}]   ;;  %s503_s0 = inlined_call_operand.vmem [shape: bf16[128,4], index: 0, kind: input, shape index: {}]   ;;  %s504_s2 = inlined_call_operand.vmem [shape: f32[1,32], index: 2, kind: input, shape index: {}]   ;;  %s505_s3 = inlined_call_operand.vmem [shape: bf16[128,32], index: 3, kind: input, shape index: {}]   ;;  %s506_s4 = inlined_call_operand.vmem [shape: bf16[128,32], index: 4, kind: output, shape index: {}]  }
   0x1   :  { %v34_v0 = vld [vmem:[%s502_s1] sm:$0x3]  ;;  %v284_v3 = vld [vmem:[%s503_s0 + $0x10] sm:$0xff]  ;;  %v283_v6 = vld [vmem:[%s503_s0 + $0x8] sm:$0xff] }
   0x2   :  { %v106_v1 = vsel %vm104_vm0, %v34_v0, 0  ;;  %v282_v2 = vld [vmem:[%s503_s0] sm:$0xff]  ;;  %v288_v5 = vld [vmem:[%s503_s0 + $0x30] sm:$0xff]  ;;  %v285_v7 = vld [vmem:[%s503_s0 + $0x18] sm:$0xff] }
   0x3   :  { %115 = vmatpush.bf16.msra.mxu0 %v106_v1  ;;  %329 = vmatpush.bf16.msra.mxu1 %v106_v1  ;;  %v286_v4 = vld [vmem:[%s503_s0 + $0x20] sm:$0xff]  ;;  %v287_v8 = vld [vmem:[%s503_s0 + $0x28] sm:$0xff]  ;;  %v289_v9 = vld [vmem:[%s503_s0 + $0x38] sm:$0xff] }
   0x4   :  { %330 = vmatpush.bf16.msra.mxu2 %v106_v1  ;;  %331 = vmatpush.bf16.msra.mxu3 %v106_v1  ;;  %v291_v10 = vld [vmem:[%s505_s3] sm:$0xff]   ;;  %v323_v11 = vld [vmem:[%s505_s3 + $0x10] sm:$0xff]   ;;  %v322_v43 = vld [vmem:[%s505_s3 + $0x8] sm:$0xff]  }
   0x5   :  { %v402_v12 = vld [vmem:[%s504_s2] ss:$0 sm:$0xff]  ;;  %v292_v13 = vunpack.c.l.bf16 %v291_v10  ;;  %v300_v14 = vunpack.c.l.bf16 %v323_v11  ;;  %v327_v22 = vld [vmem:[%s505_s3 + $0x30] sm:$0xff]   ;;  %v293_v29 = vunpack.c.h.bf16 %v291_v10  ;;  %v301_v30 = vunpack.c.h.bf16 %v323_v11  ;;  %v324_v44 = vld [vmem:[%s505_s3 + $0x18] sm:$0xff]  }
   0x6   :  { %274 = vmatmul.msk.bf16.vlgmr.msra.gmra.mxu0 %vm79_vm1, %v282_v2  ;;  %276 = vmatmul.msk.bf16.vlgmr.msra.gmra.mxu1 %vm79_vm1, %v284_v3  ;;  %v325_v21 = vld [vmem:[%s505_s3 + $0x20] sm:$0xff]   ;;  %v316_v26 = vunpack.c.l.bf16 %v327_v22  ;;  %v317_v48 = vunpack.c.h.bf16 %v327_v22  ;;  %v296_v51 = vunpack.c.l.bf16 %v322_v43  ;;  %v304_v52 = vunpack.c.l.bf16 %v324_v44  ;;  %v326_v63 = vld [vmem:[%s505_s3 + $0x28] sm:$0xff]   ;;  %v328_v0 = vld [vmem:[%s505_s3 + $0x38] sm:$0xff]  }
   0x7   :  { %278 = vmatmul.msk.bf16.vlgmr.msra.gmra.mxu2 %vm79_vm1, %v286_v4  ;;  %280 = vmatmul.msk.bf16.vlgmr.msra.gmra.mxu3 %vm79_vm1, %v288_v5  ;;  %v308_v25 = vunpack.c.l.bf16 %v325_v21  ;;  %v309_v47 = vunpack.c.h.bf16 %v325_v21  ;;  %v312_v5 = vunpack.c.l.bf16 %v326_v63  ;;  %v305_v10 = vunpack.c.h.bf16 %v324_v44 }
  0x16   :  { %275 = vmatmul.msk.bf16.gmra.mxu0 %vm79_vm1, %v283_v6  ;;  %277 = vmatmul.msk.bf16.gmra.mxu1 %vm79_vm1, %v285_v7  ;;  %v320_v6 = vunpack.c.l.bf16 %v328_v0 }
  0x17   :  { %279 = vmatmul.msk.bf16.gmra.mxu2 %vm79_vm1, %v287_v8  ;;  %281 = vmatmul.msk.bf16.gmra.mxu3 %vm79_vm1, %v289_v9  ;;  %v297_v9 = vunpack.c.h.bf16 %v322_v43 }
  0x83   :  { %v117_v15 = vpop.f32.mrf.mxu0  ;;  %v127_v16 = vpop.f32.mrf.mxu1 }
  0x84   :  { %v118_v17 = vadd.f32 %v402_v12, %v117_v15  ;;  %v128_v18 = vadd.f32 %v402_v12, %v127_v16 }
  0x86   :  { %v189_v19 = vadd.f32 %v292_v13, %v118_v17  ;;  %v193_v20 = vadd.f32 %v300_v14, %v128_v18 }
  0x88   :  { %v205_v23 = vpack.c.bf16 %v189_v19, %v189_v19  ;;  %v209_v24 = vpack.c.bf16 %v193_v20, %v193_v20 }
  0x8a   :  { %222 = vst.msk [vmem:[%s506_s4] sm:$0xf] %vm221_vm2, %v205_v23  ;;  %v137_v27 = vpop.f32.mrf.mxu2  ;;  %v147_v28 = vpop.f32.mrf.mxu3 }
  0x8b   :  { %226 = vst.msk [vmem:[%s506_s4 + $0x10] sm:$0xf] %vm221_vm2, %v209_v24  ;;  %v138_v31 = vadd.f32 %v402_v12, %v137_v27  ;;  %v148_v32 = vadd.f32 %v402_v12, %v147_v28  ;;  %v119_v33 = vpop.f32.mrf.mxu0  ;;  %v129_v34 = vpop.f32.mrf.mxu1  ;;  %v321_v27 = vunpack.c.h.bf16 %v328_v0 }
  0x8c   :  { %v120_v35 = vadd.f32 %v402_v12, %v119_v33  ;;  %v130_v36 = vadd.f32 %v402_v12, %v129_v34 }
  0x8d   :  { %v197_v37 = vadd.f32 %v308_v25, %v138_v31  ;;  %v201_v38 = vadd.f32 %v316_v26, %v148_v32  ;;  %v313_v26 = vunpack.c.h.bf16 %v326_v63 }
  0x8e   :  { %v190_v39 = vadd.f32 %v293_v29, %v120_v35  ;;  %v194_v40 = vadd.f32 %v301_v30, %v130_v36 }
  0x8f   :  { %v213_v41 = vpack.c.bf16 %v197_v37, %v197_v37  ;;  %v217_v42 = vpack.c.bf16 %v201_v38, %v201_v38 }
  0x90   :  { %v206_v45 = vpack.c.bf16 %v190_v39, %v190_v39  ;;  %v210_v46 = vpack.c.bf16 %v194_v40, %v194_v40 }
  0x91   :  { %230 = vst.msk [vmem:[%s506_s4 + $0x20] sm:$0xf] %vm221_vm2, %v213_v41 }
  0x92   :  { %234 = vst.msk [vmem:[%s506_s4 + $0x30] sm:$0xf] %vm221_vm2, %v217_v42  ;;  %v139_v49 = vpop.f32.mrf.mxu2  ;;  %v149_v50 = vpop.f32.mrf.mxu3 }
  0x93   :  { %223 = vst.msk [vmem:[%s506_s4 + $0x4] sm:$0xf] %vm221_vm2, %v206_v45  ;;  %v140_v53 = vadd.f32 %v402_v12, %v139_v49  ;;  %v150_v54 = vadd.f32 %v402_v12, %v149_v50  ;;  %v122_v55 = vpop.f32.mrf.mxu0  ;;  %v132_v56 = vpop.f32.mrf.mxu1 }
  0x94   :  { %227 = vst.msk [vmem:[%s506_s4 + $0x14] sm:$0xf] %vm221_vm2, %v210_v46  ;;  %v123_v57 = vadd.f32 %v402_v12, %v122_v55  ;;  %v133_v58 = vadd.f32 %v402_v12, %v132_v56 }
  0x95   :  { %v198_v59 = vadd.f32 %v309_v47, %v140_v53  ;;  %v202_v60 = vadd.f32 %v317_v48, %v150_v54 }
  0x96   :  { %v191_v61 = vadd.f32 %v296_v51, %v123_v57  ;;  %v195_v62 = vadd.f32 %v304_v52, %v133_v58 }
  0x97   :  { %v214_v1 = vpack.c.bf16 %v198_v59, %v198_v59  ;;  %v218_v2 = vpack.c.bf16 %v202_v60, %v202_v60 }
  0x98   :  { %v207_v3 = vpack.c.bf16 %v191_v61, %v191_v61  ;;  %v211_v4 = vpack.c.bf16 %v195_v62, %v195_v62 }
  0x99   :  { %231 = vst.msk [vmem:[%s506_s4 + $0x24] sm:$0xf] %vm221_vm2, %v214_v1 }
  0x9a   :  { %235 = vst.msk [vmem:[%s506_s4 + $0x34] sm:$0xf] %vm221_vm2, %v218_v2  ;;  %v142_v7 = vpop.f32.mrf.mxu2  ;;  %v152_v8 = vpop.f32.mrf.mxu3 }
  0x9b   :  { %224 = vst.msk [vmem:[%s506_s4 + $0x8] sm:$0xf] %vm221_vm2, %v207_v3  ;;  %v143_v11 = vadd.f32 %v402_v12, %v142_v7  ;;  %v153_v13 = vadd.f32 %v402_v12, %v152_v8  ;;  %v124_v14 = vpop.f32.mrf.mxu0  ;;  %v134_v15 = vpop.f32.mrf.mxu1 }
  0x9c   :  { %228 = vst.msk [vmem:[%s506_s4 + $0x18] sm:$0xf] %vm221_vm2, %v211_v4  ;;  %v125_v16 = vadd.f32 %v402_v12, %v124_v14  ;;  %v135_v17 = vadd.f32 %v402_v12, %v134_v15 }
  0x9d   :  { %v199_v18 = vadd.f32 %v312_v5, %v143_v11  ;;  %v203_v19 = vadd.f32 %v320_v6, %v153_v13 }
  0x9e   :  { %v192_v20 = vadd.f32 %v297_v9, %v125_v16  ;;  %v196_v21 = vadd.f32 %v305_v10, %v135_v17 }
  0x9f   :  { %v215_v22 = vpack.c.bf16 %v199_v18, %v199_v18  ;;  %v219_v23 = vpack.c.bf16 %v203_v19, %v203_v19 }
  0xa0   :  { %v208_v24 = vpack.c.bf16 %v192_v20, %v192_v20  ;;  %v212_v25 = vpack.c.bf16 %v196_v21, %v196_v21 }
  0xa1   :  { %232 = vst.msk [vmem:[%s506_s4 + $0x28] sm:$0xf] %vm221_vm2, %v215_v22 }
  0xa2   :  { %236 = vst.msk [vmem:[%s506_s4 + $0x38] sm:$0xf] %vm221_vm2, %v219_v23  ;;  %v144_v28 = vpop.f32.mrf.mxu2  ;;  %v154_v29 = vpop.f32.mrf.mxu3 }
  0xa3   :  { %225 = vst.msk [vmem:[%s506_s4 + $0xc] sm:$0xf] %vm221_vm2, %v208_v24  ;;  %v145_v30 = vadd.f32 %v402_v12, %v144_v28  ;;  %v155_v31 = vadd.f32 %v402_v12, %v154_v29 }
  0xa4   :  { %229 = vst.msk [vmem:[%s506_s4 + $0x1c] sm:$0xf] %vm221_vm2, %v212_v25 }
  0xa5   :  { %v200_v32 = vadd.f32 %v313_v26, %v145_v30  ;;  %v204_v33 = vadd.f32 %v321_v27, %v155_v31 }
  0xa7   :  { %v216_v34 = vpack.c.bf16 %v200_v32, %v200_v32  ;;  %v220_v35 = vpack.c.bf16 %v204_v33, %v204_v33 }
  0xa9   :  { %233 = vst.msk [vmem:[%s506_s4 + $0x2c] sm:$0xf] %vm221_vm2, %v216_v34 }
  0xaa   :  { %237 = vst.msk [vmem:[%s506_s4 + $0x3c] sm:$0xf] %vm221_vm2, %v220_v35 }

</bundles_post_ra>
